<compile_context>
chip_gen: v6e
topology: v6e:2x2x1
jax: 0.10.0
libtpu: 0.0.40
codegen_flags: <defaults>
</compile_context>

<pallas_src>
import functools

import numpy as np
import jax
import jax.numpy as jnp
from jax.experimental import pallas as pl
from jax.experimental.pallas import tpu as pltpu


# ----------------------------------------------------------------------------
# db2 filter banks (pywt coefficients hard-coded; they are fixed, non-learnable
# buffers in the torch module, so they are baked into the kernels as constants)
# ----------------------------------------------------------------------------
_DB2_DEC_LO = np.array([-0.12940952255092145, 0.22414386804185735,
                        0.836516303737469, 0.48296291314469025], np.float64)
_DB2_DEC_HI = np.array([-0.48296291314469025, 0.836516303737469,
                        -0.22414386804185735, -0.12940952255092145], np.float64)
_DB2_REC_LO = np.array([0.48296291314469025, 0.836516303737469,
                        0.22414386804185735, -0.12940952255092145], np.float64)
_DB2_REC_HI = np.array([-0.12940952255092145, -0.22414386804185735,
                        0.836516303737469, -0.48296291314469025], np.float64)


def _filter_banks():
    # mirrors WTAB1.create_wavelet_filter (identical per channel -> keep one bank)
    dec_lo = _DB2_DEC_LO[::-1]          # torch: w.dec_lo[::-1]
    dec_hi = _DB2_DEC_HI[::-1]
    dec = np.stack([np.outer(dec_lo, dec_lo),
                    np.outer(dec_hi, dec_lo),
                    np.outer(dec_lo, dec_hi),
                    np.outer(dec_hi, dec_hi)], axis=0)
    rec_lo = _DB2_REC_LO                # torch: rec_lo[::-1].flip(0) == original
    rec_hi = _DB2_REC_HI
    rec = np.stack([np.outer(rec_lo, rec_lo),
                    np.outer(rec_hi, rec_lo),
                    np.outer(rec_lo, rec_hi),
                    np.outer(rec_hi, rec_hi)], axis=0)
    return dec.astype(np.float64), rec.astype(np.float64)


_DEC_BANK, _REC_BANK = _filter_banks()

_VMEM_LIMIT = 32 * 1024 * 1024


def _cparams(n_axes):
    return pltpu.CompilerParams(
        dimension_semantics=("parallel",) * n_axes,
        vmem_limit_bytes=_VMEM_LIMIT,
    )


# ----------------------------------------------------------------------------
# Kernel 1: forward DWT (depthwise 4x4 stride-2 conv, pad=1), parity-plane stencil
# ----------------------------------------------------------------------------
def _dwt_kernel(planes_ref, out_ref, *, filt, hh, wh):
    # planes_ref: (4, BC, hh+1, wh+1)  parity planes p = 2a+b of the 1-padded input
    # out_ref:    (4, BC, hh, wh)      sub-bands in the torch filter-bank order
    planes = [planes_ref[p] for p in range(4)]
    for s in range(4):
        acc = None
        for ki in range(4):
            a, da = ki % 2, ki // 2
            for kj in range(4):
                b, db = kj % 2, kj // 2
                term = planes[2 * a + b][:, da:da + hh, db:db + wh] * float(filt[s, ki, kj])
                acc = term if acc is None else acc + term
        out_ref[s] = acc


def wavelet_transform(x):
    """x:(B,C,H,W) -> (4,B,C,H/2,W/2); == F.conv2d(x, dec, stride=2, groups=C, pad=1)."""
    B, C, H, W = x.shape
    hh, wh = H // 2, W // 2
    bc = B * C
    xp = jnp.pad(x.reshape(bc, H, W).astype(jnp.float32), ((0, 0), (1, 1), (1, 1)))
    planes = jnp.stack([xp[:, a::2, b::2] for a in (0, 1) for b in (0, 1)], axis=0)
    kernel = functools.partial(_dwt_kernel, filt=_DEC_BANK, hh=hh, wh=wh)
    out = pl.pallas_call(
        kernel,
        out_shape=jax.ShapeDtypeStruct((4, bc, hh, wh), jnp.float32),
        grid=(1,),
        in_specs=[pl.BlockSpec((4, bc, hh + 1, wh + 1), lambda i: (0, 0, 0, 0))],
        out_specs=pl.BlockSpec((4, bc, hh, wh), lambda i: (0, 0, 0, 0)),
        compiler_params=_cparams(1),
    )(planes)
    return out.reshape(4, B, C, hh, wh)


# ----------------------------------------------------------------------------
# Kernel 2: inverse DWT (conv_transpose2d, stride=2, pad=1, groups=C), phase form.
# The torch module feeds coeffs = [LL, CH, CH, CH], so bands 1..3 share one input
# and their filters are pre-summed (dedup) -- only 2 effective sub-bands remain.
# ----------------------------------------------------------------------------
def _iwt_kernel(ll_ref, hi_ref, out_ref, *, rec, h, w):
    # ll_ref/hi_ref: (BC, h+2, w+2) zero-padded LL band and shared high band
    # out_ref: (4, BC, h, w); plane p = 2*py+px holds output pixels (2u+py, 2v+px)
    ll = ll_ref[...]
    hi = hi_ref[...]
    w_ll = rec[0]
    w_hi = rec[1] + rec[2] + rec[3]
    # per output parity: (row offset into the padded coeffs, filter tap index)
    taps = {0: ((1, 1), (0, 3)), 1: ((2, 0), (1, 2))}
    for py in (0, 1):
        for px in (0, 1):
            acc = None
            for ro, ki in taps[py]:
                for co, kj in taps[px]:
                    t = (ll[:, ro:ro + h, co:co + w] * float(w_ll[ki, kj])
                         + hi[:, ro:ro + h, co:co + w] * float(w_hi[ki, kj]))
                    acc = t if acc is None else acc + t
            out_ref[2 * py + px] = acc


def inverse_wavelet_transform_llhi(ll, hi):
    """ll,hi:(B,C,h,w) -> (B,C,2h,2w); coeffs are [ll, hi, hi, hi] per channel."""
    B, C, h, w = ll.shape
    bc = B * C
    llp = jnp.pad(ll.reshape(bc, h, w).astype(jnp.float32), ((0, 0), (1, 1), (1, 1)))
    hip = jnp.pad(hi.reshape(bc, h, w).astype(jnp.float32), ((0, 0), (1, 1), (1, 1)))
    kernel = functools.partial(_iwt_kernel, rec=_REC_BANK, h=h, w=w)
    planes = pl.pallas_call(
        kernel,
        out_shape=jax.ShapeDtypeStruct((4, bc, h, w), jnp.float32),
        grid=(1,),
        in_specs=[pl.BlockSpec((bc, h + 2, w + 2), lambda i: (0, 0, 0)),
                  pl.BlockSpec((bc, h + 2, w + 2), lambda i: (0, 0, 0))],
        out_specs=pl.BlockSpec((4, bc, h, w), lambda i: (0, 0, 0, 0)),
        compiler_params=_cparams(1),
    )(llp, hip)
    # interleave the parity planes back into (B, C, 2h, 2w)
    full = planes.reshape(2, 2, bc, h, w)
    full = jnp.transpose(full, (2, 3, 0, 4, 1)).reshape(bc, 2 * h, 2 * w)
    return full.reshape(B, C, 2 * h, 2 * w)


# ----------------------------------------------------------------------------
# Kernel 3: tap-conv  out(Cout, N) = sum_t W[t](Cout,Cin) @ X[t](Cin,N) + bias
# (used for the k=3 Conv1d's and the 3x3 Conv2d; N = batch*spatial lanes, tiled)
# ----------------------------------------------------------------------------
def _tapconv_kernel(x_ref, w_ref, b_ref, o_ref, *, taps):
    acc = jnp.dot(w_ref[0], x_ref[0], preferred_element_type=jnp.float32)
    for t in range(1, taps):
        acc = acc + jnp.dot(w_ref[t], x_ref[t], preferred_element_type=jnp.float32)
    o_ref[...] = acc + b_ref[...]


def _tapconv(x_taps, w_taps, bias, tile_n=512):
    T, Cin, N = x_taps.shape
    Cout = w_taps.shape[1]
    tn = min(tile_n, N)
    assert N % tn == 0
    kernel = functools.partial(_tapconv_kernel, taps=T)
    return pl.pallas_call(
        kernel,
        out_shape=jax.ShapeDtypeStruct((Cout, N), jnp.float32),
        grid=(N // tn,),
        in_specs=[
            pl.BlockSpec((T, Cin, tn), lambda i: (0, 0, i)),
            pl.BlockSpec((T, Cout, Cin), lambda i: (0, 0, 0)),
            pl.BlockSpec((Cout, 1), lambda i: (0, 0)),
        ],
        out_specs=pl.BlockSpec((Cout, tn), lambda i: (0, i)),
        compiler_params=_cparams(1),
    )(x_taps, w_taps, bias.reshape(Cout, 1).astype(jnp.float32))


def conv1d(x, weight, bias):
    """x:(B,Cin,L), weight:(Cout,Cin,k), pad=k//2 -> (Cout, B*L) lane-dense."""
    B, Cin, L = x.shape
    Cout, _, k = weight.shape
    p = k // 2
    xp = jnp.pad(x.astype(jnp.float32), ((0, 0), (0, 0), (p, p)))
    taps = jnp.stack([xp[:, :, t:t + L] for t in range(k)], axis=0)        # (k,B,Cin,L)
    taps = jnp.transpose(taps, (0, 2, 1, 3)).reshape(k, Cin, B * L)
    w_taps = jnp.transpose(weight, (2, 0, 1)).astype(jnp.float32)          # (k,Cout,Cin)
    return _tapconv(taps, w_taps, bias)


def conv2d(x, weight, bias):
    """x:(B,Cin,h,w), weight:(Cout,Cin,k,k), pad=k//2 -> (Cout, B*h*w) lane-dense."""
    B, Cin, h, w = x.shape
    Cout, _, k, _ = weight.shape
    p = k // 2
    xp = jnp.pad(x.astype(jnp.float32), ((0, 0), (0, 0), (p, p), (p, p)))
    patches = [xp[:, :, ki:ki + h, kj:kj + w] for ki in range(k) for kj in range(k)]
    taps = jnp.stack(patches, axis=0)                                      # (k*k,B,Cin,h,w)
    taps = jnp.transpose(taps, (0, 2, 1, 3, 4)).reshape(k * k, Cin, B * h * w)
    w_taps = jnp.transpose(weight, (2, 3, 0, 1)).reshape(k * k, Cout, Cin).astype(jnp.float32)
    return _tapconv(taps, w_taps, bias)


# ----------------------------------------------------------------------------
# Kernel 4: fused hwt chain: 1x1conv+BN+ReLU -> 1x1conv+BN -> 2x bilinear upsample
# (grid over batch; the intermediate activations never leave VMEM)
# ----------------------------------------------------------------------------
def _hwt_chain_kernel(x_ref, w1_ref, a1_ref, b1_ref, w2_ref, a2_ref, b2_ref,
                      up_ref, o_ref):
    x = x_ref[0]                                                           # (3C, hw)
    y = jnp.dot(w1_ref[...], x, preferred_element_type=jnp.float32)
    y = jnp.maximum(y * a1_ref[...] + b1_ref[...], 0.0)
    y = jnp.dot(w2_ref[...], y, preferred_element_type=jnp.float32)
    y = y * a2_ref[...] + b2_ref[...]
    o_ref[0] = jnp.dot(y, up_ref[...], preferred_element_type=jnp.float32)


def hwt_chain_upsample(x, w1, a1, b1, w2, a2, b2, up_mat):
    B, c3, hw = x.shape
    cmid = w1.shape[0]
    cout = w2.shape[0]
    HW = up_mat.shape[1]
    return pl.pallas_call(
        _hwt_chain_kernel,
        out_shape=jax.ShapeDtypeStruct((B, cout, HW), jnp.float32),
        grid=(B,),
        in_specs=[
            pl.BlockSpec((1, c3, hw), lambda i: (i, 0, 0)),
            pl.BlockSpec((cmid, c3), lambda i: (0, 0)),
            pl.BlockSpec((cmid, 1), lambda i: (0, 0)),
            pl.BlockSpec((cmid, 1), lambda i: (0, 0)),
            pl.BlockSpec((cout, cmid), lambda i: (0, 0)),
            pl.BlockSpec((cout, 1), lambda i: (0, 0)),
            pl.BlockSpec((cout, 1), lambda i: (0, 0)),
            pl.BlockSpec((hw, HW), lambda i: (0, 0)),
        ],
        out_specs=pl.BlockSpec((1, cout, HW), lambda i: (i, 0, 0)),
        compiler_params=_cparams(1),
    )(x, w1, a1, b1, w2, a2, b2, up_mat)


# ----------------------------------------------------------------------------
# Kernel 5: fused iwt chain: 1x1conv+BN+ReLU -> 1x1conv+BN (+ fused residual add)
# (tiled over the batch*spatial lane axis, "parallel" semantics)
# ----------------------------------------------------------------------------
def _iwt_chain_kernel(x_ref, w1_ref, a1_ref, b1_ref, w2_ref, a2_ref, b2_ref,
                      *rest, has_res):
    if has_res:
        res_ref, o_ref = rest
    else:
        (o_ref,) = rest
    y = jnp.dot(w1_ref[...], x_ref[...], preferred_element_type=jnp.float32)
    y = jnp.maximum(y * a1_ref[...] + b1_ref[...], 0.0)
    y = jnp.dot(w2_ref[...], y, preferred_element_type=jnp.float32)
    y = y * a2_ref[...] + b2_ref[...]
    if has_res:
        y = y + res_ref[...]
    o_ref[...] = y


def iwt_chain(x, w1, a1, b1, w2, a2, b2, residual=None, tile_n=512):
    c2, N = x.shape
    cmid = w1.shape[0]
    cout = w2.shape[0]
    tn = min(tile_n, N)
    assert N % tn == 0
    in_specs = [
        pl.BlockSpec((c2, tn), lambda i: (0, i)),
        pl.BlockSpec((cmid, c2), lambda i: (0, 0)),
        pl.BlockSpec((cmid, 1), lambda i: (0, 0)),
        pl.BlockSpec((cmid, 1), lambda i: (0, 0)),
        pl.BlockSpec((cout, cmid), lambda i: (0, 0)),
        pl.BlockSpec((cout, 1), lambda i: (0, 0)),
        pl.BlockSpec((cout, 1), lambda i: (0, 0)),
    ]
    args = [x, w1, a1, b1, w2, a2, b2]
    if residual is not None:
        in_specs.append(pl.BlockSpec((cout, tn), lambda i: (0, i)))
        args.append(residual)
    kernel = functools.partial(_iwt_chain_kernel, has_res=residual is not None)
    return pl.pallas_call(
        kernel,
        out_shape=jax.ShapeDtypeStruct((cout, N), jnp.float32),
        grid=(N // tn,),
        in_specs=in_specs,
        out_specs=pl.BlockSpec((cout, tn), lambda i: (0, i)),
        compiler_params=_cparams(1),
    )(*args)


# ----------------------------------------------------------------------------
# host-side helpers
# ----------------------------------------------------------------------------
def _fold_bn(bias, bn):
    """conv bias + eval-mode BN folded into a per-channel (scale, shift)."""
    gamma, beta, mean, var, eps = bn
    scale = gamma / jnp.sqrt(var + eps)
    shift = bias * scale + beta - mean * scale
    return (scale.reshape(-1, 1).astype(jnp.float32),
            shift.reshape(-1, 1).astype(jnp.float32))


def _bilinear_up_matrix(h, w):
    """M with (Y2)[c, yx] = (Y)[c, ij] @ M ; 2x bilinear, align_corners=True."""
    def m(n_in, n_out):
        if n_in == 1:
            return np.ones((n_out, 1), np.float64)
        src = np.arange(n_out) * (n_in - 1) / (n_out - 1)
        i0 = np.clip(np.floor(src).astype(np.int64), 0, n_in - 2)
        f = src - i0
        M = np.zeros((n_out, n_in), np.float64)
        M[np.arange(n_out), i0] += 1.0 - f
        M[np.arange(n_out), i0 + 1] += f
        return M
    Uh = m(h, 2 * h)
    Uw = m(w, 2 * w)
    M = np.einsum('yi,xj->ijyx', Uh, Uw).reshape(h * w, 4 * h * w)
    return jnp.asarray(M.astype(np.float32))


def init_params(key, in_chans, out_chans, k):
    def nrm(kk, shape, s=0.1):
        return jax.random.normal(kk, shape, jnp.float32) * s

    def bn_default(c):
        return (jnp.ones((c,), jnp.float32), jnp.zeros((c,), jnp.float32),
                jnp.zeros((c,), jnp.float32), jnp.ones((c,), jnp.float32), 1e-5)

    keys = jax.random.split(key, 14)
    return dict(
        wtch_w=nrm(keys[0], (out_chans, in_chans, k)),
        wtch_b=nrm(keys[1], (out_chans,)),
        wtcv_w=nrm(keys[2], (out_chans, in_chans, k)),
        wtcv_b=nrm(keys[3], (out_chans,)),
        wtcd_w=nrm(keys[4], (out_chans, in_chans, k, k)),
        wtcd_b=nrm(keys[5], (out_chans,)),
        hwt_w1=nrm(keys[6], (in_chans, in_chans * 3, 1, 1)),
        hwt_b1=nrm(keys[7], (in_chans,)),
        hwt_bn1=bn_default(in_chans),
        hwt_w2=nrm(keys[8], (out_chans, in_chans, 1, 1)),
        hwt_b2=nrm(keys[9], (out_chans,)),
        hwt_bn2=bn_default(out_chans),
        iwt_w1=nrm(keys[10], (in_chans, in_chans * 2, 1, 1)),
        iwt_b1=nrm(keys[11], (in_chans,)),
        iwt_bn1=bn_default(in_chans),
        iwt_w2=nrm(keys[12], (out_chans, in_chans, 1, 1)),
        iwt_b2=nrm(keys[13], (out_chans,)),
        iwt_bn2=bn_default(out_chans),
    )


# ----------------------------------------------------------------------------
# WTAB1 forward
# ----------------------------------------------------------------------------
def wt_forward(CH, CV, CD, lwt, p, up_mat, residual=None):
    B, C, h, w = lwt.shape
    L = h * w
    # WTCH / WTCV (1D convs over the flattened spatial axis) and WTCD (3x3 conv)
    ch_c = conv1d(CH.reshape(B, C, L), p['wtch_w'], p['wtch_b'])           # (O, B*L)
    cv_c = conv1d(jnp.transpose(CV, (0, 1, 3, 2)).reshape(B, C, L),
                  p['wtcv_w'], p['wtcv_b'])                                # (O, B*L)
    cd_c = conv2d(CD, p['wtcd_w'], p['wtcd_b'])                            # (O, B*L)
    O = ch_c.shape[0]

    # inverse wavelet of coeffs [lwt, CH_c, CH_c, CH_c] (matches the torch source,
    # which concatenates CH three times)
    ch_img = jnp.transpose(ch_c.reshape(O, B, h, w), (1, 0, 2, 3))         # (B, O, h, w)
    iwt = inverse_wavelet_transform_llhi(lwt, ch_img)                      # (B, C, 2h, 2w)

    # fused hwt chain (1x1 conv + BN + ReLU + 1x1 conv + BN + 2x bilinear upsample)
    def to_bchw(t):
        return jnp.transpose(t.reshape(O, B, L), (1, 0, 2))                # (B, O, L)
    hwt_in = jnp.concatenate([to_bchw(ch_c), to_bchw(cv_c), to_bchw(cd_c)], axis=1)
    s1, t1 = _fold_bn(p['hwt_b1'], p['hwt_bn1'])
    s2, t2 = _fold_bn(p['hwt_b2'], p['hwt_bn2'])
    hwt_up = hwt_chain_upsample(hwt_in, p['hwt_w1'].reshape(C, 3 * C), s1, t1,
                                p['hwt_w2'].reshape(O, C), s2, t2, up_mat)  # (B, O, 4L)

    # fused iwt chain (+ optional fused add of the other branch's output)
    HW = 4 * L
    iwt_flat = jnp.transpose(iwt, (1, 0, 2, 3)).reshape(C, B * HW)
    hwt_flat = jnp.transpose(hwt_up, (1, 0, 2)).reshape(O, B * HW)
    x_in = jnp.concatenate([iwt_flat, hwt_flat], axis=0)                   # (2C, B*HW)
    s3, t3 = _fold_bn(p['iwt_b1'], p['iwt_bn1'])
    s4, t4 = _fold_bn(p['iwt_b2'], p['iwt_bn2'])
    return iwt_chain(x_in, p['iwt_w1'].reshape(C, 2 * C), s3, t3,
                     p['iwt_w2'].reshape(O, C), s4, t4, residual=residual)  # (O, B*HW)


def wtab1_forward(x1, x2, p):
    B, C, H, W = x1.shape
    h, w = H // 2, W // 2
    up_mat = _bilinear_up_matrix(h, w)

    c1 = wavelet_transform(x1)                                             # (4,B,C,h,w)
    c2 = wavelet_transform(x2)
    lwt1, CH1, CV1, CD1 = c1[0], c1[1], c1[2], c1[3]
    lwt2, CH2, CV2, CD2 = c2[0], c2[1], c2[2], c2[3]

    wtx2 = wt_forward(CH1, CV1, CD1, lwt2, p, up_mat)                      # (O, B*H*W)
    # TODO(synk): DPFA (self.l_fuse) class definition is not provided in the source
    # module; the two branches are fused with an elementwise sum, folded into the
    # epilogue of the second branch's final fused conv kernel.
    wtx = wt_forward(CH2, CV2, CD2, lwt1, p, up_mat, residual=wtx2)        # (O, B*H*W)
    O = wtx.shape[0]
    return jnp.transpose(wtx.reshape(O, B, H, W), (1, 0, 2, 3))


if __name__ == "__main__":
    in_chans = out_chans = 4
    kernel_size = 3
    B, H, W = 2, 16, 16

    key = jax.random.PRNGKey(0)
    k1, k2, k3 = jax.random.split(key, 3)
    x1 = jax.random.normal(k1, (B, in_chans, H, W), jnp.float32)
    x2 = jax.random.normal(k2, (B, in_chans, H, W), jnp.float32)

    params = init_params(k3, in_chans, out_chans, kernel_size)

    out = jax.jit(wtab1_forward)(x1, x2, params)
    out = jax.block_until_ready(out)
    assert out.shape == (B, out_chans, H, W), out.shape
    assert bool(jnp.all(jnp.isfinite(out)))
    print("KERNEL_OK")
</pallas_src>

<mosaic_0001>
module attributes {stable_mosaic.version = 11 : i64} {
  func.func @_dwt_kernel(%arg0: i32, %arg1: memref<4x8x9x9xf32, #tpu.memory_space<vmem>>, %arg2: memref<4x8x8x8xf32, #tpu.memory_space<vmem>>) attributes {dimension_semantics = [#tpu.dimension_semantics<parallel>], iteration_bounds = array<i64: 1>, scalar_prefetch = 0 : i64, scratch_operands = 0 : i64, tpu.core_type = #tpu.core_type<tc>, window_params = [{pipeline_mode = #tpu.pipeline_mode<synchronous>, transform_indices = @transform_0, window_bounds = array<i64: 4, 8, 9, 9>}, {pipeline_mode = #tpu.pipeline_mode<synchronous>, transform_indices = @transform_1, window_bounds = array<i64: 4, 8, 8, 8>}]} {
    %c0 = arith.constant 0 : index
    %c0_0 = arith.constant 0 : index
    %c0_1 = arith.constant 0 : index
    %c0_2 = arith.constant 0 : index
    %0 = vector.load %arg1[%c0, %c0_0, %c0_1, %c0_2] : memref<4x8x9x9xf32, #tpu.memory_space<vmem>>, vector<1x8x9x9xf32>
    %1 = vector.shape_cast %0 : vector<1x8x9x9xf32> to vector<8x9x9xf32>
    %c1 = arith.constant 1 : index
    %c0_3 = arith.constant 0 : index
    %c0_4 = arith.constant 0 : index
    %c0_5 = arith.constant 0 : index
    %2 = vector.load %arg1[%c1, %c0_3, %c0_4, %c0_5] : memref<4x8x9x9xf32, #tpu.memory_space<vmem>>, vector<1x8x9x9xf32>
    %3 = vector.shape_cast %2 : vector<1x8x9x9xf32> to vector<8x9x9xf32>
    %c2 = arith.constant 2 : index
    %c0_6 = arith.constant 0 : index
    %c0_7 = arith.constant 0 : index
    %c0_8 = arith.constant 0 : index
    %4 = vector.load %arg1[%c2, %c0_6, %c0_7, %c0_8] : memref<4x8x9x9xf32, #tpu.memory_space<vmem>>, vector<1x8x9x9xf32>
    %5 = vector.shape_cast %4 : vector<1x8x9x9xf32> to vector<8x9x9xf32>
    %c3 = arith.constant 3 : index
    %c0_9 = arith.constant 0 : index
    %c0_10 = arith.constant 0 : index
    %c0_11 = arith.constant 0 : index
    %6 = vector.load %arg1[%c3, %c0_9, %c0_10, %c0_11] : memref<4x8x9x9xf32, #tpu.memory_space<vmem>>, vector<1x8x9x9xf32>
    %7 = vector.shape_cast %6 : vector<1x8x9x9xf32> to vector<8x9x9xf32>
    %8 = vector.extract_strided_slice %1 {offsets = [0, 0, 0], sizes = [8, 8, 8], strides = [1, 1, 1]} : vector<8x9x9xf32> to vector<8x8x8xf32>
    %cst = arith.constant 0.233253181 : f32
    %9 = vector.broadcast %cst : f32 to vector<8x8x8xf32>
    %10 = arith.mulf %8, %9 : vector<8x8x8xf32>
    %11 = vector.extract_strided_slice %3 {offsets = [0, 0, 0], sizes = [8, 8, 8], strides = [1, 1, 1]} : vector<8x9x9xf32> to vector<8x8x8xf32>
    %cst_12 = arith.constant 0.404006362 : f32
    %12 = vector.broadcast %cst_12 : f32 to vector<8x8x8xf32>
    %13 = arith.mulf %11, %12 : vector<8x8x8xf32>
    %14 = arith.addf %10, %13 : vector<8x8x8xf32>
    %15 = vector.extract_strided_slice %1 {offsets = [0, 0, 1], sizes = [8, 8, 8], strides = [1, 1, 1]} : vector<8x9x9xf32> to vector<8x8x8xf32>
    %cst_13 = arith.constant 0.108253174 : f32
    %16 = vector.broadcast %cst_13 : f32 to vector<8x8x8xf32>
    %17 = arith.mulf %15, %16 : vector<8x8x8xf32>
    %18 = arith.addf %14, %17 : vector<8x8x8xf32>
    %19 = vector.extract_strided_slice %3 {offsets = [0, 0, 1], sizes = [8, 8, 8], strides = [1, 1, 1]} : vector<8x9x9xf32> to vector<8x8x8xf32>
    %cst_14 = arith.constant -6.250000e-02 : f32
    %20 = vector.broadcast %cst_14 : f32 to vector<8x8x8xf32>
    %21 = arith.mulf %19, %20 : vector<8x8x8xf32>
    %22 = arith.addf %18, %21 : vector<8x8x8xf32>
    %23 = vector.extract_strided_slice %5 {offsets = [0, 0, 0], sizes = [8, 8, 8], strides = [1, 1, 1]} : vector<8x9x9xf32> to vector<8x8x8xf32>
    %cst_15 = arith.constant 0.404006362 : f32
    %24 = vector.broadcast %cst_15 : f32 to vector<8x8x8xf32>
    %25 = arith.mulf %23, %24 : vector<8x8x8xf32>
    %26 = arith.addf %22, %25 : vector<8x8x8xf32>
    %27 = vector.extract_strided_slice %7 {offsets = [0, 0, 0], sizes = [8, 8, 8], strides = [1, 1, 1]} : vector<8x9x9xf32> to vector<8x8x8xf32>
    %cst_16 = arith.constant 0.699759542 : f32
    %28 = vector.broadcast %cst_16 : f32 to vector<8x8x8xf32>
    %29 = arith.mulf %27, %28 : vector<8x8x8xf32>
    %30 = arith.addf %26, %29 : vector<8x8x8xf32>
    %31 = vector.extract_strided_slice %5 {offsets = [0, 0, 1], sizes = [8, 8, 8], strides = [1, 1, 1]} : vector<8x9x9xf32> to vector<8x8x8xf32>
    %cst_17 = arith.constant 1.875000e-01 : f32
    %32 = vector.broadcast %cst_17 : f32 to vector<8x8x8xf32>
    %33 = arith.mulf %31, %32 : vector<8x8x8xf32>
    %34 = arith.addf %30, %33 : vector<8x8x8xf32>
    %35 = vector.extract_strided_slice %7 {offsets = [0, 0, 1], sizes = [8, 8, 8], strides = [1, 1, 1]} : vector<8x9x9xf32> to vector<8x8x8xf32>
    %cst_18 = arith.constant -0.108253174 : f32
    %36 = vector.broadcast %cst_18 : f32 to vector<8x8x8xf32>
    %37 = arith.mulf %35, %36 : vector<8x8x8xf32>
    %38 = arith.addf %34, %37 : vector<8x8x8xf32>
    %39 = vector.extract_strided_slice %1 {offsets = [0, 1, 0], sizes = [8, 8, 8], strides = [1, 1, 1]} : vector<8x9x9xf32> to vector<8x8x8xf32>
    %cst_19 = arith.constant 0.108253174 : f32
    %40 = vector.broadcast %cst_19 : f32 to vector<8x8x8xf32>
    %41 = arith.mulf %39, %40 : vector<8x8x8xf32>
    %42 = arith.addf %38, %41 : vector<8x8x8xf32>
    %43 = vector.extract_strided_slice %3 {offsets = [0, 1, 0], sizes = [8, 8, 8], strides = [1, 1, 1]} : vector<8x9x9xf32> to vector<8x8x8xf32>
    %cst_20 = arith.constant 1.875000e-01 : f32
    %44 = vector.broadcast %cst_20 : f32 to vector<8x8x8xf32>
    %45 = arith.mulf %43, %44 : vector<8x8x8xf32>
    %46 = arith.addf %42, %45 : vector<8x8x8xf32>
    %47 = vector.extract_strided_slice %1 {offsets = [0, 1, 1], sizes = [8, 8, 8], strides = [1, 1, 1]} : vector<8x9x9xf32> to vector<8x8x8xf32>
    %cst_21 = arith.constant 0.050240472 : f32
    %48 = vector.broadcast %cst_21 : f32 to vector<8x8x8xf32>
    %49 = arith.mulf %47, %48 : vector<8x8x8xf32>
    %50 = arith.addf %46, %49 : vector<8x8x8xf32>
    %51 = vector.extract_strided_slice %3 {offsets = [0, 1, 1], sizes = [8, 8, 8], strides = [1, 1, 1]} : vector<8x9x9xf32> to vector<8x8x8xf32>
    %cst_22 = arith.constant -0.0290063508 : f32
    %52 = vector.broadcast %cst_22 : f32 to vector<8x8x8xf32>
    %53 = arith.mulf %51, %52 : vector<8x8x8xf32>
    %54 = arith.addf %50, %53 : vector<8x8x8xf32>
    %55 = vector.extract_strided_slice %5 {offsets = [0, 1, 0], sizes = [8, 8, 8], strides = [1, 1, 1]} : vector<8x9x9xf32> to vector<8x8x8xf32>
    %cst_23 = arith.constant -6.250000e-02 : f32
    %56 = vector.broadcast %cst_23 : f32 to vector<8x8x8xf32>
    %57 = arith.mulf %55, %56 : vector<8x8x8xf32>
    %58 = arith.addf %54, %57 : vector<8x8x8xf32>
    %59 = vector.extract_strided_slice %7 {offsets = [0, 1, 0], sizes = [8, 8, 8], strides = [1, 1, 1]} : vector<8x9x9xf32> to vector<8x8x8xf32>
    %cst_24 = arith.constant -0.108253174 : f32
    %60 = vector.broadcast %cst_24 : f32 to vector<8x8x8xf32>
    %61 = arith.mulf %59, %60 : vector<8x8x8xf32>
    %62 = arith.addf %58, %61 : vector<8x8x8xf32>
    %63 = vector.extract_strided_slice %5 {offsets = [0, 1, 1], sizes = [8, 8, 8], strides = [1, 1, 1]} : vector<8x9x9xf32> to vector<8x8x8xf32>
    %cst_25 = arith.constant -0.0290063508 : f32
    %64 = vector.broadcast %cst_25 : f32 to vector<8x8x8xf32>
    %65 = arith.mulf %63, %64 : vector<8x8x8xf32>
    %66 = arith.addf %62, %65 : vector<8x8x8xf32>
    %67 = vector.extract_strided_slice %7 {offsets = [0, 1, 1], sizes = [8, 8, 8], strides = [1, 1, 1]} : vector<8x9x9xf32> to vector<8x8x8xf32>
    %cst_26 = arith.constant 0.0167468246 : f32
    %68 = vector.broadcast %cst_26 : f32 to vector<8x8x8xf32>
    %69 = arith.mulf %67, %68 : vector<8x8x8xf32>
    %70 = arith.addf %66, %69 : vector<8x8x8xf32>
    %c0_27 = arith.constant 0 : index
    %c0_28 = arith.constant 0 : index
    %c0_29 = arith.constant 0 : index
    %c0_30 = arith.constant 0 : index
    %71 = vector.load %arg2[%c0_27, %c0_28, %c0_29, %c0_30] : memref<4x8x8x8xf32, #tpu.memory_space<vmem>>, vector<1x8x8x8xf32>
    %72 = vector.shape_cast %71 : vector<1x8x8x8xf32> to vector<8x8x8xf32>
    %73 = vector.shape_cast %70 : vector<8x8x8xf32> to vector<1x8x8x8xf32>
    tpu.vector_store %arg2[%c0_27, %c0_28, %c0_29, %c0_30], %73 {strides = array<i32>} : memref<4x8x8x8xf32, #tpu.memory_space<vmem>>, vector<1x8x8x8xf32>,
    %74 = vector.extract_strided_slice %1 {offsets = [0, 0, 0], sizes = [8, 8, 8], strides = [1, 1, 1]} : vector<8x9x9xf32> to vector<8x8x8xf32>
    %cst_31 = arith.constant -6.250000e-02 : f32
    %75 = vector.broadcast %cst_31 : f32 to vector<8x8x8xf32>
    %76 = arith.mulf %74, %75 : vector<8x8x8xf32>
    %77 = vector.extract_strided_slice %3 {offsets = [0, 0, 0], sizes = [8, 8, 8], strides = [1, 1, 1]} : vector<8x9x9xf32> to vector<8x8x8xf32>
    %cst_32 = arith.constant -0.108253174 : f32
    %78 = vector.broadcast %cst_32 : f32 to vector<8x8x8xf32>
    %79 = arith.mulf %77, %78 : vector<8x8x8xf32>
    %80 = arith.addf %76, %79 : vector<8x8x8xf32>
    %81 = vector.extract_strided_slice %1 {offsets = [0, 0, 1], sizes = [8, 8, 8], strides = [1, 1, 1]} : vector<8x9x9xf32> to vector<8x8x8xf32>
    %cst_33 = arith.constant -0.0290063508 : f32
    %82 = vector.broadcast %cst_33 : f32 to vector<8x8x8xf32>
    %83 = arith.mulf %81, %82 : vector<8x8x8xf32>
    %84 = arith.addf %80, %83 : vector<8x8x8xf32>
    %85 = vector.extract_strided_slice %3 {offsets = [0, 0, 1], sizes = [8, 8, 8], strides = [1, 1, 1]} : vector<8x9x9xf32> to vector<8x8x8xf32>
    %cst_34 = arith.constant 0.0167468246 : f32
    %86 = vector.broadcast %cst_34 : f32 to vector<8x8x8xf32>
    %87 = arith.mulf %85, %86 : vector<8x8x8xf32>
    %88 = arith.addf %84, %87 : vector<8x8x8xf32>
    %89 = vector.extract_strided_slice %5 {offsets = [0, 0, 0], sizes = [8, 8, 8], strides = [1, 1, 1]} : vector<8x9x9xf32> to vector<8x8x8xf32>
    %cst_35 = arith.constant -0.108253174 : f32
    %90 = vector.broadcast %cst_35 : f32 to vector<8x8x8xf32>
    %91 = arith.mulf %89, %90 : vector<8x8x8xf32>
    %92 = arith.addf %88, %91 : vector<8x8x8xf32>
    %93 = vector.extract_strided_slice %7 {offsets = [0, 0, 0], sizes = [8, 8, 8], strides = [1, 1, 1]} : vector<8x9x9xf32> to vector<8x8x8xf32>
    %cst_36 = arith.constant -1.875000e-01 : f32
    %94 = vector.broadcast %cst_36 : f32 to vector<8x8x8xf32>
    %95 = arith.mulf %93, %94 : vector<8x8x8xf32>
    %96 = arith.addf %92, %95 : vector<8x8x8xf32>
    %97 = vector.extract_strided_slice %5 {offsets = [0, 0, 1], sizes = [8, 8, 8], strides = [1, 1, 1]} : vector<8x9x9xf32> to vector<8x8x8xf32>
    %cst_37 = arith.constant -0.050240472 : f32
    %98 = vector.broadcast %cst_37 : f32 to vector<8x8x8xf32>
    %99 = arith.mulf %97, %98 : vector<8x8x8xf32>
    %100 = arith.addf %96, %99 : vector<8x8x8xf32>
    %101 = vector.extract_strided_slice %7 {offsets = [0, 0, 1], sizes = [8, 8, 8], strides = [1, 1, 1]} : vector<8x9x9xf32> to vector<8x8x8xf32>
    %cst_38 = arith.constant 0.0290063508 : f32
    %102 = vector.broadcast %cst_38 : f32 to vector<8x8x8xf32>
    %103 = arith.mulf %101, %102 : vector<8x8x8xf32>
    %104 = arith.addf %100, %103 : vector<8x8x8xf32>
    %105 = vector.extract_strided_slice %1 {offsets = [0, 1, 0], sizes = [8, 8, 8], strides = [1, 1, 1]} : vector<8x9x9xf32> to vector<8x8x8xf32>
    %cst_39 = arith.constant 0.404006362 : f32
    %106 = vector.broadcast %cst_39 : f32 to vector<8x8x8xf32>
    %107 = arith.mulf %105, %106 : vector<8x8x8xf32>
    %108 = arith.addf %104, %107 : vector<8x8x8xf32>
    %109 = vector.extract_strided_slice %3 {offsets = [0, 1, 0], sizes = [8, 8, 8], strides = [1, 1, 1]} : vector<8x9x9xf32> to vector<8x8x8xf32>
    %cst_40 = arith.constant 0.699759542 : f32
    %110 = vector.broadcast %cst_40 : f32 to vector<8x8x8xf32>
    %111 = arith.mulf %109, %110 : vector<8x8x8xf32>
    %112 = arith.addf %108, %111 : vector<8x8x8xf32>
    %113 = vector.extract_strided_slice %1 {offsets = [0, 1, 1], sizes = [8, 8, 8], strides = [1, 1, 1]} : vector<8x9x9xf32> to vector<8x8x8xf32>
    %cst_41 = arith.constant 1.875000e-01 : f32
    %114 = vector.broadcast %cst_41 : f32 to vector<8x8x8xf32>
    %115 = arith.mulf %113, %114 : vector<8x8x8xf32>
    %116 = arith.addf %112, %115 : vector<8x8x8xf32>
    %117 = vector.extract_strided_slice %3 {offsets = [0, 1, 1], sizes = [8, 8, 8], strides = [1, 1, 1]} : vector<8x9x9xf32> to vector<8x8x8xf32>
    %cst_42 = arith.constant -0.108253174 : f32
    %118 = vector.broadcast %cst_42 : f32 to vector<8x8x8xf32>
    %119 = arith.mulf %117, %118 : vector<8x8x8xf32>
    %120 = arith.addf %116, %119 : vector<8x8x8xf32>
    %121 = vector.extract_strided_slice %5 {offsets = [0, 1, 0], sizes = [8, 8, 8], strides = [1, 1, 1]} : vector<8x9x9xf32> to vector<8x8x8xf32>
    %cst_43 = arith.constant -0.233253181 : f32
    %122 = vector.broadcast %cst_43 : f32 to vector<8x8x8xf32>
    %123 = arith.mulf %121, %122 : vector<8x8x8xf32>
    %124 = arith.addf %120, %123 : vector<8x8x8xf32>
    %125 = vector.extract_strided_slice %7 {offsets = [0, 1, 0], sizes = [8, 8, 8], strides = [1, 1, 1]} : vector<8x9x9xf32> to vector<8x8x8xf32>
    %cst_44 = arith.constant -0.404006362 : f32
    %126 = vector.broadcast %cst_44 : f32 to vector<8x8x8xf32>
    %127 = arith.mulf %125, %126 : vector<8x8x8xf32>
    %128 = arith.addf %124, %127 : vector<8x8x8xf32>
    %129 = vector.extract_strided_slice %5 {offsets = [0, 1, 1], sizes = [8, 8, 8], strides = [1, 1, 1]} : vector<8x9x9xf32> to vector<8x8x8xf32>
    %cst_45 = arith.constant -0.108253174 : f32
    %130 = vector.broadcast %cst_45 : f32 to vector<8x8x8xf32>
    %131 = arith.mulf %129, %130 : vector<8x8x8xf32>
    %132 = arith.addf %128, %131 : vector<8x8x8xf32>
    %133 = vector.extract_strided_slice %7 {offsets = [0, 1, 1], sizes = [8, 8, 8], strides = [1, 1, 1]} : vector<8x9x9xf32> to vector<8x8x8xf32>
    %cst_46 = arith.constant 6.250000e-02 : f32
    %134 = vector.broadcast %cst_46 : f32 to vector<8x8x8xf32>
    %135 = arith.mulf %133, %134 : vector<8x8x8xf32>
    %136 = arith.addf %132, %135 : vector<8x8x8xf32>
    %c1_47 = arith.constant 1 : index
    %c0_48 = arith.constant 0 : index
    %c0_49 = arith.constant 0 : index
    %c0_50 = arith.constant 0 : index
    %137 = vector.load %arg2[%c1_47, %c0_48, %c0_49, %c0_50] : memref<4x8x8x8xf32, #tpu.memory_space<vmem>>, vector<1x8x8x8xf32>
    %138 = vector.shape_cast %137 : vector<1x8x8x8xf32> to vector<8x8x8xf32>
    %139 = vector.shape_cast %136 : vector<8x8x8xf32> to vector<1x8x8x8xf32>
    tpu.vector_store %arg2[%c1_47, %c0_48, %c0_49, %c0_50], %139 {strides = array<i32>} : memref<4x8x8x8xf32, #tpu.memory_space<vmem>>, vector<1x8x8x8xf32>,
    %140 = vector.extract_strided_slice %1 {offsets = [0, 0, 0], sizes = [8, 8, 8], strides = [1, 1, 1]} : vector<8x9x9xf32> to vector<8x8x8xf32>
    %cst_51 = arith.constant -6.250000e-02 : f32
    %141 = vector.broadcast %cst_51 : f32 to vector<8x8x8xf32>
    %142 = arith.mulf %140, %141 : vector<8x8x8xf32>
    %143 = vector.extract_strided_slice %3 {offsets = [0, 0, 0], sizes = [8, 8, 8], strides = [1, 1, 1]} : vector<8x9x9xf32> to vector<8x8x8xf32>
    %cst_52 = arith.constant -0.108253174 : f32
    %144 = vector.broadcast %cst_52 : f32 to vector<8x8x8xf32>
    %145 = arith.mulf %143, %144 : vector<8x8x8xf32>
    %146 = arith.addf %142, %145 : vector<8x8x8xf32>
    %147 = vector.extract_strided_slice %1 {offsets = [0, 0, 1], sizes = [8, 8, 8], strides = [1, 1, 1]} : vector<8x9x9xf32> to vector<8x8x8xf32>
    %cst_53 = arith.constant 0.404006362 : f32
    %148 = vector.broadcast %cst_53 : f32 to vector<8x8x8xf32>
    %149 = arith.mulf %147, %148 : vector<8x8x8xf32>
    %150 = arith.addf %146, %149 : vector<8x8x8xf32>
    %151 = vector.extract_strided_slice %3 {offsets = [0, 0, 1], sizes = [8, 8, 8], strides = [1, 1, 1]} : vector<8x9x9xf32> to vector<8x8x8xf32>
    %cst_54 = arith.constant -0.233253181 : f32
    %152 = vector.broadcast %cst_54 : f32 to vector<8x8x8xf32>
    %153 = arith.mulf %151, %152 : vector<8x8x8xf32>
    %154 = arith.addf %150, %153 : vector<8x8x8xf32>
    %155 = vector.extract_strided_slice %5 {offsets = [0, 0, 0], sizes = [8, 8, 8], strides = [1, 1, 1]} : vector<8x9x9xf32> to vector<8x8x8xf32>
    %cst_55 = arith.constant -0.108253174 : f32
    %156 = vector.broadcast %cst_55 : f32 to vector<8x8x8xf32>
    %157 = arith.mulf %155, %156 : vector<8x8x8xf32>
    %158 = arith.addf %154, %157 : vector<8x8x8xf32>
    %159 = vector.extract_strided_slice %7 {offsets = [0, 0, 0], sizes = [8, 8, 8], strides = [1, 1, 1]} : vector<8x9x9xf32> to vector<8x8x8xf32>
    %cst_56 = arith.constant -1.875000e-01 : f32
    %160 = vector.broadcast %cst_56 : f32 to vector<8x8x8xf32>
    %161 = arith.mulf %159, %160 : vector<8x8x8xf32>
    %162 = arith.addf %158, %161 : vector<8x8x8xf32>
    %163 = vector.extract_strided_slice %5 {offsets = [0, 0, 1], sizes = [8, 8, 8], strides = [1, 1, 1]} : vector<8x9x9xf32> to vector<8x8x8xf32>
    %cst_57 = arith.constant 0.699759542 : f32
    %164 = vector.broadcast %cst_57 : f32 to vector<8x8x8xf32>
    %165 = arith.mulf %163, %164 : vector<8x8x8xf32>
    %166 = arith.addf %162, %165 : vector<8x8x8xf32>
    %167 = vector.extract_strided_slice %7 {offsets = [0, 0, 1], sizes = [8, 8, 8], strides = [1, 1, 1]} : vector<8x9x9xf32> to vector<8x8x8xf32>
    %cst_58 = arith.constant -0.404006362 : f32
    %168 = vector.broadcast %cst_58 : f32 to vector<8x8x8xf32>
    %169 = arith.mulf %167, %168 : vector<8x8x8xf32>
    %170 = arith.addf %166, %169 : vector<8x8x8xf32>
    %171 = vector.extract_strided_slice %1 {offsets = [0, 1, 0], sizes = [8, 8, 8], strides = [1, 1, 1]} : vector<8x9x9xf32> to vector<8x8x8xf32>
    %cst_59 = arith.constant -0.0290063508 : f32
    %172 = vector.broadcast %cst_59 : f32 to vector<8x8x8xf32>
    %173 = arith.mulf %171, %172 : vector<8x8x8xf32>
    %174 = arith.addf %170, %173 : vector<8x8x8xf32>
    %175 = vector.extract_strided_slice %3 {offsets = [0, 1, 0], sizes = [8, 8, 8], strides = [1, 1, 1]} : vector<8x9x9xf32> to vector<8x8x8xf32>
    %cst_60 = arith.constant -0.050240472 : f32
    %176 = vector.broadcast %cst_60 : f32 to vector<8x8x8xf32>
    %177 = arith.mulf %175, %176 : vector<8x8x8xf32>
    %178 = arith.addf %174, %177 : vector<8x8x8xf32>
    %179 = vector.extract_strided_slice %1 {offsets = [0, 1, 1], sizes = [8, 8, 8], strides = [1, 1, 1]} : vector<8x9x9xf32> to vector<8x8x8xf32>
    %cst_61 = arith.constant 1.875000e-01 : f32
    %180 = vector.broadcast %cst_61 : f32 to vector<8x8x8xf32>
    %181 = arith.mulf %179, %180 : vector<8x8x8xf32>
    %182 = arith.addf %178, %181 : vector<8x8x8xf32>
    %183 = vector.extract_strided_slice %3 {offsets = [0, 1, 1], sizes = [8, 8, 8], strides = [1, 1, 1]} : vector<8x9x9xf32> to vector<8x8x8xf32>
    %cst_62 = arith.constant -0.108253174 : f32
    %184 = vector.broadcast %cst_62 : f32 to vector<8x8x8xf32>
    %185 = arith.mulf %183, %184 : vector<8x8x8xf32>
    %186 = arith.addf %182, %185 : vector<8x8x8xf32>
    %187 = vector.extract_strided_slice %5 {offsets = [0, 1, 0], sizes = [8, 8, 8], strides = [1, 1, 1]} : vector<8x9x9xf32> to vector<8x8x8xf32>
    %cst_63 = arith.constant 0.0167468246 : f32
    %188 = vector.broadcast %cst_63 : f32 to vector<8x8x8xf32>
    %189 = arith.mulf %187, %188 : vector<8x8x8xf32>
    %190 = arith.addf %186, %189 : vector<8x8x8xf32>
    %191 = vector.extract_strided_slice %7 {offsets = [0, 1, 0], sizes = [8, 8, 8], strides = [1, 1, 1]} : vector<8x9x9xf32> to vector<8x8x8xf32>
    %cst_64 = arith.constant 0.0290063508 : f32
    %192 = vector.broadcast %cst_64 : f32 to vector<8x8x8xf32>
    %193 = arith.mulf %191, %192 : vector<8x8x8xf32>
    %194 = arith.addf %190, %193 : vector<8x8x8xf32>
    %195 = vector.extract_strided_slice %5 {offsets = [0, 1, 1], sizes = [8, 8, 8], strides = [1, 1, 1]} : vector<8x9x9xf32> to vector<8x8x8xf32>
    %cst_65 = arith.constant -0.108253174 : f32
    %196 = vector.broadcast %cst_65 : f32 to vector<8x8x8xf32>
    %197 = arith.mulf %195, %196 : vector<8x8x8xf32>
    %198 = arith.addf %194, %197 : vector<8x8x8xf32>
    %199 = vector.extract_strided_slice %7 {offsets = [0, 1, 1], sizes = [8, 8, 8], strides = [1, 1, 1]} : vector<8x9x9xf32> to vector<8x8x8xf32>
    %cst_66 = arith.constant 6.250000e-02 : f32
    %200 = vector.broadcast %cst_66 : f32 to vector<8x8x8xf32>
    %201 = arith.mulf %199, %200 : vector<8x8x8xf32>
    %202 = arith.addf %198, %201 : vector<8x8x8xf32>
    %c2_67 = arith.constant 2 : index
    %c0_68 = arith.constant 0 : index
    %c0_69 = arith.constant 0 : index
    %c0_70 = arith.constant 0 : index
    %203 = vector.load %arg2[%c2_67, %c0_68, %c0_69, %c0_70] : memref<4x8x8x8xf32, #tpu.memory_space<vmem>>, vector<1x8x8x8xf32>
    %204 = vector.shape_cast %203 : vector<1x8x8x8xf32> to vector<8x8x8xf32>
    %205 = vector.shape_cast %202 : vector<8x8x8xf32> to vector<1x8x8x8xf32>
    tpu.vector_store %arg2[%c2_67, %c0_68, %c0_69, %c0_70], %205 {strides = array<i32>} : memref<4x8x8x8xf32, #tpu.memory_space<vmem>>, vector<1x8x8x8xf32>,
    %206 = vector.extract_strided_slice %1 {offsets = [0, 0, 0], sizes = [8, 8, 8], strides = [1, 1, 1]} : vector<8x9x9xf32> to vector<8x8x8xf32>
    %cst_71 = arith.constant 0.0167468246 : f32
    %207 = vector.broadcast %cst_71 : f32 to vector<8x8x8xf32>
    %208 = arith.mulf %206, %207 : vector<8x8x8xf32>
    %209 = vector.extract_strided_slice %3 {offsets = [0, 0, 0], sizes = [8, 8, 8], strides = [1, 1, 1]} : vector<8x9x9xf32> to vector<8x8x8xf32>
    %cst_72 = arith.constant 0.0290063508 : f32
    %210 = vector.broadcast %cst_72 : f32 to vector<8x8x8xf32>
    %211 = arith.mulf %209, %210 : vector<8x8x8xf32>
    %212 = arith.addf %208, %211 : vector<8x8x8xf32>
    %213 = vector.extract_strided_slice %1 {offsets = [0, 0, 1], sizes = [8, 8, 8], strides = [1, 1, 1]} : vector<8x9x9xf32> to vector<8x8x8xf32>
    %cst_73 = arith.constant -0.108253174 : f32
    %214 = vector.broadcast %cst_73 : f32 to vector<8x8x8xf32>
    %215 = arith.mulf %213, %214 : vector<8x8x8xf32>
    %216 = arith.addf %212, %215 : vector<8x8x8xf32>
    %217 = vector.extract_strided_slice %3 {offsets = [0, 0, 1], sizes = [8, 8, 8], strides = [1, 1, 1]} : vector<8x9x9xf32> to vector<8x8x8xf32>
    %cst_74 = arith.constant 6.250000e-02 : f32
    %218 = vector.broadcast %cst_74 : f32 to vector<8x8x8xf32>
    %219 = arith.mulf %217, %218 : vector<8x8x8xf32>
    %220 = arith.addf %216, %219 : vector<8x8x8xf32>
    %221 = vector.extract_strided_slice %5 {offsets = [0, 0, 0], sizes = [8, 8, 8], strides = [1, 1, 1]} : vector<8x9x9xf32> to vector<8x8x8xf32>
    %cst_75 = arith.constant 0.0290063508 : f32
    %222 = vector.broadcast %cst_75 : f32 to vector<8x8x8xf32>
    %223 = arith.mulf %221, %222 : vector<8x8x8xf32>
    %224 = arith.addf %220, %223 : vector<8x8x8xf32>
    %225 = vector.extract_strided_slice %7 {offsets = [0, 0, 0], sizes = [8, 8, 8], strides = [1, 1, 1]} : vector<8x9x9xf32> to vector<8x8x8xf32>
    %cst_76 = arith.constant 0.050240472 : f32
    %226 = vector.broadcast %cst_76 : f32 to vector<8x8x8xf32>
    %227 = arith.mulf %225, %226 : vector<8x8x8xf32>
    %228 = arith.addf %224, %227 : vector<8x8x8xf32>
    %229 = vector.extract_strided_slice %5 {offsets = [0, 0, 1], sizes = [8, 8, 8], strides = [1, 1, 1]} : vector<8x9x9xf32> to vector<8x8x8xf32>
    %cst_77 = arith.constant -1.875000e-01 : f32
    %230 = vector.broadcast %cst_77 : f32 to vector<8x8x8xf32>
    %231 = arith.mulf %229, %230 : vector<8x8x8xf32>
    %232 = arith.addf %228, %231 : vector<8x8x8xf32>
    %233 = vector.extract_strided_slice %7 {offsets = [0, 0, 1], sizes = [8, 8, 8], strides = [1, 1, 1]} : vector<8x9x9xf32> to vector<8x8x8xf32>
    %cst_78 = arith.constant 0.108253174 : f32
    %234 = vector.broadcast %cst_78 : f32 to vector<8x8x8xf32>
    %235 = arith.mulf %233, %234 : vector<8x8x8xf32>
    %236 = arith.addf %232, %235 : vector<8x8x8xf32>
    %237 = vector.extract_strided_slice %1 {offsets = [0, 1, 0], sizes = [8, 8, 8], strides = [1, 1, 1]} : vector<8x9x9xf32> to vector<8x8x8xf32>
    %cst_79 = arith.constant -0.108253174 : f32
    %238 = vector.broadcast %cst_79 : f32 to vector<8x8x8xf32>
    %239 = arith.mulf %237, %238 : vector<8x8x8xf32>
    %240 = arith.addf %236, %239 : vector<8x8x8xf32>
    %241 = vector.extract_strided_slice %3 {offsets = [0, 1, 0], sizes = [8, 8, 8], strides = [1, 1, 1]} : vector<8x9x9xf32> to vector<8x8x8xf32>
    %cst_80 = arith.constant -1.875000e-01 : f32
    %242 = vector.broadcast %cst_80 : f32 to vector<8x8x8xf32>
    %243 = arith.mulf %241, %242 : vector<8x8x8xf32>
    %244 = arith.addf %240, %243 : vector<8x8x8xf32>
    %245 = vector.extract_strided_slice %1 {offsets = [0, 1, 1], sizes = [8, 8, 8], strides = [1, 1, 1]} : vector<8x9x9xf32> to vector<8x8x8xf32>
    %cst_81 = arith.constant 0.699759542 : f32
    %246 = vector.broadcast %cst_81 : f32 to vector<8x8x8xf32>
    %247 = arith.mulf %245, %246 : vector<8x8x8xf32>
    %248 = arith.addf %244, %247 : vector<8x8x8xf32>
    %249 = vector.extract_strided_slice %3 {offsets = [0, 1, 1], sizes = [8, 8, 8], strides = [1, 1, 1]} : vector<8x9x9xf32> to vector<8x8x8xf32>
    %cst_82 = arith.constant -0.404006362 : f32
    %250 = vector.broadcast %cst_82 : f32 to vector<8x8x8xf32>
    %251 = arith.mulf %249, %250 : vector<8x8x8xf32>
    %252 = arith.addf %248, %251 : vector<8x8x8xf32>
    %253 = vector.extract_strided_slice %5 {offsets = [0, 1, 0], sizes = [8, 8, 8], strides = [1, 1, 1]} : vector<8x9x9xf32> to vector<8x8x8xf32>
    %cst_83 = arith.constant 6.250000e-02 : f32
    %254 = vector.broadcast %cst_83 : f32 to vector<8x8x8xf32>
    %255 = arith.mulf %253, %254 : vector<8x8x8xf32>
    %256 = arith.addf %252, %255 : vector<8x8x8xf32>
    %257 = vector.extract_strided_slice %7 {offsets = [0, 1, 0], sizes = [8, 8, 8], strides = [1, 1, 1]} : vector<8x9x9xf32> to vector<8x8x8xf32>
    %cst_84 = arith.constant 0.108253174 : f32
    %258 = vector.broadcast %cst_84 : f32 to vector<8x8x8xf32>
    %259 = arith.mulf %257, %258 : vector<8x8x8xf32>
    %260 = arith.addf %256, %259 : vector<8x8x8xf32>
    %261 = vector.extract_strided_slice %5 {offsets = [0, 1, 1], sizes = [8, 8, 8], strides = [1, 1, 1]} : vector<8x9x9xf32> to vector<8x8x8xf32>
    %cst_85 = arith.constant -0.404006362 : f32
    %262 = vector.broadcast %cst_85 : f32 to vector<8x8x8xf32>
    %263 = arith.mulf %261, %262 : vector<8x8x8xf32>
    %264 = arith.addf %260, %263 : vector<8x8x8xf32>
    %265 = vector.extract_strided_slice %7 {offsets = [0, 1, 1], sizes = [8, 8, 8], strides = [1, 1, 1]} : vector<8x9x9xf32> to vector<8x8x8xf32>
    %cst_86 = arith.constant 0.233253181 : f32
    %266 = vector.broadcast %cst_86 : f32 to vector<8x8x8xf32>
    %267 = arith.mulf %265, %266 : vector<8x8x8xf32>
    %268 = arith.addf %264, %267 : vector<8x8x8xf32>
    %c3_87 = arith.constant 3 : index
    %c0_88 = arith.constant 0 : index
    %c0_89 = arith.constant 0 : index
    %c0_90 = arith.constant 0 : index
    %269 = vector.load %arg2[%c3_87, %c0_88, %c0_89, %c0_90] : memref<4x8x8x8xf32, #tpu.memory_space<vmem>>, vector<1x8x8x8xf32>
    %270 = vector.shape_cast %269 : vector<1x8x8x8xf32> to vector<8x8x8xf32>
    %271 = vector.shape_cast %268 : vector<8x8x8xf32> to vector<1x8x8x8xf32>
    tpu.vector_store %arg2[%c3_87, %c0_88, %c0_89, %c0_90], %271 {strides = array<i32>} : memref<4x8x8x8xf32, #tpu.memory_space<vmem>>, vector<1x8x8x8xf32>,
    return
  }
  func.func @transform_0(%arg0: i32) -> (i32, i32, i32, i32) {
    %c0_i32 = arith.constant 0 : i32
    %c0_i32_0 = arith.constant 0 : i32
    %c0_i32_1 = arith.constant 0 : i32
    %c0_i32_2 = arith.constant 0 : i32
    %c0_i32_3 = arith.constant 0 : i32
    return %c0_i32, %c0_i32_0, %c0_i32_1, %c0_i32_2 : i32, i32, i32, i32
  }
  func.func @transform_1(%arg0: i32) -> (i32, i32, i32, i32) {
    %c0_i32 = arith.constant 0 : i32
    %c0_i32_0 = arith.constant 0 : i32
    %c0_i32_1 = arith.constant 0 : i32
    %c0_i32_2 = arith.constant 0 : i32
    %c0_i32_3 = arith.constant 0 : i32
    return %c0_i32, %c0_i32_0, %c0_i32_1, %c0_i32_2 : i32, i32, i32, i32
  }
}

module attributes {stable_mosaic.version = 11 : i64} {
  func.func @_tapconv_kernel(%arg0: i32, %arg1: memref<3x4x128xf32, #tpu.memory_space<vmem>>, %arg2: memref<3x4x4xf32, #tpu.memory_space<vmem>>, %arg3: memref<4x1xf32, #tpu.memory_space<vmem>>, %arg4: memref<4x128xf32, #tpu.memory_space<vmem>>) attributes {dimension_semantics = [#tpu.dimension_semantics<parallel>], iteration_bounds = array<i64: 1>, scalar_prefetch = 0 : i64, scratch_operands = 0 : i64, tpu.core_type = #tpu.core_type<tc>, window_params = [{transform_indices = @transform_0, window_bounds = array<i64: 3, 4, 128>}, {pipeline_mode = #tpu.pipeline_mode<synchronous>, transform_indices = @transform_1, window_bounds = array<i64: 3, 4, 4>}, {pipeline_mode = #tpu.pipeline_mode<synchronous>, transform_indices = @transform_2, window_bounds = array<i64: 4, 1>}, {transform_indices = @transform_3, window_bounds = array<i64: 4, 128>}]} {
    %c0 = arith.constant 0 : index
    %c0_0 = arith.constant 0 : index
    %c0_1 = arith.constant 0 : index
    %0 = vector.load %arg2[%c0, %c0_0, %c0_1] : memref<3x4x4xf32, #tpu.memory_space<vmem>>, vector<1x4x4xf32>
    %1 = vector.shape_cast %0 : vector<1x4x4xf32> to vector<4x4xf32>
    %c0_2 = arith.constant 0 : index
    %c0_3 = arith.constant 0 : index
    %c0_4 = arith.constant 0 : index
    %2 = vector.load %arg1[%c0_2, %c0_3, %c0_4] : memref<3x4x128xf32, #tpu.memory_space<vmem>>, vector<1x4x128xf32>
    %3 = vector.shape_cast %2 : vector<1x4x128xf32> to vector<4x128xf32>
    %cst = arith.constant dense<0.000000e+00> : vector<4x128xf32>
    %4 = tpu.matmul %1, %3, %cst {dimension_numbers = #tpu.dot_dimension_numbers<[1], [0], [0], [1], [0, 0, 1, 1], [], []>} : vector<4x4xf32>, vector<4x128xf32>, vector<4x128xf32> -> vector<4x128xf32>
    %c1 = arith.constant 1 : index
    %c0_5 = arith.constant 0 : index
    %c0_6 = arith.constant 0 : index
    %5 = vector.load %arg2[%c1, %c0_5, %c0_6] : memref<3x4x4xf32, #tpu.memory_space<vmem>>, vector<1x4x4xf32>
    %6 = vector.shape_cast %5 : vector<1x4x4xf32> to vector<4x4xf32>
    %c1_7 = arith.constant 1 : index
    %c0_8 = arith.constant 0 : index
    %c0_9 = arith.constant 0 : index
    %7 = vector.load %arg1[%c1_7, %c0_8, %c0_9] : memref<3x4x128xf32, #tpu.memory_space<vmem>>, vector<1x4x128xf32>
    %8 = vector.shape_cast %7 : vector<1x4x128xf32> to vector<4x128xf32>
    %cst_10 = arith.constant dense<0.000000e+00> : vector<4x128xf32>
    %9 = tpu.matmul %6, %8, %cst_10 {dimension_numbers = #tpu.dot_dimension_numbers<[1], [0], [0], [1], [0, 0, 1, 1], [], []>} : vector<4x4xf32>, vector<4x128xf32>, vector<4x128xf32> -> vector<4x128xf32>
    %10 = arith.addf %4, %9 : vector<4x128xf32>
    %c2 = arith.constant 2 : index
    %c0_11 = arith.constant 0 : index
    %c0_12 = arith.constant 0 : index
    %11 = vector.load %arg2[%c2, %c0_11, %c0_12] : memref<3x4x4xf32, #tpu.memory_space<vmem>>, vector<1x4x4xf32>
    %12 = vector.shape_cast %11 : vector<1x4x4xf32> to vector<4x4xf32>
    %c2_13 = arith.constant 2 : index
    %c0_14 = arith.constant 0 : index
    %c0_15 = arith.constant 0 : index
    %13 = vector.load %arg1[%c2_13, %c0_14, %c0_15] : memref<3x4x128xf32, #tpu.memory_space<vmem>>, vector<1x4x128xf32>
    %14 = vector.shape_cast %13 : vector<1x4x128xf32> to vector<4x128xf32>
    %cst_16 = arith.constant dense<0.000000e+00> : vector<4x128xf32>
    %15 = tpu.matmul %12, %14, %cst_16 {dimension_numbers = #tpu.dot_dimension_numbers<[1], [0], [0], [1], [0, 0, 1, 1], [], []>} : vector<4x4xf32>, vector<4x128xf32>, vector<4x128xf32> -> vector<4x128xf32>
    %16 = arith.addf %10, %15 : vector<4x128xf32>
    %c0_17 = arith.constant 0 : index
    %c0_18 = arith.constant 0 : index
    %17 = vector.load %arg3[%c0_17, %c0_18] : memref<4x1xf32, #tpu.memory_space<vmem>>, vector<4x1xf32>
    %18 = vector.broadcast %17 : vector<4x1xf32> to vector<4x128xf32>
    %19 = arith.addf %16, %18 : vector<4x128xf32>
    %c0_19 = arith.constant 0 : index
    %c0_20 = arith.constant 0 : index
    %20 = vector.load %arg4[%c0_19, %c0_20] : memref<4x128xf32, #tpu.memory_space<vmem>>, vector<4x128xf32>
    tpu.vector_store %arg4[%c0_19, %c0_20], %19 {strides = array<i32>} : memref<4x128xf32, #tpu.memory_space<vmem>>, vector<4x128xf32>,
    return
  }
  func.func @transform_0(%arg0: i32) -> (i32, i32, i32) {
    %c0_i32 = arith.constant 0 : i32
    %c0_i32_0 = arith.constant 0 : i32
    %c0_i32_1 = arith.constant 0 : i32
    return %c0_i32, %c0_i32_0, %arg0 : i32, i32, i32
  }
  func.func @transform_1(%arg0: i32) -> (i32, i32, i32) {
    %c0_i32 = arith.constant 0 : i32
    %c0_i32_0 = arith.constant 0 : i32
    %c0_i32_1 = arith.constant 0 : i32
    %c0_i32_2 = arith.constant 0 : i32
    return %c0_i32, %c0_i32_0, %c0_i32_1 : i32, i32, i32
  }
  func.func @transform_2(%arg0: i32) -> (i32, i32) {
    %c0_i32 = arith.constant 0 : i32
    %c0_i32_0 = arith.constant 0 : i32
    %c0_i32_1 = arith.constant 0 : i32
    return %c0_i32, %c0_i32_0 : i32, i32
  }
  func.func @transform_3(%arg0: i32) -> (i32, i32) {
    %c0_i32 = arith.constant 0 : i32
    %c0_i32_0 = arith.constant 0 : i32
    return %c0_i32, %arg0 : i32, i32
  }
}

module attributes {stable_mosaic.version = 11 : i64} {
  func.func @_iwt_kernel(%arg0: i32, %arg1: memref<8x10x10xf32, #tpu.memory_space<vmem>>, %arg2: memref<8x10x10xf32, #tpu.memory_space<vmem>>, %arg3: memref<4x8x8x8xf32, #tpu.memory_space<vmem>>) attributes {dimension_semantics = [#tpu.dimension_semantics<parallel>], iteration_bounds = array<i64: 1>, scalar_prefetch = 0 : i64, scratch_operands = 0 : i64, tpu.core_type = #tpu.core_type<tc>, window_params = [{pipeline_mode = #tpu.pipeline_mode<synchronous>, transform_indices = @transform_0, window_bounds = array<i64: 8, 10, 10>}, {pipeline_mode = #tpu.pipeline_mode<synchronous>, transform_indices = @transform_1, window_bounds = array<i64: 8, 10, 10>}, {pipeline_mode = #tpu.pipeline_mode<synchronous>, transform_indices = @transform_2, window_bounds = array<i64: 4, 8, 8, 8>}]} {
    %c0 = arith.constant 0 : index
    %c0_0 = arith.constant 0 : index
    %c0_1 = arith.constant 0 : index
    %0 = vector.load %arg1[%c0, %c0_0, %c0_1] : memref<8x10x10xf32, #tpu.memory_space<vmem>>, vector<8x10x10xf32>
    %c0_2 = arith.constant 0 : index
    %c0_3 = arith.constant 0 : index
    %c0_4 = arith.constant 0 : index
    %1 = vector.load %arg2[%c0_2, %c0_3, %c0_4] : memref<8x10x10xf32, #tpu.memory_space<vmem>>, vector<8x10x10xf32>
    %2 = vector.extract_strided_slice %0 {offsets = [0, 1, 1], sizes = [8, 8, 8], strides = [1, 1, 1]} : vector<8x10x10xf32> to vector<8x8x8xf32>
    %cst = arith.constant 0.699759542 : f32
    %3 = vector.broadcast %cst : f32 to vector<8x8x8xf32>
    %4 = arith.mulf %2, %3 : vector<8x8x8xf32>
    %5 = vector.extract_strided_slice %1 {offsets = [0, 1, 1], sizes = [8, 8, 8], strides = [1, 1, 1]} : vector<8x10x10xf32> to vector<8x8x8xf32>
    %cst_5 = arith.constant -0.324759513 : f32
    %6 = vector.broadcast %cst_5 : f32 to vector<8x8x8xf32>
    %7 = arith.mulf %5, %6 : vector<8x8x8xf32>
    %8 = arith.addf %4, %7 : vector<8x8x8xf32>
    %9 = vector.extract_strided_slice %0 {offsets = [0, 1, 0], sizes = [8, 8, 8], strides = [1, 1, 1]} : vector<8x10x10xf32> to vector<8x8x8xf32>
    %cst_6 = arith.constant -0.108253174 : f32
    %10 = vector.broadcast %cst_6 : f32 to vector<8x8x8xf32>
    %11 = arith.mulf %9, %10 : vector<8x8x8xf32>
    %12 = vector.extract_strided_slice %1 {offsets = [0, 1, 0], sizes = [8, 8, 8], strides = [1, 1, 1]} : vector<8x10x10xf32> to vector<8x8x8xf32>
    %cst_7 = arith.constant -0.266746819 : f32
    %13 = vector.broadcast %cst_7 : f32 to vector<8x8x8xf32>
    %14 = arith.mulf %12, %13 : vector<8x8x8xf32>
    %15 = arith.addf %11, %14 : vector<8x8x8xf32>
    %16 = arith.addf %8, %15 : vector<8x8x8xf32>
    %17 = vector.extract_strided_slice %0 {offsets = [0, 0, 1], sizes = [8, 8, 8], strides = [1, 1, 1]} : vector<8x10x10xf32> to vector<8x8x8xf32>
    %cst_8 = arith.constant -0.108253174 : f32
    %18 = vector.broadcast %cst_8 : f32 to vector<8x8x8xf32>
    %19 = arith.mulf %17, %18 : vector<8x8x8xf32>
    %20 = vector.extract_strided_slice %1 {offsets = [0, 0, 1], sizes = [8, 8, 8], strides = [1, 1, 1]} : vector<8x10x10xf32> to vector<8x8x8xf32>
    %cst_9 = arith.constant -0.266746819 : f32
    %21 = vector.broadcast %cst_9 : f32 to vector<8x8x8xf32>
    %22 = arith.mulf %20, %21 : vector<8x8x8xf32>
    %23 = arith.addf %19, %22 : vector<8x8x8xf32>
    %24 = arith.addf %16, %23 : vector<8x8x8xf32>
    %25 = vector.extract_strided_slice %0 {offsets = [0, 0, 0], sizes = [8, 8, 8], strides = [1, 1, 1]} : vector<8x10x10xf32> to vector<8x8x8xf32>
    %cst_10 = arith.constant 0.0167468246 : f32
    %26 = vector.broadcast %cst_10 : f32 to vector<8x8x8xf32>
    %27 = arith.mulf %25, %26 : vector<8x8x8xf32>
    %28 = vector.extract_strided_slice %1 {offsets = [0, 0, 0], sizes = [8, 8, 8], strides = [1, 1, 1]} : vector<8x10x10xf32> to vector<8x8x8xf32>
    %cst_11 = arith.constant 0.358253181 : f32
    %29 = vector.broadcast %cst_11 : f32 to vector<8x8x8xf32>
    %30 = arith.mulf %28, %29 : vector<8x8x8xf32>
    %31 = arith.addf %27, %30 : vector<8x8x8xf32>
    %32 = arith.addf %24, %31 : vector<8x8x8xf32>
    %c0_12 = arith.constant 0 : index
    %c0_13 = arith.constant 0 : index
    %c0_14 = arith.constant 0 : index
    %c0_15 = arith.constant 0 : index
    %33 = vector.load %arg3[%c0_12, %c0_13, %c0_14, %c0_15] : memref<4x8x8x8xf32, #tpu.memory_space<vmem>>, vector<1x8x8x8xf32>
    %34 = vector.shape_cast %33 : vector<1x8x8x8xf32> to vector<8x8x8xf32>
    %35 = vector.shape_cast %32 : vector<8x8x8xf32> to vector<1x8x8x8xf32>
    tpu.vector_store %arg3[%c0_12, %c0_13, %c0_14, %c0_15], %35 {strides = array<i32>} : memref<4x8x8x8xf32, #tpu.memory_space<vmem>>, vector<1x8x8x8xf32>,
    %36 = vector.extract_strided_slice %0 {offsets = [0, 1, 2], sizes = [8, 8, 8], strides = [1, 1, 1]} : vector<8x10x10xf32> to vector<8x8x8xf32>
    %cst_16 = arith.constant 0.404006362 : f32
    %37 = vector.broadcast %cst_16 : f32 to vector<8x8x8xf32>
    %38 = arith.mulf %36, %37 : vector<8x8x8xf32>
    %39 = vector.extract_strided_slice %1 {offsets = [0, 1, 2], sizes = [8, 8, 8], strides = [1, 1, 1]} : vector<8x10x10xf32> to vector<8x8x8xf32>
    %cst_17 = arith.constant -1.875000e-01 : f32
    %40 = vector.broadcast %cst_17 : f32 to vector<8x8x8xf32>
    %41 = arith.mulf %39, %40 : vector<8x8x8xf32>
    %42 = arith.addf %38, %41 : vector<8x8x8xf32>
    %43 = vector.extract_strided_slice %0 {offsets = [0, 1, 1], sizes = [8, 8, 8], strides = [1, 1, 1]} : vector<8x10x10xf32> to vector<8x8x8xf32>
    %cst_18 = arith.constant 1.875000e-01 : f32
    %44 = vector.broadcast %cst_18 : f32 to vector<8x8x8xf32>
    %45 = arith.mulf %43, %44 : vector<8x8x8xf32>
    %46 = vector.extract_strided_slice %1 {offsets = [0, 1, 1], sizes = [8, 8, 8], strides = [1, 1, 1]} : vector<8x10x10xf32> to vector<8x8x8xf32>
    %cst_19 = arith.constant 0.462019056 : f32
    %47 = vector.broadcast %cst_19 : f32 to vector<8x8x8xf32>
    %48 = arith.mulf %46, %47 : vector<8x8x8xf32>
    %49 = arith.addf %45, %48 : vector<8x8x8xf32>
    %50 = arith.addf %42, %49 : vector<8x8x8xf32>
    %51 = vector.extract_strided_slice %0 {offsets = [0, 0, 2], sizes = [8, 8, 8], strides = [1, 1, 1]} : vector<8x10x10xf32> to vector<8x8x8xf32>
    %cst_20 = arith.constant -6.250000e-02 : f32
    %52 = vector.broadcast %cst_20 : f32 to vector<8x8x8xf32>
    %53 = arith.mulf %51, %52 : vector<8x8x8xf32>
    %54 = vector.extract_strided_slice %1 {offsets = [0, 0, 2], sizes = [8, 8, 8], strides = [1, 1, 1]} : vector<8x10x10xf32> to vector<8x8x8xf32>
    %cst_21 = arith.constant -0.154006347 : f32
    %55 = vector.broadcast %cst_21 : f32 to vector<8x8x8xf32>
    %56 = arith.mulf %54, %55 : vector<8x8x8xf32>
    %57 = arith.addf %53, %56 : vector<8x8x8xf32>
    %58 = arith.addf %50, %57 : vector<8x8x8xf32>
    %59 = vector.extract_strided_slice %0 {offsets = [0, 0, 1], sizes = [8, 8, 8], strides = [1, 1, 1]} : vector<8x10x10xf32> to vector<8x8x8xf32>
    %cst_22 = arith.constant -0.0290063508 : f32
    %60 = vector.broadcast %cst_22 : f32 to vector<8x8x8xf32>
    %61 = arith.mulf %59, %60 : vector<8x8x8xf32>
    %62 = vector.extract_strided_slice %1 {offsets = [0, 0, 1], sizes = [8, 8, 8], strides = [1, 1, 1]} : vector<8x10x10xf32> to vector<8x8x8xf32>
    %cst_23 = arith.constant -0.620512724 : f32
    %63 = vector.broadcast %cst_23 : f32 to vector<8x8x8xf32>
    %64 = arith.mulf %62, %63 : vector<8x8x8xf32>
    %65 = arith.addf %61, %64 : vector<8x8x8xf32>
    %66 = arith.addf %58, %65 : vector<8x8x8xf32>
    %c1 = arith.constant 1 : index
    %c0_24 = arith.constant 0 : index
    %c0_25 = arith.constant 0 : index
    %c0_26 = arith.constant 0 : index
    %67 = vector.load %arg3[%c1, %c0_24, %c0_25, %c0_26] : memref<4x8x8x8xf32, #tpu.memory_space<vmem>>, vector<1x8x8x8xf32>
    %68 = vector.shape_cast %67 : vector<1x8x8x8xf32> to vector<8x8x8xf32>
    %69 = vector.shape_cast %66 : vector<8x8x8xf32> to vector<1x8x8x8xf32>
    tpu.vector_store %arg3[%c1, %c0_24, %c0_25, %c0_26], %69 {strides = array<i32>} : memref<4x8x8x8xf32, #tpu.memory_space<vmem>>, vector<1x8x8x8xf32>,
    %70 = vector.extract_strided_slice %0 {offsets = [0, 2, 1], sizes = [8, 8, 8], strides = [1, 1, 1]} : vector<8x10x10xf32> to vector<8x8x8xf32>
    %cst_27 = arith.constant 0.404006362 : f32
    %71 = vector.broadcast %cst_27 : f32 to vector<8x8x8xf32>
    %72 = arith.mulf %70, %71 : vector<8x8x8xf32>
    %73 = vector.extract_strided_slice %1 {offsets = [0, 2, 1], sizes = [8, 8, 8], strides = [1, 1, 1]} : vector<8x10x10xf32> to vector<8x8x8xf32>
    %cst_28 = arith.constant -1.875000e-01 : f32
    %74 = vector.broadcast %cst_28 : f32 to vector<8x8x8xf32>
    %75 = arith.mulf %73, %74 : vector<8x8x8xf32>
    %76 = arith.addf %72, %75 : vector<8x8x8xf32>
    %77 = vector.extract_strided_slice %0 {offsets = [0, 2, 0], sizes = [8, 8, 8], strides = [1, 1, 1]} : vector<8x10x10xf32> to vector<8x8x8xf32>
    %cst_29 = arith.constant -6.250000e-02 : f32
    %78 = vector.broadcast %cst_29 : f32 to vector<8x8x8xf32>
    %79 = arith.mulf %77, %78 : vector<8x8x8xf32>
    %80 = vector.extract_strided_slice %1 {offsets = [0, 2, 0], sizes = [8, 8, 8], strides = [1, 1, 1]} : vector<8x10x10xf32> to vector<8x8x8xf32>
    %cst_30 = arith.constant -0.154006347 : f32
    %81 = vector.broadcast %cst_30 : f32 to vector<8x8x8xf32>
    %82 = arith.mulf %80, %81 : vector<8x8x8xf32>
    %83 = arith.addf %79, %82 : vector<8x8x8xf32>
    %84 = arith.addf %76, %83 : vector<8x8x8xf32>
    %85 = vector.extract_strided_slice %0 {offsets = [0, 1, 1], sizes = [8, 8, 8], strides = [1, 1, 1]} : vector<8x10x10xf32> to vector<8x8x8xf32>
    %cst_31 = arith.constant 1.875000e-01 : f32
    %86 = vector.broadcast %cst_31 : f32 to vector<8x8x8xf32>
    %87 = arith.mulf %85, %86 : vector<8x8x8xf32>
    %88 = vector.extract_strided_slice %1 {offsets = [0, 1, 1], sizes = [8, 8, 8], strides = [1, 1, 1]} : vector<8x10x10xf32> to vector<8x8x8xf32>
    %cst_32 = arith.constant 0.462019056 : f32
    %89 = vector.broadcast %cst_32 : f32 to vector<8x8x8xf32>
    %90 = arith.mulf %88, %89 : vector<8x8x8xf32>
    %91 = arith.addf %87, %90 : vector<8x8x8xf32>
    %92 = arith.addf %84, %91 : vector<8x8x8xf32>
    %93 = vector.extract_strided_slice %0 {offsets = [0, 1, 0], sizes = [8, 8, 8], strides = [1, 1, 1]} : vector<8x10x10xf32> to vector<8x8x8xf32>
    %cst_33 = arith.constant -0.0290063508 : f32
    %94 = vector.broadcast %cst_33 : f32 to vector<8x8x8xf32>
    %95 = arith.mulf %93, %94 : vector<8x8x8xf32>
    %96 = vector.extract_strided_slice %1 {offsets = [0, 1, 0], sizes = [8, 8, 8], strides = [1, 1, 1]} : vector<8x10x10xf32> to vector<8x8x8xf32>
    %cst_34 = arith.constant -0.620512724 : f32
    %97 = vector.broadcast %cst_34 : f32 to vector<8x8x8xf32>
    %98 = arith.mulf %96, %97 : vector<8x8x8xf32>
    %99 = arith.addf %95, %98 : vector<8x8x8xf32>
    %100 = arith.addf %92, %99 : vector<8x8x8xf32>
    %c2 = arith.constant 2 : index
    %c0_35 = arith.constant 0 : index
    %c0_36 = arith.constant 0 : index
    %c0_37 = arith.constant 0 : index
    %101 = vector.load %arg3[%c2, %c0_35, %c0_36, %c0_37] : memref<4x8x8x8xf32, #tpu.memory_space<vmem>>, vector<1x8x8x8xf32>
    %102 = vector.shape_cast %101 : vector<1x8x8x8xf32> to vector<8x8x8xf32>
    %103 = vector.shape_cast %100 : vector<8x8x8xf32> to vector<1x8x8x8xf32>
    tpu.vector_store %arg3[%c2, %c0_35, %c0_36, %c0_37], %103 {strides = array<i32>} : memref<4x8x8x8xf32, #tpu.memory_space<vmem>>, vector<1x8x8x8xf32>,
    %104 = vector.extract_strided_slice %0 {offsets = [0, 2, 2], sizes = [8, 8, 8], strides = [1, 1, 1]} : vector<8x10x10xf32> to vector<8x8x8xf32>
    %cst_38 = arith.constant 0.233253181 : f32
    %105 = vector.broadcast %cst_38 : f32 to vector<8x8x8xf32>
    %106 = arith.mulf %104, %105 : vector<8x8x8xf32>
    %107 = vector.extract_strided_slice %1 {offsets = [0, 2, 2], sizes = [8, 8, 8], strides = [1, 1, 1]} : vector<8x10x10xf32> to vector<8x8x8xf32>
    %cst_39 = arith.constant -0.108253174 : f32
    %108 = vector.broadcast %cst_39 : f32 to vector<8x8x8xf32>
    %109 = arith.mulf %107, %108 : vector<8x8x8xf32>
    %110 = arith.addf %106, %109 : vector<8x8x8xf32>
    %111 = vector.extract_strided_slice %0 {offsets = [0, 2, 1], sizes = [8, 8, 8], strides = [1, 1, 1]} : vector<8x10x10xf32> to vector<8x8x8xf32>
    %cst_40 = arith.constant 0.108253174 : f32
    %112 = vector.broadcast %cst_40 : f32 to vector<8x8x8xf32>
    %113 = arith.mulf %111, %112 : vector<8x8x8xf32>
    %114 = vector.extract_strided_slice %1 {offsets = [0, 2, 1], sizes = [8, 8, 8], strides = [1, 1, 1]} : vector<8x10x10xf32> to vector<8x8x8xf32>
    %cst_41 = arith.constant 0.266746819 : f32
    %115 = vector.broadcast %cst_41 : f32 to vector<8x8x8xf32>
    %116 = arith.mulf %114, %115 : vector<8x8x8xf32>
    %117 = arith.addf %113, %116 : vector<8x8x8xf32>
    %118 = arith.addf %110, %117 : vector<8x8x8xf32>
    %119 = vector.extract_strided_slice %0 {offsets = [0, 1, 2], sizes = [8, 8, 8], strides = [1, 1, 1]} : vector<8x10x10xf32> to vector<8x8x8xf32>
    %cst_42 = arith.constant 0.108253174 : f32
    %120 = vector.broadcast %cst_42 : f32 to vector<8x8x8xf32>
    %121 = arith.mulf %119, %120 : vector<8x8x8xf32>
    %122 = vector.extract_strided_slice %1 {offsets = [0, 1, 2], sizes = [8, 8, 8], strides = [1, 1, 1]} : vector<8x10x10xf32> to vector<8x8x8xf32>
    %cst_43 = arith.constant 0.266746819 : f32
    %123 = vector.broadcast %cst_43 : f32 to vector<8x8x8xf32>
    %124 = arith.mulf %122, %123 : vector<8x8x8xf32>
    %125 = arith.addf %121, %124 : vector<8x8x8xf32>
    %126 = arith.addf %118, %125 : vector<8x8x8xf32>
    %127 = vector.extract_strided_slice %0 {offsets = [0, 1, 1], sizes = [8, 8, 8], strides = [1, 1, 1]} : vector<8x10x10xf32> to vector<8x8x8xf32>
    %cst_44 = arith.constant 0.050240472 : f32
    %128 = vector.broadcast %cst_44 : f32 to vector<8x8x8xf32>
    %129 = arith.mulf %127, %128 : vector<8x8x8xf32>
    %130 = vector.extract_strided_slice %1 {offsets = [0, 1, 1], sizes = [8, 8, 8], strides = [1, 1, 1]} : vector<8x10x10xf32> to vector<8x8x8xf32>
    %cst_45 = arith.constant 1.07475948 : f32
    %131 = vector.broadcast %cst_45 : f32 to vector<8x8x8xf32>
    %132 = arith.mulf %130, %131 : vector<8x8x8xf32>
    %133 = arith.addf %129, %132 : vector<8x8x8xf32>
    %134 = arith.addf %126, %133 : vector<8x8x8xf32>
    %c3 = arith.constant 3 : index
    %c0_46 = arith.constant 0 : index
    %c0_47 = arith.constant 0 : index
    %c0_48 = arith.constant 0 : index
    %135 = vector.load %arg3[%c3, %c0_46, %c0_47, %c0_48] : memref<4x8x8x8xf32, #tpu.memory_space<vmem>>, vector<1x8x8x8xf32>
    %136 = vector.shape_cast %135 : vector<1x8x8x8xf32> to vector<8x8x8xf32>
    %137 = vector.shape_cast %134 : vector<8x8x8xf32> to vector<1x8x8x8xf32>
    tpu.vector_store %arg3[%c3, %c0_46, %c0_47, %c0_48], %137 {strides = array<i32>} : memref<4x8x8x8xf32, #tpu.memory_space<vmem>>, vector<1x8x8x8xf32>,
    return
  }
  func.func @transform_0(%arg0: i32) -> (i32, i32, i32) {
    %c0_i32 = arith.constant 0 : i32
    %c0_i32_0 = arith.constant 0 : i32
    %c0_i32_1 = arith.constant 0 : i32
    %c0_i32_2 = arith.constant 0 : i32
    return %c0_i32, %c0_i32_0, %c0_i32_1 : i32, i32, i32
  }
  func.func @transform_1(%arg0: i32) -> (i32, i32, i32) {
    %c0_i32 = arith.constant 0 : i32
    %c0_i32_0 = arith.constant 0 : i32
    %c0_i32_1 = arith.constant 0 : i32
    %c0_i32_2 = arith.constant 0 : i32
    return %c0_i32, %c0_i32_0, %c0_i32_1 : i32, i32, i32
  }
  func.func @transform_2(%arg0: i32) -> (i32, i32, i32, i32) {
    %c0_i32 = arith.constant 0 : i32
    %c0_i32_0 = arith.constant 0 : i32
    %c0_i32_1 = arith.constant 0 : i32
    %c0_i32_2 = arith.constant 0 : i32
    %c0_i32_3 = arith.constant 0 : i32
    return %c0_i32, %c0_i32_0, %c0_i32_1, %c0_i32_2 : i32, i32, i32, i32
  }
}

module attributes {stable_mosaic.version = 11 : i64} {
  func.func @_hwt_chain_kernel(%arg0: i32, %arg1: memref<1x12x64xf32, #tpu.memory_space<vmem>>, %arg2: memref<4x12xf32, #tpu.memory_space<vmem>>, %arg3: memref<4x1xf32, #tpu.memory_space<vmem>>, %arg4: memref<4x1xf32, #tpu.memory_space<vmem>>, %arg5: memref<4x4xf32, #tpu.memory_space<vmem>>, %arg6: memref<4x1xf32, #tpu.memory_space<vmem>>, %arg7: memref<4x1xf32, #tpu.memory_space<vmem>>, %arg8: memref<64x256xf32, #tpu.memory_space<vmem>>, %arg9: memref<1x4x256xf32, #tpu.memory_space<vmem>>) attributes {dimension_semantics = [#tpu.dimension_semantics<parallel>], iteration_bounds = array<i64: 2>, scalar_prefetch = 0 : i64, scratch_operands = 0 : i64, tpu.core_type = #tpu.core_type<tc>, window_params = [{transform_indices = @transform_0, window_bounds = array<i64: 1, 12, 64>}, {pipeline_mode = #tpu.pipeline_mode<synchronous>, transform_indices = @transform_1, window_bounds = array<i64: 4, 12>}, {pipeline_mode = #tpu.pipeline_mode<synchronous>, transform_indices = @transform_2, window_bounds = array<i64: 4, 1>}, {pipeline_mode = #tpu.pipeline_mode<synchronous>, transform_indices = @transform_3, window_bounds = array<i64: 4, 1>}, {pipeline_mode = #tpu.pipeline_mode<synchronous>, transform_indices = @transform_4, window_bounds = array<i64: 4, 4>}, {pipeline_mode = #tpu.pipeline_mode<synchronous>, transform_indices = @transform_5, window_bounds = array<i64: 4, 1>}, {pipeline_mode = #tpu.pipeline_mode<synchronous>, transform_indices = @transform_6, window_bounds = array<i64: 4, 1>}, {pipeline_mode = #tpu.pipeline_mode<synchronous>, transform_indices = @transform_7, window_bounds = array<i64: 64, 256>}, {transform_indices = @transform_8, window_bounds = array<i64: 1, 4, 256>}]} {
    %c0 = arith.constant 0 : index
    %c0_0 = arith.constant 0 : index
    %c0_1 = arith.constant 0 : index
    %0 = vector.load %arg1[%c0, %c0_0, %c0_1] : memref<1x12x64xf32, #tpu.memory_space<vmem>>, vector<1x12x64xf32>
    %1 = vector.shape_cast %0 : vector<1x12x64xf32> to vector<12x64xf32>
    %c0_2 = arith.constant 0 : index
    %c0_3 = arith.constant 0 : index
    %2 = vector.load %arg2[%c0_2, %c0_3] : memref<4x12xf32, #tpu.memory_space<vmem>>, vector<4x12xf32>
    %cst = arith.constant dense<0.000000e+00> : vector<4x64xf32>
    %3 = tpu.matmul %2, %1, %cst {dimension_numbers = #tpu.dot_dimension_numbers<[1], [0], [0], [1], [0, 0, 1, 1], [], []>} : vector<4x12xf32>, vector<12x64xf32>, vector<4x64xf32> -> vector<4x64xf32>
    %c0_4 = arith.constant 0 : index
    %c0_5 = arith.constant 0 : index
    %4 = vector.load %arg3[%c0_4, %c0_5] : memref<4x1xf32, #tpu.memory_space<vmem>>, vector<4x1xf32>
    %5 = vector.broadcast %4 : vector<4x1xf32> to vector<4x64xf32>
    %6 = arith.mulf %3, %5 : vector<4x64xf32>
    %c0_6 = arith.constant 0 : index
    %c0_7 = arith.constant 0 : index
    %7 = vector.load %arg4[%c0_6, %c0_7] : memref<4x1xf32, #tpu.memory_space<vmem>>, vector<4x1xf32>
    %8 = vector.broadcast %7 : vector<4x1xf32> to vector<4x64xf32>
    %9 = arith.addf %6, %8 : vector<4x64xf32>
    %cst_8 = arith.constant 0.000000e+00 : f32
    %10 = vector.broadcast %cst_8 : f32 to vector<4x64xf32>
    %11 = arith.maximumf %9, %10 : vector<4x64xf32>
    %c0_9 = arith.constant 0 : index
    %c0_10 = arith.constant 0 : index
    %12 = vector.load %arg5[%c0_9, %c0_10] : memref<4x4xf32, #tpu.memory_space<vmem>>, vector<4x4xf32>
    %cst_11 = arith.constant dense<0.000000e+00> : vector<4x64xf32>
    %13 = tpu.matmul %12, %11, %cst_11 {dimension_numbers = #tpu.dot_dimension_numbers<[1], [0], [0], [1], [0, 0, 1, 1], [], []>} : vector<4x4xf32>, vector<4x64xf32>, vector<4x64xf32> -> vector<4x64xf32>
    %c0_12 = arith.constant 0 : index
    %c0_13 = arith.constant 0 : index
    %14 = vector.load %arg6[%c0_12, %c0_13] : memref<4x1xf32, #tpu.memory_space<vmem>>, vector<4x1xf32>
    %15 = vector.broadcast %14 : vector<4x1xf32> to vector<4x64xf32>
    %16 = arith.mulf %13, %15 : vector<4x64xf32>
    %c0_14 = arith.constant 0 : index
    %c0_15 = arith.constant 0 : index
    %17 = vector.load %arg7[%c0_14, %c0_15] : memref<4x1xf32, #tpu.memory_space<vmem>>, vector<4x1xf32>
    %18 = vector.broadcast %17 : vector<4x1xf32> to vector<4x64xf32>
    %19 = arith.addf %16, %18 : vector<4x64xf32>
    %c0_16 = arith.constant 0 : index
    %c0_17 = arith.constant 0 : index
    %20 = vector.load %arg8[%c0_16, %c0_17] : memref<64x256xf32, #tpu.memory_space<vmem>>, vector<64x256xf32>
    %cst_18 = arith.constant dense<0.000000e+00> : vector<4x256xf32>
    %21 = tpu.matmul %19, %20, %cst_18 {dimension_numbers = #tpu.dot_dimension_numbers<[1], [0], [0], [1], [0, 0, 1, 1], [], []>} : vector<4x64xf32>, vector<64x256xf32>, vector<4x256xf32> -> vector<4x256xf32>
    %c0_19 = arith.constant 0 : index
    %c0_20 = arith.constant 0 : index
    %c0_21 = arith.constant 0 : index
    %22 = vector.load %arg9[%c0_19, %c0_20, %c0_21] : memref<1x4x256xf32, #tpu.memory_space<vmem>>, vector<1x4x256xf32>
    %23 = vector.shape_cast %22 : vector<1x4x256xf32> to vector<4x256xf32>
    %24 = vector.shape_cast %21 : vector<4x256xf32> to vector<1x4x256xf32>
    tpu.vector_store %arg9[%c0_19, %c0_20, %c0_21], %24 {strides = array<i32>} : memref<1x4x256xf32, #tpu.memory_space<vmem>>, vector<1x4x256xf32>,
    return
  }
  func.func @transform_0(%arg0: i32) -> (i32, i32, i32) {
    %c0_i32 = arith.constant 0 : i32
    %c0_i32_0 = arith.constant 0 : i32
    %c0_i32_1 = arith.constant 0 : i32
    return %arg0, %c0_i32, %c0_i32_0 : i32, i32, i32
  }
  func.func @transform_1(%arg0: i32) -> (i32, i32) {
    %c0_i32 = arith.constant 0 : i32
    %c0_i32_0 = arith.constant 0 : i32
    %c0_i32_1 = arith.constant 0 : i32
    return %c0_i32, %c0_i32_0 : i32, i32
  }
  func.func @transform_2(%arg0: i32) -> (i32, i32) {
    %c0_i32 = arith.constant 0 : i32
    %c0_i32_0 = arith.constant 0 : i32
    %c0_i32_1 = arith.constant 0 : i32
    return %c0_i32, %c0_i32_0 : i32, i32
  }
  func.func @transform_3(%arg0: i32) -> (i32, i32) {
    %c0_i32 = arith.constant 0 : i32
    %c0_i32_0 = arith.constant 0 : i32
    %c0_i32_1 = arith.constant 0 : i32
    return %c0_i32, %c0_i32_0 : i32, i32
  }
  func.func @transform_4(%arg0: i32) -> (i32, i32) {
    %c0_i32 = arith.constant 0 : i32
    %c0_i32_0 = arith.constant 0 : i32
    %c0_i32_1 = arith.constant 0 : i32
    return %c0_i32, %c0_i32_0 : i32, i32
  }
  func.func @transform_5(%arg0: i32) -> (i32, i32) {
    %c0_i32 = arith.constant 0 : i32
    %c0_i32_0 = arith.constant 0 : i32
    %c0_i32_1 = arith.constant 0 : i32
    return %c0_i32, %c0_i32_0 : i32, i32
  }
  func.func @transform_6(%arg0: i32) -> (i32, i32) {
    %c0_i32 = arith.constant 0 : i32
    %c0_i32_0 = arith.constant 0 : i32
    %c0_i32_1 = arith.constant 0 : i32
    return %c0_i32, %c0_i32_0 : i32, i32
  }
  func.func @transform_7(%arg0: i32) -> (i32, i32) {
    %c0_i32 = arith.constant 0 : i32
    %c0_i32_0 = arith.constant 0 : i32
    %c0_i32_1 = arith.constant 0 : i32
    return %c0_i32, %c0_i32_0 : i32, i32
  }
  func.func @transform_8(%arg0: i32) -> (i32, i32, i32) {
    %c0_i32 = arith.constant 0 : i32
    %c0_i32_0 = arith.constant 0 : i32
    %c0_i32_1 = arith.constant 0 : i32
    return %arg0, %c0_i32, %c0_i32_0 : i32, i32, i32
  }
}

module attributes {stable_mosaic.version = 11 : i64} {
  func.func @_tapconv_kernel(%arg0: i32, %arg1: memref<9x4x128xf32, #tpu.memory_space<vmem>>, %arg2: memref<9x4x4xf32, #tpu.memory_space<vmem>>, %arg3: memref<4x1xf32, #tpu.memory_space<vmem>>, %arg4: memref<4x128xf32, #tpu.memory_space<vmem>>) attributes {dimension_semantics = [#tpu.dimension_semantics<parallel>], iteration_bounds = array<i64: 1>, scalar_prefetch = 0 : i64, scratch_operands = 0 : i64, tpu.core_type = #tpu.core_type<tc>, window_params = [{transform_indices = @transform_0, window_bounds = array<i64: 9, 4, 128>}, {pipeline_mode = #tpu.pipeline_mode<synchronous>, transform_indices = @transform_1, window_bounds = array<i64: 9, 4, 4>}, {pipeline_mode = #tpu.pipeline_mode<synchronous>, transform_indices = @transform_2, window_bounds = array<i64: 4, 1>}, {transform_indices = @transform_3, window_bounds = array<i64: 4, 128>}]} {
    %c0 = arith.constant 0 : index
    %c0_0 = arith.constant 0 : index
    %c0_1 = arith.constant 0 : index
    %0 = vector.load %arg2[%c0, %c0_0, %c0_1] : memref<9x4x4xf32, #tpu.memory_space<vmem>>, vector<1x4x4xf32>
    %1 = vector.shape_cast %0 : vector<1x4x4xf32> to vector<4x4xf32>
    %c0_2 = arith.constant 0 : index
    %c0_3 = arith.constant 0 : index
    %c0_4 = arith.constant 0 : index
    %2 = vector.load %arg1[%c0_2, %c0_3, %c0_4] : memref<9x4x128xf32, #tpu.memory_space<vmem>>, vector<1x4x128xf32>
    %3 = vector.shape_cast %2 : vector<1x4x128xf32> to vector<4x128xf32>
    %cst = arith.constant dense<0.000000e+00> : vector<4x128xf32>
    %4 = tpu.matmul %1, %3, %cst {dimension_numbers = #tpu.dot_dimension_numbers<[1], [0], [0], [1], [0, 0, 1, 1], [], []>} : vector<4x4xf32>, vector<4x128xf32>, vector<4x128xf32> -> vector<4x128xf32>
    %c1 = arith.constant 1 : index
    %c0_5 = arith.constant 0 : index
    %c0_6 = arith.constant 0 : index
    %5 = vector.load %arg2[%c1, %c0_5, %c0_6] : memref<9x4x4xf32, #tpu.memory_space<vmem>>, vector<1x4x4xf32>
    %6 = vector.shape_cast %5 : vector<1x4x4xf32> to vector<4x4xf32>
    %c1_7 = arith.constant 1 : index
    %c0_8 = arith.constant 0 : index
    %c0_9 = arith.constant 0 : index
    %7 = vector.load %arg1[%c1_7, %c0_8, %c0_9] : memref<9x4x128xf32, #tpu.memory_space<vmem>>, vector<1x4x128xf32>
    %8 = vector.shape_cast %7 : vector<1x4x128xf32> to vector<4x128xf32>
    %cst_10 = arith.constant dense<0.000000e+00> : vector<4x128xf32>
    %9 = tpu.matmul %6, %8, %cst_10 {dimension_numbers = #tpu.dot_dimension_numbers<[1], [0], [0], [1], [0, 0, 1, 1], [], []>} : vector<4x4xf32>, vector<4x128xf32>, vector<4x128xf32> -> vector<4x128xf32>
    %10 = arith.addf %4, %9 : vector<4x128xf32>
    %c2 = arith.constant 2 : index
    %c0_11 = arith.constant 0 : index
    %c0_12 = arith.constant 0 : index
    %11 = vector.load %arg2[%c2, %c0_11, %c0_12] : memref<9x4x4xf32, #tpu.memory_space<vmem>>, vector<1x4x4xf32>
    %12 = vector.shape_cast %11 : vector<1x4x4xf32> to vector<4x4xf32>
    %c2_13 = arith.constant 2 : index
    %c0_14 = arith.constant 0 : index
    %c0_15 = arith.constant 0 : index
    %13 = vector.load %arg1[%c2_13, %c0_14, %c0_15] : memref<9x4x128xf32, #tpu.memory_space<vmem>>, vector<1x4x128xf32>
    %14 = vector.shape_cast %13 : vector<1x4x128xf32> to vector<4x128xf32>
    %cst_16 = arith.constant dense<0.000000e+00> : vector<4x128xf32>
    %15 = tpu.matmul %12, %14, %cst_16 {dimension_numbers = #tpu.dot_dimension_numbers<[1], [0], [0], [1], [0, 0, 1, 1], [], []>} : vector<4x4xf32>, vector<4x128xf32>, vector<4x128xf32> -> vector<4x128xf32>
    %16 = arith.addf %10, %15 : vector<4x128xf32>
    %c3 = arith.constant 3 : index
    %c0_17 = arith.constant 0 : index
    %c0_18 = arith.constant 0 : index
    %17 = vector.load %arg2[%c3, %c0_17, %c0_18] : memref<9x4x4xf32, #tpu.memory_space<vmem>>, vector<1x4x4xf32>
    %18 = vector.shape_cast %17 : vector<1x4x4xf32> to vector<4x4xf32>
    %c3_19 = arith.constant 3 : index
    %c0_20 = arith.constant 0 : index
    %c0_21 = arith.constant 0 : index
    %19 = vector.load %arg1[%c3_19, %c0_20, %c0_21] : memref<9x4x128xf32, #tpu.memory_space<vmem>>, vector<1x4x128xf32>
    %20 = vector.shape_cast %19 : vector<1x4x128xf32> to vector<4x128xf32>
    %cst_22 = arith.constant dense<0.000000e+00> : vector<4x128xf32>
    %21 = tpu.matmul %18, %20, %cst_22 {dimension_numbers = #tpu.dot_dimension_numbers<[1], [0], [0], [1], [0, 0, 1, 1], [], []>} : vector<4x4xf32>, vector<4x128xf32>, vector<4x128xf32> -> vector<4x128xf32>
    %22 = arith.addf %16, %21 : vector<4x128xf32>
    %c4 = arith.constant 4 : index
    %c0_23 = arith.constant 0 : index
    %c0_24 = arith.constant 0 : index
    %23 = vector.load %arg2[%c4, %c0_23, %c0_24] : memref<9x4x4xf32, #tpu.memory_space<vmem>>, vector<1x4x4xf32>
    %24 = vector.shape_cast %23 : vector<1x4x4xf32> to vector<4x4xf32>
    %c4_25 = arith.constant 4 : index
    %c0_26 = arith.constant 0 : index
    %c0_27 = arith.constant 0 : index
    %25 = vector.load %arg1[%c4_25, %c0_26, %c0_27] : memref<9x4x128xf32, #tpu.memory_space<vmem>>, vector<1x4x128xf32>
    %26 = vector.shape_cast %25 : vector<1x4x128xf32> to vector<4x128xf32>
    %cst_28 = arith.constant dense<0.000000e+00> : vector<4x128xf32>
    %27 = tpu.matmul %24, %26, %cst_28 {dimension_numbers = #tpu.dot_dimension_numbers<[1], [0], [0], [1], [0, 0, 1, 1], [], []>} : vector<4x4xf32>, vector<4x128xf32>, vector<4x128xf32> -> vector<4x128xf32>
    %28 = arith.addf %22, %27 : vector<4x128xf32>
    %c5 = arith.constant 5 : index
    %c0_29 = arith.constant 0 : index
    %c0_30 = arith.constant 0 : index
    %29 = vector.load %arg2[%c5, %c0_29, %c0_30] : memref<9x4x4xf32, #tpu.memory_space<vmem>>, vector<1x4x4xf32>
    %30 = vector.shape_cast %29 : vector<1x4x4xf32> to vector<4x4xf32>
    %c5_31 = arith.constant 5 : index
    %c0_32 = arith.constant 0 : index
    %c0_33 = arith.constant 0 : index
    %31 = vector.load %arg1[%c5_31, %c0_32, %c0_33] : memref<9x4x128xf32, #tpu.memory_space<vmem>>, vector<1x4x128xf32>
    %32 = vector.shape_cast %31 : vector<1x4x128xf32> to vector<4x128xf32>
    %cst_34 = arith.constant dense<0.000000e+00> : vector<4x128xf32>
    %33 = tpu.matmul %30, %32, %cst_34 {dimension_numbers = #tpu.dot_dimension_numbers<[1], [0], [0], [1], [0, 0, 1, 1], [], []>} : vector<4x4xf32>, vector<4x128xf32>, vector<4x128xf32> -> vector<4x128xf32>
    %34 = arith.addf %28, %33 : vector<4x128xf32>
    %c6 = arith.constant 6 : index
    %c0_35 = arith.constant 0 : index
    %c0_36 = arith.constant 0 : index
    %35 = vector.load %arg2[%c6, %c0_35, %c0_36] : memref<9x4x4xf32, #tpu.memory_space<vmem>>, vector<1x4x4xf32>
    %36 = vector.shape_cast %35 : vector<1x4x4xf32> to vector<4x4xf32>
    %c6_37 = arith.constant 6 : index
    %c0_38 = arith.constant 0 : index
    %c0_39 = arith.constant 0 : index
    %37 = vector.load %arg1[%c6_37, %c0_38, %c0_39] : memref<9x4x128xf32, #tpu.memory_space<vmem>>, vector<1x4x128xf32>
    %38 = vector.shape_cast %37 : vector<1x4x128xf32> to vector<4x128xf32>
    %cst_40 = arith.constant dense<0.000000e+00> : vector<4x128xf32>
    %39 = tpu.matmul %36, %38, %cst_40 {dimension_numbers = #tpu.dot_dimension_numbers<[1], [0], [0], [1], [0, 0, 1, 1], [], []>} : vector<4x4xf32>, vector<4x128xf32>, vector<4x128xf32> -> vector<4x128xf32>
    %40 = arith.addf %34, %39 : vector<4x128xf32>
    %c7 = arith.constant 7 : index
    %c0_41 = arith.constant 0 : index
    %c0_42 = arith.constant 0 : index
    %41 = vector.load %arg2[%c7, %c0_41, %c0_42] : memref<9x4x4xf32, #tpu.memory_space<vmem>>, vector<1x4x4xf32>
    %42 = vector.shape_cast %41 : vector<1x4x4xf32> to vector<4x4xf32>
    %c7_43 = arith.constant 7 : index
    %c0_44 = arith.constant 0 : index
    %c0_45 = arith.constant 0 : index
    %43 = vector.load %arg1[%c7_43, %c0_44, %c0_45] : memref<9x4x128xf32, #tpu.memory_space<vmem>>, vector<1x4x128xf32>
    %44 = vector.shape_cast %43 : vector<1x4x128xf32> to vector<4x128xf32>
    %cst_46 = arith.constant dense<0.000000e+00> : vector<4x128xf32>
    %45 = tpu.matmul %42, %44, %cst_46 {dimension_numbers = #tpu.dot_dimension_numbers<[1], [0], [0], [1], [0, 0, 1, 1], [], []>} : vector<4x4xf32>, vector<4x128xf32>, vector<4x128xf32> -> vector<4x128xf32>
    %46 = arith.addf %40, %45 : vector<4x128xf32>
    %c8 = arith.constant 8 : index
    %c0_47 = arith.constant 0 : index
    %c0_48 = arith.constant 0 : index
    %47 = vector.load %arg2[%c8, %c0_47, %c0_48] : memref<9x4x4xf32, #tpu.memory_space<vmem>>, vector<1x4x4xf32>
    %48 = vector.shape_cast %47 : vector<1x4x4xf32> to vector<4x4xf32>
    %c8_49 = arith.constant 8 : index
    %c0_50 = arith.constant 0 : index
    %c0_51 = arith.constant 0 : index
    %49 = vector.load %arg1[%c8_49, %c0_50, %c0_51] : memref<9x4x128xf32, #tpu.memory_space<vmem>>, vector<1x4x128xf32>
    %50 = vector.shape_cast %49 : vector<1x4x128xf32> to vector<4x128xf32>
    %cst_52 = arith.constant dense<0.000000e+00> : vector<4x128xf32>
    %51 = tpu.matmul %48, %50, %cst_52 {dimension_numbers = #tpu.dot_dimension_numbers<[1], [0], [0], [1], [0, 0, 1, 1], [], []>} : vector<4x4xf32>, vector<4x128xf32>, vector<4x128xf32> -> vector<4x128xf32>
    %52 = arith.addf %46, %51 : vector<4x128xf32>
    %c0_53 = arith.constant 0 : index
    %c0_54 = arith.constant 0 : index
    %53 = vector.load %arg3[%c0_53, %c0_54] : memref<4x1xf32, #tpu.memory_space<vmem>>, vector<4x1xf32>
    %54 = vector.broadcast %53 : vector<4x1xf32> to vector<4x128xf32>
    %55 = arith.addf %52, %54 : vector<4x128xf32>
    %c0_55 = arith.constant 0 : index
    %c0_56 = arith.constant 0 : index
    %56 = vector.load %arg4[%c0_55, %c0_56] : memref<4x128xf32, #tpu.memory_space<vmem>>, vector<4x128xf32>
    tpu.vector_store %arg4[%c0_55, %c0_56], %55 {strides = array<i32>} : memref<4x128xf32, #tpu.memory_space<vmem>>, vector<4x128xf32>,
    return
  }
  func.func @transform_0(%arg0: i32) -> (i32, i32, i32) {
    %c0_i32 = arith.constant 0 : i32
    %c0_i32_0 = arith.constant 0 : i32
    %c0_i32_1 = arith.constant 0 : i32
    return %c0_i32, %c0_i32_0, %arg0 : i32, i32, i32
  }
  func.func @transform_1(%arg0: i32) -> (i32, i32, i32) {
    %c0_i32 = arith.constant 0 : i32
    %c0_i32_0 = arith.constant 0 : i32
    %c0_i32_1 = arith.constant 0 : i32
    %c0_i32_2 = arith.constant 0 : i32
    return %c0_i32, %c0_i32_0, %c0_i32_1 : i32, i32, i32
  }
  func.func @transform_2(%arg0: i32) -> (i32, i32) {
    %c0_i32 = arith.constant 0 : i32
    %c0_i32_0 = arith.constant 0 : i32
    %c0_i32_1 = arith.constant 0 : i32
    return %c0_i32, %c0_i32_0 : i32, i32
  }
  func.func @transform_3(%arg0: i32) -> (i32, i32) {
    %c0_i32 = arith.constant 0 : i32
    %c0_i32_0 = arith.constant 0 : i32
    return %c0_i32, %arg0 : i32, i32
  }
}

module attributes {stable_mosaic.version = 11 : i64} {
  func.func @_iwt_chain_kernel(%arg0: i32, %arg1: memref<8x512xf32, #tpu.memory_space<vmem>>, %arg2: memref<4x8xf32, #tpu.memory_space<vmem>>, %arg3: memref<4x1xf32, #tpu.memory_space<vmem>>, %arg4: memref<4x1xf32, #tpu.memory_space<vmem>>, %arg5: memref<4x4xf32, #tpu.memory_space<vmem>>, %arg6: memref<4x1xf32, #tpu.memory_space<vmem>>, %arg7: memref<4x1xf32, #tpu.memory_space<vmem>>, %arg8: memref<4x512xf32, #tpu.memory_space<vmem>>, %arg9: memref<4x512xf32, #tpu.memory_space<vmem>>) attributes {dimension_semantics = [#tpu.dimension_semantics<parallel>], iteration_bounds = array<i64: 1>, scalar_prefetch = 0 : i64, scratch_operands = 0 : i64, tpu.core_type = #tpu.core_type<tc>, window_params = [{transform_indices = @transform_0, window_bounds = array<i64: 8, 512>}, {pipeline_mode = #tpu.pipeline_mode<synchronous>, transform_indices = @transform_1, window_bounds = array<i64: 4, 8>}, {pipeline_mode = #tpu.pipeline_mode<synchronous>, transform_indices = @transform_2, window_bounds = array<i64: 4, 1>}, {pipeline_mode = #tpu.pipeline_mode<synchronous>, transform_indices = @transform_3, window_bounds = array<i64: 4, 1>}, {pipeline_mode = #tpu.pipeline_mode<synchronous>, transform_indices = @transform_4, window_bounds = array<i64: 4, 4>}, {pipeline_mode = #tpu.pipeline_mode<synchronous>, transform_indices = @transform_5, window_bounds = array<i64: 4, 1>}, {pipeline_mode = #tpu.pipeline_mode<synchronous>, transform_indices = @transform_6, window_bounds = array<i64: 4, 1>}, {transform_indices = @transform_7, window_bounds = array<i64: 4, 512>}, {transform_indices = @transform_8, window_bounds = array<i64: 4, 512>}]} {
    %c0 = arith.constant 0 : index
    %c0_0 = arith.constant 0 : index
    %0 = vector.load %arg2[%c0, %c0_0] : memref<4x8xf32, #tpu.memory_space<vmem>>, vector<4x8xf32>
    %c0_1 = arith.constant 0 : index
    %c0_2 = arith.constant 0 : index
    %1 = vector.load %arg1[%c0_1, %c0_2] : memref<8x512xf32, #tpu.memory_space<vmem>>, vector<8x512xf32>
    %cst = arith.constant dense<0.000000e+00> : vector<4x512xf32>
    %2 = tpu.matmul %0, %1, %cst {dimension_numbers = #tpu.dot_dimension_numbers<[1], [0], [0], [1], [0, 0, 1, 1], [], []>} : vector<4x8xf32>, vector<8x512xf32>, vector<4x512xf32> -> vector<4x512xf32>
    %c0_3 = arith.constant 0 : index
    %c0_4 = arith.constant 0 : index
    %3 = vector.load %arg3[%c0_3, %c0_4] : memref<4x1xf32, #tpu.memory_space<vmem>>, vector<4x1xf32>
    %4 = vector.broadcast %3 : vector<4x1xf32> to vector<4x512xf32>
    %5 = arith.mulf %2, %4 : vector<4x512xf32>
    %c0_5 = arith.constant 0 : index
    %c0_6 = arith.constant 0 : index
    %6 = vector.load %arg4[%c0_5, %c0_6] : memref<4x1xf32, #tpu.memory_space<vmem>>, vector<4x1xf32>
    %7 = vector.broadcast %6 : vector<4x1xf32> to vector<4x512xf32>
    %8 = arith.addf %5, %7 : vector<4x512xf32>
    %cst_7 = arith.constant 0.000000e+00 : f32
    %9 = vector.broadcast %cst_7 : f32 to vector<4x512xf32>
    %10 = arith.maximumf %8, %9 : vector<4x512xf32>
    %c0_8 = arith.constant 0 : index
    %c0_9 = arith.constant 0 : index
    %11 = vector.load %arg5[%c0_8, %c0_9] : memref<4x4xf32, #tpu.memory_space<vmem>>, vector<4x4xf32>
    %cst_10 = arith.constant dense<0.000000e+00> : vector<4x512xf32>
    %12 = tpu.matmul %11, %10, %cst_10 {dimension_numbers = #tpu.dot_dimension_numbers<[1], [0], [0], [1], [0, 0, 1, 1], [], []>} : vector<4x4xf32>, vector<4x512xf32>, vector<4x512xf32> -> vector<4x512xf32>
    %c0_11 = arith.constant 0 : index
    %c0_12 = arith.constant 0 : index
    %13 = vector.load %arg6[%c0_11, %c0_12] : memref<4x1xf32, #tpu.memory_space<vmem>>, vector<4x1xf32>
    %14 = vector.broadcast %13 : vector<4x1xf32> to vector<4x512xf32>
    %15 = arith.mulf %12, %14 : vector<4x512xf32>
    %c0_13 = arith.constant 0 : index
    %c0_14 = arith.constant 0 : index
    %16 = vector.load %arg7[%c0_13, %c0_14] : memref<4x1xf32, #tpu.memory_space<vmem>>, vector<4x1xf32>
    %17 = vector.broadcast %16 : vector<4x1xf32> to vector<4x512xf32>
    %18 = arith.addf %15, %17 : vector<4x512xf32>
    %c0_15 = arith.constant 0 : index
    %c0_16 = arith.constant 0 : index
    %19 = vector.load %arg8[%c0_15, %c0_16] : memref<4x512xf32, #tpu.memory_space<vmem>>, vector<4x512xf32>
    %20 = arith.addf %18, %19 : vector<4x512xf32>
    %c0_17 = arith.constant 0 : index
    %c0_18 = arith.constant 0 : index
    %21 = vector.load %arg9[%c0_17, %c0_18] : memref<4x512xf32, #tpu.memory_space<vmem>>, vector<4x512xf32>
    tpu.vector_store %arg9[%c0_17, %c0_18], %20 {strides = array<i32>} : memref<4x512xf32, #tpu.memory_space<vmem>>, vector<4x512xf32>,
    return
  }
  func.func @transform_0(%arg0: i32) -> (i32, i32) {
    %c0_i32 = arith.constant 0 : i32
    %c0_i32_0 = arith.constant 0 : i32
    return %c0_i32, %arg0 : i32, i32
  }
  func.func @transform_1(%arg0: i32) -> (i32, i32) {
    %c0_i32 = arith.constant 0 : i32
    %c0_i32_0 = arith.constant 0 : i32
    %c0_i32_1 = arith.constant 0 : i32
    return %c0_i32, %c0_i32_0 : i32, i32
  }
  func.func @transform_2(%arg0: i32) -> (i32, i32) {
    %c0_i32 = arith.constant 0 : i32
    %c0_i32_0 = arith.constant 0 : i32
    %c0_i32_1 = arith.constant 0 : i32
    return %c0_i32, %c0_i32_0 : i32, i32
  }
  func.func @transform_3(%arg0: i32) -> (i32, i32) {
    %c0_i32 = arith.constant 0 : i32
    %c0_i32_0 = arith.constant 0 : i32
    %c0_i32_1 = arith.constant 0 : i32
    return %c0_i32, %c0_i32_0 : i32, i32
  }
  func.func @transform_4(%arg0: i32) -> (i32, i32) {
    %c0_i32 = arith.constant 0 : i32
    %c0_i32_0 = arith.constant 0 : i32
    %c0_i32_1 = arith.constant 0 : i32
    return %c0_i32, %c0_i32_0 : i32, i32
  }
  func.func @transform_5(%arg0: i32) -> (i32, i32) {
    %c0_i32 = arith.constant 0 : i32
    %c0_i32_0 = arith.constant 0 : i32
    %c0_i32_1 = arith.constant 0 : i32
    return %c0_i32, %c0_i32_0 : i32, i32
  }
  func.func @transform_6(%arg0: i32) -> (i32, i32) {
    %c0_i32 = arith.constant 0 : i32
    %c0_i32_0 = arith.constant 0 : i32
    %c0_i32_1 = arith.constant 0 : i32
    return %c0_i32, %c0_i32_0 : i32, i32
  }
  func.func @transform_7(%arg0: i32) -> (i32, i32) {
    %c0_i32 = arith.constant 0 : i32
    %c0_i32_0 = arith.constant 0 : i32
    return %c0_i32, %arg0 : i32, i32
  }
  func.func @transform_8(%arg0: i32) -> (i32, i32) {
    %c0_i32 = arith.constant 0 : i32
    %c0_i32_0 = arith.constant 0 : i32
    return %c0_i32, %arg0 : i32, i32
  }
}

module attributes {stable_mosaic.version = 11 : i64} {
  func.func @_iwt_chain_kernel(%arg0: i32, %arg1: memref<8x512xf32, #tpu.memory_space<vmem>>, %arg2: memref<4x8xf32, #tpu.memory_space<vmem>>, %arg3: memref<4x1xf32, #tpu.memory_space<vmem>>, %arg4: memref<4x1xf32, #tpu.memory_space<vmem>>, %arg5: memref<4x4xf32, #tpu.memory_space<vmem>>, %arg6: memref<4x1xf32, #tpu.memory_space<vmem>>, %arg7: memref<4x1xf32, #tpu.memory_space<vmem>>, %arg8: memref<4x512xf32, #tpu.memory_space<vmem>>) attributes {dimension_semantics = [#tpu.dimension_semantics<parallel>], iteration_bounds = array<i64: 1>, scalar_prefetch = 0 : i64, scratch_operands = 0 : i64, tpu.core_type = #tpu.core_type<tc>, window_params = [{transform_indices = @transform_0, window_bounds = array<i64: 8, 512>}, {pipeline_mode = #tpu.pipeline_mode<synchronous>, transform_indices = @transform_1, window_bounds = array<i64: 4, 8>}, {pipeline_mode = #tpu.pipeline_mode<synchronous>, transform_indices = @transform_2, window_bounds = array<i64: 4, 1>}, {pipeline_mode = #tpu.pipeline_mode<synchronous>, transform_indices = @transform_3, window_bounds = array<i64: 4, 1>}, {pipeline_mode = #tpu.pipeline_mode<synchronous>, transform_indices = @transform_4, window_bounds = array<i64: 4, 4>}, {pipeline_mode = #tpu.pipeline_mode<synchronous>, transform_indices = @transform_5, window_bounds = array<i64: 4, 1>}, {pipeline_mode = #tpu.pipeline_mode<synchronous>, transform_indices = @transform_6, window_bounds = array<i64: 4, 1>}, {transform_indices = @transform_7, window_bounds = array<i64: 4, 512>}]} {
    %c0 = arith.constant 0 : index
    %c0_0 = arith.constant 0 : index
    %0 = vector.load %arg2[%c0, %c0_0] : memref<4x8xf32, #tpu.memory_space<vmem>>, vector<4x8xf32>
    %c0_1 = arith.constant 0 : index
    %c0_2 = arith.constant 0 : index
    %1 = vector.load %arg1[%c0_1, %c0_2] : memref<8x512xf32, #tpu.memory_space<vmem>>, vector<8x512xf32>
    %cst = arith.constant dense<0.000000e+00> : vector<4x512xf32>
    %2 = tpu.matmul %0, %1, %cst {dimension_numbers = #tpu.dot_dimension_numbers<[1], [0], [0], [1], [0, 0, 1, 1], [], []>} : vector<4x8xf32>, vector<8x512xf32>, vector<4x512xf32> -> vector<4x512xf32>
    %c0_3 = arith.constant 0 : index
    %c0_4 = arith.constant 0 : index
    %3 = vector.load %arg3[%c0_3, %c0_4] : memref<4x1xf32, #tpu.memory_space<vmem>>, vector<4x1xf32>
    %4 = vector.broadcast %3 : vector<4x1xf32> to vector<4x512xf32>
    %5 = arith.mulf %2, %4 : vector<4x512xf32>
    %c0_5 = arith.constant 0 : index
    %c0_6 = arith.constant 0 : index
    %6 = vector.load %arg4[%c0_5, %c0_6] : memref<4x1xf32, #tpu.memory_space<vmem>>, vector<4x1xf32>
    %7 = vector.broadcast %6 : vector<4x1xf32> to vector<4x512xf32>
    %8 = arith.addf %5, %7 : vector<4x512xf32>
    %cst_7 = arith.constant 0.000000e+00 : f32
    %9 = vector.broadcast %cst_7 : f32 to vector<4x512xf32>
    %10 = arith.maximumf %8, %9 : vector<4x512xf32>
    %c0_8 = arith.constant 0 : index
    %c0_9 = arith.constant 0 : index
    %11 = vector.load %arg5[%c0_8, %c0_9] : memref<4x4xf32, #tpu.memory_space<vmem>>, vector<4x4xf32>
    %cst_10 = arith.constant dense<0.000000e+00> : vector<4x512xf32>
    %12 = tpu.matmul %11, %10, %cst_10 {dimension_numbers = #tpu.dot_dimension_numbers<[1], [0], [0], [1], [0, 0, 1, 1], [], []>} : vector<4x4xf32>, vector<4x512xf32>, vector<4x512xf32> -> vector<4x512xf32>
    %c0_11 = arith.constant 0 : index
    %c0_12 = arith.constant 0 : index
    %13 = vector.load %arg6[%c0_11, %c0_12] : memref<4x1xf32, #tpu.memory_space<vmem>>, vector<4x1xf32>
    %14 = vector.broadcast %13 : vector<4x1xf32> to vector<4x512xf32>
    %15 = arith.mulf %12, %14 : vector<4x512xf32>
    %c0_13 = arith.constant 0 : index
    %c0_14 = arith.constant 0 : index
    %16 = vector.load %arg7[%c0_13, %c0_14] : memref<4x1xf32, #tpu.memory_space<vmem>>, vector<4x1xf32>
    %17 = vector.broadcast %16 : vector<4x1xf32> to vector<4x512xf32>
    %18 = arith.addf %15, %17 : vector<4x512xf32>
    %c0_15 = arith.constant 0 : index
    %c0_16 = arith.constant 0 : index
    %19 = vector.load %arg8[%c0_15, %c0_16] : memref<4x512xf32, #tpu.memory_space<vmem>>, vector<4x512xf32>
    tpu.vector_store %arg8[%c0_15, %c0_16], %18 {strides = array<i32>} : memref<4x512xf32, #tpu.memory_space<vmem>>, vector<4x512xf32>,
    return
  }
  func.func @transform_0(%arg0: i32) -> (i32, i32) {
    %c0_i32 = arith.constant 0 : i32
    %c0_i32_0 = arith.constant 0 : i32
    return %c0_i32, %arg0 : i32, i32
  }
  func.func @transform_1(%arg0: i32) -> (i32, i32) {
    %c0_i32 = arith.constant 0 : i32
    %c0_i32_0 = arith.constant 0 : i32
    %c0_i32_1 = arith.constant 0 : i32
    return %c0_i32, %c0_i32_0 : i32, i32
  }
  func.func @transform_2(%arg0: i32) -> (i32, i32) {
    %c0_i32 = arith.constant 0 : i32
    %c0_i32_0 = arith.constant 0 : i32
    %c0_i32_1 = arith.constant 0 : i32
    return %c0_i32, %c0_i32_0 : i32, i32
  }
  func.func @transform_3(%arg0: i32) -> (i32, i32) {
    %c0_i32 = arith.constant 0 : i32
    %c0_i32_0 = arith.constant 0 : i32
    %c0_i32_1 = arith.constant 0 : i32
    return %c0_i32, %c0_i32_0 : i32, i32
  }
  func.func @transform_4(%arg0: i32) -> (i32, i32) {
    %c0_i32 = arith.constant 0 : i32
    %c0_i32_0 = arith.constant 0 : i32
    %c0_i32_1 = arith.constant 0 : i32
    return %c0_i32, %c0_i32_0 : i32, i32
  }
  func.func @transform_5(%arg0: i32) -> (i32, i32) {
    %c0_i32 = arith.constant 0 : i32
    %c0_i32_0 = arith.constant 0 : i32
    %c0_i32_1 = arith.constant 0 : i32
    return %c0_i32, %c0_i32_0 : i32, i32
  }
  func.func @transform_6(%arg0: i32) -> (i32, i32) {
    %c0_i32 = arith.constant 0 : i32
    %c0_i32_0 = arith.constant 0 : i32
    %c0_i32_1 = arith.constant 0 : i32
    return %c0_i32, %c0_i32_0 : i32, i32
  }
  func.func @transform_7(%arg0: i32) -> (i32, i32) {
    %c0_i32 = arith.constant 0 : i32
    %c0_i32_0 = arith.constant 0 : i32
    return %c0_i32, %arg0 : i32, i32
  }
}

</mosaic_0001>

<bundles_post_ra>
// kernel: squeeze.14
= control target key start
LH: loop header
LB: loop body
LE: loop exit
PB: predicated region body
PF: predicated region fallthrough
CT: control target
= control target key end

     0   :  { %vm4_vm0 = vcmask 1047556   ;;  %s180_s16 = smov 56   ;;  %s181_s19 = smov 40   ;;  %vm6_vm1 = vcmask 64512   ;;  %vm22_vm2 = vcmask 523712   ;;  %vm38_vm3 = vcmask 458112   ;;  %s265_s0 = inlined_call_operand.vmem [shape: f32[1,2,4,8,8], index: 0, kind: input, shape index: {}]   ;;  %s266_s1 = inlined_call_operand.vmem [shape: f32[2,4,64], index: 1, kind: output, shape index: {}]  }
   0x1   :  { %v156_v0 = vld [vmem:[%s265_s0 + $0x7] ss:$8 sm:$0xf]   ;;  %v160_v2 = vld [vmem:[%s265_s0 + $0x5] ss:$8 sm:$0xf]  }
   0x2   :  { %v157_v1 = vld [vmem:[%s265_s0 + $0x7] ss:$8 sm:$0xf0]   ;;  %v161_v4 = vld [vmem:[%s265_s0 + $0x5] ss:$8 sm:$0xf0]  }
   0x3   :  { %v19_v3 = vsel %vm4_vm0, %v157_v1, %v156_v0  ;;  %v158_v5 = vld [vmem:[%s265_s0 + $0x6] ss:$8 sm:$0xf]   ;;  %v51_v6 = vsel %vm4_vm0, %v161_v4, %v160_v2  ;;  %v162_v9 = vld [vmem:[%s265_s0 + $0x4] ss:$8 sm:$0xf]  }
   0x4   :  { %20 = vrot.lane.b32.xlu0 %v19_v3, %s180_s16  ;;  %v159_v7 = vld [vmem:[%s265_s0 + $0x6] ss:$8 sm:$0xf0]   ;;  %52 = vrot.lane.b32.xlu1 %v51_v6, %s181_s19  ;;  %v163_v10 = vld [vmem:[%s265_s0 + $0x4] ss:$8 sm:$0xf0]  }
   0x5   :  { %v35_v8 = vsel %vm4_vm0, %v159_v7, %v158_v5  ;;  %v67_v11 = vsel %vm4_vm0, %v163_v10, %v162_v9  ;;  %v164_v12 = vld [vmem:[%s265_s0 + $0x3] ss:$8 sm:$0xf]   ;;  %v166_v14 = vld [vmem:[%s265_s0 + $0x2] ss:$8 sm:$0xf]  }
   0x6   :  { %v165_v13 = vld [vmem:[%s265_s0 + $0x3] ss:$8 sm:$0xf0]   ;;  %s182_s30 = smov 48   ;;  %s183_s4 = smov 32   ;;  %vm54_vm4 = vcmask 392512  }
   0x7   :  { %v167_v15 = vld [vmem:[%s265_s0 + $0x2] ss:$8 sm:$0xf0]   ;;  %v83_v16 = vsel %vm4_vm0, %v165_v13, %v164_v12  ;;  %v168_v17 = vld [vmem:[%s265_s0 + $0x1] ss:$8 sm:$0xf]  }
   0x8   :  { %36 = vrot.lane.b32.xlu0 %v35_v8, %s182_s30  ;;  %68 = vrot.lane.b32.xlu1 %v67_v11, %s183_s4  ;;  %v169_v18 = vld [vmem:[%s265_s0 + $0x1] ss:$8 sm:$0xf0]   ;;  %v99_v19 = vsel %vm4_vm0, %v167_v15, %v166_v14  ;;  %v2_v20 = vld [vmem:[%s265_s0] ss:$8 sm:$0xf]  }
   0x9   :  { %v3_v21 = vld [vmem:[%s265_s0] ss:$8 sm:$0xf0]   ;;  %s184_s0 = smov 24   ;;  %s185_s13 = smov 16   ;;  %v115_v23 = vsel %vm4_vm0, %v169_v18, %v168_v17  ;;  %vm70_vm5 = vcmask 326912  }
   0xa   :  { %v5_v22 = vsel %vm4_vm0, %v3_v21, %v2_v20  ;;  %s186_s14 = smov 8   ;;  %vm86_vm6 = vcmask 261312   ;;  %vm102_vm7 = vcmask 195712   ;;  %vm118_vm8 = vcmask 130112  }
   0xb   :  { %7 = vst.msk [vmem:[#allocation0] sm:$0x3] %vm6_vm1, %v5_v22   ;;  %9 = vst.msk [vmem:[#allocation0 + $0x6] sm:$0xc] %vm6_vm1, %v5_v22  }
   0xc   :  { %84 = vrot.lane.b32.xlu0 %v83_v16, %s184_s0  ;;  %11 = vst.msk [vmem:[#allocation0 + $0xc] sm:$0x30] %vm6_vm1, %v5_v22   ;;  %13 = vst.msk [vmem:[#allocation0 + $0x12] sm:$0xc0] %vm6_vm1, %v5_v22   ;;  %100 = vrot.lane.b32.xlu1 %v99_v19, %s185_s13 }
  0x10   :  { %116 = vrot.lane.b32.xlu0 %v115_v23, %s186_s14 }
  0x76   :  { %v21_v24 = vpop.permute.xlu0 %20   ;;  %v53_v25 = vpop.permute.xlu1 %52  }
  0x77   :  { %23 = vst.msk [vmem:[#allocation0] sm:$0x3] %vm22_vm2, %v21_v24   ;;  %25 = vst.msk [vmem:[#allocation0 + $0x6] sm:$0xc] %vm22_vm2, %v21_v24  }
  0x78   :  { %27 = vst.msk [vmem:[#allocation0 + $0xc] sm:$0x30] %vm22_vm2, %v21_v24   ;;  %29 = vst.msk [vmem:[#allocation0 + $0x12] sm:$0xc0] %vm22_vm2, %v21_v24  }
  0x7a   :  { %v37_v26 = vpop.permute.xlu0 %36   ;;  %v69_v27 = vpop.permute.xlu1 %68  }
  0x7b   :  { %39 = vst.msk [vmem:[#allocation0] sm:$0x3] %vm38_vm3, %v37_v26   ;;  %41 = vst.msk [vmem:[#allocation0 + $0x6] sm:$0xc] %vm38_vm3, %v37_v26  }
  0x7c   :  { %43 = vst.msk [vmem:[#allocation0 + $0xc] sm:$0x30] %vm38_vm3, %v37_v26   ;;  %45 = vst.msk [vmem:[#allocation0 + $0x12] sm:$0xc0] %vm38_vm3, %v37_v26  }
  0x7d   :  { %55 = vst.msk [vmem:[#allocation0] sm:$0x3] %vm54_vm4, %v53_v25   ;;  %57 = vst.msk [vmem:[#allocation0 + $0x6] sm:$0xc] %vm54_vm4, %v53_v25  }
  0x7e   :  { %59 = vst.msk [vmem:[#allocation0 + $0xc] sm:$0x30] %vm54_vm4, %v53_v25   ;;  %61 = vst.msk [vmem:[#allocation0 + $0x12] sm:$0xc0] %vm54_vm4, %v53_v25   ;;  %v85_v28 = vpop.permute.xlu0 %84   ;;  %v101_v29 = vpop.permute.xlu1 %100  }
  0x7f   :  { %71 = vst.msk [vmem:[#allocation0] sm:$0x3] %vm70_vm5, %v69_v27   ;;  %73 = vst.msk [vmem:[#allocation0 + $0x6] sm:$0xc] %vm70_vm5, %v69_v27  }
  0x80   :  { %75 = vst.msk [vmem:[#allocation0 + $0xc] sm:$0x30] %vm70_vm5, %v69_v27   ;;  %77 = vst.msk [vmem:[#allocation0 + $0x12] sm:$0xc0] %vm70_vm5, %v69_v27  }
  0x81   :  { %87 = vst.msk [vmem:[#allocation0] sm:$0x3] %vm86_vm6, %v85_v28   ;;  %89 = vst.msk [vmem:[#allocation0 + $0x6] sm:$0xc] %vm86_vm6, %v85_v28  }
  0x82   :  { %91 = vst.msk [vmem:[#allocation0 + $0xc] sm:$0x30] %vm86_vm6, %v85_v28   ;;  %93 = vst.msk [vmem:[#allocation0 + $0x12] sm:$0xc0] %vm86_vm6, %v85_v28   ;;  %v117_v30 = vpop.permute.xlu0 %116  }
  0x83   :  { %103 = vst.msk [vmem:[#allocation0] sm:$0x3] %vm102_vm7, %v101_v29   ;;  %105 = vst.msk [vmem:[#allocation0 + $0x6] sm:$0xc] %vm102_vm7, %v101_v29  }
  0x84   :  { %107 = vst.msk [vmem:[#allocation0 + $0xc] sm:$0x30] %vm102_vm7, %v101_v29   ;;  %109 = vst.msk [vmem:[#allocation0 + $0x12] sm:$0xc0] %vm102_vm7, %v101_v29  }
  0x85   :  { %119 = vst.msk [vmem:[#allocation0] sm:$0x3] %vm118_vm8, %v117_v30   ;;  %121 = vst.msk [vmem:[#allocation0 + $0x6] sm:$0xc] %vm118_vm8, %v117_v30  }
  0x86   :  { %123 = vst.msk [vmem:[#allocation0 + $0xc] sm:$0x30] %vm118_vm8, %v117_v30   ;;  %125 = vst.msk [vmem:[#allocation0 + $0x12] sm:$0xc0] %vm118_vm8, %v117_v30  }
  0x8c   :  { %v130_v31 = vld [vmem:[#allocation0] sm:$0x3]  ;;  %v135_v32 = vld [vmem:[#allocation0 + $0x8] sm:$0x3] }
  0x8d   :  { %v141_v33 = vld [vmem:[#allocation0 + $0x10] sm:$0x3]  ;;  %133 = vst [vmem:[%s266_s1] sm:$0x3] %v130_v31  ;;  %170 = vst [vmem:[%s266_s1 + $0x2] sm:$0x3] %v135_v32 }
  0x8e   :  { %171 = vst [vmem:[%s266_s1 + $0x4] sm:$0x3] %v141_v33  ;;  %v148_v34 = vld [vmem:[#allocation0 + $0x18] sm:$0x3] }
  0x8f   :  { %172 = vst [vmem:[%s266_s1 + $0x6] sm:$0x3] %v148_v34 }

// kernel: wtab1_forward.22
= control target key start
LH: loop header
LB: loop body
LE: loop exit
PB: predicated region body
PF: predicated region fallthrough
CT: control target
= control target key end

     0   :  { %vm24_vm0 = vcmask 1043456   ;;  %vm20_vm1 = vcmask 31744   ;;  %v302_v0 = vmov 0.0   ;;  %vm303_vm2 = vmmov 0   ;;  %s358_s0 = inlined_call_operand.vmem [shape: f32[3,4,128], index: 0, kind: input, shape index: {}]   ;;  %s359_s1 = inlined_call_operand.vmem [shape: f32[3,4,4], index: 1, kind: input, shape index: {}]   ;;  %s360_s2 = inlined_call_operand.vmem [shape: f32[4,1], index: 2, kind: input, shape index: {}]   ;;  %s361_s3 = inlined_call_operand.vmem [shape: f32[4,128], index: 3, kind: output, shape index: {}]  }
   0x1   :  { %283 = vmatprep.subr.mxu0 %v302_v0  ;;  %v268_v1 = vld [vmem:[%s358_s0 + $0x4] sm:$0xf]  ;;  %285 = vmatprep.mubr.msk.f32.mxu0 %vm303_vm2, %v302_v0  ;;  %v15_v3 = vld [vmem:[%s358_s0] sm:$0xf]  ;;  %v274_v5 = vld [vmem:[%s358_s0 + $0x8] sm:$0xf] }
   0x2   :  { %v267_v2 = vld [vmem:[%s359_s1 + $0x4] sm:$0xf]  ;;  %284 = vmatpush3.msk.msra.mxu0 %vm24_vm0, %v268_v1  ;;  %288 = vmatprep.subr.mxu1 %v302_v0  ;;  %v14_v4 = vld [vmem:[%s359_s1] sm:$0xf]  ;;  %v273_v6 = vld [vmem:[%s359_s1 + $0x8] sm:$0xf] }
   0x3   :  { %286 = vmatmul.mubr.msk.f32.vlgmr.msra.gmra.mxu0 %vm20_vm1, %v267_v2  ;;  %289 = vmatpush3.msk.msra.mxu1 %vm24_vm0, %v15_v3  ;;  %v255_v7 = vld [vmem:[%s360_s2] sm:$0xf]  ;;  %v304_v8 = vmov 0  }
   0x4   :  { %290 = vmatprep.mubr.msk.f32.mxu1 %vm303_vm2, %v302_v0  ;;  %293 = vmatprep.subr.mxu0 %v302_v0 }
   0x5   :  { %291 = vmatmul.mubr.msk.f32.vlgmr.msra.gmra.mxu1 %vm20_vm1, %v14_v4  ;;  %294 = vmatpush3.msk.msra.mxu0 %vm24_vm0, %v274_v5 }
   0x6   :  { %295 = vmatprep.mubr.msk.f32.mxu0 %vm303_vm2, %v302_v0  ;;  %301 = vset.pattern.permute.xlu0 %v304_v8 }
   0x7   :  { %296 = vmatmul.mubr.msk.f32.vlgmr.msra.gmra.mxu0 %vm20_vm1, %v273_v6  ;;  %258 = vperm.xlu0 %301, %v255_v7  }
  0x82   :  { %v259_v13 = vpop.permute.xlu0 %258 }
  0xc3   :  { %v94_v9 = vpop.f32.mrf.mxu0 }
  0xc5   :  { %v170_v10 = vpop.f32.mrf.mxu1  ;;  %v287_v11 = vpop.f32.mrf.mxu0 }
  0xc6   :  { %v171_v12 = vadd.f32 %v170_v10, %v94_v9 }
  0xc7   :  { %v292_v14 = vpop.f32.mrf.mxu1  ;;  %v250_v15 = vpop.f32.mrf.mxu0 }
  0xc8   :  { %v254_v16 = vadd.f32 %v250_v15, %v171_v12 }
  0xc9   :  { %v297_v17 = vpop.f32.mrf.mxu0 }
  0xca   :  { %v261_v18 = vadd.f32 %v259_v13, %v254_v16 }
  0xcc   :  { %262 = vst [vmem:[%s361_s3] sm:$0xf] %v261_v18 }

// kernel: wtab1_forward.25
= control target key start
LH: loop header
LB: loop body
LE: loop exit
PB: predicated region body
PF: predicated region fallthrough
CT: control target
= control target key end

     0   :  { %s1690_s27 = smov 1   ;;  %s1691_s19 = smov 127   ;;  %vm910_vm0 = vcmask 1040384   ;;  %vm397_vm1 = vcmask 57344   ;;  %vm395_vm2 = vcmask 64513   ;;  %vm1120_vm3 = vcmask 64514   ;;  %s3359_s0 = inlined_call_operand.vmem [shape: f32[8,10,10], index: 0, kind: input, shape index: {}]   ;;  %s3360_s1 = inlined_call_operand.vmem [shape: f32[8,10,10], index: 1, kind: input, shape index: {}]   ;;  %s3361_s2 = inlined_call_operand.vmem [shape: f32[4,8,8,8], index: 2, kind: output, shape index: {}]  }
   0x1   :  { %v1711_v0 = vld [vmem:[%s3359_s0 + $0x10] sm:$0xff]  ;;  %v1721_v2 = vld [vmem:[%s3359_s0] sm:$0xff]  ;;  %v1735_v8 = vld [vmem:[%s3359_s0 + $0x18] sm:$0x3]  ;;  %s1692_s20 = smov 126   ;;  %vm1122_vm4 = vcmask 58368  }
   0x2   :  { %3454 = vst [vmem:[#allocation2_spill] sm:$0xff] %v1711_v0  ;;  %v1716_v1 = vld [vmem:[%s3360_s1 + $0x10] sm:$0xff]  ;;  %3456 = vst [vmem:[#allocation4_spill] sm:$0xff] %v1721_v2  ;;  %v93_v3 = vmul.f32 -0.10825317, %v1711_v0  ;;  %v1728_v5 = vld [vmem:[%s3360_s1] sm:$0xff] }
   0x3   :  { %3455 = vst [vmem:[#allocation3_spill] sm:$0xff] %v1716_v1  ;;  %v109_v4 = vmul.f32 -0.26674682, %v1716_v1  ;;  %3457 = vst [vmem:[#allocation5_spill] sm:$0xff] %v1728_v5  ;;  %v91_v6 = vmul.f32 -0.10825317, %v1721_v2 }
   0x4   :  { %v107_v7 = vmul.f32 -0.26674682, %v1728_v5  ;;  %3458 = vst [vmem:[#allocation6_spill] sm:$0xff] %v1735_v8  ;;  %v1740_v9 = vld [vmem:[%s3359_s0 + $0x20] sm:$0xff]  ;;  %v1747_v11 = vld [vmem:[%s3360_s1 + $0x18] sm:$0x3] }
   0x5   :  { %3459 = vst [vmem:[#allocation7_spill] sm:$0xff] %v1740_v9  ;;  %v1742_v10 = vadd.f32 %v109_v4, %v93_v3  ;;  %3460 = vst [vmem:[#allocation8_spill] sm:$0xff] %v1747_v11  ;;  %v94_v12 = vmul.f32 -0.10825317, %v1735_v8  ;;  %v1753_v13 = vld [vmem:[%s3359_s0 + $0x8] sm:$0x3] }
   0x6   :  { %3461 = vst [vmem:[#allocation9_spill] sm:$0xff] %v1753_v13  ;;  %v1755_v14 = vadd.f32 %v107_v7, %v91_v6  ;;  %v110_v15 = vmul.f32 -0.26674682, %v1747_v11  ;;  %v1761_v16 = vld [vmem:[%s3360_s1 + $0x8] sm:$0x3]  ;;  %v1775_v20 = vld [vmem:[%s3360_s1 + $0x20] sm:$0xff] }
   0x7   :  { %3462 = vst [vmem:[#allocation10_spill] sm:$0xff] %v1761_v16  ;;  %v92_v17 = vmul.f32 -0.10825317, %v1753_v13  ;;  %159 = vrot.lane.b32.xlu1 %v1742_v10, %s1690_s27  ;;  %v108_v18 = vmul.f32 -0.26674682, %v1761_v16  ;;  %3464 = vst [vmem:[#allocation12_spill] sm:$0xff] %v1775_v20 }
   0x8   :  { %v1770_v19 = vld [vmem:[%s3359_s0 + $0x28] sm:$0x3]  ;;  %155 = vrot.lane.b32.xlu0 %v1755_v14, %s1690_s27  ;;  %v126_v21 = vadd.f32 %v110_v15, %v94_v12  ;;  %v1788_v24 = vld [vmem:[%s3359_s0 + $0x30] sm:$0xff]  ;;  %v95_v27 = vmul.f32 -0.10825317, %v1740_v9  ;;  %v1829_v40 = vld [vmem:[%s3359_s0 + $0x40] sm:$0xff] }
   0x9   :  { %3463 = vst [vmem:[#allocation11_spill] sm:$0xff] %v1770_v19  ;;  %v1782_v22 = vld [vmem:[%s3360_s1 + $0x28] sm:$0x3]  ;;  %v96_v23 = vmul.f32 -0.10825317, %v1770_v19  ;;  %v124_v25 = vadd.f32 %v108_v18, %v92_v17  ;;  %v1806_v31 = vld [vmem:[%s3360_s1 + $0x30] sm:$0xff] }
   0xa   :  { %3465 = vst [vmem:[#allocation13_spill] sm:$0xff] %v1782_v22  ;;  %v112_v26 = vmul.f32 -0.26674682, %v1782_v22  ;;  %v111_v28 = vmul.f32 -0.26674682, %v1775_v20  ;;  %v1834_v41 = vld [vmem:[%s3360_s1 + $0x40] sm:$0xff] }
   0xb   :  { %v1796_v29 = vld [vmem:[%s3359_s0 + $0x38] sm:$0x3]  ;;  %161 = vrot.lane.b32.xlu1 %v126_v21, %s1690_s27  ;;  %v1814_v35 = vld [vmem:[%s3359_s0 + $0x48] sm:$0x3]  ;;  %v97_v37 = vmul.f32 -0.10825317, %v1788_v24 }
   0xc   :  { %3466 = vst [vmem:[#allocation14_spill] sm:$0xff] %v1796_v29  ;;  %v1801_v30 = vld [vmem:[%s3360_s1 + $0x38] sm:$0x3]  ;;  %v128_v32 = vadd.f32 %v112_v26, %v96_v23  ;;  %v98_v33 = vmul.f32 -0.10825317, %v1796_v29  ;;  %157 = vrot.lane.b32.xlu0 %v124_v25, %s1690_s27  ;;  %v1817_v36 = vadd.f32 %v111_v28, %v95_v27  ;;  %v1858_v50 = vld [vmem:[%s3359_s0 + $0x50] sm:$0xff] }
   0xd   :  { %3467 = vst [vmem:[#allocation15_spill] sm:$0xff] %v1801_v30  ;;  %v114_v34 = vmul.f32 -0.26674682, %v1801_v30  ;;  %v113_v38 = vmul.f32 -0.26674682, %v1806_v31  ;;  %v1863_v51 = vld [vmem:[%s3360_s1 + $0x50] sm:$0xff] }
   0xe   :  { %v1824_v39 = vld [vmem:[%s3360_s1 + $0x48] sm:$0x3]  ;;  %v100_v43 = vmul.f32 -0.10825317, %v1814_v35  ;;  %v99_v45 = vmul.f32 -0.10825317, %v1829_v40 }
   0xf   :  { %165 = vrot.lane.b32.xlu1 %v128_v32, %s1690_s27  ;;  %v130_v42 = vadd.f32 %v114_v34, %v98_v33  ;;  %v116_v44 = vmul.f32 -0.26674682, %v1824_v39  ;;  %v1842_v46 = vadd.f32 %v113_v38, %v97_v37  ;;  %v115_v47 = vmul.f32 -0.26674682, %v1834_v41  ;;  %v1848_v48 = vld [vmem:[%s3359_s0 + $0x58] sm:$0x3] }
  0x10   :  { %163 = vrot.lane.b32.xlu0 %v1817_v36, %s1690_s27  ;;  %v1853_v49 = vld [vmem:[%s3360_s1 + $0x58] sm:$0x3]  ;;  %v102_v53 = vmul.f32 -0.10825317, %v1848_v48  ;;  %v1871_v55 = vld [vmem:[%s3359_s0 + $0x68] sm:$0x3] }
  0x11   :  { %v132_v52 = vadd.f32 %v116_v44, %v100_v43  ;;  %v118_v54 = vmul.f32 -0.26674682, %v1853_v49  ;;  %v1875_v56 = vadd.f32 %v115_v47, %v99_v45  ;;  %v101_v57 = vmul.f32 -0.10825317, %v1858_v50  ;;  %v1882_v59 = vld [vmem:[%s3360_s1 + $0x68] sm:$0x3] }
  0x12   :  { %v117_v58 = vmul.f32 -0.26674682, %v1863_v51  ;;  %v1887_v60 = vld [vmem:[%s3359_s0 + $0x60] sm:$0xff]  ;;  %v104_v62 = vmul.f32 -0.10825317, %v1871_v55  ;;  %v1916_v17 = vld [vmem:[%s3359_s0 + $0x70] sm:$0xff] }
  0x13   :  { %169 = vrot.lane.b32.xlu1 %v130_v42, %s1690_s27  ;;  %v1892_v61 = vld [vmem:[%s3360_s1 + $0x60] sm:$0xff]  ;;  %v134_v63 = vadd.f32 %v118_v54, %v102_v53  ;;  %v120_v3 = vmul.f32 -0.26674682, %v1882_v59  ;;  %v1900_v4 = vld [vmem:[%s3359_s0 + $0x78] sm:$0x3]  ;;  %v1921_v18 = vld [vmem:[%s3360_s1 + $0x70] sm:$0xff] }
  0x14   :  { %167 = vrot.lane.b32.xlu0 %v1842_v46, %s1690_s27  ;;  %v1905_v6 = vld [vmem:[%s3360_s1 + $0x78] sm:$0x3]  ;;  %v1909_v7 = vadd.f32 %v117_v58, %v101_v57  ;;  %v103_v12 = vmul.f32 -0.10825317, %v1887_v60  ;;  %v119_v15 = vmul.f32 -0.26674682, %v1892_v61 }
  0x15   :  { %v106_v21 = vmul.f32 -0.10825317, %v1900_v4  ;;  %v122_v23 = vmul.f32 -0.26674682, %v1905_v6  ;;  %v136_v25 = vadd.f32 %v120_v3, %v104_v62  ;;  %v105_v26 = vmul.f32 -0.10825317, %v1916_v17 }
  0x16   :  { %v252_v27 = vmul.f32 0.016746825, %v1711_v0  ;;  %v260_v28 = vmul.f32 0.35825318, %v1716_v1  ;;  %v1931_v32 = vadd.f32 %v119_v15, %v103_v12  ;;  %v121_v33 = vmul.f32 -0.26674682, %v1921_v18 }
  0x17   :  { %173 = vrot.lane.b32.xlu1 %v132_v52, %s1690_s27  ;;  %v251_v34 = vmul.f32 0.016746825, %v1721_v2  ;;  %v259_v37 = vmul.f32 0.35825318, %v1728_v5  ;;  %v138_v38 = vadd.f32 %v122_v23, %v106_v21  ;;  %v254_v43 = vmul.f32 0.016746825, %v1788_v24 }
  0x18   :  { %171 = vrot.lane.b32.xlu0 %v1875_v56, %s1690_s27  ;;  %v268_v42 = vadd.f32 %v260_v28, %v252_v27  ;;  %v262_v44 = vmul.f32 0.35825318, %v1806_v31  ;;  %v1941_v45 = vadd.f32 %v121_v33, %v105_v26  ;;  %v253_v52 = vmul.f32 0.016746825, %v1740_v9 }
  0x19   :  { %v267_v47 = vadd.f32 %v259_v37, %v251_v34  ;;  %v261_v53 = vmul.f32 0.35825318, %v1775_v20  ;;  %v256_v58 = vmul.f32 0.016746825, %v1858_v50  ;;  %v264_v62 = vmul.f32 0.35825318, %v1863_v51 }
  0x1a   :  { %3468 = vst [vmem:[#allocation16_spill] sm:$0xff] %v1941_v45  ;;  %v284_v54 = vrot.slane %v268_v42, 7  ;;  %v270_v57 = vadd.f32 %v262_v44, %v254_v43  ;;  %v255_v12 = vmul.f32 0.016746825, %v1829_v40  ;;  %v263_v15 = vmul.f32 0.35825318, %v1834_v41 }
  0x1b   :  { %177 = vrot.lane.b32.xlu1 %v134_v63, %s1690_s27  ;;  %v283_v63 = vrot.slane %v267_v47, 7  ;;  %v269_v3 = vadd.f32 %v261_v53, %v253_v52  ;;  %v272_v23 = vadd.f32 %v264_v62, %v256_v58  ;;  %v266_v26 = vmul.f32 0.35825318, %v1921_v18 }
  0x1c   :  { %175 = vrot.lane.b32.xlu0 %v1909_v7, %s1690_s27  ;;  %v286_v21 = vrot.slane %v270_v57, 7  ;;  %v271_v28 = vadd.f32 %v263_v15, %v255_v12  ;;  %v257_v33 = vmul.f32 0.016746825, %v1887_v60  ;;  %v265_v34 = vmul.f32 0.35825318, %v1892_v61 }
  0x1d   :  { %v285_v27 = vrot.slane %v269_v3, 7  ;;  %v288_v37 = vrot.slane %v272_v23, 7  ;;  %v462_v47 = vmul.f32 0.1875, %v1753_v13  ;;  %v478_v52 = vmul.f32 0.46201906, %v1761_v16 }
  0x1e   :  { %v287_v42 = vrot.slane %v271_v28, 7  ;;  %v273_v43 = vadd.f32 %v265_v34, %v257_v33  ;;  %v477_v57 = vmul.f32 0.46201906, %v1728_v5  ;;  %v464_v62 = vmul.f32 0.1875, %v1735_v8 }
  0x1f   :  { %181 = vrot.lane.b32.xlu1 %v136_v25, %s1690_s27  ;;  %v258_v25 = vmul.f32 0.016746825, %v1916_v17  ;;  %v1967_v58 = vadd.f32 %v478_v52, %v462_v47  ;;  %v463_v12 = vmul.f32 0.1875, %v1711_v0  ;;  %v479_v15 = vmul.f32 0.46201906, %v1716_v1 }
  0x20   :  { %179 = vrot.lane.b32.xlu0 %v1931_v32, %s1690_s27  ;;  %v289_v53 = vrot.slane %v273_v43, 7  ;;  %v466_v23 = vmul.f32 0.1875, %v1770_v19  ;;  %v481_v28 = vmul.f32 0.46201906, %v1775_v20  ;;  %v468_v34 = vmul.f32 0.1875, %v1796_v29 }
  0x21   :  { %3469 = vst [vmem:[#allocation17_spill] sm:$0xff] %v1967_v58  ;;  %v483_v43 = vmul.f32 0.46201906, %v1806_v31  ;;  %v470_v47 = vmul.f32 0.1875, %v1814_v35  ;;  %v486_v52 = vmul.f32 0.46201906, %v1824_v39 }
  0x23   :  { %185 = vrot.lane.b32.xlu1 %v138_v38, %s1690_s27  ;;  %v274_v38 = vadd.f32 %v266_v26, %v258_v25  ;;  %v482_v25 = vmul.f32 0.46201906, %v1782_v22  ;;  %v1984_v26 = vadd.f32 %v479_v15, %v463_v12  ;;  %v488_v12 = vmul.f32 0.46201906, %v1853_v49 }
  0x24   :  { %183 = vrot.lane.b32.xlu0 %v1941_v45, %s1690_s27 }
  0x25   :  { %v290_v44 = vrot.slane %v274_v38, 7  ;;  %3472 = vst [vmem:[#allocation20_spill] sm:$0xff] %v1984_v26  ;;  %v1990_v33 = vadd.f32 %v482_v25, %v466_v23  ;;  %v471_v23 = vmul.f32 0.1875, %v1858_v50  ;;  %v487_v25 = vmul.f32 0.46201906, %v1863_v51 }
  0x27   :  { %293 = vrot.lane.b32.xlu1 %v284_v54, %s1690_s27  ;;  %v461_v54 = vmul.f32 0.1875, %v1721_v2  ;;  %3473 = vst [vmem:[#allocation21_spill] sm:$0xff] %v1990_v33 }
  0x28   :  { %291 = vrot.lane.b32.xlu0 %v283_v63, %s1690_s27  ;;  %v480_v63 = vmul.f32 0.46201906, %v1747_v11 }
  0x29   :  { %v1972_v3 = vadd.f32 %v477_v57, %v461_v54  ;;  %v469_v54 = vmul.f32 0.1875, %v1829_v40  ;;  %v485_v57 = vmul.f32 0.46201906, %v1834_v41 }
  0x2b   :  { %297 = vrot.lane.b32.xlu1 %v286_v21, %s1690_s27  ;;  %3470 = vst [vmem:[#allocation18_spill] sm:$0xff] %v1972_v3  ;;  %v1978_v21 = vadd.f32 %v480_v63, %v464_v62  ;;  %v2014_v62 = vadd.f32 %v486_v52, %v470_v47  ;;  %v472_v63 = vmul.f32 0.1875, %v1848_v48  ;;  %v2020_v15 = vadd.f32 %v485_v57, %v469_v54 }
  0x2c   :  { %295 = vrot.lane.b32.xlu0 %v285_v27, %s1690_s27  ;;  %v465_v27 = vmul.f32 0.1875, %v1740_v9  ;;  %v492_v52 = vmul.f32 0.46201906, %v1905_v6  ;;  %v476_v54 = vmul.f32 0.1875, %v1900_v4  ;;  %v475_v57 = vmul.f32 0.1875, %v1916_v17 }
  0x2d   :  { %3471 = vst [vmem:[#allocation19_spill] sm:$0xff] %v1978_v21  ;;  %3477 = vst [vmem:[#allocation25_spill] sm:$0xff] %v2014_v62 }
  0x2e   :  { %v1996_v38 = vadd.f32 %v481_v28, %v465_v27  ;;  %3478 = vst [vmem:[#allocation26_spill] sm:$0xff] %v2020_v15  ;;  %v474_v27 = vmul.f32 0.1875, %v1871_v55  ;;  %v490_v28 = vmul.f32 0.46201906, %v1882_v59 }
  0x2f   :  { %301 = vrot.lane.b32.xlu1 %v288_v37, %s1690_s27  ;;  %v484_v37 = vmul.f32 0.46201906, %v1801_v30 }
  0x30   :  { %299 = vrot.lane.b32.xlu0 %v287_v42, %s1690_s27  ;;  %3474 = vst [vmem:[#allocation22_spill] sm:$0xff] %v1996_v38  ;;  %v467_v42 = vmul.f32 0.1875, %v1788_v24  ;;  %v2036_v47 = vadd.f32 %v490_v28, %v474_v27  ;;  %v653_v27 = vmul.f32 -0.02900635, %v1721_v2  ;;  %v661_v28 = vmul.f32 -0.6205127, %v1728_v5 }
  0x32   :  { %3481 = vst [vmem:[#allocation29_spill] sm:$0xff] %v2036_v47 }
  0x33   :  { %305 = vrot.lane.b32.xlu1 %v290_v44, %s1690_s27  ;;  %v2002_v44 = vadd.f32 %v484_v37, %v468_v34  ;;  %v2028_v34 = vadd.f32 %v488_v12, %v472_v63  ;;  %v2032_v37 = vadd.f32 %v487_v25, %v471_v23  ;;  %v654_v63 = vmul.f32 -0.02900635, %v1711_v0 }
  0x34   :  { %303 = vrot.lane.b32.xlu0 %v289_v53, %s1690_s27  ;;  %v2008_v53 = vadd.f32 %v483_v43, %v467_v42  ;;  %v473_v42 = vmul.f32 0.1875, %v1887_v60  ;;  %v489_v43 = vmul.f32 0.46201906, %v1892_v61  ;;  %v662_v12 = vmul.f32 -0.6205127, %v1716_v1 }
  0x35   :  { %3475 = vst [vmem:[#allocation23_spill] sm:$0xff] %v2002_v44  ;;  %3479 = vst [vmem:[#allocation27_spill] sm:$0xff] %v2028_v34  ;;  %v491_v25 = vmul.f32 0.46201906, %v1921_v18 }
  0x36   :  { %3476 = vst [vmem:[#allocation24_spill] sm:$0xff] %v2008_v53  ;;  %3480 = vst [vmem:[#allocation28_spill] sm:$0xff] %v2032_v37  ;;  %v2047_v23 = vadd.f32 %v489_v43, %v473_v42  ;;  %v2064_v43 = vadd.f32 %v661_v28, %v653_v27  ;;  %v657_v27 = vmul.f32 -0.02900635, %v1829_v40  ;;  %v665_v28 = vmul.f32 -0.6205127, %v1834_v41 }
  0x37   :  { %527 = vrot.lane.b32.xlu1 %v1967_v58, %s1690_s27  ;;  %v2062_v42 = vadd.f32 %v491_v25, %v475_v57  ;;  %v43_v58 = vmul.f32 0.69975954, %v1721_v2  ;;  %v219_v2 = vrot.slane %v1755_v14, 7  ;;  %v50_v14 = vmul.f32 0.69975954, %v1796_v29 }
  0x38   :  { %525 = vrot.lane.b32.xlu0 %v1972_v3, %s1690_s27  ;;  %3482 = vst [vmem:[#allocation30_spill] sm:$0xff] %v2047_v23  ;;  %3486 = vst [vmem:[#allocation34_spill] sm:$0xff] %v2064_v43  ;;  %v3372_v57 = vrot.slane %v2064_v43, 7  ;;  %v60_v3 = vmul.f32 -0.3247595, %v1761_v16 }
  0x39   :  { %3485 = vst [vmem:[#allocation33_spill] sm:$0xff] %v2062_v42 }
  0x3b   :  { %531 = vrot.lane.b32.xlu1 %v1978_v21, %s1690_s27 }
  0x3c   :  { %529 = vrot.lane.b32.xlu0 %v1984_v26, %s1690_s27 }
  0x3f   :  { %535 = vrot.lane.b32.xlu1 %v1990_v33, %s1690_s27  ;;  %v664_v33 = vmul.f32 -0.6205127, %v1806_v31 }
  0x40   :  { %533 = vrot.lane.b32.xlu0 %v1996_v38, %s1690_s27 }
  0x43   :  { %539 = vrot.lane.b32.xlu1 %v2002_v44, %s1690_s27  ;;  %v656_v44 = vmul.f32 -0.02900635, %v1788_v24 }
  0x44   :  { %537 = vrot.lane.b32.xlu0 %v2008_v53, %s1690_s27 }
  0x47   :  { %543 = vrot.lane.b32.xlu1 %v2014_v62, %s1690_s27  ;;  %v2056_v62 = vadd.f32 %v662_v12, %v654_v63  ;;  %v658_v63 = vmul.f32 -0.02900635, %v1858_v50  ;;  %v666_v12 = vmul.f32 -0.6205127, %v1863_v51 }
  0x48   :  { %541 = vrot.lane.b32.xlu0 %v2020_v15, %s1690_s27  ;;  %v663_v15 = vmul.f32 -0.6205127, %v1775_v20 }
  0x49   :  { %3484 = vst [vmem:[#allocation32_spill] sm:$0xff] %v2056_v62 }
  0x4b   :  { %547 = vrot.lane.b32.xlu1 %v2028_v34, %s1690_s27  ;;  %v2054_v34 = vadd.f32 %v492_v52, %v476_v54  ;;  %v3371_v52 = vrot.slane %v2056_v62, 7  ;;  %v2071_v54 = vadd.f32 %v664_v33, %v656_v44  ;;  %v2086_v44 = vadd.f32 %v666_v12, %v658_v63 }
  0x4c   :  { %545 = vrot.lane.b32.xlu0 %v2032_v37, %s1690_s27  ;;  %v655_v37 = vmul.f32 -0.02900635, %v1740_v9 }
  0x4d   :  { %3483 = vst [vmem:[#allocation31_spill] sm:$0xff] %v2054_v34  ;;  %3487 = vst [vmem:[#allocation35_spill] sm:$0xff] %v2071_v54  ;;  %v3374_v33 = vrot.slane %v2071_v54, 7  ;;  %v3373_v63 = vrot.slane %v2086_v44, 7  ;;  %v62_v54 = vmul.f32 -0.3247595, %v1747_v11 }
  0x4e   :  { %v2078_v25 = vadd.f32 %v663_v15, %v655_v37  ;;  %3489 = vst [vmem:[#allocation37_spill] sm:$0xff] %v2086_v44  ;;  %v2094_v37 = vadd.f32 %v665_v28, %v657_v27 }
  0x4f   :  { %551 = vrot.lane.b32.xlu1 %v2036_v47, %s1690_s27  ;;  %v668_v47 = vmul.f32 -0.6205127, %v1921_v18 }
  0x50   :  { %549 = vrot.lane.b32.xlu0 %v2047_v23, %s1690_s27  ;;  %3488 = vst [vmem:[#allocation36_spill] sm:$0xff] %v2078_v25  ;;  %v3375_v15 = vrot.slane %v2078_v25, 7  ;;  %3490 = vst [vmem:[#allocation38_spill] sm:$0xff] %v2094_v37 }
  0x53   :  { %555 = vrot.lane.b32.xlu1 %v2054_v34, %s1690_s27  ;;  %v660_v34 = vmul.f32 -0.02900635, %v1916_v17 }
  0x54   :  { %553 = vrot.lane.b32.xlu0 %v2062_v42, %s1690_s27  ;;  %v659_v42 = vmul.f32 -0.02900635, %v1887_v60 }
  0x55   :  { %v2102_v12 = vadd.f32 %v668_v47, %v660_v34 }
  0x57   :  { %695 = vrot.lane.b32.xlu1 %v3371_v52, %s1690_s27  ;;  %v667_v52 = vmul.f32 -0.6205127, %v1892_v61  ;;  %3491 = vst [vmem:[#allocation39_spill] sm:$0xff] %v2102_v12  ;;  %v3380_v28 = vrot.slane %v2102_v12, 7  ;;  %v61_v12 = vmul.f32 -0.3247595, %v1716_v1 }
  0x58   :  { %693 = vrot.lane.b32.xlu0 %v3372_v57, %s1690_s27  ;;  %v3378_v57 = vrot.slane %v2094_v37, 7  ;;  %v46_v37 = vmul.f32 0.69975954, %v1735_v8  ;;  %v47_v1 = vmul.f32 0.69975954, %v1740_v9 }
  0x59   :  { %v2108_v27 = vadd.f32 %v667_v52, %v659_v42  ;;  %v49_v9 = vmul.f32 0.69975954, %v1788_v24 }
  0x5a   :  { %v78_v8 = vadd.f32 %v62_v54, %v46_v37 }
  0x5b   :  { %699 = vrot.lane.b32.xlu1 %v3374_v33, %s1690_s27  ;;  %3492 = vst [vmem:[#allocation40_spill] sm:$0xff] %v2108_v27  ;;  %v3382_v34 = vrot.slane %v2108_v27, 7  ;;  %v45_v27 = vmul.f32 0.69975954, %v1711_v0  ;;  %v63_v0 = vmul.f32 -0.3247595, %v1775_v20 }
  0x5c   :  { %697 = vrot.lane.b32.xlu0 %v3375_v15, %s1690_s27  ;;  %v65_v20 = vmul.f32 -0.3247595, %v1806_v31 }
  0x5f   :  { %703 = vrot.lane.b32.xlu1 %v3373_v63, %s1690_s27 }
  0x60   :  { %701 = vrot.lane.b32.xlu0 %v3378_v57, %s1690_s27 }
  0x63   :  { %707 = vrot.lane.b32.xlu1 %v3380_v28, %s1690_s27  ;;  %v59_v28 = vmul.f32 -0.3247595, %v1728_v5  ;;  %v48_v5 = vmul.f32 0.69975954, %v1770_v19  ;;  %v66_v19 = vmul.f32 -0.3247595, %v1801_v30 }
  0x64   :  { %705 = vrot.lane.b32.xlu0 %v3382_v34, %s1690_s27  ;;  %v44_v34 = vmul.f32 0.69975954, %v1753_v13  ;;  %v64_v13 = vmul.f32 -0.3247595, %v1782_v22  ;;  %v79_v22 = vadd.f32 %v63_v0, %v47_v1  ;;  %v51_v0 = vmul.f32 0.69975954, %v1829_v40 }
  0x65   :  { %v75_v44 = vadd.f32 %v59_v28, %v43_v58  ;;  %v77_v58 = vadd.f32 %v61_v12, %v45_v27  ;;  %v68_v27 = vmul.f32 -0.3247595, %v1824_v39  ;;  %v67_v1 = vmul.f32 -0.3247595, %v1834_v41 }
  0x66   :  { %v76_v25 = vadd.f32 %v60_v3, %v44_v34  ;;  %v220_v34 = vrot.slane %v1742_v10, 7  ;;  %v80_v45 = vadd.f32 %v64_v13, %v48_v5  ;;  %v81_v5 = vadd.f32 %v65_v20, %v49_v9 }
  0x67   :  { %v70_v9 = vmul.f32 -0.3247595, %v1853_v49 }
  0x79   :  { %v160_v47 = vpop.permute.xlu1 %159 }
  0x7a   :  { %v156_v42 = vpop.permute.xlu0 %155  ;;  %v205_v12 = vadd.f32 %v160_v47, %v77_v58 }
  0x7b   :  { %v203_v28 = vadd.f32 %v156_v42, %v75_v44  ;;  %v82_v42 = vadd.f32 %v66_v19, %v50_v14 }
  0x7c   :  { %v237_v13 = vadd.f32 %v220_v34, %v205_v12  ;;  %v56_v12 = vmul.f32 0.69975954, %v1871_v55 }
  0x7d   :  { %v162_v52 = vpop.permute.xlu1 %161  ;;  %v235_v44 = vadd.f32 %v219_v2, %v203_v28  ;;  %v83_v28 = vadd.f32 %v67_v1, %v51_v0  ;;  %v58_v1 = vmul.f32 0.69975954, %v1900_v4 }
  0x7e   :  { %v158_v63 = vpop.permute.xlu0 %157  ;;  %v206_v54 = vadd.f32 %v162_v52, %v78_v8  ;;  %v221_v8 = vrot.slane %v1817_v36, 7 }
  0x7f   :  { %v204_v16 = vadd.f32 %v158_v63, %v76_v25  ;;  %v52_v63 = vmul.f32 0.69975954, %v1814_v35 }
  0x80   :  { %v238_v47 = vadd.f32 %v220_v34, %v206_v54  ;;  %v53_v34 = vmul.f32 0.69975954, %v1858_v50  ;;  %v72_v54 = vmul.f32 -0.3247595, %v1882_v59 }
  0x81   :  { %v166_v33 = vpop.permute.xlu1 %165  ;;  %v236_v25 = vadd.f32 %v219_v2, %v204_v16  ;;  %v84_v19 = vadd.f32 %v68_v27, %v52_v63 }
  0x82   :  { %v164_v15 = vpop.permute.xlu0 %163  ;;  %v208_v30 = vadd.f32 %v166_v33, %v80_v45  ;;  %v54_v45 = vmul.f32 0.69975954, %v1848_v48 }
  0x83   :  { %v207_v2 = vadd.f32 %v164_v15, %v79_v22  ;;  %v69_v22 = vmul.f32 -0.3247595, %v1863_v51  ;;  %v222_v15 = vrot.slane %v1842_v46, 7 }
  0x84   :  { %v240_v58 = vadd.f32 %v221_v8, %v208_v30 }
  0x85   :  { %v2124_v23 = vpop.permute.xlu1 %169  ;;  %v239_v36 = vadd.f32 %v221_v8, %v207_v2  ;;  %v85_v46 = vadd.f32 %v69_v22, %v53_v34 }
  0x86   :  { %v2126_v53 = vpop.permute.xlu0 %167 }
  0x89   :  { %v2128_v57 = vpop.permute.xlu1 %173 }
  0x8a   :  { %v2130_v38 = vpop.permute.xlu0 %171  ;;  %v212_v63 = vadd.f32 %v2128_v57, %v84_v19  ;;  %v88_v57 = vadd.f32 %v72_v54, %v56_v12 }
  0x8d   :  { %v2136_v26 = vpop.permute.xlu1 %177 }
  0x8e   :  { %v2138_v21 = vpop.permute.xlu0 %175 }
  0x91   :  { %v2144_v62 = vpop.permute.xlu1 %181 }
  0x92   :  { %v2146_v43 = vpop.permute.xlu0 %179  ;;  %v216_v22 = vadd.f32 %v2144_v62, %v88_v57 }
  0x95   :  { %v2153_v11 = vpop.permute.xlu1 %185 }
  0x96   :  { %v2155_v3 = vpop.permute.xlu0 %183 }
  0x97   :  { %3493 = vst [vmem:[#allocation41_spill] sm:$0xff] %v2155_v3 }
  0x99   :  { %v294_v37 = vpop.permute.xlu1 %293 }
  0x9a   :  { %v292_v10 = vpop.permute.xlu0 %291  ;;  %v317_v20 = vadd.f32 %v294_v37, %v237_v13  ;;  %v318_v33 = vadd.f32 %v294_v37, %v238_v47  ;;  %v74_v47 = vmul.f32 -0.3247595, %v1905_v6 }
  0x9b   :  { %v315_v29 = vadd.f32 %v292_v10, %v235_v44  ;;  %v316_v3 = vadd.f32 %v292_v10, %v236_v25  ;;  %v86_v44 = vadd.f32 %v70_v9, %v54_v45  ;;  %v57_v45 = vmul.f32 0.69975954, %v1916_v17 }
  0x9c   :  { %v224_v9 = vrot.slane %v1909_v7, 7 }
  0x9d   :  { %349 = vrot.lane.b32.xlu1 %v316_v3, %s1691_s19  ;;  %347 = vrot.lane.b32.xlu0 %v315_v29, %s1691_s19  ;;  %v298_v16 = vpop.permute.xlu1 %297  ;;  %v210_v29 = vadd.f32 %v2124_v23, %v82_v42  ;;  %v209_v3 = vadd.f32 %v2126_v53, %v81_v5  ;;  %v55_v23 = vmul.f32 0.69975954, %v1887_v60  ;;  %v71_v53 = vmul.f32 -0.3247595, %v1892_v61 }
  0x9e   :  { %v296_v52 = vpop.permute.xlu0 %295  ;;  %v223_v42 = vrot.slane %v1875_v56, 7  ;;  %v211_v5 = vadd.f32 %v2130_v38, %v83_v28  ;;  %v73_v56 = vmul.f32 -0.3247595, %v1921_v18 }
  0x9f   :  { %v319_v25 = vadd.f32 %v296_v52, %v239_v36  ;;  %v320_v37 = vadd.f32 %v296_v52, %v240_v58  ;;  %v242_v27 = vadd.f32 %v222_v15, %v210_v29  ;;  %v241_v10 = vadd.f32 %v222_v15, %v209_v3 }
  0xa0   :  { %v244_v19 = vadd.f32 %v223_v42, %v212_v63  ;;  %v87_v52 = vadd.f32 %v71_v53, %v55_v23  ;;  %v243_v38 = vadd.f32 %v223_v42, %v211_v5  ;;  %v90_v36 = vadd.f32 %v74_v47, %v58_v1 }
  0xa1   :  { %353 = vrot.lane.b32.xlu1 %v318_v33, %s1691_s19  ;;  %351 = vrot.lane.b32.xlu0 %v317_v20, %s1691_s19  ;;  %v302_v14 = vpop.permute.xlu1 %301  ;;  %v321_v8 = vadd.f32 %v298_v16, %v241_v10  ;;  %v322_v2 = vadd.f32 %v298_v16, %v242_v27  ;;  %v214_v20 = vadd.f32 %v2136_v26, %v86_v44  ;;  %v225_v26 = vrot.slane %v1931_v32, 7 }
  0xa2   :  { %v300_v30 = vpop.permute.xlu0 %299  ;;  %v213_v33 = vadd.f32 %v2138_v21, %v85_v46  ;;  %v89_v15 = vadd.f32 %v73_v56, %v57_v45  ;;  %v215_v21 = vadd.f32 %v2146_v43, %v87_v52  ;;  %v218_v63 = vadd.f32 %v2153_v11, %v90_v36  ;;  %v3495_v46 = vld [vmem:[#allocation41_spill] sm:$0xff]  ;;  %v3499_v56 = vld [vmem:[#allocation4_spill] sm:$0xff] }
  0xa3   :  { %v323_v28 = vadd.f32 %v300_v30, %v243_v38  ;;  %v324_v34 = vadd.f32 %v300_v30, %v244_v19  ;;  %v246_v29 = vadd.f32 %v224_v9, %v214_v20  ;;  %v248_v54 = vadd.f32 %v225_v26, %v216_v22  ;;  %v3498_v52 = vld [vmem:[#allocation5_spill] sm:$0xff] }
  0xa4   :  { %v245_v7 = vadd.f32 %v224_v9, %v213_v33  ;;  %v247_v62 = vadd.f32 %v225_v26, %v215_v21  ;;  %v217_v32 = vadd.f32 %v3495_v46, %v89_v15  ;;  %v597_v45 = vmul.f32 -0.15400635, %v3498_v52  ;;  %v3500_v33 = vld [vmem:[#allocation2_spill] sm:$0xff]  ;;  %v3503_v26 = vld [vmem:[#allocation8_spill] sm:$0xff] }
  0xa5   :  { %357 = vrot.lane.b32.xlu1 %v320_v37, %s1691_s19  ;;  %355 = vrot.lane.b32.xlu0 %v319_v25, %s1691_s19  ;;  %v306_v0 = vpop.permute.xlu1 %305  ;;  %v326_v30 = vadd.f32 %v302_v14, %v246_v29  ;;  %v3494_v25 = vld [vmem:[#allocation16_spill] sm:$0xff]  ;;  %v589_v38 = vmul.f32 -0.0625, %v3499_v56  ;;  %v413_v9 = vmul.f32 0.40400636, %v3499_v56  ;;  %v3502_v29 = vld [vmem:[#allocation6_spill] sm:$0xff]  ;;  %v432_v21 = vmul.f32 -0.1875, %v3503_v26 }
  0xa6   :  { %v304_v13 = vpop.permute.xlu0 %303  ;;  %v325_v44 = vadd.f32 %v302_v14, %v245_v7  ;;  %v226_v37 = vrot.slane %v3494_v25, 7  ;;  %v416_v7 = vmul.f32 0.40400636, %v3502_v29  ;;  %v3511_v29 = vld [vmem:[#allocation15_spill] sm:$0xff]  ;;  %v592_v26 = vmul.f32 -0.0625, %v1788_v24 }
  0xa7   :  { %v327_v53 = vadd.f32 %v304_v13, %v247_v62  ;;  %v328_v27 = vadd.f32 %v304_v13, %v248_v54  ;;  %v3496_v13 = vld [vmem:[#allocation10_spill] sm:$0xff]  ;;  %v415_v54 = vmul.f32 0.40400636, %v3500_v33 }
  0xa8   :  { %v250_v10 = vadd.f32 %v226_v37, %v218_v63  ;;  %v249_v14 = vadd.f32 %v226_v37, %v217_v32  ;;  %v3504_v63 = vld [vmem:[#allocation11_spill] sm:$0xff]  ;;  %v3505_v32 = vld [vmem:[#allocation13_spill] sm:$0xff] }
  0xa9   :  { %361 = vrot.lane.b32.xlu1 %v322_v2, %s1691_s19  ;;  %359 = vrot.lane.b32.xlu0 %v321_v8, %s1691_s19  ;;  %v2196_v58 = vpop.permute.xlu1 %527  ;;  %v430_v8 = vmul.f32 -0.1875, %v3496_v13  ;;  %v3497_v2 = vld [vmem:[#allocation9_spill] sm:$0xff]  ;;  %v418_v46 = vmul.f32 0.40400636, %v3504_v63 }
  0xaa   :  { %v2198_v16 = vpop.permute.xlu0 %525  ;;  %v329_v5 = vadd.f32 %v306_v0, %v249_v14  ;;  %v330_v1 = vadd.f32 %v306_v0, %v250_v10  ;;  %v414_v19 = vmul.f32 0.40400636, %v3497_v2  ;;  %v429_v0 = vmul.f32 -0.1875, %v3498_v52  ;;  %v3506_v10 = vld [vmem:[#allocation7_spill] sm:$0xff] }
  0xab   :  { %v591_v14 = vmul.f32 -0.0625, %v3506_v10  ;;  %v417_v13 = vmul.f32 0.40400636, %v3506_v10  ;;  %v2264_v2 = vadd.f32 %v432_v21, %v416_v7  ;;  %v436_v7 = vmul.f32 -0.1875, %v3511_v29 }
  0xac   :  { %v2242_v15 = vadd.f32 %v430_v8, %v414_v19  ;;  %v419_v21 = vmul.f32 0.40400636, %v1788_v24  ;;  %v438_v10 = vmul.f32 -0.1875, %v1824_v39  ;;  %v421_v24 = vmul.f32 0.40400636, %v1829_v40 }
  0xad   :  { %365 = vrot.lane.b32.xlu1 %v324_v34, %s1691_s19  ;;  %363 = vrot.lane.b32.xlu0 %v323_v28, %s1691_s19  ;;  %v2205_v3 = vpop.permute.xlu1 %531  ;;  %v590_v28 = vmul.f32 -0.0625, %v3500_v33  ;;  %v3501_v34 = vld [vmem:[#allocation3_spill] sm:$0xff]  ;;  %3508 = vst [vmem:[#allocation16_spill] sm:$0xff] %v2264_v2  ;;  %v440_v29 = vmul.f32 -0.1875, %v1853_v49 }
  0xae   :  { %v2207_v12 = vpop.permute.xlu0 %529  ;;  %v598_v22 = vmul.f32 -0.15400635, %v3501_v34  ;;  %v431_v62 = vmul.f32 -0.1875, %v3501_v34  ;;  %v574_v19 = vadd.f32 %v2196_v58, %v2242_v15 }
  0xb0   :  { %v2254_v37 = vadd.f32 %v598_v22, %v590_v28  ;;  %v2271_v56 = vadd.f32 %v431_v62, %v415_v54  ;;  %v435_v54 = vmul.f32 -0.1875, %v1806_v31  ;;  %v422_v62 = vmul.f32 0.40400636, %v1814_v35 }
  0xb1   :  { %369 = vrot.lane.b32.xlu1 %v326_v30, %s1691_s19  ;;  %367 = vrot.lane.b32.xlu0 %v325_v44, %s1691_s19  ;;  %v2214_v43 = vpop.permute.xlu1 %535  ;;  %v2246_v44 = vadd.f32 %v597_v45, %v589_v38  ;;  %v2248_v30 = vadd.f32 %v429_v0, %v413_v9  ;;  %v3510_v0 = vld [vmem:[#allocation14_spill] sm:$0xff] }
  0xb2   :  { %v2216_v23 = vpop.permute.xlu0 %533  ;;  %v622_v38 = vrot.slane %v2254_v37, 7  ;;  %v420_v33 = vmul.f32 0.40400636, %v3510_v0 }
  0xb3   :  { %v621_v52 = vrot.slane %v2246_v44, 7  ;;  %v573_v45 = vadd.f32 %v2198_v16, %v2248_v30  ;;  %v600_v16 = vmul.f32 -0.15400635, %v1806_v31  ;;  %v437_v31 = vmul.f32 -0.1875, %v1834_v41 }
  0xb5   :  { %373 = vrot.lane.b32.xlu1 %v328_v27, %s1691_s19  ;;  %371 = vrot.lane.b32.xlu0 %v327_v53, %s1691_s19  ;;  %v2220_v42 = vpop.permute.xlu1 %539  ;;  %v434_v53 = vmul.f32 -0.1875, %v3505_v32  ;;  %v638_v63 = vadd.f32 %v621_v52, %v574_v19  ;;  %v576_v32 = vadd.f32 %v2205_v3, %v2264_v2  ;;  %v2308_v39 = vadd.f32 %v600_v16, %v592_v26 }
  0xb6   :  { %v2222_v11 = vpop.permute.xlu0 %537 }
  0xb7   :  { %v2274_v9 = vadd.f32 %v434_v53, %v418_v46  ;;  %v637_v46 = vadd.f32 %v621_v52, %v573_v45  ;;  %v575_v53 = vadd.f32 %v2207_v12, %v2271_v56  ;;  %v2306_v12 = vadd.f32 %v436_v7, %v420_v33 }
  0xb8   :  { %v640_v52 = vadd.f32 %v622_v38, %v576_v32  ;;  %v424_v33 = vmul.f32 0.40400636, %v1848_v48  ;;  %v2325_v7 = vadd.f32 %v437_v31, %v421_v24  ;;  %v624_v49 = vrot.slane %v2308_v39, 7 }
  0xb9   :  { %377 = vrot.lane.b32.xlu1 %v330_v1, %s1691_s19  ;;  %375 = vrot.lane.b32.xlu0 %v329_v5, %s1691_s19  ;;  %v2226_v57 = vpop.permute.xlu1 %543  ;;  %v3507_v5 = vld [vmem:[#allocation12_spill] sm:$0xff]  ;;  %3509 = vst [vmem:[#allocation41_spill] sm:$0xff] %v2274_v9  ;;  %v578_v3 = vadd.f32 %v2214_v43, %v2274_v9  ;;  %3512 = vst [vmem:[#allocation10_spill] sm:$0xff] %v2306_v12  ;;  %v639_v45 = vadd.f32 %v622_v38, %v575_v53  ;;  %v594_v38 = vmul.f32 -0.0625, %v1858_v50 }
  0xba   :  { %v2228_v47 = vpop.permute.xlu0 %541  ;;  %v599_v1 = vmul.f32 -0.15400635, %v3507_v5  ;;  %v433_v8 = vmul.f32 -0.1875, %v3507_v5  ;;  %v601_v5 = vmul.f32 -0.15400635, %v1834_v41  ;;  %v2319_v43 = vadd.f32 %v438_v10, %v422_v62 }
  0xbb   :  { %v439_v62 = vmul.f32 -0.1875, %v1863_v51  ;;  %v426_v53 = vmul.f32 0.40400636, %v1871_v55  ;;  %v603_v10 = vmul.f32 -0.15400635, %v1892_v61  ;;  %v2352_v31 = vadd.f32 %v440_v29, %v424_v33 }
  0xbc   :  { %v2281_v22 = vadd.f32 %v599_v1, %v591_v14  ;;  %v2283_v58 = vadd.f32 %v433_v8, %v417_v13  ;;  %v593_v14 = vmul.f32 -0.0625, %v1829_v40  ;;  %v2310_v8 = vadd.f32 %v435_v54, %v419_v21  ;;  %3513 = vst [vmem:[#allocation9_spill] sm:$0xff] %v2319_v43 }
  0xbd   :  { %v2236_v20 = vpop.permute.xlu1 %547  ;;  %v602_v21 = vmul.f32 -0.15400635, %v1863_v51  ;;  %v423_v54 = vmul.f32 0.40400636, %v1858_v50  ;;  %v442_v50 = vmul.f32 -0.1875, %v1882_v59  ;;  %v595_v51 = vmul.f32 -0.0625, %v1887_v60 }
  0xbe   :  { %v2240_v36 = vpop.permute.xlu0 %545  ;;  %v623_v40 = vrot.slane %v2281_v22, 7  ;;  %v577_v41 = vadd.f32 %v2216_v23, %v2283_v58  ;;  %v2321_v0 = vadd.f32 %v601_v5, %v593_v14  ;;  %v579_v32 = vadd.f32 %v2222_v11, %v2310_v8  ;;  %3514 = vst [vmem:[#allocation5_spill] sm:$0xff] %v2352_v31 }
  0xbf   :  { %v425_v14 = vmul.f32 0.40400636, %v1887_v60  ;;  %v441_v5 = vmul.f32 -0.1875, %v1892_v61  ;;  %v582_v24 = vadd.f32 %v2226_v57, %v2319_v43  ;;  %v2354_v55 = vadd.f32 %v602_v21, %v594_v38 }
  0xc0   :  { %v642_v26 = vadd.f32 %v623_v40, %v578_v3  ;;  %v641_v48 = vadd.f32 %v623_v40, %v577_v41  ;;  %v2356_v59 = vadd.f32 %v439_v62, %v423_v54  ;;  %v643_v3 = vadd.f32 %v624_v49, %v579_v32 }
  0xc1   :  { %v2252_v25 = vpop.permute.xlu1 %551  ;;  %v625_v60 = vrot.slane %v2321_v0, 7  ;;  %v581_v61 = vadd.f32 %v2228_v47, %v2325_v7  ;;  %v2365_v57 = vadd.f32 %v442_v50, %v426_v53  ;;  %v444_v40 = vmul.f32 -0.1875, %v1905_v6 }
  0xc2   :  { %v2258_v27 = vpop.permute.xlu0 %549  ;;  %v2371_v41 = vadd.f32 %v441_v5, %v425_v14  ;;  %v596_v33 = vmul.f32 -0.0625, %v1916_v17  ;;  %v626_v6 = vrot.slane %v2354_v55, 7  ;;  %v584_v54 = vadd.f32 %v2236_v20, %v2352_v31 }
  0xc3   :  { %3515 = vst [vmem:[#allocation4_spill] sm:$0xff] %v2365_v57  ;;  %v646_v38 = vadd.f32 %v625_v60, %v582_v24  ;;  %v583_v62 = vadd.f32 %v2240_v36, %v2356_v59 }
  0xc4   :  { %v648_v36 = vadd.f32 %v626_v6, %v584_v54  ;;  %v2456_v54 = vld [vmem:[%s3359_s0 + $0x28] sm:$0x3] }
  0xc5   :  { %v2277_v28 = vpop.permute.xlu1 %555  ;;  %v647_v53 = vadd.f32 %v626_v6, %v583_v62  ;;  %v816_v62 = vmul.f32 -0.0625, %v2456_v54 }
  0xc6   :  { %v2279_v34 = vpop.permute.xlu0 %553 }
  0xc9   :  { %v2312_v19 = vpop.permute.xlu1 %695 }
  0xca   :  { %v2298_v1 = vpop.permute.xlu0 %693  ;;  %v720_v16 = vadd.f32 %v2312_v19, %v640_v52  ;;  %v719_v23 = vadd.f32 %v2312_v19, %v639_v45  ;;  %v2367_v52 = vadd.f32 %v603_v10, %v595_v51  ;;  %v428_v45 = vmul.f32 0.40400636, %v1900_v4 }
  0xcb   :  { %v718_v35 = vadd.f32 %v2298_v1, %v638_v63  ;;  %v717_v13 = vadd.f32 %v2298_v1, %v637_v46  ;;  %v580_v46 = vadd.f32 %v2220_v42, %v2306_v12  ;;  %v645_v4 = vadd.f32 %v625_v60, %v581_v61 }
  0xcc   :  { %v627_v50 = vrot.slane %v2367_v52, 7  ;;  %v585_v51 = vadd.f32 %v2258_v27, %v2371_v41 }
  0xcd   :  { %751 = vrot.lane.b32.xlu1 %v718_v35, %s1692_s20  ;;  %749 = vrot.lane.b32.xlu0 %v717_v13, %s1692_s20  ;;  %v2358_v35 = vpop.permute.xlu1 %699  ;;  %v644_v13 = vadd.f32 %v624_v49, %v580_v46  ;;  %v2392_v49 = vadd.f32 %v444_v40, %v428_v45  ;;  %v2431_v40 = vld [vmem:[%s3360_s1 + $0x8] sm:$0x3] }
  0xce   :  { %v2333_v63 = vpop.permute.xlu0 %697  ;;  %v723_v47 = vadd.f32 %v2358_v35, %v643_v3  ;;  %3522 = vst [vmem:[#allocation7_spill] sm:$0xff] %v2431_v40  ;;  %v1387_v12 = vmul.f32 1.0747595, %v2431_v40 }
  0xcf   :  { %v722_v42 = vadd.f32 %v2333_v63, %v642_v26  ;;  %v721_v11 = vadd.f32 %v2333_v63, %v641_v48  ;;  %v724_v29 = vadd.f32 %v2358_v35, %v644_v13  ;;  %v443_v26 = vmul.f32 -0.1875, %v1921_v18  ;;  %3516 = vst [vmem:[#allocation2_spill] sm:$0xff] %v2392_v49 }
  0xd0   :  { %v588_v24 = vadd.f32 %v2277_v28, %v2392_v49  ;;  %v2425_v28 = vld [vmem:[%s3359_s0 + $0x8] sm:$0x3] }
  0xd1   :  { %755 = vrot.lane.b32.xlu1 %v720_v16, %s1692_s20  ;;  %753 = vrot.lane.b32.xlu0 %v719_v23, %s1692_s20  ;;  %v604_v16 = vmul.f32 -0.15400635, %v1921_v18  ;;  %v427_v23 = vmul.f32 0.40400636, %v1916_v17  ;;  %v586_v18 = vadd.f32 %v2252_v25, %v2365_v57  ;;  %v2398_v20 = vpop.permute.xlu1 %703  ;;  %3521 = vst [vmem:[#allocation13_spill] sm:$0xff] %v2425_v28 }
  0xd2   :  { %v2379_v21 = vpop.permute.xlu0 %701  ;;  %3518 = vst [vmem:[#allocation6_spill] sm:$0xff] %v2398_v20  ;;  %v728_v25 = vadd.f32 %v2398_v20, %v648_v36  ;;  %v727_v10 = vadd.f32 %v2398_v20, %v647_v53  ;;  %v2477_v53 = vld [vmem:[%s3360_s1 + $0x38] sm:$0x3]  ;;  %v1371_v57 = vmul.f32 0.050240472, %v2425_v28 }
  0xd3   :  { %v726_v48 = vadd.f32 %v2379_v21, %v646_v38  ;;  %v725_v17 = vadd.f32 %v2379_v21, %v645_v4  ;;  %v2394_v46 = vadd.f32 %v604_v16, %v596_v33  ;;  %v2396_v32 = vadd.f32 %v443_v26, %v427_v23  ;;  %v2441_v16 = vld [vmem:[%s3359_s0 + $0x18] sm:$0x3]  ;;  %3523 = vst [vmem:[#allocation12_spill] sm:$0xff] %v2477_v53 }
  0xd4   :  { %v650_v14 = vadd.f32 %v627_v50, %v586_v18  ;;  %v822_v33 = vmul.f32 -0.15400635, %v2431_v40  ;;  %v815_v23 = vmul.f32 -0.0625, %v2441_v16  ;;  %v2447_v26 = vld [vmem:[%s3360_s1 + $0x18] sm:$0x3] }
  0xd5   :  { %759 = vrot.lane.b32.xlu1 %v722_v42, %s1692_s20  ;;  %757 = vrot.lane.b32.xlu0 %v721_v11, %s1692_s20  ;;  %3517 = vst [vmem:[#allocation3_spill] sm:$0xff] %v2396_v32  ;;  %v649_v42 = vadd.f32 %v627_v50, %v585_v51  ;;  %v628_v11 = vrot.slane %v2394_v46, 7  ;;  %v587_v27 = vadd.f32 %v2279_v34, %v2396_v32  ;;  %v2418_v60 = vpop.permute.xlu1 %707  ;;  %v814_v34 = vmul.f32 -0.0625, %v2425_v28  ;;  %v2471_v18 = vld [vmem:[%s3359_s0 + $0x38] sm:$0x3] }
  0xd6   :  { %v2407_v5 = vpop.permute.xlu0 %705  ;;  %3520 = vst [vmem:[#allocation11_spill] sm:$0xff] %v2418_v60  ;;  %v823_v4 = vmul.f32 -0.15400635, %v2447_v26  ;;  %v817_v36 = vmul.f32 -0.0625, %v2471_v18  ;;  %v825_v50 = vmul.f32 -0.15400635, %v2477_v53 }
  0xd7   :  { %3519 = vst [vmem:[#allocation8_spill] sm:$0xff] %v2407_v5  ;;  %v730_v13 = vadd.f32 %v2407_v5, %v650_v14  ;;  %v729_v3 = vadd.f32 %v2407_v5, %v649_v42  ;;  %v652_v61 = vadd.f32 %v628_v11, %v588_v24  ;;  %v651_v45 = vadd.f32 %v628_v11, %v587_v27  ;;  %v2486_v51 = vld [vmem:[%s3359_s0 + $0x48] sm:$0x3]  ;;  %v2501_v42 = vld [vmem:[%s3359_s0 + $0x58] sm:$0x3] }
  0xd8   :  { %v830_v38 = vadd.f32 %v822_v33, %v814_v34  ;;  %v831_v6 = vadd.f32 %v823_v4, %v815_v23  ;;  %3524 = vst [vmem:[#allocation14_spill] sm:$0xff] %v2486_v51  ;;  %v819_v11 = vmul.f32 -0.0625, %v2501_v42  ;;  %v2507_v24 = vld [vmem:[%s3360_s1 + $0x58] sm:$0x3]  ;;  %v2524_v34 = vld [vmem:[%s3360_s1 + $0x68] sm:$0x3] }
  0xd9   :  { %763 = vrot.lane.b32.xlu1 %v724_v29, %s1692_s20  ;;  %761 = vrot.lane.b32.xlu0 %v723_v47, %s1692_s20  ;;  %v732_v29 = vadd.f32 %v2418_v60, %v652_v61  ;;  %v731_v47 = vadd.f32 %v2418_v60, %v651_v45  ;;  %v827_v27 = vmul.f32 -0.15400635, %v2507_v24  ;;  %v828_v33 = vmul.f32 -0.15400635, %v2524_v34 }
  0xda   :  { %v969_v23 = vmul.f32 -0.02900635, %v2456_v54  ;;  %v1389_v32 = vmul.f32 1.0747595, %v2447_v26 }
  0xdb   :  { %v835_v45 = vadd.f32 %v827_v27, %v819_v11  ;;  %v971_v11 = vmul.f32 -0.02900635, %v2486_v51 }
  0xdd   :  { %767 = vrot.lane.b32.xlu1 %v726_v48, %s1692_s20  ;;  %765 = vrot.lane.b32.xlu0 %v725_v17, %s1692_s20  ;;  %v2462_v48 = vld [vmem:[%s3360_s1 + $0x28] sm:$0x3] }
  0xde   :  { %v824_v17 = vmul.f32 -0.15400635, %v2462_v48  ;;  %v977_v4 = vmul.f32 -0.6205127, %v2462_v48 }
  0xe1   :  { %771 = vrot.lane.b32.xlu1 %v728_v25, %s1692_s20  ;;  %769 = vrot.lane.b32.xlu0 %v727_v10, %s1692_s20  ;;  %v818_v25 = vmul.f32 -0.0625, %v2486_v51  ;;  %v2492_v10 = vld [vmem:[%s3360_s1 + $0x48] sm:$0x3] }
  0xe2   :  { %3525 = vst [vmem:[#allocation15_spill] sm:$0xff] %v2492_v10  ;;  %v826_v14 = vmul.f32 -0.15400635, %v2492_v10  ;;  %v979_v27 = vmul.f32 -0.6205127, %v2492_v10 }
  0xe5   :  { %775 = vrot.lane.b32.xlu1 %v730_v13, %s1692_s20  ;;  %773 = vrot.lane.b32.xlu0 %v729_v3, %s1692_s20  ;;  %v967_v13 = vmul.f32 -0.02900635, %v2425_v28  ;;  %v2515_v3 = vld [vmem:[%s3359_s0 + $0x68] sm:$0x3] }
  0xe6   :  { %v820_v61 = vmul.f32 -0.0625, %v2515_v3 }
  0xe9   :  { %779 = vrot.lane.b32.xlu1 %v732_v29, %s1692_s20  ;;  %777 = vrot.lane.b32.xlu0 %v731_v47, %s1692_s20  ;;  %v968_v29 = vmul.f32 -0.02900635, %v2441_v16  ;;  %v976_v47 = vmul.f32 -0.6205127, %v2447_v26 }
  0xed   :  { %846 = vrot.lane.b32.xlu0 %v2246_v44, %s1690_s27  ;;  %848 = vrot.lane.b32.xlu1 %v830_v38, %s1690_s27  ;;  %v832_v44 = vadd.f32 %v824_v17, %v816_v62  ;;  %v2543_v17 = vld [vmem:[%s3360_s1 + $0x78] sm:$0x3] }
  0xf1   :  { %850 = vrot.lane.b32.xlu0 %v2254_v37, %s1690_s27  ;;  %852 = vrot.lane.b32.xlu1 %v831_v6, %s1690_s27  ;;  %v833_v37 = vadd.f32 %v825_v50, %v817_v36  ;;  %v2537_v6 = vld [vmem:[%s3359_s0 + $0x78] sm:$0x3]  ;;  %v984_v36 = vadd.f32 %v976_v47, %v968_v29  ;;  %v978_v50 = vmul.f32 -0.6205127, %v2477_v53 }
  0xf2   :  { %v821_v62 = vmul.f32 -0.0625, %v2537_v6 }
  0xf5   :  { %854 = vrot.lane.b32.xlu0 %v2281_v22, %s1690_s27  ;;  %856 = vrot.lane.b32.xlu1 %v832_v44, %s1690_s27  ;;  %v834_v22 = vadd.f32 %v826_v14, %v818_v25  ;;  %v829_v44 = vmul.f32 -0.15400635, %v2543_v17  ;;  %v985_v25 = vadd.f32 %v977_v4, %v969_v23  ;;  %v987_v4 = vadd.f32 %v979_v27, %v971_v11 }
  0xf7   :  { %v837_v14 = vadd.f32 %v829_v44, %v821_v62  ;;  %v1003_v47 = vrot.slane %v985_v25, 7  ;;  %v981_v62 = vmul.f32 -0.6205127, %v2524_v34 }
  0xf9   :  { %858 = vrot.lane.b32.xlu0 %v2308_v39, %s1690_s27  ;;  %860 = vrot.lane.b32.xlu1 %v833_v37, %s1690_s27  ;;  %v975_v39 = vmul.f32 -0.6205127, %v2431_v40 }
  0xfb   :  { %v983_v38 = vadd.f32 %v975_v39, %v967_v13  ;;  %v972_v39 = vmul.f32 -0.02900635, %v2501_v42 }
  0xfd   :  { %862 = vrot.lane.b32.xlu0 %v2321_v0, %s1690_s27  ;;  %864 = vrot.lane.b32.xlu1 %v834_v22, %s1690_s27  ;;  %v836_v0 = vadd.f32 %v828_v33, %v820_v61  ;;  %v999_v37 = vrot.slane %v983_v38, 7  ;;  %v1001_v22 = vrot.slane %v984_v36, 7  ;;  %v980_v61 = vmul.f32 -0.6205127, %v2507_v24 }
  0xff   :  { %v988_v36 = vadd.f32 %v980_v61, %v972_v39 }
 0x101   :  { %866 = vrot.lane.b32.xlu0 %v2354_v55, %s1690_s27  ;;  %868 = vrot.lane.b32.xlu1 %v835_v45, %s1690_s27  ;;  %v970_v55 = vmul.f32 -0.02900635, %v2471_v18  ;;  %v3526_v45 = vld [vmem:[#allocation34_spill] sm:$0xff]  ;;  %v1009_v39 = vrot.slane %v988_v36, 7 }
 0x102   :  { %v3527_v33 = vrot.slane %v3526_v45, 7 }
 0x103   :  { %v986_v13 = vadd.f32 %v978_v50, %v970_v55  ;;  %v974_v55 = vmul.f32 -0.02900635, %v2537_v6  ;;  %v982_v50 = vmul.f32 -0.6205127, %v2543_v17 }
 0x104   :  { %v1000_v29 = vsel %vm910_vm0, %v3527_v33, %v999_v37 }
 0x105   :  { %870 = vrot.lane.b32.xlu0 %v2367_v52, %s1690_s27  ;;  %872 = vrot.lane.b32.xlu1 %v836_v0, %s1690_s27  ;;  %v3528_v52 = vld [vmem:[#allocation32_spill] sm:$0xff]  ;;  %v973_v0 = vmul.f32 -0.02900635, %v2515_v3  ;;  %v1005_v44 = vrot.slane %v986_v13, 7  ;;  %v990_v61 = vadd.f32 %v982_v50, %v974_v55 }
 0x106   :  { %v3529_v38 = vrot.slane %v3528_v52, 7  ;;  %v3538_v55 = vld [vmem:[#allocation40_spill] sm:$0xff] }
 0x107   :  { %v989_v13 = vadd.f32 %v981_v62, %v973_v0  ;;  %v1013_v62 = vrot.slane %v990_v61, 7  ;;  %v3539_v50 = vrot.slane %v3538_v55, 7 }
 0x108   :  { %v1002_v23 = vsel %vm910_vm0, %v3529_v38, %v1001_v22  ;;  %v3532_v22 = vld [vmem:[#allocation35_spill] sm:$0xff] }
 0x109   :  { %874 = vrot.lane.b32.xlu0 %v2394_v46, %s1690_s27  ;;  %876 = vrot.lane.b32.xlu1 %v837_v14, %s1690_s27  ;;  %v3530_v46 = vld [vmem:[#allocation36_spill] sm:$0xff]  ;;  %v1007_v14 = vrot.slane %v987_v4, 7  ;;  %v3533_v11 = vrot.slane %v3532_v22, 7  ;;  %v1011_v38 = vrot.slane %v989_v13, 7 }
 0x10a   :  { %v3531_v37 = vrot.slane %v3530_v46, 7 }
 0x10b   :  { %v1006_v27 = vsel %vm910_vm0, %v3533_v11, %v1005_v44  ;;  %v1012_v46 = vsel %vm910_vm0, %v3539_v50, %v1011_v38 }
 0x10c   :  { %v1004_v25 = vsel %vm910_vm0, %v3531_v37, %v1003_v47  ;;  %v3540_v37 = vld [vmem:[#allocation39_spill] sm:$0xff] }
 0x10d   :  { %1015 = vrot.lane.b32.xlu0 %v1000_v29, %s1690_s27  ;;  %1017 = vrot.lane.b32.xlu1 %v1002_v23, %s1690_s27  ;;  %v3534_v29 = vld [vmem:[#allocation38_spill] sm:$0xff]  ;;  %v3536_v23 = vld [vmem:[#allocation37_spill] sm:$0xff] }
 0x10e   :  { %v3535_v47 = vrot.slane %v3534_v29, 7  ;;  %v3537_v4 = vrot.slane %v3536_v23, 7  ;;  %v3542_v23 = vld [vmem:[#allocation19_spill] sm:$0xff] }
 0x10f   :  { %v350_v45 = vpop.permute.xlu1 %349  ;;  %v348_v33 = vpop.permute.xlu0 %347 }
 0x110   :  { %398 = vst.msk [vmem:[%s3361_s2 + $0x7] sm:$0x1] %vm397_vm1, %v350_v45  ;;  %v1008_v52 = vsel %vm910_vm0, %v3535_v47, %v1007_v14  ;;  %v1010_v0 = vsel %vm910_vm0, %v3537_v4, %v1009_v39  ;;  %v915_v4 = vrot.slane %v3542_v23, 7 }
 0x111   :  { %396 = vst.msk [vmem:[%s3361_s2 - $0x1] sm:$0xfe] %vm395_vm2, %v348_v33  ;;  %1019 = vrot.lane.b32.xlu0 %v1004_v25, %s1690_s27  ;;  %1021 = vrot.lane.b32.xlu1 %v1006_v27, %s1690_s27  ;;  %v3541_v25 = vrot.slane %v3540_v37, 7 }
 0x113   :  { %v354_v44 = vpop.permute.xlu1 %353  ;;  %v352_v36 = vpop.permute.xlu0 %351  ;;  %v1014_v14 = vsel %vm910_vm0, %v3541_v25, %v1013_v62 }
 0x114   :  { %400 = vst.msk [vmem:[%s3361_s2 + $0xf] sm:$0x1] %vm397_vm1, %v354_v44  ;;  %v3543_v44 = vld [vmem:[#allocation20_spill] sm:$0xff] }
 0x115   :  { %399 = vst.msk [vmem:[%s3361_s2 + $0x7] sm:$0xfe] %vm395_vm2, %v352_v36  ;;  %1023 = vrot.lane.b32.xlu0 %v1008_v52, %s1690_s27  ;;  %1025 = vrot.lane.b32.xlu1 %v1010_v0, %s1690_s27  ;;  %v914_v36 = vrot.slane %v3543_v44, 7 }
 0x117   :  { %v358_v22 = vpop.permute.xlu1 %357  ;;  %v356_v11 = vpop.permute.xlu0 %355  ;;  %v2669_v55 = vsel %vm910_vm0, %v914_v36, %v915_v4 }
 0x118   :  { %402 = vst.msk [vmem:[%s3361_s2 + $0x17] sm:$0x1] %vm397_vm1, %v358_v22  ;;  %3544 = vst [vmem:[#allocation34_spill] sm:$0xff] %v2669_v55  ;;  %v1201_v55 = vmul.f32 0.10825317, %v2537_v6 }
 0x119   :  { %401 = vst.msk [vmem:[%s3361_s2 + $0xf] sm:$0xfe] %vm395_vm2, %v356_v11  ;;  %1027 = vrot.lane.b32.xlu0 %v1012_v46, %s1690_s27  ;;  %1029 = vrot.lane.b32.xlu1 %v1014_v14, %s1690_s27 }
 0x11b   :  { %v362_v27 = vpop.permute.xlu1 %361  ;;  %v360_v13 = vpop.permute.xlu0 %359 }
 0x11c   :  { %404 = vst.msk [vmem:[%s3361_s2 + $0x1f] sm:$0x1] %vm397_vm1, %v362_v27 }
 0x11d   :  { %403 = vst.msk [vmem:[%s3361_s2 + $0x17] sm:$0xfe] %vm395_vm2, %v360_v13 }
 0x11f   :  { %v366_v39 = vpop.permute.xlu1 %365  ;;  %v364_v61 = vpop.permute.xlu0 %363 }
 0x120   :  { %406 = vst.msk [vmem:[%s3361_s2 + $0x27] sm:$0x1] %vm397_vm1, %v366_v39 }
 0x121   :  { %405 = vst.msk [vmem:[%s3361_s2 + $0x1f] sm:$0xfe] %vm395_vm2, %v364_v61 }
 0x123   :  { %v370_v45 = vpop.permute.xlu1 %369  ;;  %v368_v33 = vpop.permute.xlu0 %367 }
 0x124   :  { %408 = vst.msk [vmem:[%s3361_s2 + $0x2f] sm:$0x1] %vm397_vm1, %v370_v45 }
 0x125   :  { %407 = vst.msk [vmem:[%s3361_s2 + $0x27] sm:$0xfe] %vm395_vm2, %v368_v33 }
 0x127   :  { %v374_v29 = vpop.permute.xlu1 %373  ;;  %v372_v47 = vpop.permute.xlu0 %371 }
 0x128   :  { %410 = vst.msk [vmem:[%s3361_s2 + $0x37] sm:$0x1] %vm397_vm1, %v374_v29 }
 0x129   :  { %409 = vst.msk [vmem:[%s3361_s2 + $0x2f] sm:$0xfe] %vm395_vm2, %v372_v47  ;;  %v3545_v47 = vld [vmem:[#allocation18_spill] sm:$0xff] }
 0x12b   :  { %v378_v52 = vpop.permute.xlu1 %377  ;;  %v376_v38 = vpop.permute.xlu0 %375 }
 0x12c   :  { %412 = vst.msk [vmem:[%s3361_s2 + $0x3f] sm:$0x1] %vm397_vm1, %v378_v52  ;;  %v911_v52 = vrot.slane %v3545_v47, 7  ;;  %v2766_v47 = vld [vmem:[%s3360_s1] sm:$0xff] }
 0x12d   :  { %411 = vst.msk [vmem:[%s3361_s2 + $0x37] sm:$0xfe] %vm395_vm2, %v376_v38  ;;  %3547 = vst [vmem:[#allocation36_spill] sm:$0xff] %v2766_v47  ;;  %v1386_v49 = vmul.f32 1.0747595, %v2766_v47 }
 0x13f   :  { %v752_v0 = vpop.permute.xlu1 %751  ;;  %v750_v62 = vpop.permute.xlu0 %749 }
 0x140   :  { %1608 = vst.msk [vmem:[%s3361_s2 + $0x47] sm:$0x1] %vm397_vm1, %v752_v0 }
 0x141   :  { %1607 = vst.msk [vmem:[%s3361_s2 + $0x3f] sm:$0xfe] %vm395_vm2, %v750_v62 }
 0x143   :  { %v756_v50 = vpop.permute.xlu1 %755  ;;  %v754_v46 = vpop.permute.xlu0 %753 }
 0x144   :  { %1610 = vst.msk [vmem:[%s3361_s2 + $0x4f] sm:$0x1] %vm397_vm1, %v756_v50 }
 0x145   :  { %1609 = vst.msk [vmem:[%s3361_s2 + $0x47] sm:$0xfe] %vm395_vm2, %v754_v46  ;;  %v1187_v46 = vmul.f32 0.10825317, %v2425_v28 }
 0x147   :  { %v760_v37 = vpop.permute.xlu1 %759  ;;  %v758_v25 = vpop.permute.xlu0 %757 }
 0x148   :  { %1612 = vst.msk [vmem:[%s3361_s2 + $0x57] sm:$0x1] %vm397_vm1, %v760_v37  ;;  %v1203_v37 = vmul.f32 0.26674682, %v2431_v40  ;;  %v1403_v40 = vadd.f32 %v1387_v12, %v1371_v57  ;;  %v2872_v57 = vld [vmem:[%s3359_s0 + $0x40] sm:$0xff] }
 0x149   :  { %1611 = vst.msk [vmem:[%s3361_s2 + $0x4f] sm:$0xfe] %vm395_vm2, %v758_v25  ;;  %3562 = vst [vmem:[#allocation45_spill] sm:$0xff] %v2872_v57 }
 0x14b   :  { %v764_v14 = vpop.permute.xlu1 %763  ;;  %v762_v22 = vpop.permute.xlu0 %761 }
 0x14c   :  { %1614 = vst.msk [vmem:[%s3361_s2 + $0x5f] sm:$0x1] %vm397_vm1, %v764_v14 }
 0x14d   :  { %1613 = vst.msk [vmem:[%s3361_s2 + $0x57] sm:$0xfe] %vm395_vm2, %v762_v22  ;;  %v1189_v22 = vmul.f32 0.10825317, %v2441_v16 }
 0x14f   :  { %v768_v11 = vpop.permute.xlu1 %767  ;;  %v766_v27 = vpop.permute.xlu0 %765 }
 0x150   :  { %1616 = vst.msk [vmem:[%s3361_s2 + $0x67] sm:$0x1] %vm397_vm1, %v768_v11 }
 0x151   :  { %1615 = vst.msk [vmem:[%s3361_s2 + $0x5f] sm:$0xfe] %vm395_vm2, %v766_v27  ;;  %v1207_v27 = vmul.f32 0.26674682, %v2462_v48 }
 0x153   :  { %v772_v13 = vpop.permute.xlu1 %771  ;;  %v770_v39 = vpop.permute.xlu0 %769 }
 0x154   :  { %1618 = vst.msk [vmem:[%s3361_s2 + $0x6f] sm:$0x1] %vm397_vm1, %v772_v13 }
 0x155   :  { %1617 = vst.msk [vmem:[%s3361_s2 + $0x67] sm:$0xfe] %vm395_vm2, %v770_v39  ;;  %v1193_v39 = vmul.f32 0.10825317, %v2471_v18 }
 0x157   :  { %v776_v61 = vpop.permute.xlu1 %775  ;;  %v774_v45 = vpop.permute.xlu0 %773 }
 0x158   :  { %1620 = vst.msk [vmem:[%s3361_s2 + $0x77] sm:$0x1] %vm397_vm1, %v776_v61  ;;  %v1209_v61 = vmul.f32 0.26674682, %v2477_v53 }
 0x159   :  { %1619 = vst.msk [vmem:[%s3361_s2 + $0x6f] sm:$0xfe] %vm395_vm2, %v774_v45 }
 0x15b   :  { %v780_v33 = vpop.permute.xlu1 %779  ;;  %v778_v29 = vpop.permute.xlu0 %777 }
 0x15c   :  { %1622 = vst.msk [vmem:[%s3361_s2 + $0x7f] sm:$0x1] %vm397_vm1, %v780_v33  ;;  %v2760_v33 = vld [vmem:[%s3359_s0] sm:$0xff] }
 0x15d   :  { %1621 = vst.msk [vmem:[%s3361_s2 + $0x77] sm:$0xfe] %vm395_vm2, %v778_v29  ;;  %3546 = vst [vmem:[#allocation32_spill] sm:$0xff] %v2760_v33  ;;  %v1186_v29 = vmul.f32 0.10825317, %v2760_v33 }
 0x15f   :  { %v847_v38 = vpop.permute.xlu0 %846 }
 0x160   :  { %v894_v23 = vadd.f32 %v847_v38, %v2248_v30  ;;  %v1219_v30 = vadd.f32 %v1203_v37, %v1187_v46  ;;  %v1202_v38 = vmul.f32 0.26674682, %v2766_v47  ;;  %v1197_v37 = vmul.f32 0.10825317, %v2501_v42 }
 0x162   :  { %v951_v4 = vadd.f32 %v911_v52, %v894_v23  ;;  %v3548_v23 = vld [vmem:[#allocation17_spill] sm:$0xff] }
 0x163   :  { %v851_v0 = vpop.permute.xlu0 %850 }
 0x164   :  { %v1039_v62 = vadd.f32 %v951_v4, %v2298_v1  ;;  %v896_v44 = vadd.f32 %v851_v0, %v2271_v56  ;;  %v1205_v1 = vmul.f32 0.26674682, %v2447_v26  ;;  %v912_v4 = vrot.slane %v3548_v23, 7  ;;  %v849_v0 = vpop.permute.xlu1 %848 }
 0x166   :  { %v953_v50 = vadd.f32 %v914_v36, %v896_v44  ;;  %1071 = vrot.lane.b32.xlu0 %v1039_v62, %s1691_s19  ;;  %v2743_v56 = vadd.f32 %v1205_v1, %v1189_v22  ;;  %v1191_v36 = vmul.f32 0.10825317, %v2456_v54  ;;  %v2772_v62 = vadd.f32 %v1209_v61, %v1193_v39  ;;  %v2785_v1 = vld [vmem:[%s3359_s0 + $0x10] sm:$0xff] }
 0x167   :  { %v2734_v25 = vpop.permute.xlu0 %854  ;;  %v1195_v44 = vmul.f32 0.10825317, %v2486_v51  ;;  %v2780_v22 = vadd.f32 %v1202_v38, %v1186_v29  ;;  %3550 = vst [vmem:[#allocation38_spill] sm:$0xff] %v2785_v1  ;;  %v913_v61 = vsel %vm910_vm0, %v911_v52, %v912_v4  ;;  %v1199_v29 = vmul.f32 0.10825317, %v2515_v3  ;;  %v2810_v52 = vld [vmem:[%s3359_s0 + $0x20] sm:$0xff] }
 0x168   :  { %v1041_v14 = vadd.f32 %v953_v50, %v2312_v19  ;;  %v2751_v19 = vadd.f32 %v1207_v27, %v1191_v36  ;;  %v1211_v50 = vmul.f32 0.26674682, %v2492_v10  ;;  %v1188_v36 = vmul.f32 0.10825317, %v2785_v1  ;;  %v2791_v27 = vld [vmem:[%s3360_s1 + $0x10] sm:$0xff]  ;;  %3553 = vst [vmem:[#allocation39_spill] sm:$0xff] %v2810_v52 }
 0x169   :  { %3549 = vst [vmem:[#allocation35_spill] sm:$0xff] %v2780_v22  ;;  %3551 = vst [vmem:[#allocation37_spill] sm:$0xff] %v2791_v27  ;;  %v1204_v39 = vmul.f32 0.26674682, %v2791_v27  ;;  %v1215_v38 = vmul.f32 0.26674682, %v2524_v34 }
 0x16a   :  { %1075 = vrot.lane.b32.xlu0 %v1041_v14, %s1691_s19  ;;  %v895_v14 = vadd.f32 %v849_v0, %v2242_v15  ;;  %v1213_v15 = vmul.f32 0.26674682, %v2507_v24  ;;  %v2800_v23 = vadd.f32 %v1211_v50, %v1195_v44  ;;  %v1370_v0 = vmul.f32 0.050240472, %v2760_v33  ;;  %v2816_v44 = vld [vmem:[%s3360_s1 + $0x20] sm:$0xff] }
 0x16b   :  { %v2740_v11 = vpop.permute.xlu0 %858  ;;  %v1190_v4 = vmul.f32 0.10825317, %v2810_v52  ;;  %3554 = vst [vmem:[#allocation19_spill] sm:$0xff] %v2816_v44  ;;  %v1206_v50 = vmul.f32 0.26674682, %v2816_v44  ;;  %v1315_v33 = vrot.slane %v1219_v30, 7  ;;  %v2819_v43 = vadd.f32 %v1204_v39, %v1188_v36 }
 0x16c   :  { %v952_v47 = vadd.f32 %v913_v61, %v895_v14  ;;  %v2823_v60 = vadd.f32 %v1213_v15, %v1197_v37  ;;  %v3556_v9 = vrot.slane %v2780_v22, 7  ;;  %v2838_v14 = vld [vmem:[%s3359_s0 + $0x30] sm:$0xff]  ;;  %v1217_v61 = vmul.f32 0.26674682, %v2543_v17 }
 0x16d   :  { %3555 = vst [vmem:[#allocation20_spill] sm:$0xff] %v2819_v43  ;;  %3558 = vst [vmem:[#allocation17_spill] sm:$0xff] %v2838_v14  ;;  %v1192_v37 = vmul.f32 0.10825317, %v2838_v14  ;;  %v2844_v36 = vld [vmem:[%s3360_s1 + $0x30] sm:$0xff]  ;;  %v2849_v15 = vadd.f32 %v1386_v49, %v1370_v0 }
 0x16e   :  { %1252 = vrot.lane.b32.xlu0 %v1219_v30, %s1690_s27  ;;  %v2829_v5 = vsel %vm910_vm0, %v3556_v9, %v1315_v33  ;;  %v2833_v30 = vadd.f32 %v1215_v38, %v1199_v29  ;;  %3559 = vst [vmem:[#allocation42_spill] sm:$0xff] %v2844_v36  ;;  %v1208_v9 = vmul.f32 0.26674682, %v2844_v36  ;;  %v3430_v33 = vrot.slane %v2819_v43, 7 }
 0x16f   :  { %v2747_v13 = vpop.permute.xlu0 %862  ;;  %3557 = vst [vmem:[#allocation18_spill] sm:$0xff] %v2829_v5  ;;  %v2851_v29 = vadd.f32 %v1206_v50, %v1190_v4  ;;  %v1318_v38 = vrot.slane %v2743_v56, 7  ;;  %v1372_v28 = vmul.f32 0.050240472, %v2785_v1  ;;  %v1388_v2 = vmul.f32 1.0747595, %v2791_v27 }
 0x170   :  { %v2867_v12 = vadd.f32 %v1208_v9, %v1192_v37  ;;  %v1321_v4 = vrot.slane %v2751_v19, 7  ;;  %v1435_v50 = vrot.slane %v1403_v40, 7  ;;  %v1390_v27 = vmul.f32 1.0747595, %v2816_v44  ;;  %v2911_v40 = vld [vmem:[%s3360_s1 + $0x50] sm:$0xff] }
 0x171   :  { %3560 = vst [vmem:[#allocation43_spill] sm:$0xff] %v2851_v29  ;;  %v2861_v20 = vsel %vm910_vm0, %v3430_v33, %v1318_v38  ;;  %v3433_v49 = vrot.slane %v2851_v29, 7  ;;  %v2883_v37 = vadd.f32 %v1388_v2, %v1372_v28  ;;  %v1374_v33 = vmul.f32 0.050240472, %v2810_v52 }
 0x172   :  { %1256 = vrot.lane.b32.xlu0 %v2743_v56, %s1690_s27  ;;  %3561 = vst [vmem:[#allocation44_spill] sm:$0xff] %v2861_v20  ;;  %v1194_v56 = vmul.f32 0.10825317, %v2872_v57  ;;  %v1324_v1 = vrot.slane %v2772_v62, 7  ;;  %v2898_v2 = vadd.f32 %v1217_v61, %v1201_v55  ;;  %v1391_v55 = vmul.f32 1.0747595, %v2462_v48 }
 0x173   :  { %v2755_v45 = vpop.permute.xlu0 %866  ;;  %v2888_v9 = vsel %vm910_vm0, %v3433_v49, %v1321_v4  ;;  %v1327_v4 = vrot.slane %v2800_v23, 7  ;;  %v2927_v44 = vadd.f32 %v1390_v27, %v1374_v33  ;;  %v1376_v52 = vmul.f32 0.050240472, %v2838_v14  ;;  %v2945_v27 = vld [vmem:[%s3360_s1 + $0x60] sm:$0xff] }
 0x174   :  { %3564 = vst [vmem:[#allocation47_spill] sm:$0xff] %v2888_v9  ;;  %v1214_v33 = vmul.f32 0.26674682, %v2945_v27  ;;  %v1378_v49 = vmul.f32 0.050240472, %v2872_v57  ;;  %v1330_v14 = vrot.slane %v2823_v60, 7 }
 0x176   :  { %1260 = vrot.lane.b32.xlu0 %v2751_v19, %s1690_s27  ;;  %v1212_v19 = vmul.f32 0.26674682, %v2911_v40 }
 0x177   :  { %v2776_v46 = vpop.permute.xlu0 %870 }
 0x17a   :  { %1264 = vrot.lane.b32.xlu0 %v2772_v62, %s1690_s27  ;;  %v1375_v62 = vmul.f32 0.050240472, %v2456_v54 }
 0x17b   :  { %v2805_v31 = vpop.permute.xlu0 %874 }
 0x17c   :  { %3552 = vst [vmem:[#allocation40_spill] sm:$0xff] %v2805_v31  ;;  %v1373_v31 = vmul.f32 0.050240472, %v2441_v16 }
 0x17e   :  { %1268 = vrot.lane.b32.xlu0 %v2800_v23, %s1690_s27  ;;  %v1405_v38 = vadd.f32 %v1389_v32, %v1373_v31  ;;  %v2905_v31 = vld [vmem:[%s3359_s0 + $0x50] sm:$0xff] }
 0x17f   :  { %v1016_v39 = vpop.permute.xlu0 %1015  ;;  %v1196_v32 = vmul.f32 0.10825317, %v2905_v31 }
 0x180   :  { %v1040_v5 = vadd.f32 %v1016_v39, %v952_v47  ;;  %v2878_v47 = vld [vmem:[%s3360_s1 + $0x40] sm:$0xff]  ;;  %v3437_v39 = vrot.slane %v2867_v12, 7 }
 0x181   :  { %3563 = vst [vmem:[#allocation46_spill] sm:$0xff] %v2878_v47  ;;  %v1210_v0 = vmul.f32 0.26674682, %v2878_v47 }
 0x182   :  { %1272 = vrot.lane.b32.xlu0 %v2823_v60, %s1690_s27  ;;  %1073 = vrot.lane.b32.xlu1 %v1040_v5, %s1691_s19  ;;  %v3438_v5 = vrot.slane %v2849_v15, 7  ;;  %v2919_v61 = vsel %vm910_vm0, %v3437_v39, %v1324_v1  ;;  %v2934_v1 = vadd.f32 %v1212_v19, %v1196_v32  ;;  %v1407_v32 = vadd.f32 %v1391_v55, %v1375_v62  ;;  %v2973_v60 = vld [vmem:[%s3359_s0 + $0x70] sm:$0xff] }
 0x183   :  { %v2900_v28 = vadd.f32 %v1210_v0, %v1194_v56  ;;  %3565 = vst [vmem:[#allocation48_spill] sm:$0xff] %v2919_v61  ;;  %v1377_v19 = vmul.f32 0.050240472, %v2471_v18  ;;  %v1392_v39 = vmul.f32 1.0747595, %v2844_v36  ;;  %v3567_v61 = vrot.slane %v2883_v37, 7 }
 0x184   :  { %v1436_v56 = vsel %vm910_vm0, %v3438_v5, %v1435_v50  ;;  %v2939_v50 = vld [vmem:[%s3359_s0 + $0x60] sm:$0xff]  ;;  %v1393_v5 = vmul.f32 1.0747595, %v2477_v53  ;;  %v1394_v62 = vmul.f32 1.0747595, %v2878_v47 }
 0x185   :  { %v3441_v0 = vrot.slane %v2900_v28, 7  ;;  %v1198_v23 = vmul.f32 0.10825317, %v2939_v50  ;;  %v1395_v55 = vmul.f32 1.0747595, %v2492_v10  ;;  %v2988_v47 = vadd.f32 %v1392_v39, %v1376_v52 }
 0x186   :  { %1276 = vrot.lane.b32.xlu0 %v2833_v30, %s1690_s27  ;;  %1250 = vrot.lane.b32.xlu1 %v2780_v22, %s1690_s27  ;;  %v1438_v22 = vrot.slane %v1405_v38, 7  ;;  %v1409_v57 = vadd.f32 %v1393_v5, %v1377_v19  ;;  %v2992_v20 = vadd.f32 %v1394_v62, %v1378_v49  ;;  %v1396_v53 = vmul.f32 1.0747595, %v2911_v40 }
 0x187   :  { %v2951_v38 = vsel %vm910_vm0, %v3441_v0, %v1327_v4  ;;  %v1379_v4 = vmul.f32 0.050240472, %v2486_v51  ;;  %v2968_v0 = vadd.f32 %v1214_v33, %v1198_v23  ;;  %v3453_v23 = vrot.slane %v2927_v44, 7 }
 0x188   :  { %3566 = vst [vmem:[#allocation49_spill] sm:$0xff] %v2951_v38  ;;  %v1439_v9 = vsel %vm910_vm0, %v3567_v61, %v1438_v22  ;;  %v1200_v22 = vmul.f32 0.10825317, %v2973_v60  ;;  %v2979_v61 = vld [vmem:[%s3360_s1 + $0x70] sm:$0xff]  ;;  %v1441_v33 = vrot.slane %v1407_v32, 7  ;;  %v1333_v38 = vrot.slane %v2833_v30, 7 }
 0x189   :  { %v3450_v36 = vrot.slane %v2968_v0, 7  ;;  %v1411_v10 = vadd.f32 %v1395_v55, %v1379_v4  ;;  %v1380_v51 = vmul.f32 0.050240472, %v2905_v31  ;;  %v1381_v52 = vmul.f32 0.050240472, %v2501_v42  ;;  %v3017_v55 = vpop.permute.xlu1 %852 }
 0x18a   :  { %1280 = vrot.lane.b32.xlu0 %v2898_v2, %s1690_s27  ;;  %1254 = vrot.lane.b32.xlu1 %v2819_v43, %s1690_s27  ;;  %v1216_v43 = vmul.f32 0.26674682, %v2979_v61  ;;  %v1442_v49 = vsel %vm910_vm0, %v3453_v23, %v1441_v33  ;;  %v1444_v39 = vrot.slane %v1409_v57, 7  ;;  %v1336_v19 = vrot.slane %v2898_v2, 7 }
 0x18b   :  { %v3006_v30 = vsel %vm910_vm0, %v3450_v36, %v1333_v38  ;;  %v3451_v4 = vrot.slane %v2992_v20, 7  ;;  %v3015_v62 = vadd.f32 %v1396_v53, %v1380_v51  ;;  %v1398_v57 = vmul.f32 1.0747595, %v2945_v27 }
 0x18c   :  { %v3001_v5 = vadd.f32 %v1216_v43, %v1200_v22  ;;  %v1447_v43 = vrot.slane %v1411_v10, 7  ;;  %v1382_v22 = vmul.f32 0.050240472, %v2939_v50  ;;  %v1383_v51 = vmul.f32 0.050240472, %v2515_v3 }
 0x18d   :  { %v1399_v10 = vmul.f32 1.0747595, %v2524_v34  ;;  %v1449_v33 = vrot.slane %v3015_v62, 7  ;;  %v1401_v36 = vmul.f32 1.0747595, %v2543_v17 }
 0x18e   :  { %1460 = vrot.lane.b32.xlu0 %v1436_v56, %s1690_s27  ;;  %1258 = vrot.lane.b32.xlu1 %v2851_v29, %s1690_s27  ;;  %v3568_v56 = vrot.slane %v2934_v1, 7  ;;  %v3449_v32 = vrot.slane %v3001_v5, 7 }
 0x190   :  { %v2985_v29 = vsel %vm910_vm0, %v3568_v56, %v1330_v14  ;;  %v1397_v14 = vmul.f32 1.0747595, %v2507_v24  ;;  %v3027_v2 = vsel %vm910_vm0, %v3449_v32, %v1336_v19  ;;  %v1448_v56 = vsel %vm910_vm0, %v3451_v4, %v1447_v43  ;;  %v857_v43 = vpop.permute.xlu1 %856 }
 0x191   :  { %v1385_v19 = vmul.f32 0.050240472, %v2537_v6  ;;  %v1400_v32 = vmul.f32 1.0747595, %v2979_v61 }
 0x192   :  { %1464 = vrot.lane.b32.xlu0 %v1439_v9, %s1690_s27  ;;  %1262 = vrot.lane.b32.xlu1 %v2867_v12, %s1690_s27  ;;  %v3452_v9 = vrot.slane %v2988_v47, 7  ;;  %v1413_v38 = vadd.f32 %v1397_v14, %v1381_v52  ;;  %v3041_v14 = vadd.f32 %v1398_v57, %v1382_v22 }
 0x194   :  { %v1445_v53 = vsel %vm910_vm0, %v3452_v9, %v1444_v39  ;;  %v1450_v52 = vrot.slane %v1413_v38, 7  ;;  %v1415_v39 = vadd.f32 %v1399_v10, %v1383_v51  ;;  %v1452_v38 = vrot.slane %v3041_v14, 7  ;;  %v861_v51 = vpop.permute.xlu1 %860  ;;  %v3569_v9 = vld [vmem:[#allocation22_spill] sm:$0xff] }
 0x195   :  { %v917_v23 = vrot.slane %v3569_v9, 7 }
 0x196   :  { %1468 = vrot.lane.b32.xlu0 %v1442_v49, %s1690_s27  ;;  %1266 = vrot.lane.b32.xlu1 %v2900_v28, %s1690_s27  ;;  %v1384_v49 = vmul.f32 0.050240472, %v2973_v60  ;;  %v1451_v62 = vsel %vm910_vm0, %v1449_v33, %v1450_v52  ;;  %v1453_v22 = vrot.slane %v1415_v39, 7  ;;  %v898_v52 = vadd.f32 %v2734_v25, %v2283_v58  ;;  %v3571_v39 = vld [vmem:[#allocation24_spill] sm:$0xff] }
 0x197   :  { %v3572_v58 = vrot.slane %v2883_v37, 7  ;;  %v3575_v37 = vld [vmem:[#allocation28_spill] sm:$0xff] }
 0x198   :  { %v1416_v57 = vadd.f32 %v1400_v32, %v1384_v49  ;;  %v1454_v10 = vsel %vm910_vm0, %v1452_v38, %v1453_v22  ;;  %v865_v14 = vpop.permute.xlu1 %864  ;;  %v955_v49 = vadd.f32 %v917_v23, %v898_v52 }
 0x19a   :  { %1472 = vrot.lane.b32.xlu0 %v1445_v53, %s1690_s27  ;;  %1270 = vrot.lane.b32.xlu1 %v2934_v1, %s1690_s27  ;;  %v1417_v53 = vadd.f32 %v1401_v36, %v1385_v19  ;;  %v1455_v4 = vrot.slane %v1416_v57, 7  ;;  %v3570_v36 = vrot.slane %v2849_v15, 7  ;;  %v920_v19 = vrot.slane %v3571_v39, 7  ;;  %v3573_v15 = vld [vmem:[#allocation26_spill] sm:$0xff] }
 0x19b   :  { %v1043_v25 = vadd.f32 %v955_v49, %v2333_v63  ;;  %v923_v22 = vrot.slane %v3573_v15, 7  ;;  %v902_v57 = vadd.f32 %v2747_v13, %v2325_v7  ;;  %v904_v63 = vadd.f32 %v2755_v45, %v2356_v59  ;;  %v3579_v45 = vld [vmem:[#allocation6_spill] sm:$0xff]  ;;  %v3583_v15 = vld [vmem:[#allocation16_spill] sm:$0xff] }
 0x19c   :  { %v3576_v7 = vrot.slane %v2988_v47, 7  ;;  %v3578_v59 = vrot.slane %v2992_v20, 7  ;;  %v3580_v47 = vld [vmem:[#allocation33_spill] sm:$0xff]  ;;  %v3585_v20 = vld [vmem:[#allocation8_spill] sm:$0xff] }
 0x19e   :  { %1476 = vrot.lane.b32.xlu0 %v1448_v56, %s1690_s27  ;;  %1274 = vrot.lane.b32.xlu1 %v2968_v0, %s1690_s27  ;;  %v1456_v56 = vrot.slane %v1417_v53, 7  ;;  %v869_v53 = vpop.permute.xlu1 %868 }
 0x1a0   :  { %v1457_v32 = vsel %vm910_vm0, %v1455_v4, %v1456_v56  ;;  %v926_v56 = vrot.slane %v3575_v37, 7 }
 0x1a2   :  { %1480 = vrot.lane.b32.xlu0 %v1451_v62, %s1690_s27  ;;  %1278 = vrot.lane.b32.xlu1 %v3001_v5, %s1690_s27  ;;  %v900_v62 = vadd.f32 %v2740_v11, %v2310_v8  ;;  %v3574_v8 = vrot.slane %v2927_v44, 7  ;;  %v873_v13 = vpop.permute.xlu1 %872  ;;  %v3577_v44 = vld [vmem:[#allocation30_spill] sm:$0xff] }
 0x1a4   :  { %v957_v9 = vadd.f32 %v920_v19, %v900_v62  ;;  %v932_v62 = vrot.slane %v3580_v47, 7 }
 0x1a6   :  { %1484 = vrot.lane.b32.xlu0 %v1454_v10, %s1690_s27  ;;  %1458 = vrot.lane.b32.xlu1 %v3570_v36, %s1690_s27  ;;  %v1045_v11 = vadd.f32 %v957_v9, %v2358_v35  ;;  %v959_v10 = vadd.f32 %v923_v22, %v902_v57  ;;  %v961_v36 = vadd.f32 %v926_v56, %v904_v63  ;;  %v877_v9 = vpop.permute.xlu1 %876  ;;  %v3587_v63 = vld [vmem:[#allocation34_spill] sm:$0xff] }
 0x1a7   :  { %v906_v35 = vadd.f32 %v2776_v46, %v2371_v41  ;;  %v897_v57 = vadd.f32 %v3017_v55, %v3583_v15  ;;  %v3584_v41 = vld [vmem:[#allocation21_spill] sm:$0xff] }
 0x1a8   :  { %v1047_v52 = vadd.f32 %v959_v10, %v2379_v21  ;;  %v1049_v49 = vadd.f32 %v961_v36, %v3579_v45  ;;  %v918_v46 = vrot.slane %v3584_v41, 7  ;;  %v3586_v10 = vld [vmem:[#allocation41_spill] sm:$0xff] }
 0x1a9   :  { %v899_v37 = vadd.f32 %v857_v43, %v3586_v10  ;;  %v3595_v10 = vld [vmem:[#allocation29_spill] sm:$0xff] }
 0x1aa   :  { %1488 = vrot.lane.b32.xlu0 %v1457_v32, %s1690_s27  ;;  %1462 = vrot.lane.b32.xlu1 %v3572_v58, %s1690_s27  ;;  %v929_v32 = vrot.slane %v3577_v44, 7  ;;  %v3581_v58 = vld [vmem:[#allocation3_spill] sm:$0xff]  ;;  %v1018_v55 = vpop.permute.xlu1 %1017  ;;  %v919_v44 = vsel %vm910_vm0, %v917_v23, %v918_v46 }
 0x1ac   :  { %v963_v39 = vadd.f32 %v929_v32, %v906_v35  ;;  %v3589_v35 = vld [vmem:[#allocation11_spill] sm:$0xff] }
 0x1ae   :  { %1079 = vrot.lane.b32.xlu0 %v1043_v25, %s1691_s19  ;;  %1466 = vrot.lane.b32.xlu1 %v3574_v8, %s1690_s27  ;;  %v3582_v25 = vld [vmem:[#allocation40_spill] sm:$0xff]  ;;  %v1051_v8 = vadd.f32 %v963_v39, %v3585_v20  ;;  %v3591_v39 = vld [vmem:[#allocation25_spill] sm:$0xff]  ;;  %v1022_v46 = vpop.permute.xlu1 %1021 }
 0x1af   :  { %v908_v21 = vadd.f32 %v3582_v25, %v3581_v58  ;;  %v924_v47 = vrot.slane %v3591_v39, 7  ;;  %v1020_v58 = vpop.permute.xlu0 %1019  ;;  %v3592_v25 = vld [vmem:[#allocation9_spill] sm:$0xff] }
 0x1b0   :  { %v3594_v20 = vld [vmem:[#allocation5_spill] sm:$0xff] }
 0x1b2   :  { %1083 = vrot.lane.b32.xlu0 %v1045_v11, %s1691_s19  ;;  %1470 = vrot.lane.b32.xlu1 %v3576_v7, %s1690_s27  ;;  %v965_v11 = vadd.f32 %v932_v62, %v908_v21  ;;  %v954_v7 = vadd.f32 %v3587_v63, %v897_v57  ;;  %v903_v21 = vadd.f32 %v865_v14, %v3592_v25  ;;  %v3593_v57 = vld [vmem:[#allocation27_spill] sm:$0xff]  ;;  %v3596_v63 = vld [vmem:[#allocation4_spill] sm:$0xff] }
 0x1b3   :  { %v927_v41 = vrot.slane %v3593_v57, 7  ;;  %v1024_v14 = vpop.permute.xlu0 %1023  ;;  %v3600_v57 = vld [vmem:[#allocation7_spill] sm:$0xff] }
 0x1b4   :  { %v1042_v43 = vadd.f32 %v1018_v55, %v954_v7  ;;  %v907_v7 = vadd.f32 %v873_v13, %v3596_v63  ;;  %v3597_v55 = vld [vmem:[#allocation31_spill] sm:$0xff] }
 0x1b6   :  { %1087 = vrot.lane.b32.xlu0 %v1047_v52, %s1691_s19  ;;  %1474 = vrot.lane.b32.xlu1 %v3578_v59, %s1690_s27  ;;  %v3588_v52 = vld [vmem:[#allocation23_spill] sm:$0xff]  ;;  %v3590_v59 = vld [vmem:[#allocation10_spill] sm:$0xff] }
 0x1b7   :  { %v921_v36 = vrot.slane %v3588_v52, 7  ;;  %v901_v45 = vadd.f32 %v861_v51, %v3590_v59  ;;  %v925_v51 = vsel %vm910_vm0, %v923_v22, %v924_v47  ;;  %v933_v22 = vrot.slane %v3597_v55, 7 }
 0x1ba   :  { %1091 = vrot.lane.b32.xlu0 %v1049_v49, %s1691_s19  ;;  %1478 = vrot.lane.b32.xlu1 %v1449_v33, %s1690_s27  ;;  %v1053_v33 = vadd.f32 %v965_v11, %v3589_v35  ;;  %v956_v49 = vadd.f32 %v919_v44, %v899_v37  ;;  %v928_v37 = vsel %vm910_vm0, %v926_v56, %v927_v41  ;;  %v3598_v35 = vld [vmem:[#allocation2_spill] sm:$0xff]  ;;  %v1155_v41 = vmul.f32 -0.10825317, %v3600_v57 }
 0x1bb   :  { %v934_v56 = vsel %vm910_vm0, %v932_v62, %v933_v22  ;;  %v1145_v22 = vmul.f32 0.23325318, %v2471_v18 }
 0x1bc   :  { %v1044_v15 = vadd.f32 %v1020_v58, %v956_v49 }
 0x1be   :  { %1095 = vrot.lane.b32.xlu0 %v1051_v8, %s1691_s19  ;;  %1482 = vrot.lane.b32.xlu1 %v1452_v38, %s1690_s27  ;;  %v922_v38 = vsel %vm910_vm0, %v920_v19, %v921_v36  ;;  %v960_v8 = vadd.f32 %v925_v51, %v903_v21  ;;  %v930_v19 = vrot.slane %v3595_v10, 7 }
 0x1bf   :  { %v958_v23 = vadd.f32 %v922_v38, %v901_v45  ;;  %v1028_v45 = vpop.permute.xlu0 %1027 }
 0x1c0   :  { %v1048_v52 = vadd.f32 %v1024_v14, %v960_v8  ;;  %v931_v44 = vsel %vm910_vm0, %v929_v32, %v930_v19  ;;  %v1157_v8 = vmul.f32 -0.10825317, %v2447_v26  ;;  %v1143_v19 = vmul.f32 0.23325318, %v2456_v54 }
 0x1c1   :  { %v1046_v11 = vadd.f32 %v1022_v46, %v958_v23  ;;  %v964_v59 = vadd.f32 %v931_v44, %v907_v7  ;;  %v3601_v44 = vld [vmem:[#allocation12_spill] sm:$0xff] }
 0x1c2   :  { %1099 = vrot.lane.b32.xlu0 %v1053_v33, %s1691_s19  ;;  %1486 = vrot.lane.b32.xlu1 %v1455_v4, %s1690_s27  ;;  %v905_v4 = vadd.f32 %v869_v53, %v3594_v20  ;;  %v1026_v53 = vpop.permute.xlu1 %1025  ;;  %v909_v33 = vadd.f32 %v877_v9, %v3598_v35 }
 0x1c3   :  { %v1052_v49 = vadd.f32 %v1028_v45, %v964_v59  ;;  %v3603_v59 = vld [vmem:[#allocation14_spill] sm:$0xff]  ;;  %v3604_v45 = vld [vmem:[#allocation15_spill] sm:$0xff] }
 0x1c4   :  { %v962_v36 = vadd.f32 %v928_v37, %v905_v4  ;;  %v966_v13 = vadd.f32 %v934_v56, %v909_v33  ;;  %v1141_v4 = vmul.f32 0.23325318, %v2441_v16  ;;  %v1159_v37 = vmul.f32 -0.10825317, %v2462_v48 }
 0x1c5   :  { %v1161_v16 = vmul.f32 -0.10825317, %v3601_v44  ;;  %v1147_v48 = vmul.f32 0.23325318, %v3603_v59 }
 0x1c6   :  { %1077 = vrot.lane.b32.xlu1 %v1042_v43, %s1691_s19  ;;  %v1050_v43 = vadd.f32 %v1026_v53, %v962_v36  ;;  %v1030_v39 = vpop.permute.xlu1 %1029  ;;  %v1173_v63 = vadd.f32 %v1157_v8, %v1141_v4  ;;  %v1175_v36 = vadd.f32 %v1159_v37, %v1143_v19  ;;  %v3602_v53 = vld [vmem:[#allocation18_spill] sm:$0xff]  ;;  %v3608_v8 = vld [vmem:[#allocation36_spill] sm:$0xff]  ;;  %v1151_v37 = vmul.f32 0.23325318, %v2515_v3 }
 0x1c7   :  { %v1054_v32 = vadd.f32 %v1030_v39, %v966_v13  ;;  %v3605_v13 = vld [vmem:[#allocation44_spill] sm:$0xff]  ;;  %v1154_v19 = vmul.f32 -0.10825317, %v3608_v8  ;;  %v1153_v3 = vmul.f32 0.23325318, %v2537_v6 }
 0x1ca   :  { %1081 = vrot.lane.b32.xlu1 %v1044_v15, %s1691_s19  ;;  %v3599_v15 = vld [vmem:[#allocation13_spill] sm:$0xff] }
 0x1cb   :  { %v1139_v23 = vmul.f32 0.23325318, %v3599_v15  ;;  %v1165_v15 = vmul.f32 -0.10825317, %v2507_v24  ;;  %v3609_v24 = vld [vmem:[#allocation48_spill] sm:$0xff] }
 0x1cd   :  { %v1171_v20 = vadd.f32 %v1155_v41, %v1139_v23  ;;  %v3606_v23 = vld [vmem:[#allocation47_spill] sm:$0xff] }
 0x1ce   :  { %1085 = vrot.lane.b32.xlu1 %v1046_v11, %s1691_s19 }
 0x1d2   :  { %1089 = vrot.lane.b32.xlu1 %v1048_v52, %s1691_s19 }
 0x1d6   :  { %1093 = vrot.lane.b32.xlu1 %v1050_v43, %s1691_s19  ;;  %v1163_v43 = vmul.f32 -0.10825317, %v3604_v45 }
 0x1d8   :  { %v1072_v47 = vpop.permute.xlu0 %1071 }
 0x1d9   :  { %1623 = vst.msk [vmem:[%s3361_s2 + $0x7e] sm:$0xfc] %vm1120_vm3, %v1072_v47 }
 0x1da   :  { %1097 = vrot.lane.b32.xlu1 %v1052_v49, %s1691_s19  ;;  %v1177_v49 = vadd.f32 %v1161_v16, %v1145_v22 }
 0x1dc   :  { %v1076_v9 = vpop.permute.xlu0 %1075 }
 0x1dd   :  { %1625 = vst.msk [vmem:[%s3361_s2 + $0x86] sm:$0xfc] %vm1120_vm3, %v1076_v9  ;;  %v1179_v9 = vadd.f32 %v1163_v43, %v1147_v48 }
 0x1de   :  { %1101 = vrot.lane.b32.xlu1 %v1054_v32, %s1691_s19 }
 0x1e0   :  { %v1253_v62 = vpop.permute.xlu0 %1252 }
 0x1e1   :  { %v1299_v14 = vadd.f32 %v1253_v62, %v1171_v20 }
 0x1e3   :  { %v1355_v26 = vadd.f32 %v3602_v53, %v1299_v14  ;;  %v3610_v53 = vld [vmem:[#allocation38_spill] sm:$0xff] }
 0x1e4   :  { %v1257_v38 = vpop.permute.xlu0 %1256 }
 0x1e5   :  { %v1301_v55 = vadd.f32 %v1257_v38, %v1173_v63  ;;  %v1149_v38 = vmul.f32 0.23325318, %v2501_v42 }
 0x1e7   :  { %v1357_v39 = vadd.f32 %v3605_v13, %v1301_v55  ;;  %v1181_v42 = vadd.f32 %v1165_v15, %v1149_v38  ;;  %v3613_v13 = vld [vmem:[#allocation39_spill] sm:$0xff] }
 0x1e8   :  { %v1261_v58 = vpop.permute.xlu0 %1260 }
 0x1e9   :  { %v1303_v56 = vadd.f32 %v1261_v58, %v1175_v36 }
 0x1eb   :  { %v1359_v57 = vadd.f32 %v3606_v23, %v1303_v56 }
 0x1ec   :  { %v1265_v25 = vpop.permute.xlu0 %1264 }
 0x1ed   :  { %v1305_v62 = vadd.f32 %v1265_v25, %v1177_v49  ;;  %v1167_v25 = vmul.f32 -0.10825317, %v2524_v34  ;;  %v1169_v34 = vmul.f32 -0.10825317, %v2543_v17 }
 0x1ef   :  { %v1361_v63 = vadd.f32 %v3609_v24, %v1305_v62  ;;  %v1183_v16 = vadd.f32 %v1167_v25, %v1151_v37 }
 0x1f0   :  { %v1269_v21 = vpop.permute.xlu0 %1268 }
 0x1f1   :  { %v1307_v14 = vadd.f32 %v1269_v21, %v1179_v9  ;;  %v3612_v21 = vld [vmem:[#allocation49_spill] sm:$0xff] }
 0x1f3   :  { %v1363_v48 = vadd.f32 %v3612_v21, %v1307_v14  ;;  %v1148_v21 = vmul.f32 0.23325318, %v2905_v31  ;;  %v1166_v31 = vmul.f32 -0.10825317, %v2945_v27  ;;  %v1152_v27 = vmul.f32 0.23325318, %v2973_v60 }
 0x1f4   :  { %v1074_v51 = vpop.permute.xlu1 %1073  ;;  %v1273_v46 = vpop.permute.xlu0 %1272  ;;  %v3627_v60 = vrot.slane %v2934_v1, 7  ;;  %v3629_v1 = vrot.slane %v3001_v5, 7 }
 0x1f5   :  { %1624 = vst.msk [vmem:[%s3361_s2 + $0x86] sm:$0x3] %vm1122_vm4, %v1074_v51  ;;  %v3607_v51 = vld [vmem:[#allocation32_spill] sm:$0xff]  ;;  %v1309_v59 = vadd.f32 %v1273_v46, %v1181_v42  ;;  %v1185_v46 = vadd.f32 %v1169_v34, %v1153_v3 }
 0x1f6   :  { %v1138_v20 = vmul.f32 0.23325318, %v3607_v51  ;;  %v3616_v51 = vld [vmem:[#allocation42_spill] sm:$0xff] }
 0x1f7   :  { %v1365_v6 = vadd.f32 %v2985_v29, %v1309_v59 }
 0x1f8   :  { %v1251_v11 = vpop.permute.xlu1 %1250  ;;  %v1277_v10 = vpop.permute.xlu0 %1276  ;;  %v1170_v44 = vadd.f32 %v1154_v19, %v1138_v20  ;;  %v1160_v20 = vmul.f32 -0.10825317, %v3616_v51 }
 0x1f9   :  { %v1311_v62 = vadd.f32 %v1277_v10, %v1183_v16 }
 0x1fa   :  { %v1298_v9 = vadd.f32 %v1251_v11, %v1170_v44  ;;  %v3617_v11 = vld [vmem:[#allocation35_spill] sm:$0xff] }
 0x1fb   :  { %v3618_v10 = vrot.slane %v3617_v11, 7  ;;  %v1367_v29 = vadd.f32 %v3006_v30, %v1311_v62 }
 0x1fc   :  { %v3153_v7 = vpop.permute.xlu1 %1254  ;;  %v3155_v52 = vpop.permute.xlu0 %1280 }
 0x1fd   :  { %v1313_v8 = vadd.f32 %v3155_v52, %v1185_v46  ;;  %v1354_v19 = vadd.f32 %v3618_v10, %v1298_v9  ;;  %v3621_v52 = vld [vmem:[#allocation20_spill] sm:$0xff] }
 0x1fe   :  { %v3622_v16 = vrot.slane %v3621_v52, 7 }
 0x1ff   :  { %v1369_v30 = vadd.f32 %v3027_v2, %v1313_v8 }
 0x200   :  { %v3160_v35 = vpop.permute.xlu1 %1258  ;;  %v1461_v33 = vpop.permute.xlu0 %1460 }
 0x201   :  { %v1507_v54 = vadd.f32 %v1461_v33, %v1355_v26  ;;  %v1140_v26 = vmul.f32 0.23325318, %v3610_v53  ;;  %v3611_v33 = vld [vmem:[#allocation37_spill] sm:$0xff] }
 0x203   :  { %1540 = vrot.lane.b32.xlu1 %v1507_v54, %s1692_s20  ;;  %v1156_v54 = vmul.f32 -0.10825317, %v3611_v33 }
 0x204   :  { %v3166_v47 = vpop.permute.xlu1 %1262  ;;  %v1465_v18 = vpop.permute.xlu0 %1464 }
 0x205   :  { %v1509_v32 = vadd.f32 %v1465_v18, %v1357_v39  ;;  %v1172_v49 = vadd.f32 %v1156_v54, %v1140_v26  ;;  %v1142_v39 = vmul.f32 0.23325318, %v3613_v13  ;;  %v3614_v18 = vld [vmem:[#allocation19_spill] sm:$0xff] }
 0x207   :  { %1544 = vrot.lane.b32.xlu1 %v1509_v32, %s1692_s20  ;;  %v1158_v32 = vmul.f32 -0.10825317, %v3614_v18  ;;  %v3625_v18 = vrot.slane %v2867_v12, 7  ;;  %v3626_v12 = vrot.slane %v2900_v28, 7 }
 0x208   :  { %v3172_v58 = vpop.permute.xlu1 %1266  ;;  %v1469_v41 = vpop.permute.xlu0 %1468 }
 0x209   :  { %v1511_v4 = vadd.f32 %v1469_v41, %v1359_v57  ;;  %v1174_v23 = vadd.f32 %v1158_v32, %v1142_v39  ;;  %v3615_v57 = vld [vmem:[#allocation17_spill] sm:$0xff] }
 0x20a   :  { %v1144_v41 = vmul.f32 0.23325318, %v3615_v57 }
 0x20b   :  { %1548 = vrot.lane.b32.xlu1 %v1511_v4, %s1692_s20  ;;  %v1300_v4 = vadd.f32 %v3153_v7, %v1172_v49  ;;  %v1302_v7 = vadd.f32 %v3160_v35, %v1174_v23  ;;  %v1164_v35 = vmul.f32 -0.10825317, %v2911_v40 }
 0x20c   :  { %v3180_v36 = vpop.permute.xlu1 %1270  ;;  %v1473_v55 = vpop.permute.xlu0 %1472  ;;  %v1176_v24 = vadd.f32 %v1160_v20, %v1144_v41 }
 0x20d   :  { %v1513_v22 = vadd.f32 %v1473_v55, %v1361_v63  ;;  %v3619_v63 = vld [vmem:[#allocation45_spill] sm:$0xff]  ;;  %v1356_v53 = vadd.f32 %v3622_v16, %v1300_v4  ;;  %v1180_v39 = vadd.f32 %v1164_v35, %v1148_v21 }
 0x20e   :  { %v1146_v55 = vmul.f32 0.23325318, %v3619_v63  ;;  %v1304_v34 = vadd.f32 %v3166_v47, %v1176_v24  ;;  %v1150_v47 = vmul.f32 0.23325318, %v2939_v50 }
 0x20f   :  { %1552 = vrot.lane.b32.xlu1 %v1513_v22, %s1692_s20  ;;  %v3620_v22 = vld [vmem:[#allocation46_spill] sm:$0xff]  ;;  %v1308_v50 = vadd.f32 %v3180_v36, %v1180_v39 }
 0x210   :  { %v3188_v45 = vpop.permute.xlu1 %1274  ;;  %v1477_v43 = vpop.permute.xlu0 %1476  ;;  %v1162_v44 = vmul.f32 -0.10825317, %v3620_v22  ;;  %v1360_v32 = vadd.f32 %v3625_v18, %v1304_v34 }
 0x211   :  { %v1515_v56 = vadd.f32 %v1477_v43, %v1363_v48  ;;  %v3623_v48 = vld [vmem:[#allocation43_spill] sm:$0xff] }
 0x212   :  { %v1178_v3 = vadd.f32 %v1162_v44, %v1146_v55  ;;  %v3624_v43 = vrot.slane %v3623_v48, 7 }
 0x213   :  { %1556 = vrot.lane.b32.xlu1 %v1515_v56, %s1692_s20 }
 0x214   :  { %v3194_v17 = vpop.permute.xlu1 %1278  ;;  %v1481_v38 = vpop.permute.xlu0 %1480  ;;  %v1358_v56 = vadd.f32 %v3624_v43, %v1302_v7  ;;  %v1306_v40 = vadd.f32 %v3172_v58, %v1178_v3  ;;  %v1168_v58 = vmul.f32 -0.10825317, %v2979_v61  ;;  %v1364_v61 = vadd.f32 %v3627_v60, %v1308_v50 }
 0x215   :  { %v1517_v15 = vadd.f32 %v1481_v38, %v1365_v6  ;;  %v1182_v6 = vadd.f32 %v1166_v31, %v1150_v47 }
 0x216   :  { %v1362_v38 = vadd.f32 %v3626_v12, %v1306_v40  ;;  %v1184_v36 = vadd.f32 %v1168_v58, %v1152_v27 }
 0x217   :  { %1560 = vrot.lane.b32.xlu1 %v1517_v15, %s1692_s20  ;;  %v1310_v41 = vadd.f32 %v3188_v45, %v1182_v6  ;;  %v3628_v45 = vrot.slane %v2968_v0, 7 }
 0x218   :  { %v1459_v37 = vpop.permute.xlu1 %1458  ;;  %v1485_v25 = vpop.permute.xlu0 %1484  ;;  %v1312_v4 = vadd.f32 %v3194_v17, %v1184_v36 }
 0x219   :  { %v1506_v14 = vadd.f32 %v1459_v37, %v1354_v19  ;;  %v1519_v42 = vadd.f32 %v1485_v25, %v1367_v29  ;;  %v1366_v8 = vadd.f32 %v3628_v45, %v1310_v41 }
 0x21a   :  { %v1368_v29 = vadd.f32 %v3629_v1, %v1312_v4 }
 0x21b   :  { %1538 = vrot.lane.b32.xlu0 %v1506_v14, %s1692_s20  ;;  %1564 = vrot.lane.b32.xlu1 %v1519_v42, %s1692_s20 }
 0x21c   :  { %v1463_v26 = vpop.permute.xlu1 %1462  ;;  %v1489_v33 = vpop.permute.xlu0 %1488 }
 0x21d   :  { %v1508_v54 = vadd.f32 %v1463_v26, %v1356_v53  ;;  %v1521_v59 = vadd.f32 %v1489_v33, %v1369_v30 }
 0x21f   :  { %1542 = vrot.lane.b32.xlu0 %v1508_v54, %s1692_s20  ;;  %1568 = vrot.lane.b32.xlu1 %v1521_v59, %s1692_s20 }
 0x220   :  { %v1467_v49 = vpop.permute.xlu1 %1466  ;;  %v1080_v2 = vpop.permute.xlu0 %1079 }
 0x221   :  { %v1510_v13 = vadd.f32 %v1467_v49, %v1358_v56  ;;  %1627 = vst.msk [vmem:[%s3361_s2 + $0x8e] sm:$0xfc] %vm1120_vm3, %v1080_v2 }
 0x223   :  { %1546 = vrot.lane.b32.xlu0 %v1510_v13, %s1692_s20 }
 0x224   :  { %v1471_v9 = vpop.permute.xlu1 %1470  ;;  %v1084_v62 = vpop.permute.xlu0 %1083 }
 0x225   :  { %v1512_v46 = vadd.f32 %v1471_v9, %v1360_v32  ;;  %1629 = vst.msk [vmem:[%s3361_s2 + $0x96] sm:$0xfc] %vm1120_vm3, %v1084_v62 }
 0x227   :  { %1550 = vrot.lane.b32.xlu0 %v1512_v46, %s1692_s20 }
 0x228   :  { %v1475_v15 = vpop.permute.xlu1 %1474  ;;  %v1088_v23 = vpop.permute.xlu0 %1087 }
 0x229   :  { %v1514_v57 = vadd.f32 %v1475_v15, %v1362_v38  ;;  %1631 = vst.msk [vmem:[%s3361_s2 + $0x9e] sm:$0xfc] %vm1120_vm3, %v1088_v23 }
 0x22b   :  { %1554 = vrot.lane.b32.xlu0 %v1514_v57, %s1692_s20 }
 0x22c   :  { %v1479_v51 = vpop.permute.xlu1 %1478  ;;  %v1092_v20 = vpop.permute.xlu0 %1091 }
 0x22d   :  { %v1516_v28 = vadd.f32 %v1479_v51, %v1364_v61  ;;  %1633 = vst.msk [vmem:[%s3361_s2 + $0xa6] sm:$0xfc] %vm1120_vm3, %v1092_v20 }
 0x22f   :  { %1558 = vrot.lane.b32.xlu0 %v1516_v28, %s1692_s20 }
 0x230   :  { %v1483_v11 = vpop.permute.xlu1 %1482  ;;  %v1096_v10 = vpop.permute.xlu0 %1095 }
 0x231   :  { %v1518_v19 = vadd.f32 %v1483_v11, %v1366_v8  ;;  %1635 = vst.msk [vmem:[%s3361_s2 + $0xae] sm:$0xfc] %vm1120_vm3, %v1096_v10 }
 0x233   :  { %1562 = vrot.lane.b32.xlu0 %v1518_v19, %s1692_s20 }
 0x234   :  { %v1487_v37 = vpop.permute.xlu1 %1486  ;;  %v1100_v17 = vpop.permute.xlu0 %1099 }
 0x235   :  { %v1520_v25 = vadd.f32 %v1487_v37, %v1368_v29  ;;  %1637 = vst.msk [vmem:[%s3361_s2 + $0xb6] sm:$0xfc] %vm1120_vm3, %v1100_v17 }
 0x237   :  { %1566 = vrot.lane.b32.xlu0 %v1520_v25, %s1692_s20 }
 0x238   :  { %v1078_v0 = vpop.permute.xlu1 %1077 }
 0x239   :  { %1626 = vst.msk [vmem:[%s3361_s2 + $0x8e] sm:$0x3] %vm1122_vm4, %v1078_v0 }
 0x23c   :  { %v1082_v14 = vpop.permute.xlu1 %1081 }
 0x23d   :  { %1628 = vst.msk [vmem:[%s3361_s2 + $0x96] sm:$0x3] %vm1122_vm4, %v1082_v14 }
 0x240   :  { %v1086_v5 = vpop.permute.xlu1 %1085 }
 0x241   :  { %1630 = vst.msk [vmem:[%s3361_s2 + $0x9e] sm:$0x3] %vm1122_vm4, %v1086_v5 }
 0x244   :  { %v1090_v42 = vpop.permute.xlu1 %1089 }
 0x245   :  { %1632 = vst.msk [vmem:[%s3361_s2 + $0xa6] sm:$0x3] %vm1122_vm4, %v1090_v42 }
 0x248   :  { %v1094_v24 = vpop.permute.xlu1 %1093 }
 0x249   :  { %1634 = vst.msk [vmem:[%s3361_s2 + $0xae] sm:$0x3] %vm1122_vm4, %v1094_v24 }
 0x24c   :  { %v1098_v63 = vpop.permute.xlu1 %1097 }
 0x24d   :  { %1636 = vst.msk [vmem:[%s3361_s2 + $0xb6] sm:$0x3] %vm1122_vm4, %v1098_v63 }
 0x250   :  { %v1102_v55 = vpop.permute.xlu1 %1101 }
 0x251   :  { %1638 = vst.msk [vmem:[%s3361_s2 + $0xbe] sm:$0x3] %vm1122_vm4, %v1102_v55 }
 0x275   :  { %v1541_v22 = vpop.permute.xlu1 %1540 }
 0x276   :  { %1640 = vst.msk [vmem:[%s3361_s2 + $0xc6] sm:$0x3] %vm1122_vm4, %v1541_v22 }
 0x279   :  { %v1545_v44 = vpop.permute.xlu1 %1544 }
 0x27a   :  { %1642 = vst.msk [vmem:[%s3361_s2 + $0xce] sm:$0x3] %vm1122_vm4, %v1545_v44 }
 0x27d   :  { %v1549_v7 = vpop.permute.xlu1 %1548 }
 0x27e   :  { %1644 = vst.msk [vmem:[%s3361_s2 + $0xd6] sm:$0x3] %vm1122_vm4, %v1549_v7 }
 0x281   :  { %v1553_v52 = vpop.permute.xlu1 %1552 }
 0x282   :  { %1646 = vst.msk [vmem:[%s3361_s2 + $0xde] sm:$0x3] %vm1122_vm4, %v1553_v52 }
 0x285   :  { %v1557_v16 = vpop.permute.xlu1 %1556 }
 0x286   :  { %1648 = vst.msk [vmem:[%s3361_s2 + $0xe6] sm:$0x3] %vm1122_vm4, %v1557_v16 }
 0x289   :  { %v1561_v53 = vpop.permute.xlu1 %1560 }
 0x28a   :  { %1650 = vst.msk [vmem:[%s3361_s2 + $0xee] sm:$0x3] %vm1122_vm4, %v1561_v53 }
 0x28d   :  { %v1565_v30 = vpop.permute.xlu1 %1564  ;;  %v1539_v26 = vpop.permute.xlu0 %1538 }
 0x28e   :  { %1652 = vst.msk [vmem:[%s3361_s2 + $0xf6] sm:$0x3] %vm1122_vm4, %v1565_v30 }
 0x28f   :  { %1639 = vst.msk [vmem:[%s3361_s2 + $0xbe] sm:$0xfc] %vm1120_vm3, %v1539_v26 }
 0x291   :  { %v1569_v33 = vpop.permute.xlu1 %1568  ;;  %v1543_v54 = vpop.permute.xlu0 %1542 }
 0x292   :  { %1654 = vst.msk [vmem:[%s3361_s2 + $0xfe] sm:$0x3] %vm1122_vm4, %v1569_v33 }
 0x293   :  { %1641 = vst.msk [vmem:[%s3361_s2 + $0xc6] sm:$0xfc] %vm1120_vm3, %v1543_v54 }
 0x295   :  { %v1547_v59 = vpop.permute.xlu0 %1546 }
 0x296   :  { %1643 = vst.msk [vmem:[%s3361_s2 + $0xce] sm:$0xfc] %vm1120_vm3, %v1547_v59 }
 0x299   :  { %v1551_v3 = vpop.permute.xlu0 %1550 }
 0x29a   :  { %1645 = vst.msk [vmem:[%s3361_s2 + $0xd6] sm:$0xfc] %vm1120_vm3, %v1551_v3 }
 0x29d   :  { %v1555_v34 = vpop.permute.xlu0 %1554 }
 0x29e   :  { %1647 = vst.msk [vmem:[%s3361_s2 + $0xde] sm:$0xfc] %vm1120_vm3, %v1555_v34 }
 0x2a1   :  { %v1559_v21 = vpop.permute.xlu0 %1558 }
 0x2a2   :  { %1649 = vst.msk [vmem:[%s3361_s2 + $0xe6] sm:$0xfc] %vm1120_vm3, %v1559_v21 }
 0x2a5   :  { %v1563_v35 = vpop.permute.xlu0 %1562 }
 0x2a6   :  { %1651 = vst.msk [vmem:[%s3361_s2 + $0xee] sm:$0xfc] %vm1120_vm3, %v1563_v35 }
 0x2a9   :  { %v1567_v48 = vpop.permute.xlu0 %1566 }
 0x2aa   :  { %1653 = vst.msk [vmem:[%s3361_s2 + $0xf6] sm:$0xfc] %vm1120_vm3, %v1567_v48 }

// kernel: wtab1_forward.14
= control target key start
LH: loop header
LB: loop body
LE: loop exit
PB: predicated region body
PF: predicated region fallthrough
CT: control target
= control target key end

     0   :  { %s3393_s14 = smov 127   ;;  %vm339_vm0 = vcmask 1046528   ;;  %vm932_vm1 = vcmask 64512   ;;  %s7347_s0 = inlined_call_operand.vmem [shape: f32[4,8,9,9], index: 0, kind: input, shape index: {}]   ;;  %s7348_s1 = inlined_call_operand.vmem [shape: f32[4,8,8,8], index: 1, kind: output, shape index: {}]  }
   0x1   :  { %v3407_v0 = vld [vmem:[%s7347_s0 + $0x20] sm:$0xff]  ;;  %v3417_v2 = vld [vmem:[%s7347_s0 + $0x30] sm:$0xff]  ;;  %v3645_v58 = vld [vmem:[%s7347_s0 + $0x18] sm:$0x1] }
   0x2   :  { %v3412_v1 = vld [vmem:[%s7347_s0] sm:$0xff]  ;;  %7646 = vst [vmem:[#allocation3_spill] sm:$0xff] %v3417_v2  ;;  %v3420_v3 = vmul.f32 0.10825317, %v3407_v0  ;;  %v3428_v5 = vld [vmem:[%s7347_s0 + $0x10] sm:$0xff]  ;;  %7662 = vst [vmem:[#allocation19_spill] sm:$0xff] %v3645_v58 }
   0x3   :  { %7645 = vst [vmem:[#allocation2_spill] sm:$0xff] %v3412_v1  ;;  %v3423_v4 = vmul.f32 0.10825317, %v3412_v1  ;;  %7647 = vst [vmem:[#allocation4_spill] sm:$0xff] %v3428_v5  ;;  %v3435_v6 = vmul.f32 0.10825317, %v3417_v2 }
   0x4   :  { %119 = vrot.lane.b32.xlu1 %v3420_v3, %s3393_s14  ;;  %v3438_v7 = vmul.f32 0.10825317, %v3428_v5  ;;  %v3443_v8 = vld [vmem:[%s7347_s0 + $0x50] sm:$0xff]  ;;  %v3448_v9 = vld [vmem:[%s7347_s0 + $0x40] sm:$0xff]  ;;  %v3650_v59 = vld [vmem:[%s7347_s0 + $0x8] sm:$0x1] }
   0x5   :  { %115 = vrot.lane.b32.xlu0 %v3423_v4, %s3393_s14  ;;  %7648 = vst [vmem:[#allocation5_spill] sm:$0xff] %v3443_v8  ;;  %7649 = vst [vmem:[#allocation6_spill] sm:$0xff] %v3448_v9  ;;  %v3455_v10 = vmul.f32 0.10825317, %v3443_v8  ;;  %v3458_v11 = vmul.f32 0.10825317, %v3448_v9 }
   0x6   :  { %v3463_v12 = vld [vmem:[%s7347_s0 + $0x70] sm:$0xff]  ;;  %v3468_v13 = vld [vmem:[%s7347_s0 + $0x60] sm:$0xff]  ;;  %7663 = vst [vmem:[#allocation20_spill] sm:$0xff] %v3650_v59  ;;  %v452_v60 = vmul.f32 0.050240472, %v3412_v1 }
   0x7   :  { %7650 = vst [vmem:[#allocation7_spill] sm:$0xff] %v3455_v10  ;;  %7651 = vst [vmem:[#allocation8_spill] sm:$0xff] %v3458_v11  ;;  %v3475_v14 = vmul.f32 0.10825317, %v3463_v12  ;;  %v3478_v15 = vmul.f32 0.10825317, %v3468_v13 }
   0x8   :  { %121 = vrot.lane.b32.xlu1 %v3435_v6, %s3393_s14  ;;  %7652 = vst [vmem:[#allocation9_spill] sm:$0xff] %v3463_v12  ;;  %7653 = vst [vmem:[#allocation10_spill] sm:$0xff] %v3468_v13  ;;  %v3483_v16 = vld [vmem:[%s7347_s0 + $0x90] sm:$0xff]  ;;  %v3488_v17 = vld [vmem:[%s7347_s0 + $0x80] sm:$0xff]  ;;  %v454_v63 = vmul.f32 0.050240472, %v3428_v5 }
   0x9   :  { %117 = vrot.lane.b32.xlu0 %v3438_v7, %s3393_s14  ;;  %7654 = vst [vmem:[#allocation11_spill] sm:$0xff] %v3475_v14  ;;  %7655 = vst [vmem:[#allocation12_spill] sm:$0xff] %v3478_v15  ;;  %v148_v18 = vmul.f32 -0.0625, %v3483_v16  ;;  %v147_v19 = vmul.f32 -0.0625, %v3488_v17  ;;  %v3499_v20 = vld [vmem:[%s7347_s0 + $0xb0] sm:$0xff]  ;;  %v3504_v21 = vld [vmem:[%s7347_s0 + $0xa0] sm:$0xff] }
   0xa   :  { %7656 = vst [vmem:[#allocation13_spill] sm:$0xff] %v3499_v20  ;;  %v150_v22 = vmul.f32 -0.0625, %v3499_v20  ;;  %v149_v23 = vmul.f32 -0.0625, %v3504_v21  ;;  %v3513_v24 = vld [vmem:[%s7347_s0 + $0xd0] sm:$0xff]  ;;  %v3518_v25 = vld [vmem:[%s7347_s0 + $0xc0] sm:$0xff] }
   0xb   :  { %v152_v26 = vmul.f32 -0.0625, %v3513_v24  ;;  %v151_v27 = vmul.f32 -0.0625, %v3518_v25  ;;  %v3527_v28 = vld [vmem:[%s7347_s0 + $0xf0] sm:$0xff]  ;;  %v3532_v29 = vld [vmem:[%s7347_s0 + $0xe0] sm:$0xff]  ;;  %v3721_v5 = vld [vmem:[%s7347_s0 + $0x78] sm:$0x1] }
   0xc   :  { %125 = vrot.lane.b32.xlu1 %v3455_v10, %s3393_s14  ;;  %v154_v30 = vmul.f32 -0.0625, %v3527_v28  ;;  %v153_v31 = vmul.f32 -0.0625, %v3532_v29  ;;  %v3541_v32 = vld [vmem:[%s7347_s0 + $0x110] sm:$0xff]  ;;  %v3546_v33 = vld [vmem:[%s7347_s0 + $0x100] sm:$0xff]  ;;  %7672 = vst [vmem:[#allocation29_spill] sm:$0xff] %v3721_v5 }
   0xd   :  { %123 = vrot.lane.b32.xlu0 %v3458_v11, %s3393_s14  ;;  %v228_v34 = vmul.f32 0.1875, %v3541_v32  ;;  %v227_v35 = vmul.f32 0.1875, %v3546_v33  ;;  %v3555_v36 = vld [vmem:[%s7347_s0 + $0x130] sm:$0xff]  ;;  %v3560_v37 = vld [vmem:[%s7347_s0 + $0x120] sm:$0xff] }
   0xe   :  { %v230_v38 = vmul.f32 0.1875, %v3555_v36  ;;  %v229_v39 = vmul.f32 0.1875, %v3560_v37  ;;  %v3569_v40 = vld [vmem:[%s7347_s0 + $0x150] sm:$0xff]  ;;  %v3574_v41 = vld [vmem:[%s7347_s0 + $0x140] sm:$0xff] }
   0xf   :  { %v232_v42 = vmul.f32 0.1875, %v3569_v40  ;;  %v231_v43 = vmul.f32 0.1875, %v3574_v41  ;;  %v3583_v44 = vld [vmem:[%s7347_s0 + $0x170] sm:$0xff]  ;;  %v3588_v45 = vld [vmem:[%s7347_s0 + $0x160] sm:$0xff] }
  0x10   :  { %129 = vrot.lane.b32.xlu1 %v3475_v14, %s3393_s14  ;;  %v234_v46 = vmul.f32 0.1875, %v3583_v44  ;;  %v233_v47 = vmul.f32 0.1875, %v3588_v45  ;;  %v3597_v48 = vld [vmem:[%s7347_s0 + $0x190] sm:$0xff]  ;;  %v3602_v49 = vld [vmem:[%s7347_s0 + $0x180] sm:$0xff] }
  0x11   :  { %127 = vrot.lane.b32.xlu0 %v3478_v15, %s3393_s14  ;;  %7657 = vst [vmem:[#allocation14_spill] sm:$0xff] %v3602_v49  ;;  %v3607_v50 = vmul.f32 -0.10825317, %v3597_v48  ;;  %v3610_v51 = vmul.f32 -0.10825317, %v3602_v49  ;;  %v3615_v52 = vld [vmem:[%s7347_s0 + $0x1b0] sm:$0xff] }
  0x12   :  { %v3620_v53 = vld [vmem:[%s7347_s0 + $0x1a0] sm:$0xff]  ;;  %v3627_v54 = vmul.f32 -0.10825317, %v3615_v52  ;;  %v3635_v56 = vld [vmem:[%s7347_s0 + $0x1d0] sm:$0xff]  ;;  %v4046_v15 = vmul.f32 0.40400636, %v3546_v33 }
  0x13   :  { %7658 = vst [vmem:[#allocation15_spill] sm:$0xff] %v3607_v50  ;;  %7659 = vst [vmem:[#allocation16_spill] sm:$0xff] %v3610_v51  ;;  %v3630_v55 = vmul.f32 -0.10825317, %v3620_v53  ;;  %v3640_v57 = vld [vmem:[%s7347_s0 + $0x1c0] sm:$0xff] }
  0x14   :  { %165 = vrot.lane.b32.xlu1 %v148_v18, %s3393_s14  ;;  %7660 = vst [vmem:[#allocation17_spill] sm:$0xff] %v3627_v54  ;;  %v3654_v61 = vmul.f32 -0.10825317, %v3635_v56  ;;  %v3657_v62 = vmul.f32 -0.10825317, %v3640_v57  ;;  %v7711_v11 = vld [vmem:[#allocation10_spill] sm:$0xff] }
  0x15   :  { %163 = vrot.lane.b32.xlu0 %v147_v19, %s3393_s14  ;;  %7661 = vst [vmem:[#allocation18_spill] sm:$0xff] %v3630_v55  ;;  %v455_v18 = vmul.f32 0.050240472, %v3645_v58  ;;  %v453_v19 = vmul.f32 0.050240472, %v3650_v59  ;;  %7715 = vst [vmem:[#allocation10_spill] sm:$0xff] %v4046_v15 }
  0x16   :  { %7664 = vst [vmem:[#allocation21_spill] sm:$0xff] %v3654_v61  ;;  %7665 = vst [vmem:[#allocation22_spill] sm:$0xff] %v3657_v62  ;;  %v4029_v10 = vmul.f32 0.23325318, %v7711_v11 }
  0x18   :  { %169 = vrot.lane.b32.xlu1 %v150_v22, %s3393_s14  ;;  %v3669_v22 = vld [vmem:[%s7347_s0 + $0x38] sm:$0x1] }
  0x19   :  { %167 = vrot.lane.b32.xlu0 %v149_v23, %s3393_s14  ;;  %7666 = vst [vmem:[#allocation23_spill] sm:$0xff] %v3669_v22  ;;  %v3674_v23 = vld [vmem:[%s7347_s0 + $0x1f0] sm:$0xff] }
  0x1c   :  { %173 = vrot.lane.b32.xlu1 %v152_v26, %s3393_s14  ;;  %v3679_v26 = vld [vmem:[%s7347_s0 + $0x1e0] sm:$0xff] }
  0x1d   :  { %171 = vrot.lane.b32.xlu0 %v151_v27, %s3393_s14  ;;  %v3684_v27 = vld [vmem:[%s7347_s0 + $0x28] sm:$0x1] }
  0x1e   :  { %7667 = vst [vmem:[#allocation24_spill] sm:$0xff] %v3684_v27 }
  0x20   :  { %177 = vrot.lane.b32.xlu1 %v154_v30, %s3393_s14  ;;  %v487_v30 = vrot.slane %v454_v63, 1  ;;  %v3708_v63 = vld [vmem:[%s7347_s0 + $0x48] sm:$0x1] }
  0x21   :  { %175 = vrot.lane.b32.xlu0 %v153_v31, %s3393_s14  ;;  %v484_v31 = vrot.slane %v452_v60, 1  ;;  %v3703_v60 = vld [vmem:[%s7347_s0 + $0x58] sm:$0x1]  ;;  %7671 = vst [vmem:[#allocation28_spill] sm:$0xff] %v3708_v63  ;;  %v461_v1 = vmul.f32 0.050240472, %v3708_v63 }
  0x22   :  { %7670 = vst [vmem:[#allocation27_spill] sm:$0xff] %v3703_v60  ;;  %v463_v58 = vmul.f32 0.050240472, %v3703_v60  ;;  %v464_v60 = vmul.f32 0.050240472, %v3468_v13 }
  0x23   :  { %v3739_v63 = vld [vmem:[%s7347_s0 + $0x98] sm:$0x1] }
  0x24   :  { %245 = vrot.lane.b32.xlu1 %v228_v34, %s3393_s14  ;;  %v458_v34 = vmul.f32 0.050240472, %v3417_v2  ;;  %v460_v2 = vmul.f32 0.050240472, %v3448_v9  ;;  %7674 = vst [vmem:[#allocation31_spill] sm:$0xff] %v3739_v63 }
  0x25   :  { %243 = vrot.lane.b32.xlu0 %v227_v35, %s3393_s14  ;;  %v459_v35 = vmul.f32 0.050240472, %v3669_v22  ;;  %v3759_v13 = vld [vmem:[%s7347_s0 + $0xb8] sm:$0x1] }
  0x26   :  { %v493_v22 = vrot.slane %v458_v34, 1  ;;  %7676 = vst [vmem:[#allocation33_spill] sm:$0xff] %v3759_v13 }
  0x27   :  { %v494_v59 = vrot.slane %v459_v35, 1 }
  0x28   :  { %249 = vrot.lane.b32.xlu1 %v230_v38, %s3393_s14  ;;  %v3693_v38 = vmul.f32 -0.10825317, %v3674_v23 }
  0x29   :  { %247 = vrot.lane.b32.xlu0 %v229_v39, %s3393_s14  ;;  %v3696_v39 = vmul.f32 -0.10825317, %v3679_v26 }
  0x2a   :  { %7668 = vst [vmem:[#allocation25_spill] sm:$0xff] %v3693_v38 }
  0x2b   :  { %7669 = vst [vmem:[#allocation26_spill] sm:$0xff] %v3696_v39 }
  0x2c   :  { %253 = vrot.lane.b32.xlu1 %v232_v42, %s3393_s14  ;;  %v488_v42 = vrot.slane %v455_v18, 1 }
  0x2d   :  { %251 = vrot.lane.b32.xlu0 %v231_v43, %s3393_s14  ;;  %v485_v43 = vrot.slane %v453_v19, 1 }
  0x2e   :  { %v489_v18 = vsel %vm339_vm0, %v487_v30, %v488_v42  ;;  %v3728_v30 = vld [vmem:[%s7347_s0 + $0x68] sm:$0x1]  ;;  %v467_v42 = vmul.f32 0.050240472, %v3721_v5 }
  0x2f   :  { %v486_v19 = vsel %vm339_vm0, %v484_v31, %v485_v43  ;;  %7673 = vst [vmem:[#allocation30_spill] sm:$0xff] %v3728_v30  ;;  %v466_v31 = vmul.f32 0.050240472, %v3463_v12  ;;  %v495_v43 = vsel %vm339_vm0, %v493_v22, %v494_v59  ;;  %v496_v12 = vrot.slane %v460_v2, 1 }
  0x30   :  { %257 = vrot.lane.b32.xlu1 %v234_v46, %s3393_s14  ;;  %v456_v46 = vmul.f32 0.050240472, %v3407_v0  ;;  %v465_v5 = vmul.f32 0.050240472, %v3728_v30  ;;  %v543_v59 = vmul.f32 -0.02900635, %v3739_v63 }
  0x31   :  { %255 = vrot.lane.b32.xlu0 %v233_v47, %s3393_s14  ;;  %v457_v47 = vmul.f32 0.050240472, %v3684_v27  ;;  %v462_v27 = vmul.f32 0.050240472, %v3443_v8  ;;  %v497_v8 = vrot.slane %v461_v1, 1  ;;  %v505_v22 = vrot.slane %v466_v31, 1 }
  0x32   :  { %v490_v34 = vrot.slane %v456_v46, 1  ;;  %v540_v2 = vmul.f32 -0.02900635, %v3488_v17  ;;  %v503_v30 = vrot.slane %v465_v5, 1 }
  0x33   :  { %v491_v35 = vrot.slane %v457_v47, 1  ;;  %v499_v46 = vrot.slane %v462_v27, 1  ;;  %v500_v47 = vrot.slane %v463_v58, 1  ;;  %v542_v58 = vmul.f32 -0.02900635, %v3483_v16 }
  0x34   :  { %293 = vrot.lane.b32.xlu1 %v3607_v50, %s3393_s14  ;;  %v506_v27 = vrot.slane %v467_v42, 1  ;;  %v576_v42 = vrot.slane %v543_v59, 1  ;;  %v7707_v50 = vld [vmem:[#allocation6_spill] sm:$0xff] }
  0x35   :  { %291 = vrot.lane.b32.xlu0 %v3610_v51, %s3393_s14  ;;  %v492_v9 = vsel %vm339_vm0, %v490_v34, %v491_v35  ;;  %v498_v34 = vsel %vm339_vm0, %v496_v12, %v497_v8  ;;  %v502_v35 = vrot.slane %v464_v60, 1  ;;  %v575_v31 = vrot.slane %v542_v58, 1  ;;  %v3773_v60 = vld [vmem:[%s7347_s0 + $0xd8] sm:$0x1] }
  0x36   :  { %v572_v8 = vrot.slane %v540_v2, 1  ;;  %v547_v12 = vmul.f32 -0.02900635, %v3759_v13  ;;  %7678 = vst [vmem:[#allocation35_spill] sm:$0xff] %v3773_v60  ;;  %v544_v58 = vmul.f32 -0.02900635, %v3504_v21 }
  0x37   :  { %v3782_v2 = vld [vmem:[%s7347_s0 + $0xc8] sm:$0x1]  ;;  %v77_v51 = vmul.f32 0.23325318, %v3407_v0 }
  0x38   :  { %297 = vrot.lane.b32.xlu1 %v3627_v54, %s3393_s14  ;;  %7679 = vst [vmem:[#allocation36_spill] sm:$0xff] %v3782_v2  ;;  %v578_v13 = vrot.slane %v544_v58, 1  ;;  %v88_v54 = vmul.f32 0.40400636, %v3513_v24 }
  0x39   :  { %295 = vrot.lane.b32.xlu0 %v3630_v55, %s3393_s14 }
  0x3c   :  { %301 = vrot.lane.b32.xlu1 %v3654_v61, %s3393_s14 }
  0x3d   :  { %299 = vrot.lane.b32.xlu0 %v3657_v62, %s3393_s14 }
  0x40   :  { %305 = vrot.lane.b32.xlu1 %v3693_v38, %s3393_s14 }
  0x41   :  { %303 = vrot.lane.b32.xlu0 %v3696_v39, %s3393_s14  ;;  %v7700_v39 = vld [vmem:[#allocation2_spill] sm:$0xff] }
  0x44   :  { %510 = vrot.lane.b32.xlu1 %v489_v18, %s3393_s14  ;;  %v3746_v18 = vld [vmem:[%s7347_s0 + $0x88] sm:$0x1] }
  0x45   :  { %508 = vrot.lane.b32.xlu0 %v486_v19, %s3393_s14  ;;  %7675 = vst [vmem:[#allocation32_spill] sm:$0xff] %v3746_v18  ;;  %v541_v1 = vmul.f32 -0.02900635, %v3746_v18  ;;  %v501_v19 = vsel %vm339_vm0, %v499_v46, %v500_v47  ;;  %v507_v46 = vsel %vm339_vm0, %v505_v22, %v506_v27  ;;  %v504_v47 = vsel %vm339_vm0, %v502_v35, %v503_v30 }
  0x46   :  { %v577_v22 = vsel %vm339_vm0, %v575_v31, %v576_v42  ;;  %v548_v27 = vmul.f32 -0.02900635, %v3518_v25 }
  0x47   :  { %v573_v5 = vrot.slane %v541_v1, 1  ;;  %v550_v1 = vmul.f32 -0.02900635, %v3513_v24 }
  0x48   :  { %514 = vrot.lane.b32.xlu1 %v495_v43, %s3393_s14  ;;  %v546_v43 = vmul.f32 -0.02900635, %v3499_v20 }
  0x49   :  { %512 = vrot.lane.b32.xlu0 %v492_v9, %s3393_s14  ;;  %v3764_v9 = vld [vmem:[%s7347_s0 + $0xa8] sm:$0x1]  ;;  %v574_v35 = vsel %vm339_vm0, %v572_v8, %v573_v5  ;;  %v587_v31 = vrot.slane %v550_v1, 1  ;;  %v584_v8 = vrot.slane %v548_v27, 1  ;;  %v552_v1 = vmul.f32 -0.02900635, %v3532_v29 }
  0x4a   :  { %7677 = vst [vmem:[#allocation34_spill] sm:$0xff] %v3764_v9  ;;  %v545_v59 = vmul.f32 -0.02900635, %v3764_v9  ;;  %v581_v30 = vrot.slane %v546_v43, 1  ;;  %v582_v9 = vrot.slane %v547_v12, 1 }
  0x4b   :  { %v554_v43 = vmul.f32 -0.02900635, %v3527_v28  ;;  %v758_v27 = vmul.f32 -0.02900635, %v3541_v32 }
  0x4c   :  { %518 = vrot.lane.b32.xlu1 %v501_v19, %s3393_s14  ;;  %v551_v19 = vmul.f32 -0.02900635, %v3773_v60  ;;  %v579_v20 = vrot.slane %v545_v59, 1  ;;  %v3795_v60 = vld [vmem:[%s7347_s0 + $0xf8] sm:$0x1]  ;;  %v583_v58 = vsel %vm339_vm0, %v581_v30, %v582_v9 }
  0x4d   :  { %516 = vrot.lane.b32.xlu0 %v498_v34, %s3393_s14  ;;  %v549_v34 = vmul.f32 -0.02900635, %v3782_v2  ;;  %7680 = vst [vmem:[#allocation37_spill] sm:$0xff] %v3795_v60  ;;  %v555_v12 = vmul.f32 -0.02900635, %v3795_v60  ;;  %v590_v60 = vrot.slane %v552_v1, 1 }
  0x4e   :  { %v588_v42 = vrot.slane %v551_v19, 1  ;;  %v580_v59 = vsel %vm339_vm0, %v578_v13, %v579_v20  ;;  %v593_v13 = vrot.slane %v554_v43, 1  ;;  %v756_v20 = vmul.f32 -0.02900635, %v3546_v33 }
  0x4f   :  { %v585_v5 = vrot.slane %v549_v34, 1  ;;  %v762_v43 = vmul.f32 -0.02900635, %v3555_v36 }
  0x50   :  { %522 = vrot.lane.b32.xlu1 %v507_v46, %s3393_s14  ;;  %v3800_v46 = vld [vmem:[%s7347_s0 + $0xe8] sm:$0x1]  ;;  %v589_v9 = vsel %vm339_vm0, %v587_v31, %v588_v42  ;;  %v791_v31 = vrot.slane %v758_v27, 1  ;;  %v760_v27 = vmul.f32 -0.02900635, %v3560_v37 }
  0x51   :  { %520 = vrot.lane.b32.xlu0 %v504_v47, %s3393_s14  ;;  %7681 = vst [vmem:[#allocation38_spill] sm:$0xff] %v3800_v46  ;;  %v3809_v47 = vld [vmem:[%s7347_s0 + $0x118] sm:$0x1]  ;;  %v553_v19 = vmul.f32 -0.02900635, %v3800_v46  ;;  %v594_v46 = vrot.slane %v555_v12, 1 }
  0x52   :  { %7682 = vst [vmem:[#allocation39_spill] sm:$0xff] %v3809_v47  ;;  %v759_v34 = vmul.f32 -0.02900635, %v3809_v47  ;;  %v3831_v47 = vld [vmem:[%s7347_s0 + $0x138] sm:$0x1] }
  0x53   :  { %v591_v2 = vrot.slane %v553_v19, 1  ;;  %7684 = vst [vmem:[#allocation41_spill] sm:$0xff] %v3831_v47  ;;  %v763_v12 = vmul.f32 -0.02900635, %v3831_v47  ;;  %v595_v1 = vsel %vm339_vm0, %v593_v13, %v594_v46  ;;  %v794_v47 = vrot.slane %v760_v27, 1 }
  0x54   :  { %598 = vrot.lane.b32.xlu1 %v577_v22, %s3393_s14  ;;  %v3818_v22 = vld [vmem:[%s7347_s0 + $0x108] sm:$0x1]  ;;  %v792_v42 = vrot.slane %v759_v34, 1 }
  0x55   :  { %596 = vrot.lane.b32.xlu0 %v574_v35, %s3393_s14  ;;  %7683 = vst [vmem:[#allocation40_spill] sm:$0xff] %v3818_v22  ;;  %v757_v30 = vmul.f32 -0.02900635, %v3818_v22  ;;  %v586_v35 = vsel %vm339_vm0, %v584_v8, %v585_v5  ;;  %v788_v8 = vrot.slane %v756_v20, 1  ;;  %v592_v19 = vsel %vm339_vm0, %v590_v60, %v591_v2 }
  0x56   :  { %v766_v20 = vmul.f32 -0.02900635, %v3569_v40  ;;  %v793_v46 = vsel %vm339_vm0, %v791_v31, %v792_v42  ;;  %v797_v60 = vrot.slane %v762_v43, 1  ;;  %v764_v2 = vmul.f32 -0.02900635, %v3574_v41 }
  0x57   :  { %v789_v5 = vrot.slane %v757_v30, 1  ;;  %v770_v43 = vmul.f32 -0.02900635, %v3583_v44 }
  0x58   :  { %602 = vrot.lane.b32.xlu1 %v583_v58, %s3393_s14  ;;  %v3836_v58 = vld [vmem:[%s7347_s0 + $0x128] sm:$0x1]  ;;  %v803_v31 = vrot.slane %v766_v20, 1  ;;  %v768_v20 = vmul.f32 -0.02900635, %v3588_v45 }
  0x59   :  { %600 = vrot.lane.b32.xlu0 %v580_v59, %s3393_s14  ;;  %7685 = vst [vmem:[#allocation42_spill] sm:$0xff] %v3836_v58  ;;  %v3845_v59 = vld [vmem:[%s7347_s0 + $0x158] sm:$0x1]  ;;  %v761_v34 = vmul.f32 -0.02900635, %v3836_v58  ;;  %v798_v58 = vrot.slane %v763_v12, 1 }
  0x5a   :  { %7686 = vst [vmem:[#allocation43_spill] sm:$0xff] %v3845_v59  ;;  %v767_v30 = vmul.f32 -0.02900635, %v3845_v59  ;;  %v3867_v59 = vld [vmem:[%s7347_s0 + $0x178] sm:$0x1] }
  0x5b   :  { %v795_v22 = vrot.slane %v761_v34, 1  ;;  %7688 = vst [vmem:[#allocation45_spill] sm:$0xff] %v3867_v59  ;;  %v771_v12 = vmul.f32 -0.02900635, %v3867_v59  ;;  %v799_v27 = vsel %vm339_vm0, %v797_v60, %v798_v58  ;;  %v3902_v60 = vld [vmem:[%s7347_s0 + $0x1b8] sm:$0x1] }
  0x5c   :  { %606 = vrot.lane.b32.xlu1 %v589_v9, %s3393_s14  ;;  %v3854_v9 = vld [vmem:[%s7347_s0 + $0x148] sm:$0x1]  ;;  %v804_v42 = vrot.slane %v767_v30, 1  ;;  %7692 = vst [vmem:[#allocation49_spill] sm:$0xff] %v3902_v60  ;;  %v806_v59 = vrot.slane %v768_v20, 1 }
  0x5d   :  { %604 = vrot.lane.b32.xlu0 %v586_v35, %s3393_s14  ;;  %7687 = vst [vmem:[#allocation44_spill] sm:$0xff] %v3854_v9  ;;  %v765_v13 = vmul.f32 -0.02900635, %v3854_v9  ;;  %v790_v35 = vsel %vm339_vm0, %v788_v8, %v789_v5  ;;  %v800_v8 = vrot.slane %v764_v2, 1  ;;  %v796_v34 = vsel %vm339_vm0, %v794_v47, %v795_v22 }
  0x5e   :  { %v809_v2 = vrot.slane %v770_v43, 1  ;;  %v805_v47 = vsel %vm339_vm0, %v803_v31, %v804_v42  ;;  %v844_v22 = vmul.f32 0.016746825, %v3602_v49  ;;  %v3910_v31 = vld [vmem:[%s7347_s0 + $0x1a8] sm:$0x1] }
  0x5f   :  { %v801_v5 = vrot.slane %v765_v13, 1  ;;  %v846_v13 = vmul.f32 0.016746825, %v3597_v48  ;;  %7693 = vst [vmem:[#allocation50_spill] sm:$0xff] %v3910_v31  ;;  %v850_v9 = vmul.f32 0.016746825, %v3615_v52 }
  0x60   :  { %610 = vrot.lane.b32.xlu1 %v595_v1, %s3393_s14  ;;  %v3872_v1 = vld [vmem:[%s7347_s0 + $0x168] sm:$0x1]  ;;  %v851_v49 = vmul.f32 0.016746825, %v3902_v60  ;;  %v848_v20 = vmul.f32 0.016746825, %v3620_v53 }
  0x61   :  { %608 = vrot.lane.b32.xlu0 %v592_v19, %s3393_s14  ;;  %7689 = vst [vmem:[#allocation46_spill] sm:$0xff] %v3872_v1  ;;  %v3881_v19 = vld [vmem:[%s7347_s0 + $0x198] sm:$0x1]  ;;  %v769_v30 = vmul.f32 -0.02900635, %v3872_v1  ;;  %v802_v43 = vsel %vm339_vm0, %v800_v8, %v801_v5  ;;  %v810_v1 = vrot.slane %v771_v12, 1 }
  0x62   :  { %7690 = vst [vmem:[#allocation47_spill] sm:$0xff] %v3881_v19  ;;  %v876_v5 = vrot.slane %v844_v22, 1  ;;  %v849_v42 = vmul.f32 0.016746825, %v3910_v31  ;;  %v882_v31 = vrot.slane %v848_v20, 1 }
  0x63   :  { %v4009_v60 = vmul.f32 0.23325318, %v7707_v50 }
  0x64   :  { %814 = vrot.lane.b32.xlu1 %v793_v46, %s3393_s14  ;;  %v3890_v46 = vld [vmem:[%s7347_s0 + $0x188] sm:$0x1] }
  0x65   :  { %812 = vrot.lane.b32.xlu0 %v790_v35, %s3393_s14  ;;  %7691 = vst [vmem:[#allocation48_spill] sm:$0xff] %v3890_v46  ;;  %v847_v35 = vmul.f32 0.016746825, %v3881_v19  ;;  %v845_v58 = vmul.f32 0.016746825, %v3890_v46  ;;  %v807_v19 = vrot.slane %v769_v30, 1  ;;  %v811_v30 = vsel %vm339_vm0, %v809_v2, %v810_v1 }
  0x66   :  { %v879_v46 = vrot.slane %v846_v13, 1  ;;  %v3924_v13 = vld [vmem:[%s7347_s0 + $0x1d8] sm:$0x1]  ;;  %v885_v2 = vrot.slane %v850_v9, 1 }
  0x67   :  { %v880_v8 = vrot.slane %v847_v35, 1  ;;  %v877_v12 = vrot.slane %v845_v58, 1  ;;  %7694 = vst [vmem:[#allocation51_spill] sm:$0xff] %v3924_v13  ;;  %v886_v58 = vrot.slane %v851_v49, 1  ;;  %v852_v35 = vmul.f32 0.016746825, %v3640_v57 }
  0x68   :  { %818 = vrot.lane.b32.xlu1 %v799_v27, %s3393_s14  ;;  %v808_v27 = vsel %vm339_vm0, %v806_v59, %v807_v19  ;;  %v883_v19 = vrot.slane %v849_v42, 1  ;;  %v3961_v42 = vmul.f32 0.1875, %v3739_v63  ;;  %v858_v49 = vmul.f32 0.016746825, %v3674_v23 }
  0x69   :  { %816 = vrot.lane.b32.xlu0 %v796_v34, %s3393_s14  ;;  %v855_v34 = vmul.f32 0.016746825, %v3924_v13  ;;  %v881_v1 = vsel %vm339_vm0, %v879_v46, %v880_v8  ;;  %v878_v59 = vsel %vm339_vm0, %v876_v5, %v877_v12  ;;  %v887_v46 = vsel %vm339_vm0, %v885_v2, %v886_v58 }
  0x6a   :  { %v3958_v5 = vmul.f32 0.1875, %v3483_v16  ;;  %v888_v20 = vrot.slane %v852_v35, 1  ;;  %v856_v58 = vmul.f32 0.016746825, %v3679_v26  ;;  %v85_v13 = vmul.f32 0.40400636, %v3504_v21 }
  0x6b   :  { %v892_v12 = vrot.slane %v855_v34, 1  ;;  %v897_v62 = vrot.slane %v858_v49, 1  ;;  %v7704_v49 = vld [vmem:[#allocation13_spill] sm:$0xff] }
  0x6c   :  { %822 = vrot.lane.b32.xlu1 %v805_v47, %s3393_s14  ;;  %v3929_v47 = vld [vmem:[%s7347_s0 + $0x1c8] sm:$0x1]  ;;  %v894_v38 = vrot.slane %v856_v58, 1  ;;  %v84_v58 = vmul.f32 0.40400636, %v3483_v16  ;;  %v4068_v15 = vmul.f32 0.1875, %v7704_v49 }
  0x6d   :  { %820 = vrot.lane.b32.xlu0 %v802_v43, %s3393_s14  ;;  %7695 = vst [vmem:[#allocation52_spill] sm:$0xff] %v3929_v47  ;;  %v854_v43 = vmul.f32 0.016746825, %v3635_v56  ;;  %v853_v22 = vmul.f32 0.016746825, %v3929_v47  ;;  %v884_v47 = vsel %vm339_vm0, %v882_v31, %v883_v19  ;;  %v415_v19 = vrot.slane %v3958_v5, 1 }
  0x6e   :  { %v83_v5 = vmul.f32 0.40400636, %v3488_v17 }
  0x6f   :  { %v891_v8 = vrot.slane %v854_v43, 1  ;;  %v889_v9 = vrot.slane %v853_v22, 1 }
  0x70   :  { %826 = vrot.lane.b32.xlu1 %v811_v30, %s3393_s14  ;;  %v3954_v30 = vld [vmem:[%s7347_s0 + $0x1e8] sm:$0x1] }
  0x71   :  { %824 = vrot.lane.b32.xlu0 %v808_v27, %s3393_s14  ;;  %v3949_v27 = vld [vmem:[%s7347_s0 + $0x1f8] sm:$0x1]  ;;  %7697 = vst [vmem:[#allocation54_spill] sm:$0xff] %v3954_v30  ;;  %v857_v43 = vmul.f32 0.016746825, %v3954_v30  ;;  %v416_v30 = vrot.slane %v3961_v42, 1  ;;  %v893_v34 = vsel %vm339_vm0, %v891_v8, %v892_v12 }
  0x72   :  { %7696 = vst [vmem:[#allocation53_spill] sm:$0xff] %v3949_v27  ;;  %v859_v2 = vmul.f32 0.016746825, %v3949_v27  ;;  %v75_v42 = vmul.f32 0.23325318, %v7700_v39  ;;  %v7703_v8 = vld [vmem:[#allocation3_spill] sm:$0xff] }
  0x73   :  { %v86_v12 = vmul.f32 0.40400636, %v7704_v49  ;;  %v4049_v14 = vmul.f32 -0.02900635, %v7703_v8 }
  0x74   :  { %902 = vrot.lane.b32.xlu1 %v881_v1, %s3393_s14  ;;  %v890_v1 = vsel %vm339_vm0, %v888_v20, %v889_v9  ;;  %v898_v31 = vrot.slane %v859_v2, 1  ;;  %v78_v9 = vmul.f32 0.23325318, %v7703_v8  ;;  %v7705_v20 = vld [vmem:[#allocation4_spill] sm:$0xff]  ;;  %v7723_v8 = vld [vmem:[#allocation33_spill] sm:$0xff] }
  0x75   :  { %900 = vrot.lane.b32.xlu0 %v878_v59, %s3393_s14  ;;  %v895_v59 = vrot.slane %v857_v43, 1  ;;  %v76_v2 = vmul.f32 0.23325318, %v7705_v20  ;;  %v7706_v43 = vld [vmem:[#allocation5_spill] sm:$0xff]  ;;  %7716 = vst [vmem:[#allocation59_spill] sm:$0xff] %v4049_v14 }
  0x76   :  { %v3974_v35 = vpop.permute.xlu1 %119  ;;  %v80_v55 = vmul.f32 0.23325318, %v7706_v43  ;;  %v899_v63 = vsel %vm339_vm0, %v897_v62, %v898_v31  ;;  %v4032_v62 = vmul.f32 0.40400636, %v3532_v29  ;;  %v4040_v31 = vmul.f32 -0.02900635, %v7700_v39 }
  0x77   :  { %7698 = vst [vmem:[#allocation55_spill] sm:$0xff] %v3974_v35  ;;  %v3976_v22 = vpop.permute.xlu0 %115  ;;  %v4024_v35 = vmul.f32 0.40400636, %v3527_v28  ;;  %v4062_v39 = vmul.f32 0.40400636, %v3560_v37 }
  0x78   :  { %7699 = vst [vmem:[#allocation56_spill] sm:$0xff] %v3976_v22  ;;  %906 = vrot.lane.b32.xlu1 %v887_v46, %s3393_s14  ;;  %v3995_v46 = vmul.f32 0.1875, %v3488_v17  ;;  %7713 = vst [vmem:[#allocation6_spill] sm:$0xff] %v4040_v31 }
  0x79   :  { %904 = vrot.lane.b32.xlu0 %v884_v47, %s3393_s14  ;;  %v3998_v47 = vmul.f32 0.1875, %v3746_v18  ;;  %v4012_v18 = vmul.f32 0.40400636, %v3518_v25  ;;  %7721 = vst [vmem:[#allocation64_spill] sm:$0xff] %v4062_v39  ;;  %v4098_v39 = vadd.f32 %v85_v13, %v77_v51  ;;  %v421_v51 = vrot.slane %v4068_v15, 1 }
  0x7a   :  { %v3990_v61 = vpop.permute.xlu1 %121  ;;  %v4139_v15 = vmul.f32 0.69975954, %v3620_v53 }
  0x7b   :  { %7701 = vst [vmem:[#allocation57_spill] sm:$0xff] %v3990_v61  ;;  %v3992_v27 = vpop.permute.xlu0 %117  ;;  %7731 = vst [vmem:[#allocation73_spill] sm:$0xff] %v4098_v39 }
  0x7c   :  { %7702 = vst [vmem:[#allocation58_spill] sm:$0xff] %v3992_v27  ;;  %910 = vrot.lane.b32.xlu1 %v893_v34, %s3393_s14  ;;  %v896_v27 = vsel %vm339_vm0, %v894_v38, %v895_v59  ;;  %v7710_v34 = vld [vmem:[#allocation9_spill] sm:$0xff]  ;;  %v4035_v38 = vmul.f32 -0.02900635, %v7705_v20  ;;  %v4043_v59 = vmul.f32 0.40400636, %v3541_v32 }
  0x7d   :  { %908 = vrot.lane.b32.xlu0 %v890_v1, %s3393_s14  ;;  %v4021_v1 = vmul.f32 0.23325318, %v7710_v34  ;;  %v4071_v20 = vmul.f32 0.1875, %v7723_v8  ;;  %v4090_v8 = vmul.f32 -0.02900635, %v7711_v11  ;;  %7741 = vst [vmem:[#allocation81_spill] sm:$0xff] %v4139_v15 }
  0x7e   :  { %v4016_v61 = vpop.permute.xlu1 %125  ;;  %7712 = vst [vmem:[#allocation5_spill] sm:$0xff] %v4035_v38  ;;  %7714 = vst [vmem:[#allocation9_spill] sm:$0xff] %v4043_v59  ;;  %v4065_v59 = vmul.f32 -0.02900635, %v7706_v43  ;;  %v4087_v43 = vmul.f32 -0.02900635, %v7710_v34 }
  0x7f   :  { %7708 = vst [vmem:[#allocation3_spill] sm:$0xff] %v4016_v61  ;;  %v4018_v22 = vpop.permute.xlu0 %123  ;;  %v4055_v61 = vmul.f32 0.40400636, %v3555_v36  ;;  %7728 = vst [vmem:[#allocation70_spill] sm:$0xff] %v4090_v8  ;;  %v4107_v34 = vmul.f32 0.016746825, %v3488_v17 }
  0x80   :  { %7709 = vst [vmem:[#allocation13_spill] sm:$0xff] %v4018_v22  ;;  %914 = vrot.lane.b32.xlu1 %v899_v63, %s3393_s14  ;;  %v4052_v22 = vmul.f32 -0.02900635, %v3407_v0  ;;  %7722 = vst [vmem:[#allocation65_spill] sm:$0xff] %v4065_v59  ;;  %v4074_v0 = vmul.f32 -0.02900635, %v7707_v50 }
  0x81   :  { %912 = vrot.lane.b32.xlu0 %v896_v27, %s3393_s14  ;;  %7718 = vst [vmem:[#allocation61_spill] sm:$0xff] %v4055_v61  ;;  %v4077_v61 = vmul.f32 0.40400636, %v3569_v40  ;;  %7727 = vst [vmem:[#allocation69_spill] sm:$0xff] %v4087_v43  ;;  %v4093_v50 = vmul.f32 0.40400636, %v3583_v44 }
  0x82   :  { %7717 = vst [vmem:[#allocation60_spill] sm:$0xff] %v4052_v22  ;;  %v4057_v63 = vpop.permute.xlu1 %129  ;;  %7724 = vst [vmem:[#allocation66_spill] sm:$0xff] %v4074_v0  ;;  %v422_v13 = vrot.slane %v4071_v20, 1  ;;  %v4127_v17 = vmul.f32 0.016746825, %v3504_v21  ;;  %v4145_v20 = vadd.f32 %v84_v58, %v76_v2  ;;  %v7749_v58 = vld [vmem:[#allocation20_spill] sm:$0xff] }
  0x83   :  { %7719 = vst [vmem:[#allocation62_spill] sm:$0xff] %v4057_v63  ;;  %v4059_v27 = vpop.permute.xlu0 %127  ;;  %7725 = vst [vmem:[#allocation67_spill] sm:$0xff] %v4077_v61  ;;  %v4096_v61 = vsel %vm339_vm0, %v415_v19, %v416_v30  ;;  %v7736_v30 = vld [vmem:[#allocation14_spill] sm:$0xff]  ;;  %v4132_v63 = vadd.f32 %v86_v12, %v78_v9  ;;  %v4151_v9 = vmul.f32 0.69975954, %v3635_v56 }
  0x84   :  { %7720 = vst [vmem:[#allocation63_spill] sm:$0xff] %v4059_v27  ;;  %v4080_v27 = vmul.f32 0.40400636, %v3574_v41  ;;  %983 = vrot.lane.b32.xlu1 %v4035_v38, %s3393_s14  ;;  %7729 = vst [vmem:[#allocation71_spill] sm:$0xff] %v4093_v50  ;;  %v4104_v38 = vmul.f32 0.016746825, %v3483_v16  ;;  %v4224_v39 = vsel %vm339_vm0, %v421_v51, %v422_v13 }
  0x85   :  { %981 = vrot.lane.b32.xlu0 %v4040_v31, %s3393_s14  ;;  %7730 = vst [vmem:[#allocation72_spill] sm:$0xff] %v4096_v61  ;;  %v4114_v50 = vmul.f32 0.69975954, %v3597_v48  ;;  %v4117_v19 = vmul.f32 0.69975954, %v7736_v30  ;;  %v4121_v61 = vadd.f32 %v83_v5, %v75_v42  ;;  %7740 = vst [vmem:[#allocation80_spill] sm:$0xff] %v4132_v63 }
  0x86   :  { %7726 = vst [vmem:[#allocation68_spill] sm:$0xff] %v4080_v27  ;;  %v4101_v27 = vmul.f32 0.40400636, %v3588_v45  ;;  %v4109_v31 = vpop.permute.xlu1 %165  ;;  %v4124_v16 = vmul.f32 0.016746825, %v7704_v49  ;;  %v7742_v42 = vld [vmem:[#allocation19_spill] sm:$0xff] }
  0x87   :  { %7733 = vst [vmem:[#allocation75_spill] sm:$0xff] %v4109_v31  ;;  %v4111_v11 = vpop.permute.xlu0 %163  ;;  %7735 = vst [vmem:[#allocation77_spill] sm:$0xff] %v4114_v50  ;;  %v4142_v5 = vmul.f32 0.016746825, %v3513_v24  ;;  %v324_v49 = vmul.f32 0.10825317, %v7742_v42 }
  0x88   :  { %7732 = vst [vmem:[#allocation74_spill] sm:$0xff] %v4101_v27  ;;  %7734 = vst [vmem:[#allocation76_spill] sm:$0xff] %v4111_v11  ;;  %v4130_v27 = vmul.f32 0.69975954, %v3615_v52  ;;  %987 = vrot.lane.b32.xlu1 %v4049_v14, %s3393_s14  ;;  %v4154_v12 = vmul.f32 0.69975954, %v3640_v57 }
  0x89   :  { %7737 = vst [vmem:[#allocation14_spill] sm:$0xff] %v4117_v19  ;;  %7738 = vst [vmem:[#allocation78_spill] sm:$0xff] %v4121_v61  ;;  %985 = vrot.lane.b32.xlu0 %v4052_v22, %s3393_s14  ;;  %v4156_v22 = vadd.f32 %v88_v54, %v80_v55  ;;  %v4163_v19 = vmul.f32 0.016746825, %v3527_v28  ;;  %v4166_v2 = vmul.f32 0.016746825, %v3532_v29 }
  0x8a   :  { %7739 = vst [vmem:[#allocation79_spill] sm:$0xff] %v4130_v27  ;;  %7743 = vst [vmem:[#allocation19_spill] sm:$0xff] %v4145_v20  ;;  %v4148_v27 = vmul.f32 0.016746825, %v3518_v25  ;;  %v4158_v14 = vpop.permute.xlu1 %169  ;;  %v323_v50 = vmul.f32 0.10825317, %v7749_v58 }
  0x8b   :  { %7744 = vst [vmem:[#allocation82_spill] sm:$0xff] %v4151_v9  ;;  %7745 = vst [vmem:[#allocation83_spill] sm:$0xff] %v4154_v12  ;;  %v4160_v15 = vpop.permute.xlu0 %167  ;;  %v4171_v9 = vadd.f32 %v4012_v18, %v4009_v60  ;;  %v4174_v12 = vmul.f32 0.69975954, %v3674_v23  ;;  %v4177_v54 = vmul.f32 0.69975954, %v3679_v26 }
  0x8c   :  { %7746 = vst [vmem:[#allocation84_spill] sm:$0xff] %v4156_v22  ;;  %7747 = vst [vmem:[#allocation85_spill] sm:$0xff] %v4158_v14  ;;  %v4180_v55 = vmul.f32 -0.050240472, %v3541_v32  ;;  %991 = vrot.lane.b32.xlu1 %v4065_v59, %s3393_s14  ;;  %v344_v18 = vrot.slane %v324_v49, 1  ;;  %v7754_v60 = vld [vmem:[#allocation23_spill] sm:$0xff] }
  0x8d   :  { %7748 = vst [vmem:[#allocation86_spill] sm:$0xff] %v4160_v15  ;;  %7750 = vst [vmem:[#allocation20_spill] sm:$0xff] %v4171_v9  ;;  %v4184_v15 = vadd.f32 %v4024_v35, %v4021_v1  ;;  %989 = vrot.lane.b32.xlu0 %v4074_v0, %s3393_s14  ;;  %v326_v14 = vmul.f32 0.10825317, %v7754_v60  ;;  %v4197_v22 = vmul.f32 -0.050240472, %v3546_v33 }
  0x8e   :  { %7751 = vst [vmem:[#allocation87_spill] sm:$0xff] %v4174_v12  ;;  %7752 = vst [vmem:[#allocation88_spill] sm:$0xff] %v4177_v54  ;;  %v7755_v12 = vld [vmem:[#allocation24_spill] sm:$0xff]  ;;  %v4194_v54 = vadd.f32 %v4032_v62, %v4029_v10  ;;  %v7757_v35 = vld [vmem:[#allocation27_spill] sm:$0xff]  ;;  %v4201_v59 = vpop.permute.xlu1 %173  ;;  %v341_v49 = vrot.slane %v323_v50, 1  ;;  %v7761_v10 = vrot.slane %v3998_v47, 1 }
  0x8f   :  { %7753 = vst [vmem:[#allocation89_spill] sm:$0xff] %v4184_v15  ;;  %v325_v9 = vmul.f32 0.10825317, %v7755_v12  ;;  %v328_v1 = vmul.f32 0.10825317, %v7757_v35  ;;  %v7758_v15 = vld [vmem:[#allocation28_spill] sm:$0xff]  ;;  %v4203_v31 = vpop.permute.xlu0 %171 }
  0x90   :  { %7756 = vst [vmem:[#allocation23_spill] sm:$0xff] %v4194_v54  ;;  %v327_v11 = vmul.f32 0.10825317, %v7758_v15  ;;  %7759 = vst [vmem:[#allocation24_spill] sm:$0xff] %v4201_v59  ;;  %v4206_v0 = vmul.f32 -0.050240472, %v3555_v36  ;;  %995 = vrot.lane.b32.xlu1 %v4087_v43, %s3393_s14 }
  0x91   :  { %7760 = vst [vmem:[#allocation27_spill] sm:$0xff] %v4203_v31  ;;  %v4209_v20 = vmul.f32 -0.050240472, %v3560_v37  ;;  %v7762_v62 = vrot.slane %v3995_v46, 1  ;;  %v4219_v63 = vmul.f32 -0.050240472, %v3569_v40  ;;  %993 = vrot.lane.b32.xlu0 %v4090_v8, %s3393_s14 }
  0x92   :  { %v7765_v59 = vld [vmem:[#allocation29_spill] sm:$0xff]  ;;  %v7766_v31 = vld [vmem:[#allocation30_spill] sm:$0xff]  ;;  %7767 = vst [vmem:[#allocation91_spill] sm:$0xff] %v4224_v39  ;;  %v7768_v46 = vrot.slane %v3438_v7, 1  ;;  %v384_v51 = vmul.f32 0.1875, %v3504_v21  ;;  %v4240_v43 = vpop.permute.xlu1 %177  ;;  %v390_v7 = vmul.f32 0.1875, %v3513_v24 }
  0x93   :  { %v4216_v54 = vsel %vm339_vm0, %v7762_v62, %v7761_v10  ;;  %7764 = vst [vmem:[#allocation90_spill] sm:$0xff] %v4219_v63  ;;  %v330_v61 = vmul.f32 0.10825317, %v7765_v59  ;;  %v329_v50 = vmul.f32 0.10825317, %v7766_v31  ;;  %v350_v10 = vrot.slane %v326_v14, 1  ;;  %v4242_v59 = vpop.permute.xlu0 %175 }
  0x94   :  { %7763 = vst [vmem:[#allocation28_spill] sm:$0xff] %v4216_v54  ;;  %v4233_v47 = vsel %vm339_vm0, %v7768_v46, %v344_v18  ;;  %v347_v62 = vrot.slane %v325_v9, 1  ;;  %v4236_v54 = vmul.f32 -0.050240472, %v3574_v41  ;;  %v356_v63 = vrot.slane %v328_v1, 1  ;;  %v7770_v13 = vld [vmem:[#allocation34_spill] sm:$0xff]  ;;  %1031 = vrot.lane.b32.xlu1 %v4104_v38, %s3393_s14 }
  0x95   :  { %7769 = vst [vmem:[#allocation92_spill] sm:$0xff] %v4233_v47  ;;  %v353_v31 = vrot.slane %v327_v11, 1  ;;  %v385_v39 = vmul.f32 0.1875, %v7770_v13  ;;  %7771 = vst [vmem:[#allocation34_spill] sm:$0xff] %v4240_v43  ;;  %v7772_v8 = vld [vmem:[#allocation35_spill] sm:$0xff]  ;;  %v388_v14 = vmul.f32 0.1875, %v3518_v25  ;;  %1029 = vrot.lane.b32.xlu0 %v4107_v34, %s3393_s14 }
  0x96   :  { %v391_v18 = vmul.f32 0.1875, %v7772_v8  ;;  %v7773_v9 = vld [vmem:[#allocation36_spill] sm:$0xff]  ;;  %v7774_v47 = vrot.slane %v3423_v4, 1  ;;  %v4254_v21 = vmul.f32 -0.050240472, %v3583_v44  ;;  %v362_v1 = vrot.slane %v330_v61, 1 }
  0x97   :  { %v389_v46 = vmul.f32 0.1875, %v7773_v9  ;;  %v359_v43 = vrot.slane %v329_v50, 1  ;;  %v7775_v24 = vrot.slane %v3435_v6, 1  ;;  %v7776_v4 = vrot.slane %v3420_v3, 1  ;;  %v7779_v38 = vld [vmem:[#allocation7_spill] sm:$0xff]  ;;  %v7781_v6 = vld [vmem:[#allocation8_spill] sm:$0xff]  ;;  %v4288_v9 = vpop.permute.xlu0 %243 }
  0x98   :  { %v4251_v11 = vsel %vm339_vm0, %v7774_v47, %v341_v49  ;;  %v4271_v44 = vmul.f32 -0.050240472, %v3588_v45  ;;  %v4274_v61 = vmul.f32 0.02900635, %v3597_v48  ;;  %v7780_v49 = vrot.slane %v7779_v38, 1  ;;  %1035 = vrot.lane.b32.xlu1 %v4124_v16, %s3393_s14 }
  0x99   :  { %v4263_v25 = vsel %vm339_vm0, %v7775_v24, %v350_v10  ;;  %v4268_v8 = vsel %vm339_vm0, %v7776_v4, %v347_v62  ;;  %v7782_v50 = vrot.slane %v7781_v6, 1  ;;  %v418_v3 = vrot.slane %v384_v51, 1  ;;  %v4286_v62 = vpop.permute.xlu1 %245  ;;  %1033 = vrot.lane.b32.xlu0 %v4127_v17, %s3393_s14 }
  0x9a   :  { %7777 = vst [vmem:[#allocation35_spill] sm:$0xff] %v4268_v8  ;;  %7778 = vst [vmem:[#allocation36_spill] sm:$0xff] %v4274_v61  ;;  %v4279_v34 = vsel %vm339_vm0, %v7780_v49, %v356_v63  ;;  %v419_v10 = vrot.slane %v385_v39, 1  ;;  %v427_v45 = vrot.slane %v390_v7, 1  ;;  %v428_v24 = vrot.slane %v391_v18, 1  ;;  %v7784_v8 = vld [vmem:[#allocation11_spill] sm:$0xff] }
  0x9b   :  { %v4284_v47 = vsel %vm339_vm0, %v7782_v50, %v353_v31  ;;  %v424_v48 = vrot.slane %v388_v14, 1  ;;  %v425_v4 = vrot.slane %v389_v46, 1  ;;  %v7785_v38 = vrot.slane %v7784_v8, 1  ;;  %v7787_v49 = vld [vmem:[#allocation12_spill] sm:$0xff]  ;;  %v7793_v14 = vld [vmem:[#allocation37_spill] sm:$0xff] }
  0x9c   :  { %7783 = vst [vmem:[#allocation7_spill] sm:$0xff] %v4284_v47  ;;  %v7788_v6 = vrot.slane %v7787_v49, 1  ;;  %v4301_v39 = vmul.f32 0.02900635, %v7736_v30  ;;  %v4304_v51 = vmul.f32 0.02900635, %v3615_v52  ;;  %v4319_v46 = vsel %vm339_vm0, %v418_v3, %v419_v10  ;;  %1039 = vrot.lane.b32.xlu1 %v4142_v5, %s3393_s14 }
  0x9d   :  { %v4293_v63 = vsel %vm339_vm0, %v7785_v38, %v362_v1  ;;  %v4311_v7 = vmul.f32 0.02900635, %v3620_v53  ;;  %v4314_v18 = vmul.f32 0.02900635, %v3635_v56  ;;  %v395_v30 = vmul.f32 0.1875, %v7793_v14  ;;  %7794 = vst [vmem:[#allocation37_spill] sm:$0xff] %v4319_v46  ;;  %v4326_v8 = vpop.permute.xlu1 %249  ;;  %v4328_v53 = vpop.permute.xlu0 %247  ;;  %1037 = vrot.lane.b32.xlu0 %v4148_v27, %s3393_s14 }
  0x9e   :  { %7786 = vst [vmem:[#allocation8_spill] sm:$0xff] %v4293_v63  ;;  %v4298_v31 = vsel %vm339_vm0, %v7788_v6, %v359_v43  ;;  %7790 = vst [vmem:[#allocation12_spill] sm:$0xff] %v4301_v39  ;;  %v394_v43 = vmul.f32 0.1875, %v3527_v28  ;;  %v4322_v52 = vmul.f32 0.02900635, %v3640_v57  ;;  %v392_v16 = vmul.f32 0.1875, %v3532_v29 }
  0x9f   :  { %7789 = vst [vmem:[#allocation11_spill] sm:$0xff] %v4298_v31  ;;  %7791 = vst [vmem:[#allocation93_spill] sm:$0xff] %v4304_v51  ;;  %v7795_v1 = vld [vmem:[#allocation38_spill] sm:$0xff]  ;;  %v4331_v56 = vsel %vm339_vm0, %v427_v45, %v428_v24  ;;  %v4334_v28 = vsel %vm339_vm0, %v424_v48, %v425_v4  ;;  %v4337_v50 = vmul.f32 0.02900635, %v3674_v23  ;;  %v7798_v3 = vld [vmem:[#allocation4_spill] sm:$0xff] }
  0xa0   :  { %7792 = vst [vmem:[#allocation94_spill] sm:$0xff] %v4311_v7  ;;  %v393_v17 = vmul.f32 0.1875, %v7795_v1  ;;  %7796 = vst [vmem:[#allocation38_spill] sm:$0xff] %v4331_v56  ;;  %v4340_v57 = vmul.f32 0.02900635, %v3679_v26  ;;  %v1335_v29 = vmul.f32 0.1875, %v7798_v3  ;;  %1043 = vrot.lane.b32.xlu1 %v4163_v19, %s3393_s14 }
  0xa1   :  { %7797 = vst [vmem:[#allocation95_spill] sm:$0xff] %v4334_v28  ;;  %v1336_v10 = vmul.f32 0.1875, %v7742_v42  ;;  %v7799_v38 = vld [vmem:[#allocation2_spill] sm:$0xff]  ;;  %v1334_v6 = vmul.f32 0.1875, %v7749_v58  ;;  %v433_v45 = vrot.slane %v394_v43, 1  ;;  %v434_v23 = vrot.slane %v395_v30, 1  ;;  %v4356_v58 = vpop.permute.xlu0 %251  ;;  %1041 = vrot.lane.b32.xlu0 %v4166_v2, %s3393_s14 }
  0xa2   :  { %v1333_v49 = vmul.f32 0.1875, %v7799_v38  ;;  %v630_v24 = vmul.f32 -0.0625, %v3541_v32  ;;  %v7800_v26 = vld [vmem:[#allocation39_spill] sm:$0xff]  ;;  %v430_v4 = vrot.slane %v392_v16, 1  ;;  %v431_v14 = vrot.slane %v393_v17, 1  ;;  %v7801_v1 = vld [vmem:[#allocation40_spill] sm:$0xff]  ;;  %v4354_v38 = vpop.permute.xlu1 %253 }
  0xa3   :  { %v631_v48 = vmul.f32 -0.0625, %v7800_v26  ;;  %v628_v42 = vmul.f32 -0.0625, %v3546_v33  ;;  %v629_v3 = vmul.f32 -0.0625, %v7801_v1  ;;  %v4361_v27 = vld [vmem:[%s7347_s0 + $0x30] sm:$0xff]  ;;  %v1340_v32 = vmul.f32 0.1875, %v7754_v60  ;;  %v4368_v43 = vld [vmem:[%s7347_s0 + $0x20] sm:$0xff] }
  0xa4   :  { %7802 = vst [vmem:[#allocation4_spill] sm:$0xff] %v4361_v27  ;;  %v1339_v5 = vmul.f32 0.1875, %v4361_v27  ;;  %7803 = vst [vmem:[#allocation2_spill] sm:$0xff] %v4368_v43  ;;  %v1337_v33 = vmul.f32 0.1875, %v4368_v43  ;;  %v1338_v30 = vmul.f32 0.1875, %v7755_v12  ;;  %v1368_v16 = vrot.slane %v1335_v29, 1  ;;  %1111 = vrot.lane.b32.xlu1 %v4180_v55, %s3393_s14 }
  0xa5   :  { %v1369_v17 = vrot.slane %v1336_v10, 1  ;;  %v1365_v26 = vrot.slane %v1333_v49, 1  ;;  %v1366_v1 = vrot.slane %v1334_v6, 1  ;;  %v663_v60 = vrot.slane %v630_v24, 1  ;;  %v7804_v56 = vld [vmem:[#allocation41_spill] sm:$0xff]  ;;  %v7805_v29 = vld [vmem:[#allocation42_spill] sm:$0xff]  ;;  %v4382_v6 = vpop.permute.xlu0 %255  ;;  %1109 = vrot.lane.b32.xlu0 %v4197_v22, %s3393_s14 }
  0xa6   :  { %v664_v27 = vrot.slane %v631_v48, 1  ;;  %v634_v28 = vmul.f32 -0.0625, %v3555_v36  ;;  %v635_v31 = vmul.f32 -0.0625, %v7804_v56  ;;  %v660_v63 = vrot.slane %v628_v42, 1  ;;  %v4380_v49 = vpop.permute.xlu1 %257  ;;  %v4410_v55 = vld [vmem:[%s7347_s0 + $0x40] sm:$0xff] }
  0xa7   :  { %v661_v43 = vrot.slane %v629_v3, 1  ;;  %v632_v12 = vmul.f32 -0.0625, %v3560_v37  ;;  %v633_v10 = vmul.f32 -0.0625, %v7805_v29  ;;  %v1374_v19 = vrot.slane %v1339_v5, 1  ;;  %7809 = vst [vmem:[#allocation42_spill] sm:$0xff] %v4410_v55  ;;  %v7814_v29 = vld [vmem:[#allocation73_spill] sm:$0xff] }
  0xa8   :  { %v1375_v46 = vrot.slane %v1340_v32, 1  ;;  %v1371_v47 = vrot.slane %v1337_v33, 1  ;;  %v1372_v2 = vrot.slane %v1338_v30, 1  ;;  %v4385_v24 = vsel %vm339_vm0, %v433_v45, %v434_v23  ;;  %v4403_v45 = vld [vmem:[%s7347_s0 + $0x50] sm:$0xff]  ;;  %1115 = vrot.lane.b32.xlu1 %v4206_v0, %s3393_s14 }
  0xa9   :  { %7806 = vst [vmem:[#allocation39_spill] sm:$0xff] %v4385_v24  ;;  %v4388_v36 = vsel %vm339_vm0, %v430_v4, %v431_v14  ;;  %v4391_v56 = vsel %vm339_vm0, %v1368_v16, %v1369_v17  ;;  %v4394_v37 = vsel %vm339_vm0, %v1365_v26, %v1366_v1  ;;  %v669_v48 = vrot.slane %v634_v28, 1  ;;  %7808 = vst [vmem:[#allocation41_spill] sm:$0xff] %v4403_v45  ;;  %v4416_v5 = vpop.permute.xlu0 %291  ;;  %v7812_v17 = vld [vmem:[#allocation43_spill] sm:$0xff]  ;;  %v7813_v1 = vld [vmem:[#allocation44_spill] sm:$0xff] }
  0xaa   :  { %7807 = vst [vmem:[#allocation40_spill] sm:$0xff] %v4388_v36  ;;  %v670_v42 = vrot.slane %v635_v31, 1  ;;  %v1343_v23 = vmul.f32 0.1875, %v4403_v45  ;;  %v1344_v4 = vmul.f32 0.1875, %v7757_v35  ;;  %v666_v14 = vrot.slane %v632_v12, 1  ;;  %v4414_v28 = vpop.permute.xlu1 %293  ;;  %1113 = vrot.lane.b32.xlu0 %v4209_v20, %s3393_s14  ;;  %v4457_v0 = vld [vmem:[%s7347_s0 + $0x70] sm:$0xff] }
  0xab   :  { %v667_v3 = vrot.slane %v633_v10, 1  ;;  %v1341_v22 = vmul.f32 0.1875, %v4410_v55  ;;  %v1342_v31 = vmul.f32 0.1875, %v7758_v15  ;;  %v4419_v32 = vsel %vm339_vm0, %v663_v60, %v664_v27  ;;  %v7815_v27 = vld [vmem:[#allocation55_spill] sm:$0xff]  ;;  %7820 = vst [vmem:[#allocation73_spill] sm:$0xff] %v4457_v0 }
  0xac   :  { %7810 = vst [vmem:[#allocation96_spill] sm:$0xff] %v4419_v32  ;;  %v4422_v35 = vsel %vm339_vm0, %v660_v63, %v661_v43  ;;  %v4425_v33 = vsel %vm339_vm0, %v1374_v19, %v1375_v46  ;;  %v4428_v30 = vsel %vm339_vm0, %v1371_v47, %v1372_v2  ;;  %v638_v16 = vmul.f32 -0.0625, %v3569_v40  ;;  %v7816_v63 = vld [vmem:[#allocation78_spill] sm:$0xff]  ;;  %v7817_v43 = vld [vmem:[#allocation56_spill] sm:$0xff]  ;;  %v7826_v45 = vld [vmem:[#allocation19_spill] sm:$0xff] }
  0xad   :  { %7811 = vst [vmem:[#allocation97_spill] sm:$0xff] %v4422_v35  ;;  %v639_v15 = vmul.f32 -0.0625, %v7812_v17  ;;  %v636_v26 = vmul.f32 -0.0625, %v3574_v41  ;;  %v637_v12 = vmul.f32 -0.0625, %v7813_v1  ;;  %v4436_v60 = vadd.f32 %v7815_v27, %v7814_v29  ;;  %v4452_v1 = vpop.permute.xlu0 %295 }
  0xae   :  { %v139_v10 = vadd.f32 %v7817_v43, %v7816_v63  ;;  %v1380_v40 = vrot.slane %v1343_v23, 1  ;;  %v1381_v47 = vrot.slane %v1344_v4, 1  ;;  %v4445_v46 = vsel %vm339_vm0, %v669_v48, %v670_v42  ;;  %v4450_v17 = vpop.permute.xlu1 %297  ;;  %v7821_v23 = vld [vmem:[#allocation29_spill] sm:$0xff]  ;;  %v4464_v48 = vld [vmem:[%s7347_s0 + $0x60] sm:$0xff]  ;;  %v7824_v63 = vld [vmem:[#allocation80_spill] sm:$0xff]  ;;  %1117 = vrot.lane.b32.xlu0 %v4236_v54, %s3393_s14 }
  0xaf   :  { %7818 = vst [vmem:[#allocation43_spill] sm:$0xff] %v4445_v46  ;;  %v4448_v41 = vsel %vm339_vm0, %v666_v14, %v667_v3  ;;  %v1377_v19 = vrot.slane %v1341_v22, 1  ;;  %v1378_v2 = vrot.slane %v1342_v31, 1  ;;  %v1347_v20 = vmul.f32 0.1875, %v4457_v0  ;;  %7822 = vst [vmem:[#allocation55_spill] sm:$0xff] %v4464_v48  ;;  %v7823_v14 = vld [vmem:[#allocation30_spill] sm:$0xff] }
  0xb0   :  { %7819 = vst [vmem:[#allocation44_spill] sm:$0xff] %v4448_v41  ;;  %v1348_v4 = vmul.f32 0.1875, %v7821_v23  ;;  %v1345_v42 = vmul.f32 0.1875, %v4464_v48  ;;  %v1346_v3 = vmul.f32 0.1875, %v7823_v14  ;;  %v675_v22 = vrot.slane %v638_v16, 1  ;;  %v7825_v43 = vld [vmem:[#allocation57_spill] sm:$0xff] }
  0xb1   :  { %v676_v31 = vrot.slane %v639_v15, 1  ;;  %v672_v29 = vrot.slane %v636_v26, 1  ;;  %v673_v27 = vrot.slane %v637_v12, 1  ;;  %v142_v55 = vadd.f32 %v7825_v43, %v7824_v63  ;;  %v7827_v0 = vld [vmem:[#allocation58_spill] sm:$0xff]  ;;  %v4482_v16 = vld [vmem:[%s7347_s0 + $0x170] sm:$0xff]  ;;  %v4498_v63 = vpop.permute.xlu0 %299 }
  0xb2   :  { %v140_v36 = vadd.f32 %v7827_v0, %v7826_v45  ;;  %v7828_v23 = vld [vmem:[#allocation90_spill] sm:$0xff]  ;;  %v4477_v48 = vsel %vm339_vm0, %v1380_v40, %v1381_v47  ;;  %7830 = vst [vmem:[#allocation56_spill] sm:$0xff] %v4482_v16  ;;  %v642_v15 = vmul.f32 -0.0625, %v4482_v16  ;;  %v4486_v26 = vsel %vm339_vm0, %v1377_v19, %v1378_v2  ;;  %v7832_v45 = vld [vmem:[#allocation45_spill] sm:$0xff]  ;;  %v4496_v14 = vpop.permute.xlu1 %301  ;;  %v7835_v2 = vld [vmem:[#allocation75_spill] sm:$0xff]  ;;  %1121 = vrot.lane.b32.xlu0 %v4271_v44, %s3393_s14 }
  0xb3   :  { %1119 = vrot.lane.b32.xlu1 %v7828_v23, %s3393_s14  ;;  %7829 = vst [vmem:[#allocation78_spill] sm:$0xff] %v4477_v48  ;;  %7831 = vst [vmem:[#allocation29_spill] sm:$0xff] %v4486_v26  ;;  %v643_v12 = vmul.f32 -0.0625, %v7832_v45  ;;  %v4492_v0 = vld [vmem:[%s7347_s0 + $0x160] sm:$0xff]  ;;  %v1386_v43 = vrot.slane %v1347_v20, 1  ;;  %v1387_v23 = vrot.slane %v1348_v4, 1  ;;  %v4503_v46 = vsel %vm339_vm0, %v675_v22, %v676_v31 }
  0xb4   :  { %7833 = vst [vmem:[#allocation30_spill] sm:$0xff] %v4492_v0  ;;  %v640_v54 = vmul.f32 -0.0625, %v4492_v0  ;;  %v7834_v40 = vld [vmem:[#allocation46_spill] sm:$0xff]  ;;  %v1383_v16 = vrot.slane %v1345_v42, 1  ;;  %v1384_v19 = vrot.slane %v1346_v3, 1  ;;  %v188_v24 = vadd.f32 %v7835_v2, %v140_v36  ;;  %v7836_v45 = vld [vmem:[#allocation76_spill] sm:$0xff] }
  0xb5   :  { %v641_v47 = vmul.f32 -0.0625, %v7834_v40  ;;  %v187_v41 = vadd.f32 %v7836_v45, %v139_v10  ;;  %7837 = vst [vmem:[#allocation80_spill] sm:$0xff] %v4503_v46  ;;  %v4506_v26 = vsel %vm339_vm0, %v672_v29, %v673_v27  ;;  %v7839_v0 = vld [vmem:[#allocation84_spill] sm:$0xff]  ;;  %v7840_v40 = vld [vmem:[#allocation3_spill] sm:$0xff]  ;;  %v681_v20 = vrot.slane %v642_v15, 1  ;;  %v7847_v27 = vld [vmem:[#allocation13_spill] sm:$0xff] }
  0xb6   :  { %7838 = vst [vmem:[#allocation57_spill] sm:$0xff] %v4506_v26  ;;  %v144_v48 = vadd.f32 %v7840_v40, %v7839_v0  ;;  %v4517_v36 = vld [vmem:[%s7347_s0 + $0x90] sm:$0xff]  ;;  %v7843_v4 = vld [vmem:[#allocation31_spill] sm:$0xff]  ;;  %v682_v3 = vrot.slane %v643_v12, 1  ;;  %v678_v22 = vrot.slane %v640_v54, 1  ;;  %v7848_v0 = vld [vmem:[#allocation89_spill] sm:$0xff]  ;;  %v4535_v40 = vpop.permute.xlu1 %305  ;;  %v4540_v12 = vsel %vm339_vm0, %v1386_v43, %v1387_v23  ;;  %1157 = vrot.lane.b32.xlu0 %v4301_v39, %s3393_s14 }
  0xb7   :  { %1123 = vrot.lane.b32.xlu1 %v4254_v21, %s3393_s14  ;;  %7841 = vst [vmem:[#allocation19_spill] sm:$0xff] %v4517_v36  ;;  %v4520_v10 = vmul.f32 -0.10825317, %v4517_v36  ;;  %v1422_v42 = vmul.f32 -0.10825317, %v7843_v4  ;;  %v679_v31 = vrot.slane %v641_v47, 1  ;;  %v4537_v4 = vpop.permute.xlu0 %303  ;;  %v4543_v54 = vsel %vm339_vm0, %v1383_v16, %v1384_v19 }
  0xb8   :  { %v4526_v21 = vld [vmem:[%s7347_s0 + $0x80] sm:$0xff]  ;;  %v7846_v29 = vld [vmem:[#allocation20_spill] sm:$0xff]  ;;  %v7850_v47 = vld [vmem:[#allocation9_spill] sm:$0xff] }
  0xb9   :  { %7842 = vst [vmem:[#allocation58_spill] sm:$0xff] %v4520_v10  ;;  %7844 = vst [vmem:[#allocation90_spill] sm:$0xff] %v4526_v21  ;;  %v4529_v44 = vmul.f32 -0.10825317, %v4526_v21  ;;  %v143_v15 = vadd.f32 %v7847_v27, %v7846_v29  ;;  %v7849_v2 = vld [vmem:[#allocation62_spill] sm:$0xff]  ;;  %v204_v36 = vadd.f32 %v7850_v47, %v188_v24  ;;  %v7852_v46 = vld [vmem:[#allocation85_spill] sm:$0xff] }
  0xba   :  { %v146_v45 = vadd.f32 %v7849_v2, %v7848_v0  ;;  %v7851_v21 = vld [vmem:[#allocation10_spill] sm:$0xff]  ;;  %v190_v35 = vadd.f32 %v7852_v46, %v142_v55  ;;  %v7854_v0 = vld [vmem:[#allocation23_spill] sm:$0xff]  ;;  %v1448_v16 = vrot.slane %v4520_v10, 1  ;;  %v1449_v43 = vrot.slane %v1422_v42, 1  ;;  %v7856_v24 = vld [vmem:[#allocation32_spill] sm:$0xff]  ;;  %1161 = vrot.lane.b32.xlu0 %v4311_v7, %s3393_s14 }
  0xbb   :  { %7845 = vst [vmem:[#allocation45_spill] sm:$0xff] %v4529_v44  ;;  %v203_v26 = vadd.f32 %v7851_v21, %v187_v41  ;;  %v7853_v29 = vld [vmem:[#allocation86_spill] sm:$0xff]  ;;  %v7855_v2 = vld [vmem:[#allocation63_spill] sm:$0xff]  ;;  %1159 = vrot.lane.b32.xlu1 %v4274_v61, %s3393_s14  ;;  %v1421_v23 = vmul.f32 -0.10825317, %v7856_v24  ;;  %v4559_v41 = vsel %vm339_vm0, %v681_v20, %v682_v3  ;;  %v4562_v55 = vsel %vm339_vm0, %v678_v22, %v679_v31  ;;  %v7860_v21 = vld [vmem:[#allocation24_spill] sm:$0xff]  ;;  %v4570_v10 = vpop.permute.xlu0 %508 }
  0xbc   :  { %v189_v27 = vadd.f32 %v7853_v29, %v4436_v60  ;;  %v145_v32 = vadd.f32 %v7855_v2, %v7854_v0  ;;  %7857 = vst [vmem:[#allocation46_spill] sm:$0xff] %v4559_v41  ;;  %7858 = vst [vmem:[#allocation75_spill] sm:$0xff] %v4562_v55  ;;  %v1445_v60 = vrot.slane %v4529_v44, 1  ;;  %v7859_v46 = vld [vmem:[#allocation47_spill] sm:$0xff]  ;;  %v192_v47 = vadd.f32 %v7860_v21, %v144_v48  ;;  %v4568_v2 = vpop.permute.xlu1 %510  ;;  %v7862_v42 = vld [vmem:[#allocation48_spill] sm:$0xff] }
  0xbd   :  { %v701_v19 = vmul.f32 -0.10825317, %v7859_v46  ;;  %v7861_v29 = vld [vmem:[#allocation27_spill] sm:$0xff]  ;;  %v700_v24 = vmul.f32 -0.10825317, %v7862_v42  ;;  %v4576_v20 = vld [vmem:[%s7347_s0 + $0xb0] sm:$0xff]  ;;  %v4590_v42 = vsel %vm339_vm0, %v1448_v16, %v1449_v43 }
  0xbe   :  { %v191_v0 = vadd.f32 %v7861_v29, %v143_v15  ;;  %7863 = vst [vmem:[#allocation76_spill] sm:$0xff] %v4576_v20  ;;  %v4579_v3 = vmul.f32 -0.10825317, %v4576_v20  ;;  %v7864_v22 = vld [vmem:[#allocation61_spill] sm:$0xff]  ;;  %v7865_v46 = vld [vmem:[#allocation64_spill] sm:$0xff]  ;;  %v7867_v29 = vld [vmem:[#allocation14_spill] sm:$0xff]  ;;  %v193_v7 = vadd.f32 %v4242_v59, %v145_v32  ;;  %1165 = vrot.lane.b32.xlu0 %v4322_v52, %s3393_s14 }
  0xbf   :  { %v206_v31 = vadd.f32 %v7864_v22, %v190_v35  ;;  %v205_v48 = vadd.f32 %v7865_v46, %v189_v27  ;;  %v7866_v21 = vld [vmem:[#allocation77_spill] sm:$0xff]  ;;  %v219_v44 = vadd.f32 %v7867_v29, %v203_v26  ;;  %1163 = vrot.lane.b32.xlu1 %v4304_v51, %s3393_s14  ;;  %v1446_v39 = vrot.slane %v1421_v23, 1  ;;  %v4596_v35 = vld [vmem:[%s7347_s0 + $0xa0] sm:$0xff]  ;;  %v7870_v16 = vld [vmem:[#allocation67_spill] sm:$0xff]  ;;  %v4610_v55 = vpop.permute.xlu0 %512 }
  0xc0   :  { %v220_v15 = vadd.f32 %v7866_v21, %v204_v36  ;;  %v7868_v20 = vld [vmem:[#allocation33_spill] sm:$0xff]  ;;  %7869 = vst [vmem:[#allocation84_spill] sm:$0xff] %v4596_v35  ;;  %v4599_v36 = vmul.f32 -0.10825317, %v4596_v35  ;;  %v720_v22 = vrot.slane %v701_v19, 1  ;;  %v208_v43 = vadd.f32 %v7870_v16, %v192_v47  ;;  %v7871_v23 = vld [vmem:[#allocation68_spill] sm:$0xff]  ;;  %v4608_v51 = vpop.permute.xlu1 %514 }
  0xc1   :  { %v1424_v61 = vmul.f32 -0.10825317, %v7868_v20  ;;  %v267_v27 = vadd.f32 %v4288_v9, %v219_v44  ;;  %v1423_v46 = vmul.f32 -0.10825317, %v7770_v13  ;;  %v207_v21 = vadd.f32 %v7871_v23, %v191_v0  ;;  %v7872_v20 = vld [vmem:[#allocation34_spill] sm:$0xff]  ;;  %v7873_v35 = vld [vmem:[#allocation79_spill] sm:$0xff] }
  0xc2   :  { %v268_v26 = vadd.f32 %v4286_v62, %v220_v15  ;;  %v194_v29 = vadd.f32 %v7872_v20, %v146_v45  ;;  %v222_v41 = vadd.f32 %v7873_v35, %v206_v31  ;;  %v7874_v62 = vld [vmem:[#allocation81_spill] sm:$0xff]  ;;  %v4621_v59 = vsel %vm339_vm0, %v1445_v60, %v1446_v39  ;;  %v7875_v0 = vld [vmem:[#allocation71_spill] sm:$0xff]  ;;  %1169 = vrot.lane.b32.xlu0 %v4340_v57, %s3393_s14  ;;  %v7881_v20 = vld [vmem:[#allocation50_spill] sm:$0xff] }
  0xc3   :  { %v221_v15 = vadd.f32 %v7874_v62, %v205_v48  ;;  %v315_v13 = vadd.f32 %v4416_v5, %v267_v27  ;;  %1167 = vrot.lane.b32.xlu1 %v4314_v18, %s3393_s14  ;;  %v717_v32 = vrot.slane %v700_v24, 1  ;;  %v1454_v44 = vrot.slane %v4579_v3, 1  ;;  %v7876_v48 = vld [vmem:[#allocation74_spill] sm:$0xff]  ;;  %v7878_v16 = vld [vmem:[#allocation83_spill] sm:$0xff]  ;;  %v4633_v24 = vpop.permute.xlu0 %516 }
  0xc4   :  { %v316_v9 = vadd.f32 %v4414_v28, %v268_v26  ;;  %v1455_v45 = vrot.slane %v1424_v61, 1  ;;  %v270_v19 = vadd.f32 %v4326_v8, %v222_v41  ;;  %v1451_v28 = vrot.slane %v4599_v36, 1  ;;  %v7877_v26 = vld [vmem:[#allocation82_spill] sm:$0xff]  ;;  %v4631_v60 = vpop.permute.xlu1 %518  ;;  %v7879_v61 = vld [vmem:[#allocation92_spill] sm:$0xff]  ;;  %v7882_v62 = vld [vmem:[#allocation15_spill] sm:$0xff] }
  0xc5   :  { %v269_v47 = vadd.f32 %v4328_v53, %v221_v15  ;;  %v1452_v5 = vrot.slane %v1423_v46, 1  ;;  %v210_v31 = vadd.f32 %v7875_v0, %v194_v29  ;;  %v209_v35 = vadd.f32 %v7876_v48, %v193_v7  ;;  %v7884_v15 = vld [vmem:[#allocation16_spill] sm:$0xff] }
  0xc6   :  { %v224_v27 = vadd.f32 %v7877_v26, %v208_v43  ;;  %v223_v39 = vadd.f32 %v7878_v16, %v207_v21  ;;  %v373_v23 = vadd.f32 %v7879_v61, %v316_v9  ;;  %v372_v8 = vadd.f32 %v4251_v11, %v315_v13  ;;  %v7880_v43 = vld [vmem:[#allocation49_spill] sm:$0xff]  ;;  %v7886_v13 = vld [vmem:[#allocation87_spill] sm:$0xff]  ;;  %1389 = vrot.lane.b32.xlu0 %v4394_v37, %s3393_s14 }
  0xc7   :  { %v318_v53 = vadd.f32 %v4450_v17, %v270_v19  ;;  %v317_v41 = vadd.f32 %v4452_v1, %v269_v47  ;;  %1171 = vrot.lane.b32.xlu1 %v4337_v50, %s3393_s14  ;;  %v703_v21 = vmul.f32 -0.10825317, %v7880_v43  ;;  %v702_v29 = vmul.f32 -0.10825317, %v7881_v20  ;;  %v7887_v47 = vld [vmem:[#allocation88_spill] sm:$0xff]  ;;  %v7888_v16 = vld [vmem:[#allocation35_spill] sm:$0xff] }
  0xc8   :  { %v272_v46 = vadd.f32 %v4354_v38, %v224_v27  ;;  %v271_v7 = vadd.f32 %v4356_v58, %v223_v39  ;;  %v7883_v11 = vrot.slane %v7882_v62, 1  ;;  %v7885_v1 = vrot.slane %v7884_v15, 1  ;;  %v4663_v27 = vpop.permute.xlu1 %522  ;;  %v7897_v15 = vld [vmem:[#allocation18_spill] sm:$0xff] }
  0xc9   :  { %v4654_v58 = vsel %vm339_vm0, %v1454_v44, %v1455_v45  ;;  %v4657_v9 = vsel %vm339_vm0, %v1451_v28, %v1452_v5  ;;  %v226_v19 = vadd.f32 %v7886_v13, %v210_v31  ;;  %v225_v0 = vadd.f32 %v7887_v47, %v209_v35  ;;  %v7889_v45 = vld [vmem:[#allocation72_spill] sm:$0xff]  ;;  %v7899_v13 = vld [vmem:[#allocation51_spill] sm:$0xff] }
  0xca   :  { %v721_v17 = vsel %vm339_vm0, %v7883_v11, %v720_v22  ;;  %v718_v38 = vsel %vm339_vm0, %v7885_v1, %v717_v32  ;;  %v320_v48 = vadd.f32 %v4496_v14, %v272_v46  ;;  %v319_v26 = vadd.f32 %v4498_v63, %v271_v7  ;;  %v4665_v22 = vpop.permute.xlu0 %520  ;;  %v7890_v28 = vld [vmem:[#allocation28_spill] sm:$0xff]  ;;  %v7893_v7 = vld [vmem:[#allocation91_spill] sm:$0xff]  ;;  %1393 = vrot.lane.b32.xlu0 %v4428_v30, %s3393_s14 }
  0xcb   :  { %v375_v32 = vadd.f32 %v4263_v25, %v318_v53  ;;  %v374_v44 = vadd.f32 %v7888_v16, %v317_v41  ;;  %v445_v39 = vadd.f32 %v7889_v45, %v373_v23  ;;  %v444_v5 = vadd.f32 %v7890_v28, %v372_v8  ;;  %1391 = vrot.lane.b32.xlu1 %v4391_v56, %s3393_s14  ;;  %v4682_v23 = vld [vmem:[%s7347_s0 + $0xd0] sm:$0xff]  ;;  %v7902_v16 = vld [vmem:[#allocation97_spill] sm:$0xff] }
  0xcc   :  { %v274_v31 = vadd.f32 %v4380_v49, %v226_v19  ;;  %v273_v35 = vadd.f32 %v4382_v6, %v225_v0  ;;  %v726_v14 = vrot.slane %v703_v21, 1  ;;  %v723_v63 = vrot.slane %v702_v29, 1  ;;  %v4690_v6 = vld [vmem:[%s7347_s0 + $0xd8] sm:$0x1]  ;;  %v599_v41 = vpop.permute.xlu1 %598  ;;  %v7900_v47 = vld [vmem:[#allocation52_spill] sm:$0xff] }
  0xcd   :  { %v533_v25 = vadd.f32 %v4568_v2, %v445_v39  ;;  %v532_v61 = vadd.f32 %v4570_v10, %v444_v5  ;;  %v4685_v49 = vmul.f32 -0.10825317, %v4682_v23  ;;  %7891 = vst [vmem:[#allocation3_spill] sm:$0xff] %v4690_v6  ;;  %v4693_v56 = vmul.f32 -0.10825317, %v4690_v6  ;;  %v7892_v2 = vld [vmem:[#allocation7_spill] sm:$0xff] }
  0xce   :  { %v377_v37 = vadd.f32 %v4279_v34, %v320_v48  ;;  %v376_v10 = vadd.f32 %v7892_v2, %v319_v26  ;;  %v322_v8 = vadd.f32 %v4535_v40, %v274_v31  ;;  %v321_v53 = vadd.f32 %v4537_v4, %v273_v35  ;;  %v597_v46 = vpop.permute.xlu0 %596  ;;  %v7894_v21 = vld [vmem:[#allocation37_spill] sm:$0xff]  ;;  %v7904_v39 = vld [vmem:[#allocation11_spill] sm:$0xff]  ;;  %v7905_v5 = vld [vmem:[#allocation38_spill] sm:$0xff] }
  0xcf   :  { %v447_v43 = vadd.f32 %v7893_v7, %v375_v32  ;;  %v446_v20 = vadd.f32 %v7894_v21, %v374_v44  ;;  %v621_v29 = vadd.f32 %v599_v41, %v533_v25  ;;  %v620_v62 = vadd.f32 %v597_v46, %v532_v61  ;;  %1395 = vrot.lane.b32.xlu1 %v4425_v33, %s3393_s14  ;;  %v7895_v34 = vld [vmem:[#allocation17_spill] sm:$0xff]  ;;  %v7901_v33 = vld [vmem:[#allocation96_spill] sm:$0xff]  ;;  %v7906_v35 = vld [vmem:[#allocation95_spill] sm:$0xff] }
  0xd0   :  { %v7896_v11 = vrot.slane %v7895_v34, 1  ;;  %v7898_v4 = vrot.slane %v7897_v15, 1  ;;  %v705_v19 = vmul.f32 -0.10825317, %v7899_v13  ;;  %v704_v0 = vmul.f32 -0.10825317, %v7900_v47 }
  0xd1   :  { %v535_v48 = vadd.f32 %v4608_v51, %v447_v43  ;;  %v534_v26 = vadd.f32 %v4610_v55, %v446_v20  ;;  %v693_v32 = vadd.f32 %v7901_v33, %v621_v29  ;;  %v692_v30 = vadd.f32 %v7902_v16, %v620_v62  ;;  %v7903_v44 = vld [vmem:[#allocation8_spill] sm:$0xff]  ;;  %v7907_v55 = vld [vmem:[#allocation78_spill] sm:$0xff]  ;;  %v7908_v46 = vld [vmem:[#allocation29_spill] sm:$0xff] }
  0xd2   :  { %v727_v40 = vsel %vm339_vm0, %v7896_v11, %v726_v14  ;;  %v724_v1 = vsel %vm339_vm0, %v7898_v4, %v723_v63  ;;  %v379_v45 = vadd.f32 %v7903_v44, %v322_v8  ;;  %v378_v28 = vadd.f32 %v7904_v39, %v321_v53  ;;  %v603_v63 = vpop.permute.xlu1 %602  ;;  %v601_v25 = vpop.permute.xlu0 %600  ;;  %1397 = vrot.lane.b32.xlu0 %v7908_v46, %s3393_s14  ;;  %v7909_v7 = vld [vmem:[#allocation53_spill] sm:$0xff]  ;;  %v7910_v43 = vld [vmem:[#allocation54_spill] sm:$0xff]  ;;  %v7913_v34 = vld [vmem:[#allocation39_spill] sm:$0xff] }
  0xd3   :  { %v449_v31 = vadd.f32 %v7905_v5, %v377_v37  ;;  %v448_v14 = vadd.f32 %v7906_v35, %v376_v10  ;;  %v623_v61 = vadd.f32 %v603_v63, %v535_v48  ;;  %v622_v2 = vadd.f32 %v601_v25, %v534_v26  ;;  %1399 = vrot.lane.b32.xlu1 %v7907_v55, %s3393_s14  ;;  %v7914_v15 = vld [vmem:[#allocation40_spill] sm:$0xff]  ;;  %v7916_v16 = vld [vmem:[#allocation21_spill] sm:$0xff] }
  0xd4   :  { %v4721_v41 = vadd.f32 %v721_v17, %v693_v32  ;;  %v4723_v51 = vadd.f32 %v718_v38, %v692_v30  ;;  %v732_v8 = vrot.slane %v705_v19, 1  ;;  %v729_v53 = vrot.slane %v704_v0, 1  ;;  %v7911_v17 = vld [vmem:[#allocation43_spill] sm:$0xff]  ;;  %v7912_v38 = vld [vmem:[#allocation44_spill] sm:$0xff]  ;;  %v4740_v19 = vld [vmem:[%s7347_s0 + $0xc0] sm:$0xff] }
  0xd5   :  { %v707_v37 = vmul.f32 -0.10825317, %v7909_v7  ;;  %v706_v10 = vmul.f32 -0.10825317, %v7910_v43  ;;  %v537_v21 = vadd.f32 %v4631_v60, %v449_v31  ;;  %v536_v20 = vadd.f32 %v4633_v24, %v448_v14  ;;  %v4748_v60 = vld [vmem:[%s7347_s0 + $0xc8] sm:$0x1] }
  0xd6   :  { %v695_v29 = vadd.f32 %v7911_v17, %v623_v61  ;;  %v694_v62 = vadd.f32 %v7912_v38, %v622_v2  ;;  %v451_v11 = vadd.f32 %v7913_v34, %v379_v45  ;;  %v450_v4 = vadd.f32 %v7914_v15, %v378_v28  ;;  %v607_v13 = vpop.permute.xlu1 %606  ;;  %v605_v47 = vpop.permute.xlu0 %604  ;;  %7915 = vst [vmem:[#allocation31_spill] sm:$0xff] %v4748_v60  ;;  %v7918_v45 = vld [vmem:[#allocation22_spill] sm:$0xff]  ;;  %v7920_v35 = vld [vmem:[#allocation80_spill] sm:$0xff] }
  0xd7   :  { %v4743_v0 = vmul.f32 -0.10825317, %v4740_v19  ;;  %v1425_v24 = vmul.f32 -0.10825317, %v4748_v60  ;;  %v625_v48 = vadd.f32 %v607_v13, %v537_v21  ;;  %v624_v26 = vadd.f32 %v605_v47, %v536_v20  ;;  %1403 = vrot.lane.b32.xlu1 %v4540_v12, %s3393_s14  ;;  %1401 = vrot.lane.b32.xlu0 %v4543_v54, %s3393_s14  ;;  %v7921_v12 = vld [vmem:[#allocation57_spill] sm:$0xff]  ;;  %v4774_v55 = vld [vmem:[%s7347_s0 + $0xf0] sm:$0xff] }
  0xd8   :  { %v4751_v33 = vadd.f32 %v727_v40, %v695_v29  ;;  %v4753_v32 = vadd.f32 %v724_v1, %v694_v62  ;;  %v7917_v30 = vrot.slane %v7916_v16, 1  ;;  %v7919_v39 = vrot.slane %v7918_v45, 1  ;;  %v7925_v17 = vld [vmem:[#allocation26_spill] sm:$0xff] }
  0xd9   :  { %v738_v5 = vrot.slane %v707_v37, 1  ;;  %v735_v31 = vrot.slane %v706_v10, 1  ;;  %v539_v40 = vadd.f32 %v4663_v27, %v451_v11  ;;  %v538_v1 = vadd.f32 %v4665_v22, %v450_v4  ;;  %v4782_v27 = vld [vmem:[%s7347_s0 + $0xf8] sm:$0x1]  ;;  %v7927_v62 = vld [vmem:[#allocation46_spill] sm:$0xff]  ;;  %v7928_v11 = vld [vmem:[#allocation75_spill] sm:$0xff] }
  0xda   :  { %v733_v44 = vsel %vm339_vm0, %v7917_v30, %v732_v8  ;;  %v730_v28 = vsel %vm339_vm0, %v7919_v39, %v729_v53  ;;  %v697_v14 = vadd.f32 %v7920_v35, %v625_v48  ;;  %v696_v63 = vadd.f32 %v7921_v12, %v624_v26  ;;  %v611_v25 = vpop.permute.xlu1 %610  ;;  %v609_v54 = vpop.permute.xlu0 %608  ;;  %7922 = vst [vmem:[#allocation20_spill] sm:$0xff] %v4782_v27  ;;  %v7923_v10 = vld [vmem:[#allocation25_spill] sm:$0xff]  ;;  %v4813_v4 = vld [vmem:[%s7347_s0 + $0xe8] sm:$0x1] }
  0xdb   :  { %v1460_v61 = vrot.slane %v4685_v49, 1  ;;  %v1461_v2 = vrot.slane %v4693_v56, 1  ;;  %v4777_v46 = vmul.f32 -0.10825317, %v4774_v55  ;;  %v1428_v22 = vmul.f32 -0.10825317, %v4782_v27  ;;  %1471 = vrot.lane.b32.xlu1 %v4590_v42, %s3393_s14  ;;  %1469 = vrot.lane.b32.xlu0 %v4621_v59, %s3393_s14 }
  0xdc   :  { %v627_v8 = vadd.f32 %v611_v25, %v539_v40  ;;  %v626_v53 = vadd.f32 %v609_v54, %v538_v1  ;;  %v4785_v7 = vadd.f32 %v733_v44, %v697_v14  ;;  %v4787_v56 = vadd.f32 %v730_v28, %v696_v63  ;;  %v4805_v42 = vld [vmem:[%s7347_s0 + $0xe0] sm:$0xff]  ;;  %7929 = vst [vmem:[#allocation13_spill] sm:$0xff] %v4813_v4  ;;  %v4828_v44 = vld [vmem:[%s7347_s0 + $0x110] sm:$0xff]  ;;  %v4840_v39 = vld [vmem:[%s7347_s0 + $0x118] sm:$0x1] }
  0xdd   :  { %v1457_v37 = vrot.slane %v4743_v0, 1  ;;  %v1458_v43 = vrot.slane %v1425_v24, 1  ;;  %v7924_v21 = vrot.slane %v7923_v10, 1  ;;  %v7926_v29 = vrot.slane %v7925_v17, 1  ;;  %7931 = vst [vmem:[#allocation62_spill] sm:$0xff] %v4840_v39 }
  0xde   :  { %v699_v34 = vadd.f32 %v7927_v62, %v627_v8  ;;  %v698_v15 = vadd.f32 %v7928_v11, %v626_v53  ;;  %v4808_v59 = vmul.f32 -0.10825317, %v4805_v42  ;;  %v1427_v13 = vmul.f32 -0.10825317, %v4813_v4  ;;  %v4816_v47 = vpop.permute.xlu1 %814  ;;  %v4818_v24 = vpop.permute.xlu0 %812  ;;  %v4872_v8 = vld [vmem:[%s7347_s0 + $0x130] sm:$0xff] }
  0xdf   :  { %v739_v20 = vsel %vm339_vm0, %v7924_v21, %v738_v5  ;;  %v736_v38 = vsel %vm339_vm0, %v7926_v29, %v735_v31  ;;  %v1466_v48 = vrot.slane %v4777_v46, 1  ;;  %v1467_v26 = vrot.slane %v1428_v22, 1  ;;  %1475 = vrot.lane.b32.xlu1 %v4654_v58, %s3393_s14  ;;  %1473 = vrot.lane.b32.xlu0 %v4657_v9, %s3393_s14  ;;  %v4846_v5 = vld [vmem:[%s7347_s0 + $0x100] sm:$0xff]  ;;  %v4854_v58 = vld [vmem:[%s7347_s0 + $0x108] sm:$0x1] }
  0xe0   :  { %v4821_v16 = vadd.f32 %v739_v20, %v699_v34  ;;  %v4823_v30 = vadd.f32 %v736_v38, %v698_v15  ;;  %v4831_v45 = vmul.f32 -0.10825317, %v4828_v44  ;;  %v1646_v28 = vmul.f32 -0.10825317, %v4840_v39  ;;  %7933 = vst [vmem:[#allocation10_spill] sm:$0xff] %v4854_v58  ;;  %v4887_v21 = vld [vmem:[%s7347_s0 + $0x120] sm:$0xff] }
  0xe1   :  { %v4849_v31 = vmul.f32 -0.10825317, %v4846_v5  ;;  %v1645_v9 = vmul.f32 -0.10825317, %v4854_v58  ;;  %v1462_v40 = vsel %vm339_vm0, %v1460_v61, %v1461_v2  ;;  %v1459_v1 = vsel %vm339_vm0, %v1457_v37, %v1458_v43  ;;  %v4881_v43 = vld [vmem:[%s7347_s0 + $0x138] sm:$0x1] }
  0xe2   :  { %7930 = vst [vmem:[#allocation89_spill] sm:$0xff] %v4831_v45  ;;  %v1463_v35 = vrot.slane %v4808_v59, 1  ;;  %v1464_v14 = vrot.slane %v1427_v13, 1  ;;  %v4860_v12 = vpop.permute.xlu1 %818  ;;  %v4862_v63 = vpop.permute.xlu0 %816  ;;  %v1468_v25 = vsel %vm339_vm0, %v1466_v48, %v1467_v26  ;;  %v1672_v54 = vrot.slane %v4831_v45, 1  ;;  %7935 = vst [vmem:[#allocation86_spill] sm:$0xff] %v4881_v43  ;;  %v4905_v34 = vld [vmem:[%s7347_s0 + $0x150] sm:$0xff] }
  0xe3   :  { %7932 = vst [vmem:[#allocation9_spill] sm:$0xff] %v4849_v31  ;;  %1479 = vrot.lane.b32.xlu1 %v1462_v40, %s3393_s14  ;;  %1477 = vrot.lane.b32.xlu0 %v1459_v1, %s3393_s14  ;;  %v1673_v22 = vrot.slane %v1646_v28, 1  ;;  %v1669_v61 = vrot.slane %v4849_v31, 1  ;;  %v1670_v2 = vrot.slane %v1645_v9, 1  ;;  %v4875_v53 = vmul.f32 -0.10825317, %v4872_v8 }
  0xe4   :  { %v1465_v37 = vsel %vm339_vm0, %v1463_v35, %v1464_v14  ;;  %v1648_v10 = vmul.f32 -0.10825317, %v4881_v43  ;;  %v4890_v20 = vmul.f32 -0.10825317, %v4887_v21  ;;  %v4895_v17 = vld [vmem:[%s7347_s0 + $0x128] sm:$0x1] }
  0xe5   :  { %7934 = vst [vmem:[#allocation85_spill] sm:$0xff] %v4875_v53  ;;  %7937 = vst [vmem:[#allocation63_spill] sm:$0xff] %v4895_v17  ;;  %v1647_v29 = vmul.f32 -0.10825317, %v4895_v17  ;;  %v4908_v11 = vmul.f32 -0.10825317, %v4905_v34  ;;  %v1674_v48 = vsel %vm339_vm0, %v1672_v54, %v1673_v22  ;;  %v1671_v26 = vsel %vm339_vm0, %v1669_v61, %v1670_v2 }
  0xe6   :  { %7936 = vst [vmem:[#allocation23_spill] sm:$0xff] %v4890_v20  ;;  %v4898_v38 = vpop.permute.xlu1 %822  ;;  %v4900_v62 = vpop.permute.xlu0 %820  ;;  %v4913_v15 = vld [vmem:[%s7347_s0 + $0x158] sm:$0x1]  ;;  %v4923_v28 = vld [vmem:[%s7347_s0 + $0x140] sm:$0xff]  ;;  %v4931_v40 = vld [vmem:[%s7347_s0 + $0x148] sm:$0x1]  ;;  %v836_v17 = vadd.f32 %v4818_v24, %v4723_v51 }
  0xe7   :  { %7938 = vst [vmem:[#allocation32_spill] sm:$0xff] %v4908_v11  ;;  %7939 = vst [vmem:[#allocation47_spill] sm:$0xff] %v4913_v15  ;;  %v1650_v13 = vmul.f32 -0.10825317, %v4913_v15  ;;  %1483 = vrot.lane.b32.xlu1 %v1468_v25, %s3393_s14  ;;  %1481 = vrot.lane.b32.xlu0 %v1465_v37, %s3393_s14  ;;  %v4926_v9 = vmul.f32 -0.10825317, %v4923_v28 }
  0xe8   :  { %7941 = vst [vmem:[#allocation27_spill] sm:$0xff] %v4931_v40  ;;  %v1649_v1 = vmul.f32 -0.10825317, %v4931_v40  ;;  %v1678_v35 = vrot.slane %v4875_v53, 1  ;;  %v1679_v14 = vrot.slane %v1648_v10, 1  ;;  %v1675_v25 = vrot.slane %v4890_v20, 1 }
  0xe9   :  { %7940 = vst [vmem:[#allocation24_spill] sm:$0xff] %v4926_v9  ;;  %v1676_v54 = vrot.slane %v1647_v29, 1  ;;  %v1684_v2 = vrot.slane %v4908_v11, 1  ;;  %v1685_v37 = vrot.slane %v1650_v13, 1  ;;  %v7942_v31 = vld [vmem:[#allocation56_spill] sm:$0xff]  ;;  %v7945_v53 = vld [vmem:[#allocation30_spill] sm:$0xff] }
  0xea   :  { %v4936_v22 = vpop.permute.xlu1 %826  ;;  %v4938_v61 = vpop.permute.xlu0 %824  ;;  %v4942_v45 = vmul.f32 -0.10825317, %v7942_v31  ;;  %v4947_v40 = vld [vmem:[%s7347_s0 + $0x178] sm:$0x1]  ;;  %v4951_v20 = vmul.f32 -0.10825317, %v7945_v53 }
  0xeb   :  { %7944 = vst [vmem:[#allocation61_spill] sm:$0xff] %v4947_v40  ;;  %v1652_v10 = vmul.f32 -0.10825317, %v4947_v40  ;;  %1695 = vrot.lane.b32.xlu1 %v1674_v48, %s3393_s14  ;;  %1693 = vrot.lane.b32.xlu0 %v1671_v26, %s3393_s14  ;;  %v1681_v29 = vrot.slane %v4926_v9, 1  ;;  %v1682_v13 = vrot.slane %v1649_v1, 1  ;;  %v837_v40 = vadd.f32 %v4816_v47, %v4721_v41  ;;  %v4977_v47 = vld [vmem:[%s7347_s0 + $0x190] sm:$0xff] }
  0xec   :  { %7943 = vst [vmem:[#allocation48_spill] sm:$0xff] %v4942_v45  ;;  %7946 = vst [vmem:[#allocation64_spill] sm:$0xff] %v4951_v20  ;;  %v4959_v11 = vld [vmem:[%s7347_s0 + $0x168] sm:$0x1]  ;;  %v1680_v48 = vsel %vm339_vm0, %v1678_v35, %v1679_v14  ;;  %v1677_v26 = vsel %vm339_vm0, %v1675_v25, %v1676_v54  ;;  %v1686_v43 = vsel %vm339_vm0, %v1684_v2, %v1685_v37  ;;  %v1690_v58 = vrot.slane %v4942_v45, 1  ;;  %v5001_v35 = vld [vmem:[%s7347_s0 + $0x180] sm:$0xff] }
  0xed   :  { %7947 = vst [vmem:[#allocation77_spill] sm:$0xff] %v4959_v11  ;;  %v1651_v15 = vmul.f32 -0.10825317, %v4959_v11  ;;  %v1691_v11 = vrot.slane %v1652_v10, 1  ;;  %v1687_v27 = vrot.slane %v4951_v20, 1  ;;  %v1683_v41 = vsel %vm339_vm0, %v1681_v29, %v1682_v13  ;;  %v5025_v10 = vld [vmem:[%s7347_s0 + $0x1a0] sm:$0xff] }
  0xee   :  { %v903_v9 = vpop.permute.xlu1 %902  ;;  %v901_v1 = vpop.permute.xlu0 %900  ;;  %v1727_v24 = vmul.f32 0.0625, %v4977_v47  ;;  %v5019_v25 = vld [vmem:[%s7347_s0 + $0x1b8] sm:$0x1]  ;;  %v1729_v29 = vmul.f32 0.0625, %v5025_v10  ;;  %v5031_v13 = vld [vmem:[%s7347_s0 + $0x1a8] sm:$0x1] }
  0xef   :  { %v925_v39 = vadd.f32 %v903_v9, %v837_v40  ;;  %v924_v4 = vadd.f32 %v901_v1, %v836_v17  ;;  %1699 = vrot.lane.b32.xlu1 %v1680_v48, %s3393_s14  ;;  %1697 = vrot.lane.b32.xlu0 %v1677_v26, %s3393_s14  ;;  %v1688_v51 = vrot.slane %v1651_v15, 1  ;;  %v4983_v17 = vld [vmem:[%s7347_s0 + $0x198] sm:$0x1]  ;;  %v839_v40 = vadd.f32 %v4860_v12, %v4751_v33 }
  0xf0   :  { %7948 = vst [vmem:[#allocation14_spill] sm:$0xff] %v4983_v17  ;;  %v1728_v9 = vmul.f32 0.0625, %v4983_v17  ;;  %v838_v15 = vadd.f32 %v4862_v63, %v4753_v32  ;;  %v1725_v33 = vmul.f32 0.0625, %v5001_v35  ;;  %v5007_v32 = vld [vmem:[%s7347_s0 + $0x188] sm:$0x1]  ;;  %7950 = vst [vmem:[#allocation67_spill] sm:$0xff] %v5019_v25  ;;  %v1692_v26 = vsel %vm339_vm0, %v1690_v58, %v1691_v11 }
  0xf1   :  { %934 = vst.msk [vmem:[%s7348_s1 + $0x8] sm:$0xff] %vm932_vm1, %v925_v39  ;;  %933 = vst.msk [vmem:[%s7348_s1] sm:$0xff] %vm932_vm1, %v924_v4  ;;  %v1726_v12 = vmul.f32 0.0625, %v5007_v32  ;;  %v5013_v4 = vld [vmem:[%s7347_s0 + $0x1b0] sm:$0xff]  ;;  %v1732_v54 = vmul.f32 0.0625, %v5019_v25  ;;  %v1730_v48 = vmul.f32 0.0625, %v5031_v13  ;;  %v1689_v1 = vsel %vm339_vm0, %v1687_v27, %v1688_v51 }
  0xf2   :  { %7949 = vst [vmem:[#allocation33_spill] sm:$0xff] %v5007_v32  ;;  %v907_v39 = vpop.permute.xlu1 %906  ;;  %v905_v63 = vpop.permute.xlu0 %904  ;;  %v1731_v14 = vmul.f32 0.0625, %v5013_v4  ;;  %7951 = vst [vmem:[#allocation68_spill] sm:$0xff] %v5031_v13  ;;  %v1757_v58 = vrot.slane %v1725_v33, 1  ;;  %v5061_v33 = vld [vmem:[%s7347_s0 + $0x1d8] sm:$0x1] }
  0xf3   :  { %v927_v2 = vadd.f32 %v907_v39, %v839_v40  ;;  %v926_v37 = vadd.f32 %v905_v63, %v838_v15  ;;  %1703 = vrot.lane.b32.xlu1 %v1686_v43, %s3393_s14  ;;  %1701 = vrot.lane.b32.xlu0 %v1683_v41, %s3393_s14  ;;  %v1760_v40 = vrot.slane %v1727_v24, 1  ;;  %v1761_v15 = vrot.slane %v1728_v9, 1  ;;  %7952 = vst [vmem:[#allocation34_spill] sm:$0xff] %v5061_v33 }
  0xf4   :  { %v841_v39 = vadd.f32 %v4898_v38, %v4785_v7  ;;  %v840_v63 = vadd.f32 %v4900_v62, %v4787_v56  ;;  %v1758_v27 = vrot.slane %v1726_v12, 1  ;;  %v1766_v41 = vrot.slane %v1731_v14, 1  ;;  %v5055_v62 = vld [vmem:[%s7347_s0 + $0x1d0] sm:$0xff]  ;;  %v5067_v14 = vld [vmem:[%s7347_s0 + $0x1c0] sm:$0xff] }
  0xf5   :  { %936 = vst.msk [vmem:[%s7348_s1 + $0x18] sm:$0xff] %vm932_vm1, %v927_v2  ;;  %935 = vst.msk [vmem:[%s7348_s1 + $0x10] sm:$0xff] %vm932_vm1, %v926_v37  ;;  %v1767_v51 = vrot.slane %v1732_v54, 1  ;;  %v1763_v24 = vrot.slane %v1729_v29, 1  ;;  %v1764_v56 = vrot.slane %v1730_v48, 1  ;;  %v1735_v9 = vmul.f32 0.0625, %v5055_v62 }
  0xf6   :  { %v911_v43 = vpop.permute.xlu1 %910  ;;  %v909_v11 = vpop.permute.xlu0 %908  ;;  %v1736_v12 = vmul.f32 0.0625, %v5061_v33  ;;  %7953 = vst [vmem:[#allocation79_spill] sm:$0xff] %v5067_v14  ;;  %v1733_v54 = vmul.f32 0.0625, %v5067_v14  ;;  %v5073_v2 = vld [vmem:[%s7347_s0 + $0x1c8] sm:$0x1]  ;;  %v843_v29 = vadd.f32 %v4936_v22, %v4821_v16  ;;  %v842_v48 = vadd.f32 %v4938_v61, %v4823_v30 }
  0xf7   :  { %v929_v7 = vadd.f32 %v911_v43, %v841_v39  ;;  %v928_v38 = vadd.f32 %v909_v11, %v840_v63  ;;  %1707 = vrot.lane.b32.xlu1 %v1692_v26, %s3393_s14  ;;  %1705 = vrot.lane.b32.xlu0 %v1689_v1, %s3393_s14  ;;  %7954 = vst [vmem:[#allocation81_spill] sm:$0xff] %v5073_v2  ;;  %v1734_v37 = vmul.f32 0.0625, %v5073_v2  ;;  %v1772_v43 = vrot.slane %v1735_v9, 1 }
  0xf8   :  { %v1762_v26 = vsel %vm339_vm0, %v1760_v40, %v1761_v15  ;;  %v1759_v1 = vsel %vm339_vm0, %v1757_v58, %v1758_v27  ;;  %v1768_v30 = vsel %vm339_vm0, %v1766_v41, %v1767_v51  ;;  %v1765_v61 = vsel %vm339_vm0, %v1763_v24, %v1764_v56  ;;  %v5105_v40 = vld [vmem:[%s7347_s0 + $0x1f0] sm:$0xff]  ;;  %v5111_v58 = vld [vmem:[%s7347_s0 + $0x1f8] sm:$0x1]  ;;  %v5117_v41 = vld [vmem:[%s7347_s0 + $0x1e0] sm:$0xff] }
  0xf9   :  { %938 = vst.msk [vmem:[%s7348_s1 + $0x28] sm:$0xff] %vm932_vm1, %v929_v7  ;;  %937 = vst.msk [vmem:[%s7348_s1 + $0x20] sm:$0xff] %vm932_vm1, %v928_v38  ;;  %v1773_v11 = vrot.slane %v1736_v12, 1  ;;  %v1769_v7 = vrot.slane %v1733_v54, 1  ;;  %v1770_v38 = vrot.slane %v1734_v37, 1  ;;  %v1739_v15 = vmul.f32 0.0625, %v5105_v40 }
  0xfa   :  { %v915_v39 = vpop.permute.xlu1 %914  ;;  %v913_v63 = vpop.permute.xlu0 %912  ;;  %7955 = vst [vmem:[#allocation71_spill] sm:$0xff] %v5105_v40  ;;  %7956 = vst [vmem:[#allocation74_spill] sm:$0xff] %v5111_v58  ;;  %v1740_v27 = vmul.f32 0.0625, %v5111_v58  ;;  %v1737_v51 = vmul.f32 0.0625, %v5117_v41  ;;  %v5123_v24 = vld [vmem:[%s7347_s0 + $0x1e8] sm:$0x1] }
  0xfb   :  { %v931_v16 = vadd.f32 %v915_v39, %v843_v29  ;;  %v930_v22 = vadd.f32 %v913_v63, %v842_v48  ;;  %1783 = vrot.lane.b32.xlu1 %v1762_v26, %s3393_s14  ;;  %1781 = vrot.lane.b32.xlu0 %v1759_v1, %s3393_s14  ;;  %7957 = vst [vmem:[#allocation82_spill] sm:$0xff] %v5117_v41  ;;  %7958 = vst [vmem:[#allocation83_spill] sm:$0xff] %v5123_v24  ;;  %v1738_v56 = vmul.f32 0.0625, %v5123_v24 }
  0xfc   :  { %v1774_v54 = vsel %vm339_vm0, %v1772_v43, %v1773_v11  ;;  %v1771_v37 = vsel %vm339_vm0, %v1769_v7, %v1770_v38  ;;  %v1778_v29 = vrot.slane %v1739_v15, 1  ;;  %v1779_v48 = vrot.slane %v1740_v27, 1  ;;  %v5152_v11 = vld [vmem:[%s7347_s0 + $0x10] sm:$0xff]  ;;  %v5160_v38 = vld [vmem:[%s7347_s0] sm:$0xff] }
  0xfd   :  { %940 = vst.msk [vmem:[%s7348_s1 + $0x38] sm:$0xff] %vm932_vm1, %v931_v16  ;;  %939 = vst.msk [vmem:[%s7348_s1 + $0x30] sm:$0xff] %vm932_vm1, %v930_v22  ;;  %v1775_v26 = vrot.slane %v1737_v51, 1  ;;  %v1776_v1 = vrot.slane %v1738_v56, 1  ;;  %v2215_v43 = vmul.f32 0.02900635, %v4983_v17 }
  0xfe   :  { %v5126_v9 = vpop.permute.xlu1 %983  ;;  %v5128_v12 = vpop.permute.xlu0 %981  ;;  %v1780_v16 = vsel %vm339_vm0, %v1778_v29, %v1779_v48  ;;  %v5155_v7 = vmul.f32 0.40400636, %v5152_v11  ;;  %7965 = vst [vmem:[#allocation88_spill] sm:$0xff] %v5160_v38  ;;  %v5163_v15 = vmul.f32 0.40400636, %v5160_v38  ;;  %v7973_v29 = vld [vmem:[#allocation4_spill] sm:$0xff] }
  0xff   :  { %7959 = vst [vmem:[#allocation92_spill] sm:$0xff] %v5126_v9  ;;  %7960 = vst [vmem:[#allocation49_spill] sm:$0xff] %v5128_v12  ;;  %1787 = vrot.lane.b32.xlu1 %v1768_v30, %s3393_s14  ;;  %1785 = vrot.lane.b32.xlu0 %v1765_v61, %s3393_s14  ;;  %v1777_v22 = vsel %vm339_vm0, %v1775_v26, %v1776_v1  ;;  %v2234_v45 = vrot.slane %v2215_v43, 1  ;;  %v7974_v51 = vld [vmem:[#allocation2_spill] sm:$0xff]  ;;  %v2216_v56 = vmul.f32 0.02900635, %v5031_v13 }
 0x100   :  { %v2219_v27 = vmul.f32 0.02900635, %v5061_v33  ;;  %v2218_v12 = vmul.f32 0.02900635, %v5073_v2  ;;  %v2221_v9 = vmul.f32 0.02900635, %v5111_v58 }
 0x101   :  { %v7982_v43 = vld [vmem:[#allocation12_spill] sm:$0xff]  ;;  %v2220_v33 = vmul.f32 0.02900635, %v5123_v24  ;;  %v7983_v13 = vld [vmem:[#allocation93_spill] sm:$0xff]  ;;  %v2251_v24 = vrot.slane %v4337_v50, 1  ;;  %v2248_v60 = vrot.slane %v4340_v57, 1 }
 0x102   :  { %v5134_v39 = vpop.permute.xlu1 %987  ;;  %v5136_v63 = vpop.permute.xlu0 %985  ;;  %v2252_v58 = vrot.slane %v2221_v9, 1  ;;  %v942_v53 = vmul.f32 -0.0625, %v5152_v11  ;;  %v7990_v9 = vld [vmem:[#allocation55_spill] sm:$0xff] }
 0x103   :  { %7961 = vst [vmem:[#allocation50_spill] sm:$0xff] %v5134_v39  ;;  %7962 = vst [vmem:[#allocation15_spill] sm:$0xff] %v5136_v63  ;;  %1791 = vrot.lane.b32.xlu1 %v1774_v54, %s3393_s14  ;;  %1789 = vrot.lane.b32.xlu0 %v1771_v37, %s3393_s14  ;;  %v5181_v54 = vmul.f32 0.40400636, %v7973_v29  ;;  %v5184_v37 = vmul.f32 0.40400636, %v7974_v51 }
 0x104   :  { %v7984_v39 = vld [vmem:[#allocation41_spill] sm:$0xff]  ;;  %v2249_v6 = vrot.slane %v2220_v33, 1  ;;  %v5235_v57 = vmul.f32 0.40400636, %v7990_v9 }
 0x105   :  { %v5209_v63 = vmul.f32 0.40400636, %v7984_v39 }
 0x106   :  { %v5142_v30 = vpop.permute.xlu1 %991  ;;  %v5144_v61 = vpop.permute.xlu0 %989 }
 0x107   :  { %7963 = vst [vmem:[#allocation16_spill] sm:$0xff] %v5142_v30  ;;  %7964 = vst [vmem:[#allocation87_spill] sm:$0xff] %v5144_v61  ;;  %1795 = vrot.lane.b32.xlu1 %v1780_v16, %s3393_s14  ;;  %1793 = vrot.lane.b32.xlu0 %v1777_v22, %s3393_s14  ;;  %v7972_v22 = vld [vmem:[#allocation36_spill] sm:$0xff]  ;;  %v2214_v61 = vmul.f32 0.02900635, %v5007_v32 }
 0x108   :  { %v2233_v20 = vrot.slane %v7972_v22, 1  ;;  %v2217_v30 = vmul.f32 0.02900635, %v5019_v25  ;;  %v2230_v22 = vrot.slane %v7982_v43, 1 }
 0x109   :  { %v2231_v16 = vrot.slane %v2214_v61, 1  ;;  %v2237_v61 = vrot.slane %v2216_v56, 1  ;;  %v941_v56 = vmul.f32 -0.0625, %v5160_v38 }
 0x10a   :  { %v5168_v48 = vpop.permute.xlu1 %995  ;;  %v5170_v26 = vpop.permute.xlu0 %993  ;;  %v5199_v1 = vsel %vm339_vm0, %v2233_v20, %v2234_v45  ;;  %v7986_v20 = vld [vmem:[#allocation94_spill] sm:$0xff] }
 0x10b   :  { %7969 = vst [vmem:[#allocation35_spill] sm:$0xff] %v5168_v48  ;;  %7970 = vst [vmem:[#allocation72_spill] sm:$0xff] %v5170_v26  ;;  %1824 = vrot.lane.b32.xlu1 %v5155_v7, %s3393_s14  ;;  %1822 = vrot.lane.b32.xlu0 %v5163_v15, %s3393_s14  ;;  %v2239_v48 = vrot.slane %v7983_v13, 1  ;;  %v2240_v26 = vrot.slane %v2217_v30, 1  ;;  %v2236_v43 = vrot.slane %v7986_v20, 1  ;;  %v2242_v13 = vrot.slane %v4322_v52, 1 }
 0x10c   :  { %7981 = vst [vmem:[#allocation91_spill] sm:$0xff] %v5199_v1  ;;  %v2245_v1 = vrot.slane %v4314_v18, 1  ;;  %v2243_v30 = vrot.slane %v2218_v12, 1  ;;  %v944_v18 = vmul.f32 -0.0625, %v7973_v29  ;;  %v7989_v52 = vld [vmem:[#allocation73_spill] sm:$0xff]  ;;  %v5238_v33 = vsel %vm339_vm0, %v2230_v22, %v2231_v16 }
 0x10d   :  { %v5232_v50 = vmul.f32 0.40400636, %v7989_v52  ;;  %7991 = vst [vmem:[#allocation18_spill] sm:$0xff] %v5238_v33  ;;  %v5241_v12 = vsel %vm339_vm0, %v2239_v48, %v2240_v26  ;;  %v5246_v20 = vsel %vm339_vm0, %v2236_v43, %v2237_v61  ;;  %v948_v38 = vmul.f32 -0.0625, %v7989_v52 }
 0x10e   :  { %v5194_v25 = vpop.permute.xlu1 %1031  ;;  %v5196_v32 = vpop.permute.xlu0 %1029  ;;  %7992 = vst [vmem:[#allocation51_spill] sm:$0xff] %v5241_v12  ;;  %7993 = vst [vmem:[#allocation52_spill] sm:$0xff] %v5246_v20  ;;  %v5260_v48 = vsel %vm339_vm0, %v2251_v24, %v2252_v58  ;;  %v5272_v43 = vadd.f32 %v4579_v3, %v944_v18  ;;  %v8007_v58 = vld [vmem:[#allocation90_spill] sm:$0xff]  ;;  %v947_v3 = vmul.f32 -0.0625, %v7990_v9  ;;  %v5337_v12 = vmul.f32 -0.1875, %v5067_v14 }
 0x10f   :  { %7979 = vst [vmem:[#allocation28_spill] sm:$0xff] %v5194_v25  ;;  %7980 = vst [vmem:[#allocation7_spill] sm:$0xff] %v5196_v32  ;;  %1828 = vrot.lane.b32.xlu1 %v5181_v54, %s3393_s14  ;;  %1826 = vrot.lane.b32.xlu0 %v5184_v37, %s3393_s14  ;;  %v7985_v32 = vld [vmem:[#allocation42_spill] sm:$0xff]  ;;  %v2246_v25 = vrot.slane %v2219_v27, 1  ;;  %v943_v27 = vmul.f32 -0.0625, %v7974_v51  ;;  %v946_v51 = vmul.f32 -0.0625, %v7984_v39 }
 0x110   :  { %v5212_v45 = vmul.f32 0.40400636, %v7985_v32  ;;  %v945_v29 = vmul.f32 -0.0625, %v7985_v32  ;;  %7998 = vst [vmem:[#allocation38_spill] sm:$0xff] %v5260_v48  ;;  %v5263_v32 = vsel %vm339_vm0, %v2248_v60, %v2249_v6  ;;  %v8000_v39 = vld [vmem:[#allocation58_spill] sm:$0xff]  ;;  %8004 = vst [vmem:[#allocation53_spill] sm:$0xff] %v5272_v43 }
 0x111   :  { %7999 = vst [vmem:[#allocation95_spill] sm:$0xff] %v5263_v32  ;;  %v5266_v26 = vadd.f32 %v8000_v39, %v942_v53  ;;  %v5275_v61 = vadd.f32 %v4599_v36, %v943_v27  ;;  %v8006_v6 = vld [vmem:[#allocation19_spill] sm:$0xff]  ;;  %v1854_v53 = vmul.f32 -0.23325318, %v8007_v58  ;;  %v5284_v24 = vadd.f32 %v4685_v49, %v946_v51  ;;  %v8014_v27 = vld [vmem:[#allocation76_spill] sm:$0xff]  ;;  %8023 = vst [vmem:[#allocation36_spill] sm:$0xff] %v5337_v12 }
 0x112   :  { %v5218_v2 = vpop.permute.xlu1 %1035  ;;  %v5220_v17 = vpop.permute.xlu0 %1033  ;;  %v1855_v60 = vmul.f32 -0.23325318, %v8006_v6  ;;  %v5291_v36 = vmul.f32 -0.1875, %v4977_v47  ;;  %v1857_v52 = vmul.f32 -0.23325318, %v8014_v27  ;;  %v8015_v39 = vld [vmem:[#allocation84_spill] sm:$0xff] }
 0x113   :  { %7987 = vst [vmem:[#allocation37_spill] sm:$0xff] %v5218_v2  ;;  %7988 = vst [vmem:[#allocation17_spill] sm:$0xff] %v5220_v17  ;;  %1832 = vrot.lane.b32.xlu1 %v5209_v63, %s3393_s14  ;;  %1830 = vrot.lane.b32.xlu0 %v5212_v45, %s3393_s14  ;;  %v5249_v17 = vsel %vm339_vm0, %v2245_v1, %v2246_v25  ;;  %v5252_v2 = vsel %vm339_vm0, %v2242_v13, %v2243_v30  ;;  %v8002_v25 = vld [vmem:[#allocation45_spill] sm:$0xff]  ;;  %v1856_v49 = vmul.f32 -0.23325318, %v8015_v39 }
 0x114   :  { %7994 = vst [vmem:[#allocation96_spill] sm:$0xff] %v5249_v17  ;;  %7995 = vst [vmem:[#allocation97_spill] sm:$0xff] %v5252_v2  ;;  %v5269_v1 = vadd.f32 %v8002_v25, %v941_v56  ;;  %v5287_v13 = vadd.f32 %v4743_v0, %v945_v29  ;;  %v5294_v30 = vadd.f32 %v4777_v46, %v948_v38  ;;  %v5305_v0 = vld [vmem:[%s7347_s0 + $0x18] sm:$0x1]  ;;  %v5309_v51 = vmul.f32 -0.1875, %v5001_v35 }
 0x115   :  { %8001 = vst [vmem:[#allocation78_spill] sm:$0xff] %v5266_v26  ;;  %8005 = vst [vmem:[#allocation54_spill] sm:$0xff] %v5275_v61  ;;  %v1192_v9 = vmul.f32 0.40400636, %v5305_v0  ;;  %v5312_v46 = vmul.f32 -0.1875, %v5013_v4  ;;  %v5324_v32 = vmul.f32 -0.1875, %v5025_v10 }
 0x116   :  { %v5255_v16 = vpop.permute.xlu1 %1039  ;;  %v5257_v22 = vpop.permute.xlu0 %1037  ;;  %8003 = vst [vmem:[#allocation29_spill] sm:$0xff] %v5269_v1  ;;  %8008 = vst [vmem:[#allocation43_spill] sm:$0xff] %v5284_v24  ;;  %v1859_v38 = vmul.f32 -0.23325318, %v4682_v23  ;;  %v5318_v29 = vld [vmem:[%s7347_s0 + $0x8] sm:$0x1] }
 0x117   :  { %7996 = vst [vmem:[#allocation8_spill] sm:$0xff] %v5255_v16  ;;  %7997 = vst [vmem:[#allocation11_spill] sm:$0xff] %v5257_v22  ;;  %1836 = vrot.lane.b32.xlu1 %v5232_v50, %s3393_s14  ;;  %1834 = vrot.lane.b32.xlu0 %v5235_v57, %s3393_s14  ;;  %v1190_v25 = vmul.f32 0.40400636, %v5318_v29  ;;  %v1858_v48 = vmul.f32 -0.23325318, %v4740_v19 }
 0x118   :  { %8009 = vst [vmem:[#allocation44_spill] sm:$0xff] %v5287_v13  ;;  %8010 = vst [vmem:[#allocation39_spill] sm:$0xff] %v5291_v36  ;;  %v5328_v2 = vmul.f32 -0.1875, %v5055_v62  ;;  %v5333_v17 = vld [vmem:[%s7347_s0 + $0x38] sm:$0x1]  ;;  %v5342_v33 = vmul.f32 -0.1875, %v5105_v40 }
 0x119   :  { %8011 = vst [vmem:[#allocation40_spill] sm:$0xff] %v5294_v30  ;;  %8016 = vst [vmem:[#allocation80_spill] sm:$0xff] %v5305_v0  ;;  %v1196_v20 = vmul.f32 0.40400636, %v5333_v17  ;;  %v5355_v12 = vld [vmem:[%s7347_s0 + $0x28] sm:$0x1] }
 0x11a   :  { %v5296_v56 = vpop.permute.xlu1 %1043  ;;  %v5298_v18 = vpop.permute.xlu0 %1041  ;;  %8017 = vst [vmem:[#allocation57_spill] sm:$0xff] %v5309_v51  ;;  %8018 = vst [vmem:[#allocation25_spill] sm:$0xff] %v5312_v46  ;;  %v1225_v46 = vrot.slane %v1192_v9, 1  ;;  %v5359_v30 = vmul.f32 0.69975954, %v4828_v44  ;;  %v5381_v51 = vadd.f32 %v4808_v59, %v947_v3  ;;  %v1227_v3 = vrot.slane %v5184_v37, 1 }
 0x11b   :  { %8012 = vst [vmem:[#allocation21_spill] sm:$0xff] %v5296_v56  ;;  %8013 = vst [vmem:[#allocation22_spill] sm:$0xff] %v5298_v18  ;;  %1872 = vrot.lane.b32.xlu1 %v1855_v60, %s3393_s14  ;;  %1870 = vrot.lane.b32.xlu0 %v1854_v53, %s3393_s14  ;;  %v1861_v60 = vmul.f32 -0.23325318, %v4774_v55  ;;  %v1860_v53 = vmul.f32 -0.23325318, %v4805_v42 }
 0x11c   :  { %8019 = vst [vmem:[#allocation26_spill] sm:$0xff] %v5318_v29  ;;  %8020 = vst [vmem:[#allocation46_spill] sm:$0xff] %v5324_v32  ;;  %v5349_v56 = vmul.f32 -0.1875, %v5117_v41  ;;  %v1224_v32 = vrot.slane %v5155_v7, 1  ;;  %v5371_v9 = vmul.f32 0.69975954, %v4846_v5 }
 0x11d   :  { %8021 = vst [vmem:[#allocation75_spill] sm:$0xff] %v5328_v2  ;;  %8022 = vst [vmem:[#allocation56_spill] sm:$0xff] %v5333_v17  ;;  %v1194_v17 = vmul.f32 0.40400636, %v5355_v12  ;;  %v5410_v16 = vmul.f32 0.69975954, %v4923_v28 }
 0x11e   :  { %8024 = vst [vmem:[#allocation4_spill] sm:$0xff] %v5342_v33  ;;  %v5344_v18 = vpop.permute.xlu1 %1111  ;;  %v5346_v2 = vpop.permute.xlu0 %1109  ;;  %8027 = vst [vmem:[#allocation93_spill] sm:$0xff] %v5349_v56  ;;  %v1221_v33 = vrot.slane %v5163_v15, 1  ;;  %v5365_v56 = vld [vmem:[%s7347_s0 + $0x58] sm:$0x1]  ;;  %v5400_v59 = vsel %vm339_vm0, %v1224_v32, %v1225_v46 }
 0x11f   :  { %8025 = vst [vmem:[#allocation2_spill] sm:$0xff] %v5344_v18  ;;  %8026 = vst [vmem:[#allocation12_spill] sm:$0xff] %v5346_v2  ;;  %v1222_v18 = vrot.slane %v1190_v25, 1  ;;  %v1200_v7 = vmul.f32 0.40400636, %v5365_v56  ;;  %1876 = vrot.lane.b32.xlu1 %v1857_v52, %s3393_s14  ;;  %1874 = vrot.lane.b32.xlu0 %v1856_v49, %s3393_s14  ;;  %v1231_v2 = vrot.slane %v1196_v20, 1 }
 0x120   :  { %8028 = vst [vmem:[#allocation41_spill] sm:$0xff] %v5355_v12  ;;  %8029 = vst [vmem:[#allocation42_spill] sm:$0xff] %v5365_v56  ;;  %v1230_v12 = vrot.slane %v5181_v54, 1  ;;  %v5377_v15 = vld [vmem:[%s7347_s0 + $0x48] sm:$0x1] }
 0x121   :  { %8030 = vst [vmem:[#allocation94_spill] sm:$0xff] %v5377_v15  ;;  %v1198_v25 = vmul.f32 0.40400636, %v5377_v15  ;;  %8031 = vst [vmem:[#allocation73_spill] sm:$0xff] %v5381_v51  ;;  %v5384_v52 = vmul.f32 0.69975954, %v4872_v8  ;;  %v5407_v22 = vsel %vm339_vm0, %v1221_v33, %v1222_v18 }
 0x122   :  { %v5387_v49 = vmul.f32 0.69975954, %v4887_v21  ;;  %v5392_v54 = vld [vmem:[%s7347_s0 + $0x78] sm:$0x1]  ;;  %v5395_v56 = vpop.permute.xlu1 %1115  ;;  %v5397_v36 = vpop.permute.xlu0 %1113  ;;  %8035 = vst [vmem:[#allocation19_spill] sm:$0xff] %v5400_v59  ;;  %v1228_v15 = vrot.slane %v1194_v17, 1  ;;  %v5416_v32 = vsel %vm339_vm0, %v1230_v12, %v1231_v2 }
 0x123   :  { %8032 = vst [vmem:[#allocation55_spill] sm:$0xff] %v5392_v54  ;;  %v1204_v20 = vmul.f32 0.40400636, %v5392_v54  ;;  %8033 = vst [vmem:[#allocation58_spill] sm:$0xff] %v5395_v56  ;;  %v5404_v51 = vmul.f32 0.69975954, %v4905_v34  ;;  %1880 = vrot.lane.b32.xlu1 %v1859_v38, %s3393_s14  ;;  %1878 = vrot.lane.b32.xlu0 %v1858_v48, %s3393_s14 }
 0x124   :  { %8034 = vst [vmem:[#allocation45_spill] sm:$0xff] %v5397_v36  ;;  %8036 = vst [vmem:[#allocation90_spill] sm:$0xff] %v5407_v22  ;;  %v1236_v54 = vrot.slane %v5209_v63, 1  ;;  %v1237_v56 = vrot.slane %v1200_v7, 1  ;;  %v1233_v17 = vrot.slane %v5212_v45, 1  ;;  %v1234_v37 = vrot.slane %v1198_v25, 1 }
 0x125   :  { %8037 = vst [vmem:[#allocation76_spill] sm:$0xff] %v5416_v32  ;;  %v5420_v46 = vmul.f32 0.69975954, %v7942_v31  ;;  %v8038_v33 = vld [vmem:[#allocation30_spill] sm:$0xff]  ;;  %v1242_v22 = vrot.slane %v5232_v50, 1  ;;  %v1243_v63 = vrot.slane %v1204_v20, 1  ;;  %v5437_v31 = vsel %vm339_vm0, %v1227_v3, %v1228_v15 }
 0x126   :  { %v5423_v18 = vmul.f32 0.69975954, %v8038_v33  ;;  %v5429_v38 = vld [vmem:[%s7347_s0 + $0x68] sm:$0x1]  ;;  %v5432_v12 = vpop.permute.xlu1 %1119  ;;  %v5434_v45 = vpop.permute.xlu0 %1117  ;;  %8042 = vst [vmem:[#allocation99_spill] sm:$0xff] %v5437_v31  ;;  %v5450_v20 = vsel %vm339_vm0, %v1236_v54, %v1237_v56  ;;  %v1239_v56 = vrot.slane %v5235_v57, 1 }
 0x127   :  { %8039 = vst [vmem:[#allocation84_spill] sm:$0xff] %v5429_v38  ;;  %v1202_v2 = vmul.f32 0.40400636, %v5429_v38  ;;  %8040 = vst [vmem:[#allocation30_spill] sm:$0xff] %v5432_v12  ;;  %v5440_v48 = vmul.f32 -0.40400636, %v4977_v47  ;;  %1884 = vrot.lane.b32.xlu1 %v1861_v60, %s3393_s14  ;;  %1882 = vrot.lane.b32.xlu0 %v1860_v53, %s3393_s14 }
 0x128   :  { %8041 = vst [vmem:[#allocation98_spill] sm:$0xff] %v5434_v45  ;;  %v1263_v50 = vmul.f32 0.69975954, %v8006_v6  ;;  %v5446_v7 = vld [vmem:[%s7347_s0 + $0x98] sm:$0x1]  ;;  %8044 = vst [vmem:[#allocation101_spill] sm:$0xff] %v5450_v20 }
 0x129   :  { %8043 = vst [vmem:[#allocation100_spill] sm:$0xff] %v5446_v7  ;;  %v1264_v25 = vmul.f32 0.69975954, %v5446_v7  ;;  %v5453_v33 = vmul.f32 -0.40400636, %v5001_v35  ;;  %v5465_v7 = vsel %vm339_vm0, %v1233_v17, %v1234_v37  ;;  %v1240_v60 = vrot.slane %v1202_v2, 1 }
 0x12a   :  { %v1261_v15 = vmul.f32 0.69975954, %v8007_v58  ;;  %v5459_v3 = vld [vmem:[%s7347_s0 + $0x88] sm:$0x1]  ;;  %8046 = vst [vmem:[#allocation103_spill] sm:$0xff] %v5465_v7  ;;  %v5480_v37 = vpop.permute.xlu1 %1123  ;;  %v5482_v57 = vpop.permute.xlu0 %1121 }
 0x12b   :  { %8045 = vst [vmem:[#allocation102_spill] sm:$0xff] %v5459_v3  ;;  %v1262_v6 = vmul.f32 0.69975954, %v5459_v3  ;;  %v1267_v54 = vmul.f32 0.69975954, %v8014_v27  ;;  %v5476_v3 = vsel %vm339_vm0, %v1242_v22, %v1243_v63  ;;  %8049 = vst [vmem:[#allocation106_spill] sm:$0xff] %v5480_v37  ;;  %1936 = vrot.lane.b32.xlu1 %v5359_v30, %s3393_s14  ;;  %1934 = vrot.lane.b32.xlu0 %v5371_v9, %s3393_s14 }
 0x12c   :  { %v5472_v58 = vld [vmem:[%s7347_s0 + $0xb8] sm:$0x1]  ;;  %8048 = vst [vmem:[#allocation105_spill] sm:$0xff] %v5476_v3  ;;  %8050 = vst [vmem:[#allocation107_spill] sm:$0xff] %v5482_v57  ;;  %v1296_v27 = vrot.slane %v1263_v50, 1  ;;  %v1297_v7 = vrot.slane %v1264_v25, 1 }
 0x12d   :  { %8047 = vst [vmem:[#allocation104_spill] sm:$0xff] %v5472_v58  ;;  %v1268_v38 = vmul.f32 0.69975954, %v5472_v58  ;;  %v1265_v20 = vmul.f32 0.69975954, %v8015_v39  ;;  %v1293_v63 = vrot.slane %v1261_v15, 1  ;;  %v5504_v15 = vsel %vm339_vm0, %v1239_v56, %v1240_v60 }
 0x12e   :  { %v5488_v58 = vld [vmem:[%s7347_s0 + $0xa8] sm:$0x1]  ;;  %v1294_v2 = vrot.slane %v1262_v6, 1  ;;  %v5492_v53 = vmul.f32 -0.40400636, %v5013_v4  ;;  %v1302_v39 = vrot.slane %v1267_v54, 1  ;;  %v5509_v32 = vpop.permute.xlu1 %1159  ;;  %v5511_v30 = vpop.permute.xlu0 %1157  ;;  %v5514_v9 = vsel %vm339_vm0, %v1296_v27, %v1297_v7 }
 0x12f   :  { %8051 = vst [vmem:[#allocation108_spill] sm:$0xff] %v5488_v58  ;;  %v1266_v22 = vmul.f32 0.69975954, %v5488_v58  ;;  %v5495_v17 = vmul.f32 -0.40400636, %v5025_v10  ;;  %v1303_v50 = vrot.slane %v1268_v38, 1  ;;  %1940 = vrot.lane.b32.xlu1 %v5384_v52, %s3393_s14  ;;  %1938 = vrot.lane.b32.xlu0 %v5387_v49, %s3393_s14 }
 0x130   :  { %v1271_v25 = vmul.f32 0.69975954, %v4682_v23  ;;  %v8052_v3 = vld [vmem:[#allocation3_spill] sm:$0xff]  ;;  %v1269_v57 = vmul.f32 0.69975954, %v4740_v19  ;;  %8056 = vst [vmem:[#allocation109_spill] sm:$0xff] %v5511_v30  ;;  %v5518_v56 = vsel %vm339_vm0, %v1293_v63, %v1294_v2 }
 0x131   :  { %v1272_v58 = vmul.f32 0.69975954, %v8052_v3  ;;  %8053 = vst [vmem:[#allocation3_spill] sm:$0xff] %v5504_v15  ;;  %v8054_v37 = vld [vmem:[#allocation31_spill] sm:$0xff]  ;;  %8057 = vst [vmem:[#allocation110_spill] sm:$0xff] %v5514_v9  ;;  %v1299_v38 = vrot.slane %v1265_v20, 1  ;;  %v5530_v7 = vsel %vm339_vm0, %v1302_v39, %v1303_v50 }
 0x132   :  { %v1270_v31 = vmul.f32 0.69975954, %v8054_v37  ;;  %8055 = vst [vmem:[#allocation31_spill] sm:$0xff] %v5509_v32  ;;  %v1300_v3 = vrot.slane %v1266_v22, 1  ;;  %8058 = vst [vmem:[#allocation111_spill] sm:$0xff] %v5518_v56  ;;  %v8059_v37 = vld [vmem:[#allocation20_spill] sm:$0xff]  ;;  %v5539_v15 = vpop.permute.xlu1 %1163  ;;  %v5541_v52 = vpop.permute.xlu0 %1161 }
 0x133   :  { %v5521_v54 = vmul.f32 -0.40400636, %v5055_v62  ;;  %v1275_v60 = vmul.f32 0.69975954, %v4774_v55  ;;  %v1276_v6 = vmul.f32 0.69975954, %v8059_v37  ;;  %1944 = vrot.lane.b32.xlu1 %v5404_v51, %s3393_s14  ;;  %1942 = vrot.lane.b32.xlu0 %v5410_v16, %s3393_s14 }
 0x134   :  { %8060 = vst [vmem:[#allocation20_spill] sm:$0xff] %v5530_v7  ;;  %v5533_v20 = vmul.f32 -0.40400636, %v5067_v14  ;;  %v1308_v27 = vrot.slane %v1271_v25, 1  ;;  %v1309_v22 = vrot.slane %v1272_v58, 1  ;;  %v1305_v2 = vrot.slane %v1269_v57, 1 }
 0x135   :  { %v1306_v23 = vrot.slane %v1270_v31, 1  ;;  %v5537_v37 = vmul.f32 -0.40400636, %v5105_v40  ;;  %8061 = vst [vmem:[#allocation112_spill] sm:$0xff] %v5539_v15  ;;  %8062 = vst [vmem:[#allocation113_spill] sm:$0xff] %v5541_v52  ;;  %v5544_v49 = vsel %vm339_vm0, %v1299_v38, %v1300_v3  ;;  %v8064_v25 = vld [vmem:[#allocation13_spill] sm:$0xff] }
 0x136   :  { %8063 = vst [vmem:[#allocation114_spill] sm:$0xff] %v5544_v49  ;;  %v1273_v50 = vmul.f32 0.69975954, %v4805_v42  ;;  %v1274_v58 = vmul.f32 0.69975954, %v8064_v25  ;;  %v1314_v57 = vrot.slane %v1275_v60, 1  ;;  %v5558_v38 = vsel %vm339_vm0, %v1308_v27, %v1309_v22  ;;  %v5569_v9 = vpop.permute.xlu1 %1167  ;;  %v5571_v16 = vpop.permute.xlu0 %1165 }
 0x137   :  { %v5551_v31 = vmul.f32 -0.40400636, %v5117_v41  ;;  %v1315_v7 = vrot.slane %v1276_v6, 1  ;;  %8065 = vst [vmem:[#allocation13_spill] sm:$0xff] %v5558_v38  ;;  %v1503_v3 = vmul.f32 -0.23325318, %v4828_v44  ;;  %v5564_v49 = vsel %vm339_vm0, %v1305_v2, %v1306_v23  ;;  %1948 = vrot.lane.b32.xlu1 %v5420_v46, %s3393_s14  ;;  %1946 = vrot.lane.b32.xlu0 %v5423_v18, %s3393_s14 }
 0x138   :  { %v8066_v39 = vld [vmem:[#allocation62_spill] sm:$0xff]  ;;  %v1501_v63 = vmul.f32 -0.23325318, %v4846_v5  ;;  %v1507_v51 = vmul.f32 -0.23325318, %v4872_v8  ;;  %8070 = vst [vmem:[#allocation115_spill] sm:$0xff] %v5571_v16 }
 0x139   :  { %v1504_v25 = vmul.f32 -0.23325318, %v8066_v39  ;;  %8067 = vst [vmem:[#allocation62_spill] sm:$0xff] %v5564_v49  ;;  %v8068_v60 = vld [vmem:[#allocation10_spill] sm:$0xff]  ;;  %v1311_v27 = vrot.slane %v1273_v50, 1  ;;  %v1312_v22 = vrot.slane %v1274_v58, 1  ;;  %v5580_v23 = vsel %vm339_vm0, %v1314_v57, %v1315_v7 }
 0x13a   :  { %v1502_v56 = vmul.f32 -0.23325318, %v8068_v60  ;;  %8069 = vst [vmem:[#allocation10_spill] sm:$0xff] %v5569_v9  ;;  %v5574_v38 = vmul.f32 -0.10825317, %v5152_v11  ;;  %v8072_v39 = vld [vmem:[#allocation88_spill] sm:$0xff] }
 0x13b   :  { %v5577_v45 = vmul.f32 -0.10825317, %v8072_v39  ;;  %8074 = vst [vmem:[#allocation117_spill] sm:$0xff] %v5580_v23  ;;  %v8075_v2 = vld [vmem:[#allocation86_spill] sm:$0xff]  ;;  %v1505_v60 = vmul.f32 -0.23325318, %v4887_v21  ;;  %v5611_v23 = vsel %vm339_vm0, %v1311_v27, %v1312_v22  ;;  %1968 = vrot.lane.b32.xlu1 %v5440_v48, %s3393_s14  ;;  %1966 = vrot.lane.b32.xlu0 %v5453_v33, %s3393_s14 }
 0x13c   :  { %8071 = vst [vmem:[#allocation116_spill] sm:$0xff] %v5574_v38  ;;  %v1508_v6 = vmul.f32 -0.23325318, %v8075_v2  ;;  %v8076_v49 = vld [vmem:[#allocation63_spill] sm:$0xff]  ;;  %v1536_v50 = vrot.slane %v1503_v3, 1  ;;  %v1537_v58 = vrot.slane %v1504_v25, 1  ;;  %v5606_v3 = vpop.permute.xlu1 %1171  ;;  %v5608_v25 = vpop.permute.xlu0 %1169 }
 0x13d   :  { %8073 = vst [vmem:[#allocation88_spill] sm:$0xff] %v5577_v45  ;;  %v1506_v12 = vmul.f32 -0.23325318, %v8076_v49  ;;  %v1533_v16 = vrot.slane %v1501_v63, 1  ;;  %v5592_v7 = vld [vmem:[%s7347_s0 + $0x30] sm:$0xff]  ;;  %v1534_v2 = vrot.slane %v1502_v56, 1 }
 0x13e   :  { %8077 = vst [vmem:[#allocation86_spill] sm:$0xff] %v5592_v7  ;;  %v5595_v57 = vmul.f32 -0.10825317, %v5592_v7  ;;  %v5600_v49 = vld [vmem:[%s7347_s0 + $0x20] sm:$0xff]  ;;  %v1542_v18 = vrot.slane %v1507_v51, 1  ;;  %8081 = vst [vmem:[#allocation120_spill] sm:$0xff] %v5606_v3 }
 0x13f   :  { %8079 = vst [vmem:[#allocation118_spill] sm:$0xff] %v5600_v49  ;;  %v5603_v46 = vmul.f32 -0.10825317, %v5600_v49  ;;  %v1511_v63 = vmul.f32 -0.23325318, %v4905_v34  ;;  %8082 = vst [vmem:[#allocation121_spill] sm:$0xff] %v5608_v25  ;;  %v5667_v41 = vsel %vm339_vm0, %v1533_v16, %v1534_v2  ;;  %1972 = vrot.lane.b32.xlu1 %v5492_v53, %s3393_s14  ;;  %1970 = vrot.lane.b32.xlu0 %v5495_v17, %s3393_s14 }
 0x140   :  { %8078 = vst [vmem:[#allocation63_spill] sm:$0xff] %v5595_v57  ;;  %8083 = vst [vmem:[#allocation122_spill] sm:$0xff] %v5611_v23  ;;  %v8084_v9 = vld [vmem:[#allocation47_spill] sm:$0xff]  ;;  %v1509_v59 = vmul.f32 -0.23325318, %v4923_v28  ;;  %v1543_v36 = vrot.slane %v1508_v6, 1  ;;  %v5661_v49 = vpop.permute.xlu1 %1391 }
 0x141   :  { %8080 = vst [vmem:[#allocation119_spill] sm:$0xff] %v5603_v46  ;;  %v1512_v56 = vmul.f32 -0.23325318, %v8084_v9  ;;  %v8085_v52 = vld [vmem:[#allocation27_spill] sm:$0xff]  ;;  %v1539_v30 = vrot.slane %v1505_v60, 1  ;;  %v1540_v32 = vrot.slane %v1506_v12, 1  ;;  %v5629_v9 = vsel %vm339_vm0, %v1536_v50, %v1537_v58 }
 0x142   :  { %v1510_v15 = vmul.f32 -0.23325318, %v8085_v52  ;;  %v5619_v51 = vld [vmem:[%s7347_s0 + $0x50] sm:$0xff]  ;;  %8088 = vst [vmem:[#allocation123_spill] sm:$0xff] %v5629_v9  ;;  %v5634_v12 = vld [vmem:[%s7347_s0 + $0x40] sm:$0xff]  ;;  %v8092_v22 = vld [vmem:[#allocation61_spill] sm:$0xff] }
 0x143   :  { %8086 = vst [vmem:[#allocation47_spill] sm:$0xff] %v5619_v51  ;;  %v5622_v3 = vmul.f32 -0.10825317, %v5619_v51  ;;  %8089 = vst [vmem:[#allocation124_spill] sm:$0xff] %v5634_v12  ;;  %v5637_v52 = vmul.f32 -0.10825317, %v5634_v12  ;;  %1976 = vrot.lane.b32.xlu1 %v5521_v54, %s3393_s14  ;;  %1974 = vrot.lane.b32.xlu0 %v5533_v20, %s3393_s14 }
 0x144   :  { %v5642_v6 = vld [vmem:[%s7347_s0 + $0x170] sm:$0xff]  ;;  %v1516_v60 = vmul.f32 -0.23325318, %v8092_v22  ;;  %v1548_v23 = vrot.slane %v1511_v63, 1  ;;  %v5649_v50 = vld [vmem:[%s7347_s0 + $0x160] sm:$0xff]  ;;  %v8094_v9 = vld [vmem:[#allocation77_spill] sm:$0xff]  ;;  %v5663_v63 = vpop.permute.xlu0 %1389 }
 0x145   :  { %8087 = vst [vmem:[#allocation27_spill] sm:$0xff] %v5622_v3  ;;  %8090 = vst [vmem:[#allocation125_spill] sm:$0xff] %v5637_v52  ;;  %v1515_v27 = vmul.f32 -0.23325318, %v5642_v6  ;;  %v1513_v58 = vmul.f32 -0.23325318, %v5649_v50 }
 0x146   :  { %8091 = vst [vmem:[#allocation126_spill] sm:$0xff] %v5642_v6  ;;  %8093 = vst [vmem:[#allocation61_spill] sm:$0xff] %v5649_v50  ;;  %v1514_v25 = vmul.f32 -0.23325318, %v8094_v9  ;;  %v5656_v12 = vld [vmem:[%s7347_s0 + $0x90] sm:$0xff]  ;;  %v1549_v22 = vrot.slane %v1512_v56, 1 }
 0x147   :  { %8095 = vst [vmem:[#allocation77_spill] sm:$0xff] %v5656_v12  ;;  %v5659_v51 = vmul.f32 0.0625, %v5656_v12  ;;  %8096 = vst [vmem:[#allocation127_spill] sm:$0xff] %v5661_v49  ;;  %v1545_v7 = vrot.slane %v1509_v59, 1  ;;  %v1546_v52 = vrot.slane %v1510_v15, 1  ;;  %v8098_v3 = vld [vmem:[#allocation14_spill] sm:$0xff]  ;;  %v5677_v59 = vsel %vm339_vm0, %v1542_v18, %v1543_v36  ;;  %1980 = vrot.lane.b32.xlu1 %v5537_v37, %s3393_s14  ;;  %1978 = vrot.lane.b32.xlu0 %v5551_v31, %s3393_s14 }
 0x148   :  { %8097 = vst [vmem:[#allocation128_spill] sm:$0xff] %v5663_v63  ;;  %v1576_v29 = vmul.f32 -0.40400636, %v8098_v3  ;;  %8099 = vst [vmem:[#allocation14_spill] sm:$0xff] %v5667_v41  ;;  %v8100_v9 = vld [vmem:[#allocation33_spill] sm:$0xff]  ;;  %v8101_v14 = vld [vmem:[#allocation67_spill] sm:$0xff]  ;;  %v5680_v15 = vsel %vm339_vm0, %v1539_v30, %v1540_v32  ;;  %v5684_v41 = vpop.permute.xlu1 %1395  ;;  %v5686_v63 = vpop.permute.xlu0 %1393  ;;  %v5689_v49 = vsel %vm339_vm0, %v1548_v23, %v1549_v22 }
 0x149   :  { %v1574_v40 = vmul.f32 -0.40400636, %v8100_v9  ;;  %v1580_v46 = vmul.f32 -0.40400636, %v8101_v14  ;;  %v8102_v57 = vld [vmem:[#allocation68_spill] sm:$0xff]  ;;  %v1554_v16 = vrot.slane %v1515_v27, 1  ;;  %v5708_v23 = vsel %vm339_vm0, %v1545_v7, %v1546_v52 }
 0x14a   :  { %v1578_v13 = vmul.f32 -0.40400636, %v8102_v57  ;;  %v1555_v2 = vrot.slane %v1516_v60, 1  ;;  %v1551_v3 = vrot.slane %v1513_v58, 1  ;;  %v1552_v56 = vrot.slane %v1514_v25, 1  ;;  %v8103_v9 = vld [vmem:[#allocation34_spill] sm:$0xff] }
 0x14b   :  { %v1584_v14 = vmul.f32 -0.40400636, %v8103_v9  ;;  %v8104_v12 = vld [vmem:[#allocation81_spill] sm:$0xff]  ;;  %8105 = vst [vmem:[#allocation33_spill] sm:$0xff] %v5684_v41  ;;  %8106 = vst [vmem:[#allocation67_spill] sm:$0xff] %v5686_v63  ;;  %v5694_v36 = vld [vmem:[%s7347_s0 + $0x70] sm:$0xff]  ;;  %2337 = vrot.lane.b32.xlu1 %v5574_v38, %s3393_s14  ;;  %2335 = vrot.lane.b32.xlu0 %v5577_v45, %s3393_s14 }
 0x14c   :  { %v1582_v57 = vmul.f32 -0.40400636, %v8104_v12  ;;  %8107 = vst [vmem:[#allocation68_spill] sm:$0xff] %v5689_v49  ;;  %v5697_v32 = vmul.f32 -0.10825317, %v5694_v36  ;;  %v5702_v30 = vld [vmem:[%s7347_s0 + $0x60] sm:$0xff]  ;;  %v5715_v58 = vsel %vm339_vm0, %v1554_v16, %v1555_v2  ;;  %v5735_v52 = vsel %vm339_vm0, %v1551_v3, %v1552_v56  ;;  %v5747_v49 = vpop.permute.xlu0 %1397 }
 0x14d   :  { %v5705_v18 = vmul.f32 -0.10825317, %v5702_v30  ;;  %v1609_v25 = vrot.slane %v1576_v29, 1  ;;  %8110 = vst [vmem:[#allocation129_spill] sm:$0xff] %v5708_v23  ;;  %v1606_v12 = vrot.slane %v1574_v40, 1  ;;  %v1615_v27 = vrot.slane %v1580_v46, 1  ;;  %v5745_v23 = vpop.permute.xlu1 %1399 }
 0x14e   :  { %8108 = vst [vmem:[#allocation34_spill] sm:$0xff] %v5697_v32  ;;  %v1612_v60 = vrot.slane %v1578_v13, 1  ;;  %8111 = vst [vmem:[#allocation130_spill] sm:$0xff] %v5715_v58  ;;  %v5720_v22 = vld [vmem:[%s7347_s0 + $0x80] sm:$0xff]  ;;  %v5728_v40 = vld [vmem:[%s7347_s0 + $0xb0] sm:$0xff]  ;;  %v1621_v9 = vrot.slane %v1584_v14, 1 }
 0x14f   :  { %8109 = vst [vmem:[#allocation81_spill] sm:$0xff] %v5705_v18  ;;  %8112 = vst [vmem:[#allocation131_spill] sm:$0xff] %v5720_v22  ;;  %v5723_v29 = vmul.f32 0.0625, %v5720_v22  ;;  %v5731_v13 = vmul.f32 0.0625, %v5728_v40  ;;  %v8114_v7 = vld [vmem:[#allocation74_spill] sm:$0xff]  ;;  %v1618_v58 = vrot.slane %v1582_v57, 1 }
 0x150   :  { %8113 = vst [vmem:[#allocation132_spill] sm:$0xff] %v5728_v40  ;;  %v1588_v46 = vmul.f32 -0.40400636, %v8114_v7  ;;  %8115 = vst [vmem:[#allocation74_spill] sm:$0xff] %v5735_v52  ;;  %v5740_v16 = vld [vmem:[%s7347_s0 + $0xa0] sm:$0xff]  ;;  %v8119_v40 = vrot.slane %v5440_v48, 1 }
 0x151   :  { %8116 = vst [vmem:[#allocation133_spill] sm:$0xff] %v5740_v16  ;;  %v5743_v2 = vmul.f32 0.0625, %v5740_v16  ;;  %8117 = vst [vmem:[#allocation134_spill] sm:$0xff] %v5745_v23  ;;  %v5757_v3 = vld [vmem:[%s7347_s0 + $0xd0] sm:$0xff]  ;;  %v5763_v14 = vmul.f32 0.0625, %v4740_v19  ;;  %v8122_v57 = vld [vmem:[#allocation83_spill] sm:$0xff] }
 0x152   :  { %8118 = vst [vmem:[#allocation135_spill] sm:$0xff] %v5747_v49  ;;  %v5752_v7 = vsel %vm339_vm0, %v8119_v40, %v1609_v25  ;;  %8121 = vst [vmem:[#allocation137_spill] sm:$0xff] %v5757_v3  ;;  %v5760_v56 = vmul.f32 0.0625, %v5757_v3  ;;  %v1586_v52 = vmul.f32 -0.40400636, %v8122_v57  ;;  %v8123_v16 = vrot.slane %v5453_v33, 1 }
 0x153   :  { %8120 = vst [vmem:[#allocation136_spill] sm:$0xff] %v5752_v7  ;;  %v8124_v25 = vrot.slane %v5492_v53, 1  ;;  %v8125_v22 = vrot.slane %v5495_v17, 1  ;;  %v5782_v19 = vmul.f32 0.0625, %v4774_v55  ;;  %v8127_v57 = vld [vmem:[#allocation92_spill] sm:$0xff]  ;;  %v8128_v33 = vld [vmem:[#allocation49_spill] sm:$0xff] }
 0x154   :  { %v5769_v48 = vsel %vm339_vm0, %v8123_v16, %v1606_v12  ;;  %v1006_v7 = vadd.f32 %v8127_v57, %v5266_v26  ;;  %v1005_v12 = vadd.f32 %v8128_v33, %v5269_v1  ;;  %v5793_v53 = vmul.f32 0.0625, %v4805_v42  ;;  %v5811_v57 = vpop.permute.xlu1 %1403  ;;  %v5813_v42 = vpop.permute.xlu0 %1401  ;;  %v8139_v33 = vld [vmem:[#allocation28_spill] sm:$0xff]  ;;  %v8151_v38 = vld [vmem:[#allocation17_spill] sm:$0xff] }
 0x155   :  { %v5774_v40 = vsel %vm339_vm0, %v8124_v25, %v1615_v27  ;;  %v5779_v3 = vsel %vm339_vm0, %v8125_v22, %v1612_v60  ;;  %v1627_v17 = vrot.slane %v1588_v46, 1  ;;  %v8129_v27 = vrot.slane %v5521_v54, 1  ;;  %8133 = vst [vmem:[#allocation138_spill] sm:$0xff] %v5811_v57  ;;  %8134 = vst [vmem:[#allocation139_spill] sm:$0xff] %v5813_v42 }
 0x156   :  { %8126 = vst [vmem:[#allocation83_spill] sm:$0xff] %v5779_v3  ;;  %v8131_v60 = vrot.slane %v5533_v20, 1  ;;  %v5806_v16 = vmul.f32 -0.1875, %v4828_v44  ;;  %v5809_v25 = vmul.f32 -0.1875, %v4846_v5  ;;  %v1624_v46 = vrot.slane %v1586_v52, 1  ;;  %v8138_v44 = vld [vmem:[#allocation50_spill] sm:$0xff] }
 0x157   :  { %v5798_v55 = vsel %vm339_vm0, %v8129_v27, %v1621_v9  ;;  %v5816_v54 = vmul.f32 -0.1875, %v4872_v8  ;;  %v5819_v9 = vmul.f32 -0.1875, %v4887_v21  ;;  %v5822_v20 = vmul.f32 -0.1875, %v4905_v34  ;;  %v8140_v27 = vld [vmem:[#allocation7_spill] sm:$0xff]  ;;  %v8215_v3 = vld [vmem:[#allocation30_spill] sm:$0xff] }
 0x158   :  { %8130 = vst [vmem:[#allocation92_spill] sm:$0xff] %v5798_v55  ;;  %v5803_v22 = vsel %vm339_vm0, %v8131_v60, %v1618_v58  ;;  %v1008_v58 = vadd.f32 %v8138_v44, %v5272_v43  ;;  %v1054_v5 = vadd.f32 %v8139_v33, %v1006_v7  ;;  %v1053_v60 = vadd.f32 %v8140_v27, %v1005_v12  ;;  %v8142_v52 = vld [vmem:[#allocation15_spill] sm:$0xff]  ;;  %v5864_v43 = vpop.permute.xlu0 %1469 }
 0x159   :  { %8132 = vst [vmem:[#allocation49_spill] sm:$0xff] %v5803_v22  ;;  %8135 = vst [vmem:[#allocation140_spill] sm:$0xff] %v5816_v54  ;;  %v5829_v1 = vmul.f32 -0.1875, %v4923_v28  ;;  %v1007_v8 = vadd.f32 %v8142_v52, %v5275_v61  ;;  %v5838_v21 = vmul.f32 -0.1875, %v5642_v6  ;;  %v5841_v34 = vmul.f32 -0.1875, %v5649_v50  ;;  %v8150_v52 = vld [vmem:[#allocation37_spill] sm:$0xff] }
 0x15a   :  { %8136 = vst [vmem:[#allocation141_spill] sm:$0xff] %v5819_v9  ;;  %8137 = vst [vmem:[#allocation142_spill] sm:$0xff] %v5822_v20  ;;  %v5844_v7 = vmul.f32 0.10825317, %v4977_v47  ;;  %v8146_v28 = vrot.slane %v5537_v37, 1  ;;  %v1056_v45 = vadd.f32 %v8150_v52, %v1008_v58  ;;  %v5862_v47 = vpop.permute.xlu1 %1471  ;;  %v8159_v52 = vld [vmem:[#allocation44_spill] sm:$0xff] }
 0x15b   :  { %8141 = vst [vmem:[#allocation50_spill] sm:$0xff] %v5829_v1  ;;  %8143 = vst [vmem:[#allocation28_spill] sm:$0xff] %v5838_v21  ;;  %v5852_v44 = vmul.f32 0.10825317, %v5001_v35  ;;  %v5855_v33 = vmul.f32 0.10825317, %v5013_v4  ;;  %v1055_v61 = vadd.f32 %v8151_v38, %v1007_v8 }
 0x15c   :  { %8144 = vst [vmem:[#allocation7_spill] sm:$0xff] %v5841_v34  ;;  %8145 = vst [vmem:[#allocation15_spill] sm:$0xff] %v5844_v7  ;;  %v5849_v12 = vsel %vm339_vm0, %v8146_v28, %v1627_v17  ;;  %v5858_v27 = vmul.f32 0.69975954, %v5152_v11  ;;  %v5867_v37 = vmul.f32 0.10825317, %v5025_v10 }
 0x15d   :  { %8147 = vst [vmem:[#allocation143_spill] sm:$0xff] %v5849_v12  ;;  %8148 = vst [vmem:[#allocation144_spill] sm:$0xff] %v5852_v44  ;;  %v5870_v35 = vmul.f32 0.10825317, %v5055_v62  ;;  %v8156_v17 = vld [vmem:[#allocation89_spill] sm:$0xff]  ;;  %v8158_v38 = vld [vmem:[#allocation16_spill] sm:$0xff] }
 0x15e   :  { %8149 = vst [vmem:[#allocation145_spill] sm:$0xff] %v5855_v33  ;;  %8152 = vst [vmem:[#allocation37_spill] sm:$0xff] %v5862_v47  ;;  %v1070_v4 = vadd.f32 %v8156_v17, %v1054_v5  ;;  %v8157_v28 = vld [vmem:[#allocation9_spill] sm:$0xff]  ;;  %v5875_v11 = vmul.f32 0.69975954, %v5305_v0  ;;  %v1010_v8 = vadd.f32 %v8158_v38, %v5284_v24  ;;  %v8160_v50 = vld [vmem:[#allocation87_spill] sm:$0xff]  ;;  %v5908_v44 = vpop.permute.xlu1 %1475 }
 0x15f   :  { %8153 = vst [vmem:[#allocation17_spill] sm:$0xff] %v5864_v43  ;;  %8154 = vst [vmem:[#allocation146_spill] sm:$0xff] %v5867_v37  ;;  %v1069_v26 = vadd.f32 %v8157_v28, %v1053_v60  ;;  %v5878_v58 = vmul.f32 0.69975954, %v8072_v39  ;;  %v1009_v10 = vadd.f32 %v8160_v50, %v8159_v52  ;;  %v8161_v6 = vld [vmem:[#allocation63_spill] sm:$0xff]  ;;  %v8167_v39 = vrot.slane %v5551_v31, 1  ;;  %v5910_v31 = vpop.permute.xlu0 %1473 }
 0x160   :  { %8155 = vst [vmem:[#allocation147_spill] sm:$0xff] %v5870_v35  ;;  %2341 = vrot.lane.b32.xlu1 %v8161_v6, %s3393_s14  ;;  %v8162_v62 = vld [vmem:[#allocation119_spill] sm:$0xff]  ;;  %v8169_v38 = vld [vmem:[#allocation82_spill] sm:$0xff]  ;;  %v2706_v50 = vrot.slane %v5858_v27, 1  ;;  %v8172_v37 = vld [vmem:[#allocation85_spill] sm:$0xff]  ;;  %v2707_v27 = vrot.slane %v5875_v11, 1 }
 0x161   :  { %2339 = vrot.lane.b32.xlu0 %v8162_v62, %s3393_s14  ;;  %v8163_v5 = vld [vmem:[#allocation79_spill] sm:$0xff]  ;;  %v5897_v35 = vsel %vm339_vm0, %v8167_v39, %v1624_v46  ;;  %v5900_v24 = vmul.f32 0.10825317, %v8169_v38  ;;  %v8171_v6 = vld [vmem:[#allocation26_spill] sm:$0xff]  ;;  %v1072_v62 = vadd.f32 %v8172_v37, %v1056_v45  ;;  %8176 = vst [vmem:[#allocation82_spill] sm:$0xff] %v5908_v44  ;;  %v8179_v38 = vld [vmem:[#allocation57_spill] sm:$0xff] }
 0x162   :  { %v5889_v60 = vmul.f32 0.10825317, %v8163_v5  ;;  %v8165_v28 = vld [vmem:[#allocation71_spill] sm:$0xff]  ;;  %8168 = vst [vmem:[#allocation79_spill] sm:$0xff] %v5897_v35  ;;  %v2672_v52 = vmul.f32 0.69975954, %v8171_v6  ;;  %v5934_v55 = vpop.permute.xlu1 %1479 }
 0x163   :  { %v5892_v17 = vmul.f32 0.10825317, %v8165_v28  ;;  %8170 = vst [vmem:[#allocation71_spill] sm:$0xff] %v5900_v24  ;;  %v8173_v33 = vld [vmem:[#allocation23_spill] sm:$0xff]  ;;  %8177 = vst [vmem:[#allocation26_spill] sm:$0xff] %v5910_v31  ;;  %v1085_v24 = vadd.f32 %v8179_v38, %v1069_v26  ;;  %v2703_v6 = vrot.slane %v5878_v58, 1 }
 0x164   :  { %8164 = vst [vmem:[#allocation16_spill] sm:$0xff] %v5889_v60  ;;  %v1071_v5 = vadd.f32 %v8173_v33, %v1055_v61  ;;  %v8174_v60 = vld [vmem:[#allocation8_spill] sm:$0xff]  ;;  %v8175_v28 = vld [vmem:[#allocation11_spill] sm:$0xff]  ;;  %v8182_v61 = vld [vmem:[#allocation73_spill] sm:$0xff] }
 0x165   :  { %8166 = vst [vmem:[#allocation87_spill] sm:$0xff] %v5892_v17  ;;  %v1058_v0 = vadd.f32 %v8174_v60, %v1010_v8  ;;  %v1057_v17 = vadd.f32 %v8175_v28, %v1009_v10  ;;  %v8178_v46 = vld [vmem:[#allocation39_spill] sm:$0xff]  ;;  %v8180_v7 = vld [vmem:[#allocation40_spill] sm:$0xff]  ;;  %v8185_v60 = vld [vmem:[#allocation125_spill] sm:$0xff] }
 0x166   :  { %v1086_v39 = vadd.f32 %v8178_v46, %v1070_v4  ;;  %v8181_v45 = vld [vmem:[#allocation35_spill] sm:$0xff]  ;;  %v8183_v33 = vld [vmem:[#allocation72_spill] sm:$0xff]  ;;  %2343 = vrot.lane.b32.xlu0 %v8185_v60, %s3393_s14  ;;  %v8186_v28 = vld [vmem:[#allocation86_spill] sm:$0xff]  ;;  %8196 = vst [vmem:[#allocation8_spill] sm:$0xff] %v5934_v55 }
 0x167   :  { %v1012_v37 = vadd.f32 %v8181_v45, %v8180_v7  ;;  %v1011_v8 = vadd.f32 %v8183_v33, %v8182_v61  ;;  %v8184_v10 = vld [vmem:[#allocation27_spill] sm:$0xff]  ;;  %v2677_v4 = vmul.f32 0.69975954, %v8186_v28  ;;  %v8187_v46 = vld [vmem:[#allocation56_spill] sm:$0xff]  ;;  %v8188_v38 = vld [vmem:[#allocation2_spill] sm:$0xff]  ;;  %v5936_v28 = vpop.permute.xlu0 %1477 }
 0x168   :  { %2345 = vrot.lane.b32.xlu1 %v8184_v10, %s3393_s14  ;;  %v2678_v26 = vmul.f32 0.69975954, %v8187_v46  ;;  %v1134_v11 = vadd.f32 %v8188_v38, %v1086_v39  ;;  %v8189_v34 = vld [vmem:[#allocation12_spill] sm:$0xff]  ;;  %v8190_v21 = vld [vmem:[#allocation118_spill] sm:$0xff]  ;;  %v8191_v45 = vld [vmem:[#allocation41_spill] sm:$0xff]  ;;  %8197 = vst [vmem:[#allocation11_spill] sm:$0xff] %v5936_v28 }
 0x169   :  { %v1133_v58 = vadd.f32 %v8189_v34, %v1085_v24  ;;  %v2675_v35 = vmul.f32 0.69975954, %v8190_v21  ;;  %v2676_v7 = vmul.f32 0.69975954, %v8191_v45  ;;  %v8192_v12 = vld [vmem:[#allocation32_spill] sm:$0xff]  ;;  %v8194_v10 = vld [vmem:[#allocation25_spill] sm:$0xff] }
 0x16a   :  { %v1074_v33 = vadd.f32 %v8192_v12, %v1058_v0  ;;  %v8193_v61 = vld [vmem:[#allocation24_spill] sm:$0xff]  ;;  %v1088_v20 = vadd.f32 %v8194_v10, %v1072_v62  ;;  %v8195_v22 = vld [vmem:[#allocation46_spill] sm:$0xff]  ;;  %v8198_v46 = vld [vmem:[#allocation21_spill] sm:$0xff]  ;;  %2347 = vrot.lane.b32.xlu0 %v5705_v18, %s3393_s14  ;;  %v2704_v62 = vrot.slane %v2672_v52, 1 }
 0x16b   :  { %v1073_v1 = vadd.f32 %v8193_v61, %v1057_v17  ;;  %v1087_v60 = vadd.f32 %v8195_v22, %v1071_v5  ;;  %v1060_v39 = vadd.f32 %v8198_v46, %v1012_v37  ;;  %v8199_v38 = vld [vmem:[#allocation22_spill] sm:$0xff]  ;;  %v8200_v34 = vld [vmem:[#allocation31_spill] sm:$0xff]  ;;  %v8201_v9 = vld [vmem:[#allocation109_spill] sm:$0xff]  ;;  %v2712_v5 = vrot.slane %v2677_v4, 1  ;;  %v5953_v22 = vpop.permute.xlu1 %1483 }
 0x16c   :  { %v1059_v24 = vadd.f32 %v8199_v38, %v1011_v8  ;;  %v1182_v21 = vadd.f32 %v8200_v34, %v1134_v11  ;;  %v1181_v45 = vadd.f32 %v8201_v9, %v1133_v58  ;;  %v8202_v54 = vld [vmem:[#allocation58_spill] sm:$0xff]  ;;  %v8203_v12 = vld [vmem:[#allocation45_spill] sm:$0xff]  ;;  %2349 = vrot.lane.b32.xlu1 %v5697_v32, %s3393_s14  ;;  %v2713_v61 = vrot.slane %v2678_v26, 1  ;;  %v8204_v8 = vld [vmem:[#allocation47_spill] sm:$0xff]  ;;  %8209 = vst [vmem:[#allocation35_spill] sm:$0xff] %v5953_v22  ;;  %v5955_v32 = vpop.permute.xlu0 %1481 }
 0x16d   :  { %v1136_v0 = vadd.f32 %v8202_v54, %v1088_v20  ;;  %v1135_v17 = vadd.f32 %v8203_v12, %v1087_v60  ;;  %v2709_v37 = vrot.slane %v2675_v35, 1  ;;  %v2710_v46 = vrot.slane %v2676_v7, 1  ;;  %v8205_v11 = vld [vmem:[#allocation75_spill] sm:$0xff]  ;;  %v8206_v9 = vld [vmem:[#allocation36_spill] sm:$0xff]  ;;  %v8208_v12 = vld [vmem:[#allocation113_spill] sm:$0xff]  ;;  %8210 = vst [vmem:[#allocation72_spill] sm:$0xff] %v5955_v32 }
 0x16e   :  { %v2681_v38 = vmul.f32 0.69975954, %v8204_v8  ;;  %v1090_v34 = vadd.f32 %v8205_v11, %v1074_v33  ;;  %v1089_v58 = vadd.f32 %v8206_v9, %v1073_v1  ;;  %v8207_v54 = vld [vmem:[#allocation112_spill] sm:$0xff]  ;;  %v8213_v35 = vld [vmem:[#allocation19_spill] sm:$0xff]  ;;  %v8214_v10 = vld [vmem:[#allocation90_spill] sm:$0xff]  ;;  %2383 = vrot.lane.b32.xlu0 %v5723_v29, %s3393_s14 }
 0x16f   :  { %v1184_v20 = vadd.f32 %v8207_v54, %v1136_v0  ;;  %v1183_v60 = vadd.f32 %v8208_v12, %v1135_v17  ;;  %v8211_v18 = vld [vmem:[#allocation48_spill] sm:$0xff]  ;;  %v1254_v7 = vadd.f32 %v8213_v35, %v1182_v21  ;;  %v1253_v8 = vadd.f32 %v8214_v10, %v1181_v45  ;;  %v8216_v11 = vld [vmem:[#allocation98_spill] sm:$0xff]  ;;  %v8220_v29 = vld [vmem:[#allocation99_spill] sm:$0xff] }
 0x170   :  { %v1076_v52 = vadd.f32 %v8211_v18, %v1060_v39  ;;  %v8212_v4 = vld [vmem:[#allocation64_spill] sm:$0xff]  ;;  %v1138_v33 = vadd.f32 %v8215_v3, %v1090_v34  ;;  %v1137_v1 = vadd.f32 %v8216_v11, %v1089_v58  ;;  %2385 = vrot.lane.b32.xlu1 %v5659_v51, %s3393_s14  ;;  %v8217_v0 = vld [vmem:[#allocation42_spill] sm:$0xff]  ;;  %v5975_v10 = vsel %vm339_vm0, %v2703_v6, %v2704_v62  ;;  %v8222_v12 = vld [vmem:[#allocation115_spill] sm:$0xff] }
 0x171   :  { %v1075_v26 = vadd.f32 %v8212_v4, %v1059_v24  ;;  %v2682_v17 = vmul.f32 0.69975954, %v8217_v0  ;;  %v8218_v54 = vld [vmem:[#allocation124_spill] sm:$0xff]  ;;  %v5972_v24 = vsel %vm339_vm0, %v2706_v50, %v2707_v27  ;;  %v5978_v3 = vsel %vm339_vm0, %v2712_v5, %v2713_v61  ;;  %v8221_v34 = vld [vmem:[#allocation10_spill] sm:$0xff]  ;;  %v5987_v0 = vpop.permute.xlu1 %1695  ;;  %v5989_v50 = vpop.permute.xlu0 %1693  ;;  %v8226_v62 = vld [vmem:[#allocation93_spill] sm:$0xff] }
 0x172   :  { %v5969_v39 = vmul.f32 0.69975954, %v8218_v54  ;;  %v5981_v21 = vsel %vm339_vm0, %v2709_v37, %v2710_v46  ;;  %v8219_v51 = vld [vmem:[#allocation76_spill] sm:$0xff]  ;;  %v1255_v11 = vadd.f32 %v8220_v29, %v1183_v60  ;;  %v1186_v58 = vadd.f32 %v8221_v34, %v1138_v33  ;;  %8223 = vst [vmem:[#allocation86_spill] sm:$0xff] %v5987_v0  ;;  %8224 = vst [vmem:[#allocation56_spill] sm:$0xff] %v5989_v50  ;;  %v8227_v5 = vld [vmem:[#allocation110_spill] sm:$0xff] }
 0x173   :  { %v1256_v45 = vadd.f32 %v8219_v51, %v1184_v20  ;;  %v1185_v35 = vadd.f32 %v8222_v12, %v1137_v1  ;;  %v8225_v27 = vld [vmem:[#allocation4_spill] sm:$0xff]  ;;  %v1091_v61 = vadd.f32 %v8226_v62, %v1075_v26  ;;  %v1326_v54 = vadd.f32 %v8227_v5, %v1254_v7  ;;  %v8228_v37 = vld [vmem:[#allocation111_spill] sm:$0xff]  ;;  %2387 = vrot.lane.b32.xlu0 %v5743_v2, %s3393_s14  ;;  %v8229_v33 = vld [vmem:[#allocation94_spill] sm:$0xff] }
 0x174   :  { %v1092_v6 = vadd.f32 %v8225_v27, %v1076_v52  ;;  %v1325_v46 = vadd.f32 %v8228_v37, %v1253_v8  ;;  %2389 = vrot.lane.b32.xlu1 %v5731_v13, %s3393_s14  ;;  %v2718_v20 = vrot.slane %v2681_v38, 1  ;;  %v2719_v60 = vrot.slane %v2682_v17, 1  ;;  %v8230_v29 = vld [vmem:[#allocation106_spill] sm:$0xff]  ;;  %v8231_v34 = vld [vmem:[#allocation107_spill] sm:$0xff]  ;;  %v8233_v5 = vld [vmem:[#allocation128_spill] sm:$0xff] }
 0x175   :  { %v2680_v1 = vmul.f32 0.69975954, %v8229_v33  ;;  %v2715_v51 = vrot.slane %v5969_v39, 1  ;;  %v1139_v26 = vadd.f32 %v8231_v34, %v1091_v61  ;;  %v8232_v12 = vld [vmem:[#allocation127_spill] sm:$0xff]  ;;  %v8234_v37 = vld [vmem:[#allocation101_spill] sm:$0xff]  ;;  %v8236_v9 = vld [vmem:[#allocation20_spill] sm:$0xff]  ;;  %v6009_v4 = vpop.permute.xlu1 %1699  ;;  %v6011_v33 = vpop.permute.xlu0 %1697 }
 0x176   :  { %v1140_v52 = vadd.f32 %v8230_v29, %v1092_v6  ;;  %v1414_v7 = vadd.f32 %v8232_v12, %v1326_v54  ;;  %v1413_v8 = vadd.f32 %v8233_v5, %v1325_v46  ;;  %v1258_v62 = vadd.f32 %v8234_v37, %v1186_v58  ;;  %v8235_v13 = vld [vmem:[#allocation103_spill] sm:$0xff]  ;;  %v8237_v38 = vld [vmem:[#allocation114_spill] sm:$0xff]  ;;  %8238 = vst [vmem:[#allocation2_spill] sm:$0xff] %v6009_v4  ;;  %v8240_v39 = vld [vmem:[#allocation120_spill] sm:$0xff] }
 0x177   :  { %v1257_v27 = vadd.f32 %v8235_v13, %v1185_v35  ;;  %v1328_v2 = vadd.f32 %v8236_v9, %v1256_v45  ;;  %v1327_v17 = vadd.f32 %v8237_v38, %v1255_v11  ;;  %8239 = vst [vmem:[#allocation12_spill] sm:$0xff] %v6011_v33  ;;  %v8241_v29 = vld [vmem:[#allocation121_spill] sm:$0xff]  ;;  %2391 = vrot.lane.b32.xlu0 %v5763_v14, %s3393_s14  ;;  %v2685_v9 = vmul.f32 0.69975954, %v5694_v36  ;;  %v8242_v45 = vld [vmem:[#allocation55_spill] sm:$0xff] }
 0x178   :  { %v1188_v6 = vadd.f32 %v8240_v39, %v1140_v52  ;;  %v1187_v61 = vadd.f32 %v8241_v29, %v1139_v26  ;;  %v1494_v54 = vadd.f32 %v5862_v47, %v1414_v7  ;;  %v1493_v46 = vadd.f32 %v5864_v43, %v1413_v8  ;;  %2393 = vrot.lane.b32.xlu1 %v5760_v56, %s3393_s14  ;;  %v8243_v7 = vld [vmem:[#allocation84_spill] sm:$0xff]  ;;  %v8244_v37 = vld [vmem:[#allocation13_spill] sm:$0xff]  ;;  %v8250_v29 = vld [vmem:[#allocation123_spill] sm:$0xff] }
 0x179   :  { %v1416_v58 = vadd.f32 %v5684_v41, %v1328_v2  ;;  %v1415_v35 = vadd.f32 %v5686_v63, %v1327_v17  ;;  %v2686_v11 = vmul.f32 0.69975954, %v8242_v45  ;;  %v6026_v52 = vsel %vm339_vm0, %v2718_v20, %v2719_v60  ;;  %v8245_v2 = vld [vmem:[#allocation62_spill] sm:$0xff]  ;;  %v6034_v17 = vpop.permute.xlu1 %1703  ;;  %v6036_v36 = vpop.permute.xlu0 %1701  ;;  %v8248_v39 = vld [vmem:[#allocation105_spill] sm:$0xff]  ;;  %v8249_v60 = vld [vmem:[#allocation3_spill] sm:$0xff] }
 0x17a   :  { %v2716_v34 = vrot.slane %v2680_v1, 1  ;;  %v2683_v26 = vmul.f32 0.69975954, %v5702_v30  ;;  %v2684_v8 = vmul.f32 0.69975954, %v8243_v7  ;;  %v1330_v13 = vadd.f32 %v8244_v37, %v1258_v62  ;;  %8246 = vst [vmem:[#allocation118_spill] sm:$0xff] %v6034_v17 }
 0x17b   :  { %v1329_v38 = vadd.f32 %v8245_v2, %v1257_v27  ;;  %v1496_v56 = vadd.f32 %v5908_v44, %v1416_v58  ;;  %v1495_v14 = vadd.f32 %v5910_v31, %v1415_v35  ;;  %8247 = vst [vmem:[#allocation41_spill] sm:$0xff] %v6036_v36  ;;  %v1260_v20 = vadd.f32 %v8248_v39, %v1188_v6  ;;  %v8251_v45 = vld [vmem:[#allocation14_spill] sm:$0xff]  ;;  %v8301_v43 = vld [vmem:[#allocation147_spill] sm:$0xff]  ;;  %v8302_v47 = vld [vmem:[#allocation16_spill] sm:$0xff] }
 0x17c   :  { %v1259_v1 = vadd.f32 %v8249_v60, %v1187_v61  ;;  %v1566_v30 = vadd.f32 %v8250_v29, %v1494_v54  ;;  %v1565_v7 = vadd.f32 %v8251_v45, %v1493_v46  ;;  %v1418_v62 = vadd.f32 %v5745_v23, %v1330_v13  ;;  %2397 = vrot.lane.b32.xlu1 %v5782_v19, %s3393_s14  ;;  %v8252_v54 = vld [vmem:[#allocation77_spill] sm:$0xff]  ;;  %v8308_v18 = vld [vmem:[#allocation71_spill] sm:$0xff] }
 0x17d   :  { %v1417_v27 = vadd.f32 %v5747_v49, %v1329_v38  ;;  %2395 = vrot.lane.b32.xlu0 %v5793_v53, %s3393_s14  ;;  %v2724_v58 = vrot.slane %v2685_v9, 1  ;;  %v2725_v35 = vrot.slane %v2686_v11, 1  ;;  %v6049_v6 = vsel %vm339_vm0, %v2715_v51, %v2716_v34  ;;  %v6058_v39 = vpop.permute.xlu1 %1707  ;;  %v6060_v53 = vpop.permute.xlu0 %1705  ;;  %v8255_v9 = vld [vmem:[#allocation117_spill] sm:$0xff]  ;;  %v8256_v11 = vld [vmem:[#allocation122_spill] sm:$0xff] }
 0x17e   :  { %v2721_v61 = vrot.slane %v2683_v26, 1  ;;  %v2722_v37 = vrot.slane %v2684_v8, 1  ;;  %v6052_v2 = vmul.f32 -0.40400636, %v8252_v54  ;;  %v1568_v46 = vadd.f32 %v5677_v59, %v1496_v56  ;;  %8253 = vst [vmem:[#allocation21_spill] sm:$0xff] %v6058_v39  ;;  %8254 = vst [vmem:[#allocation22_spill] sm:$0xff] %v6060_v53 }
 0x17f   :  { %v1567_v13 = vadd.f32 %v5680_v15, %v1495_v14  ;;  %v1498_v38 = vadd.f32 %v5934_v55, %v1418_v62  ;;  %v1497_v19 = vadd.f32 %v5936_v28, %v1417_v27  ;;  %v1332_v51 = vadd.f32 %v8255_v9, %v1260_v20  ;;  %v8257_v26 = vld [vmem:[#allocation136_spill] sm:$0xff]  ;;  %v8259_v14 = vld [vmem:[#allocation131_spill] sm:$0xff]  ;;  %v8260_v20 = vld [vmem:[#allocation102_spill] sm:$0xff] }
 0x180   :  { %v1331_v34 = vadd.f32 %v8256_v11, %v1259_v1  ;;  %v1638_v8 = vadd.f32 %v8257_v26, %v1566_v30  ;;  %v1637_v60 = vadd.f32 %v5769_v48, %v1565_v7  ;;  %2465 = vrot.lane.b32.xlu1 %v5806_v16, %s3393_s14  ;;  %v6071_v59 = vsel %vm339_vm0, %v2724_v58, %v2725_v35  ;;  %v8258_v15 = vld [vmem:[#allocation100_spill] sm:$0xff]  ;;  %v8262_v62 = vld [vmem:[#allocation129_spill] sm:$0xff]  ;;  %v8263_v35 = vld [vmem:[#allocation83_spill] sm:$0xff] }
 0x181   :  { %2463 = vrot.lane.b32.xlu0 %v5809_v25, %s3393_s14  ;;  %v2762_v56 = vmul.f32 -0.40400636, %v8258_v15  ;;  %v6075_v29 = vmul.f32 -0.40400636, %v8259_v14  ;;  %v6078_v1 = vmul.f32 -0.40400636, %v8260_v20  ;;  %v1420_v30 = vadd.f32 %v5811_v57, %v1332_v51  ;;  %v6088_v11 = vpop.permute.xlu1 %1783  ;;  %v6090_v26 = vpop.permute.xlu0 %1781 }
 0x182   :  { %v1419_v48 = vadd.f32 %v5813_v42, %v1331_v34  ;;  %v1718_v16 = vadd.f32 %v5987_v0, %v1638_v8  ;;  %v1717_v45 = vadd.f32 %v5989_v50, %v1637_v60  ;;  %v8261_v25 = vld [vmem:[#allocation68_spill] sm:$0xff]  ;;  %v1569_v27 = vadd.f32 %v8262_v62, %v1497_v19  ;;  %8264 = vst [vmem:[#allocation31_spill] sm:$0xff] %v6088_v11  ;;  %v8267_v19 = vld [vmem:[#allocation141_spill] sm:$0xff]  ;;  %v8276_v57 = vld [vmem:[#allocation130_spill] sm:$0xff] }
 0x183   :  { %v1570_v7 = vadd.f32 %v8261_v25, %v1498_v38  ;;  %v1640_v58 = vadd.f32 %v5774_v40, %v1568_v46  ;;  %v1639_v9 = vadd.f32 %v8263_v35, %v1567_v13  ;;  %8265 = vst [vmem:[#allocation109_spill] sm:$0xff] %v6090_v26  ;;  %v1500_v51 = vadd.f32 %v5953_v22, %v1420_v30  ;;  %v8266_v38 = vld [vmem:[#allocation140_spill] sm:$0xff]  ;;  %v8278_v55 = vld [vmem:[#allocation142_spill] sm:$0xff]  ;;  %v8293_v50 = vld [vmem:[#allocation15_spill] sm:$0xff] }
 0x184   :  { %v1499_v34 = vadd.f32 %v5955_v32, %v1419_v48  ;;  %v1806_v8 = vadd.f32 %v6088_v11, %v1718_v16  ;;  %v1805_v60 = vadd.f32 %v6090_v26, %v1717_v45  ;;  %2469 = vrot.lane.b32.xlu1 %v8266_v38, %s3393_s14  ;;  %v6101_v40 = vsel %vm339_vm0, %v2721_v61, %v2722_v37  ;;  %v8268_v46 = vld [vmem:[#allocation132_spill] sm:$0xff]  ;;  %v8270_v48 = vld [vmem:[#allocation133_spill] sm:$0xff]  ;;  %v3324_v26 = vld [vmem:[%s7347_s0 + $0x108] sm:$0x1] }
 0x185   :  { %2467 = vrot.lane.b32.xlu0 %v8267_v19, %s3393_s14  ;;  %v6104_v13 = vmul.f32 -0.40400636, %v8268_v46  ;;  %v8269_v25 = vld [vmem:[#allocation104_spill] sm:$0xff]  ;;  %v6110_v62 = vmul.f32 -0.40400636, %v8270_v48  ;;  %v1720_v16 = vadd.f32 %v6009_v4, %v1640_v58  ;;  %v1719_v45 = vadd.f32 %v6011_v33, %v1639_v9  ;;  %v8273_v58 = vld [vmem:[#allocation49_spill] sm:$0xff]  ;;  %v6128_v9 = vpop.permute.xlu1 %1787  ;;  %v6130_v22 = vpop.permute.xlu0 %1785 }
 0x186   :  { %v6107_v30 = vmul.f32 -0.40400636, %v8269_v25  ;;  %3213 = vst.msk [vmem:[%s7348_s1 + $0x48] sm:$0xff] %vm932_vm1, %v1806_v8  ;;  %3212 = vst.msk [vmem:[%s7348_s1 + $0x40] sm:$0xff] %vm932_vm1, %v1805_v60  ;;  %v2794_v61 = vrot.slane %v6052_v2, 1  ;;  %v8271_v37 = vld [vmem:[#allocation108_spill] sm:$0xff]  ;;  %v1641_v32 = vadd.f32 %v8273_v58, %v1569_v27  ;;  %v1572_v33 = vadd.f32 %v8276_v57, %v1500_v51 }
 0x187   :  { %v6124_v35 = vmul.f32 -0.40400636, %v8271_v37  ;;  %v8272_v38 = vld [vmem:[#allocation92_spill] sm:$0xff]  ;;  %8274 = vst [vmem:[#allocation58_spill] sm:$0xff] %v6128_v9  ;;  %8275 = vst [vmem:[#allocation45_spill] sm:$0xff] %v6130_v22  ;;  %v2795_v42 = vrot.slane %v2762_v56, 1  ;;  %v1808_v2 = vadd.f32 %v6128_v9, %v1720_v16  ;;  %v1807_v28 = vadd.f32 %v6130_v22, %v1719_v45 }
 0x188   :  { %v1642_v19 = vadd.f32 %v8272_v38, %v1570_v7  ;;  %v2791_v8 = vrot.slane %v6075_v29, 1  ;;  %v8277_v4 = vld [vmem:[#allocation74_spill] sm:$0xff]  ;;  %2473 = vrot.lane.b32.xlu1 %v8278_v55, %s3393_s14  ;;  %v2792_v27 = vrot.slane %v6078_v1, 1  ;;  %v2800_v56 = vrot.slane %v6104_v13, 1  ;;  %v8280_v1 = vld [vmem:[#allocation137_spill] sm:$0xff]  ;;  %v6200_v9 = vld [vmem:[%s7347_s0 + $0xf0] sm:$0xff] }
 0x189   :  { %v1571_v60 = vadd.f32 %v8277_v4, %v1499_v34  ;;  %v8279_v7 = vld [vmem:[#allocation50_spill] sm:$0xff]  ;;  %v2801_v29 = vrot.slane %v6107_v30, 1  ;;  %v2797_v57 = vrot.slane %v6110_v62, 1  ;;  %v1721_v51 = vadd.f32 %v6036_v36, %v1641_v32  ;;  %3215 = vst.msk [vmem:[%s7348_s1 + $0x58] sm:$0xff] %vm932_vm1, %v1808_v2  ;;  %3214 = vst.msk [vmem:[%s7348_s1 + $0x50] sm:$0xff] %vm932_vm1, %v1807_v28  ;;  %v6159_v13 = vpop.permute.xlu1 %1791  ;;  %v6161_v30 = vpop.permute.xlu0 %1789  ;;  %v8286_v36 = vld [vmem:[#allocation28_spill] sm:$0xff] }
 0x18a   :  { %2471 = vrot.lane.b32.xlu0 %v8279_v7, %s3393_s14  ;;  %v1722_v4 = vadd.f32 %v6034_v17, %v1642_v19  ;;  %v2798_v55 = vrot.slane %v6124_v35, 1  ;;  %v6157_v34 = vmul.f32 -0.40400636, %v8280_v1  ;;  %8281 = vst [vmem:[#allocation47_spill] sm:$0xff] %v6159_v13  ;;  %8282 = vst [vmem:[#allocation112_spill] sm:$0xff] %v6161_v30  ;;  %v6164_v32 = vsel %vm339_vm0, %v2794_v61, %v2795_v42  ;;  %v6175_v28 = vld [vmem:[%s7347_s0 + $0xc0] sm:$0xff] }
 0x18b   :  { %v6169_v62 = vld [vmem:[%s7347_s0 + $0xd8] sm:$0x1]  ;;  %8283 = vst [vmem:[#allocation113_spill] sm:$0xff] %v6175_v28  ;;  %v6178_v45 = vmul.f32 -0.40400636, %v6175_v28  ;;  %v8284_v35 = vld [vmem:[#allocation143_spill] sm:$0xff]  ;;  %v1809_v7 = vadd.f32 %v6161_v30, %v1721_v51  ;;  %v6195_v22 = vsel %vm339_vm0, %v2791_v8, %v2792_v27 }
 0x18c   :  { %v2770_v16 = vmul.f32 -0.40400636, %v6169_v62  ;;  %v6183_v42 = vld [vmem:[%s7347_s0 + $0xc8] sm:$0x1]  ;;  %v1644_v38 = vadd.f32 %v8284_v35, %v1572_v33  ;;  %v1810_v2 = vadd.f32 %v6159_v13, %v1722_v4  ;;  %2477 = vrot.lane.b32.xlu1 %v8286_v36, %s3393_s14  ;;  %8288 = vst [vmem:[#allocation19_spill] sm:$0xff] %v6200_v9  ;;  %v6250_v30 = vld [vmem:[%s7347_s0 + $0x100] sm:$0xff]  ;;  %v6264_v31 = vsel %vm339_vm0, %v2797_v57, %v2798_v55 }
 0x18d   :  { %v2768_v61 = vmul.f32 -0.40400636, %v6183_v42  ;;  %v8285_v19 = vld [vmem:[#allocation79_spill] sm:$0xff]  ;;  %v2773_v33 = vmul.f32 -0.40400636, %v6200_v9  ;;  %3216 = vst.msk [vmem:[%s7348_s1 + $0x60] sm:$0xff] %vm932_vm1, %v1809_v7  ;;  %v6242_v7 = vsel %vm339_vm0, %v2800_v56, %v2801_v29 }
 0x18e   :  { %v1643_v58 = vadd.f32 %v8285_v19, %v1571_v60  ;;  %v8287_v17 = vld [vmem:[#allocation7_spill] sm:$0xff]  ;;  %v6206_v60 = vld [vmem:[%s7347_s0 + $0xf8] sm:$0x1]  ;;  %v1724_v27 = vadd.f32 %v6058_v39, %v1644_v38  ;;  %3217 = vst.msk [vmem:[%s7348_s1 + $0x68] sm:$0xff] %vm932_vm1, %v1810_v2  ;;  %v6234_v38 = vld [vmem:[%s7347_s0 + $0x110] sm:$0xff]  ;;  %v6239_v2 = vpop.permute.xlu0 %1793  ;;  %v2806_v49 = vrot.slane %v6157_v34, 1 }
 0x18f   :  { %2475 = vrot.lane.b32.xlu0 %v8287_v17, %s3393_s14  ;;  %v2774_v36 = vmul.f32 -0.40400636, %v6206_v60  ;;  %v6212_v17 = vld [vmem:[%s7347_s0 + $0xe0] sm:$0xff]  ;;  %v6228_v51 = vld [vmem:[%s7347_s0 + $0xe8] sm:$0x1]  ;;  %8289 = vst [vmem:[#allocation90_spill] sm:$0xff] %v6234_v38 }
 0x190   :  { %v2771_v8 = vmul.f32 -0.40400636, %v6212_v17  ;;  %v1723_v4 = vadd.f32 %v6060_v53, %v1643_v58  ;;  %v2772_v35 = vmul.f32 -0.40400636, %v6228_v51  ;;  %v2977_v19 = vmul.f32 -0.40400636, %v6234_v38  ;;  %v6237_v58 = vpop.permute.xlu1 %1795  ;;  %2513 = vrot.lane.b32.xlu1 %v8293_v50, %s3393_s14 }
 0x191   :  { %8290 = vst [vmem:[#allocation30_spill] sm:$0xff] %v6237_v58  ;;  %8291 = vst [vmem:[#allocation98_spill] sm:$0xff] %v6239_v2  ;;  %v3322_v53 = vld [vmem:[%s7347_s0 + $0x118] sm:$0x1]  ;;  %v2975_v13 = vmul.f32 -0.40400636, %v6250_v30  ;;  %v1812_v56 = vadd.f32 %v6237_v58, %v1724_v27 }
 0x192   :  { %v2978_v39 = vmul.f32 -0.40400636, %v3322_v53  ;;  %8292 = vst [vmem:[#allocation42_spill] sm:$0xff] %v6250_v30  ;;  %v2976_v11 = vmul.f32 -0.40400636, %v3324_v26  ;;  %v1811_v29 = vadd.f32 %v6239_v2, %v1723_v4  ;;  %v2807_v23 = vrot.slane %v2770_v16, 1  ;;  %v6277_v55 = vpop.permute.xlu0 %1822 }
 0x193   :  { %v8294_v0 = vld [vmem:[#allocation144_spill] sm:$0xff]  ;;  %v2803_v44 = vrot.slane %v6178_v45, 1  ;;  %v2804_v63 = vrot.slane %v2768_v61, 1  ;;  %v2812_v41 = vrot.slane %v2773_v33, 1  ;;  %3219 = vst.msk [vmem:[%s7348_s1 + $0x78] sm:$0xff] %vm932_vm1, %v1812_v56  ;;  %v2813_v34 = vrot.slane %v2774_v36, 1 }
 0x194   :  { %2511 = vrot.lane.b32.xlu0 %v8294_v0, %s3393_s14  ;;  %3218 = vst.msk [vmem:[%s7348_s1 + $0x70] sm:$0xff] %vm932_vm1, %v1811_v29  ;;  %v2809_v16 = vrot.slane %v2771_v8, 1  ;;  %v2810_v27 = vrot.slane %v2772_v35, 1  ;;  %v3010_v4 = vrot.slane %v2977_v19, 1  ;;  %v6275_v57 = vpop.permute.xlu1 %1824  ;;  %v3011_v45 = vrot.slane %v2978_v39, 1  ;;  %v8295_v0 = vld [vmem:[#allocation80_spill] sm:$0xff] }
 0x195   :  { %v3007_v61 = vrot.slane %v2975_v13, 1  ;;  %v3008_v33 = vrot.slane %v2976_v11, 1  ;;  %v1999_v50 = vmul.f32 -0.02900635, %v8295_v0  ;;  %v6281_v56 = vsel %vm339_vm0, %v2806_v49, %v2807_v23  ;;  %v8296_v8 = vld [vmem:[#allocation145_spill] sm:$0xff]  ;;  %v8297_v35 = vld [vmem:[#allocation146_spill] sm:$0xff] }
 0x196   :  { %v2056_v2 = vmul.f32 -0.050240472, %v8252_v54  ;;  %v2057_v29 = vmul.f32 -0.050240472, %v8258_v15  ;;  %v2144_v36 = vmul.f32 0.016746825, %v6234_v38  ;;  %2517 = vrot.lane.b32.xlu1 %v8296_v8, %s3393_s14  ;;  %v6291_v39 = vsel %vm339_vm0, %v2803_v44, %v2804_v63 }
 0x197   :  { %v2145_v11 = vmul.f32 0.016746825, %v3322_v53  ;;  %v6296_v49 = vld [vmem:[%s7347_s0 + $0x8] sm:$0x1]  ;;  %v2054_v0 = vmul.f32 -0.050240472, %v8259_v14  ;;  %v6301_v54 = vsel %vm339_vm0, %v2812_v41, %v2813_v34  ;;  %v6315_v14 = vpop.permute.xlu0 %1826  ;;  %v6318_v41 = vsel %vm339_vm0, %v2809_v16, %v2810_v27 }
 0x198   :  { %2515 = vrot.lane.b32.xlu0 %v8297_v35, %s3393_s14  ;;  %8298 = vst [vmem:[#allocation124_spill] sm:$0xff] %v6296_v49  ;;  %v1998_v23 = vmul.f32 -0.02900635, %v6296_v49  ;;  %v2055_v15 = vmul.f32 -0.050240472, %v8260_v20  ;;  %v6307_v63 = vld [vmem:[%s7347_s0 + $0x130] sm:$0xff]  ;;  %v6313_v19 = vpop.permute.xlu1 %1828  ;;  %v6321_v20 = vsel %vm339_vm0, %v3010_v4, %v3011_v45  ;;  %v6325_v8 = vsel %vm339_vm0, %v3007_v61, %v3008_v33 }
 0x199   :  { %8299 = vst [vmem:[#allocation76_spill] sm:$0xff] %v6307_v63  ;;  %v2981_v44 = vmul.f32 -0.40400636, %v6307_v63  ;;  %v3327_v53 = vld [vmem:[%s7347_s0 + $0x138] sm:$0x1]  ;;  %8300 = vst [vmem:[#allocation99_spill] sm:$0xff] %v6325_v8 }
 0x19a   :  { %v2982_v13 = vmul.f32 -0.40400636, %v3327_v53  ;;  %v2142_v34 = vmul.f32 0.016746825, %v6250_v30  ;;  %v2143_v35 = vmul.f32 0.016746825, %v3324_v26  ;;  %2521 = vrot.lane.b32.xlu1 %v8301_v43, %s3393_s14 }
 0x19b   :  { %v2018_v49 = vrot.slane %v1999_v50, 1  ;;  %v2089_v38 = vrot.slane %v2056_v2, 1  ;;  %v2090_v58 = vrot.slane %v2057_v29, 1  ;;  %v2177_v16 = vrot.slane %v2144_v36, 1  ;;  %v6334_v26 = vld [vmem:[%s7347_s0 + $0x120] sm:$0xff]  ;;  %v6339_v61 = vpop.permute.xlu0 %1830  ;;  %v8307_v43 = vld [vmem:[#allocation87_spill] sm:$0xff] }
 0x19c   :  { %2519 = vrot.lane.b32.xlu0 %v8302_v47, %s3393_s14  ;;  %v2178_v27 = vrot.slane %v2145_v11, 1  ;;  %v2015_v5 = vrot.slane %v1998_v23, 1  ;;  %v2086_v4 = vrot.slane %v2054_v0, 1  ;;  %v2087_v45 = vrot.slane %v2055_v15, 1  ;;  %8303 = vst [vmem:[#allocation10_spill] sm:$0xff] %v6334_v26  ;;  %v6337_v2 = vpop.permute.xlu1 %1832  ;;  %v8305_v15 = vld [vmem:[#allocation5_spill] sm:$0xff] }
 0x19d   :  { %v3016_v12 = vrot.slane %v2981_v44, 1  ;;  %v3017_v30 = vrot.slane %v2982_v13, 1  ;;  %v2979_v50 = vmul.f32 -0.40400636, %v6334_v26  ;;  %v2174_v33 = vrot.slane %v2142_v34, 1 }
 0x19e   :  { %v2175_v29 = vrot.slane %v2143_v35, 1  ;;  %v3329_v36 = vld [vmem:[%s7347_s0 + $0x128] sm:$0x1]  ;;  %v6347_v23 = vld [vmem:[%s7347_s0 + $0x38] sm:$0x1]  ;;  %v8306_v44 = vrot.slane %v8305_v15, 1  ;;  %2525 = vrot.lane.b32.xlu1 %v8307_v43, %s3393_s14  ;;  %v6363_v8 = vsel %vm339_vm0, %v2089_v38, %v2090_v58  ;;  %v6366_v15 = vsel %vm339_vm0, %v2177_v16, %v2178_v27 }
 0x19f   :  { %v2980_v11 = vmul.f32 -0.40400636, %v3329_v36  ;;  %8304 = vst [vmem:[#allocation115_spill] sm:$0xff] %v6347_v23  ;;  %v2001_v0 = vmul.f32 -0.02900635, %v6347_v23  ;;  %8309 = vst [vmem:[#allocation110_spill] sm:$0xff] %v6363_v8  ;;  %v6386_v16 = vpop.permute.xlu0 %1834 }
 0x1a0   :  { %v6353_v13 = vsel %vm339_vm0, %v8306_v44, %v2018_v49  ;;  %v2060_v34 = vmul.f32 -0.050240472, %v8268_v46  ;;  %v2061_v35 = vmul.f32 -0.050240472, %v8269_v25  ;;  %v2148_v47 = vmul.f32 0.016746825, %v6307_v63  ;;  %2523 = vrot.lane.b32.xlu0 %v8308_v18, %s3393_s14 }
 0x1a1   :  { %8310 = vst [vmem:[#allocation111_spill] sm:$0xff] %v6366_v15  ;;  %v2149_v49 = vmul.f32 0.016746825, %v3327_v53  ;;  %v6371_v46 = vld [vmem:[%s7347_s0 + $0x28] sm:$0x1]  ;;  %v8312_v44 = vld [vmem:[#allocation6_spill] sm:$0xff]  ;;  %v6380_v18 = vsel %vm339_vm0, %v2086_v4, %v2087_v45  ;;  %v6384_v53 = vpop.permute.xlu1 %1836  ;;  %v6389_v27 = vsel %vm339_vm0, %v2174_v33, %v2175_v29 }
 0x1a2   :  { %8311 = vst [vmem:[#allocation94_spill] sm:$0xff] %v6371_v46  ;;  %v2000_v25 = vmul.f32 -0.02900635, %v6371_v46  ;;  %v8313_v23 = vrot.slane %v8312_v44, 1  ;;  %8315 = vst [vmem:[#allocation107_spill] sm:$0xff] %v6380_v18  ;;  %v6392_v46 = vsel %vm339_vm0, %v3016_v12, %v3017_v30  ;;  %v3013_v44 = vrot.slane %v2979_v50, 1  ;;  %2729 = vrot.lane.b32.xlu1 %v5972_v24, %s3393_s14 }
 0x1a3   :  { %v2058_v38 = vmul.f32 -0.050240472, %v8270_v48  ;;  %v2059_v58 = vmul.f32 -0.050240472, %v8271_v37  ;;  %8316 = vst [vmem:[#allocation101_spill] sm:$0xff] %v6389_v27  ;;  %v2095_v63 = vrot.slane %v2060_v34, 1 }
 0x1a4   :  { %v6377_v43 = vsel %vm339_vm0, %v8313_v23, %v2015_v5  ;;  %v3014_v5 = vrot.slane %v2980_v11, 1  ;;  %v2024_v23 = vrot.slane %v2001_v0, 1  ;;  %v2096_v4 = vrot.slane %v2061_v35, 1  ;;  %2727 = vrot.lane.b32.xlu0 %v5975_v10, %s3393_s14  ;;  %v6402_v30 = vld [vmem:[%s7347_s0 + $0x150] sm:$0xff]  ;;  %v6408_v24 = vld [vmem:[%s7347_s0 + $0x158] sm:$0x1]  ;;  %v6413_v11 = vpop.permute.xlu0 %1870 }
 0x1a5   :  { %8314 = vst [vmem:[#allocation106_spill] sm:$0xff] %v6377_v43  ;;  %v2183_v45 = vrot.slane %v2148_v47, 1  ;;  %v2184_v48 = vrot.slane %v2149_v49, 1  ;;  %v2021_v37 = vrot.slane %v2000_v25, 1  ;;  %v2146_v33 = vmul.f32 0.016746825, %v6334_v26  ;;  %v6411_v50 = vpop.permute.xlu1 %1872 }
 0x1a6   :  { %v2147_v29 = vmul.f32 0.016746825, %v3329_v36  ;;  %v2092_v27 = vrot.slane %v2058_v38, 1  ;;  %v2093_v12 = vrot.slane %v2059_v58, 1  ;;  %8317 = vst [vmem:[#allocation103_spill] sm:$0xff] %v6402_v30  ;;  %8318 = vst [vmem:[#allocation20_spill] sm:$0xff] %v6408_v24  ;;  %v6416_v36 = vsel %vm339_vm0, %v3013_v44, %v3014_v5  ;;  %2733 = vrot.lane.b32.xlu1 %v5978_v3, %s3393_s14 }
 0x1a7   :  { %v2985_v47 = vmul.f32 -0.40400636, %v6402_v30  ;;  %v2986_v10 = vmul.f32 -0.40400636, %v6408_v24  ;;  %v6421_v0 = vld [vmem:[%s7347_s0 + $0x140] sm:$0xff]  ;;  %v8322_v58 = vld [vmem:[#allocation59_spill] sm:$0xff] }
 0x1a8   :  { %8319 = vst [vmem:[#allocation114_spill] sm:$0xff] %v6421_v0  ;;  %v2983_v34 = vmul.f32 -0.40400636, %v6421_v0  ;;  %v6427_v35 = vld [vmem:[%s7347_s0 + $0x148] sm:$0x1]  ;;  %v8323_v44 = vrot.slane %v8322_v58, 1  ;;  %2731 = vrot.lane.b32.xlu0 %v5981_v21, %s3393_s14  ;;  %v6456_v58 = vsel %vm339_vm0, %v2183_v45, %v2184_v48  ;;  %v6468_v21 = vpop.permute.xlu0 %1874 }
 0x1a9   :  { %8320 = vst [vmem:[#allocation120_spill] sm:$0xff] %v6427_v35  ;;  %v2984_v49 = vmul.f32 -0.40400636, %v6427_v35  ;;  %v6433_v25 = vld [vmem:[%s7347_s0 + $0x58] sm:$0x1]  ;;  %8326 = vst [vmem:[#allocation13_spill] sm:$0xff] %v6456_v58  ;;  %v6466_v43 = vpop.permute.xlu1 %1876 }
 0x1aa   :  { %8321 = vst [vmem:[#allocation121_spill] sm:$0xff] %v6433_v25  ;;  %v6436_v38 = vmul.f32 -0.02900635, %v6433_v25  ;;  %v6441_v5 = vsel %vm339_vm0, %v8323_v44, %v2024_v23  ;;  %v2064_v26 = vmul.f32 -0.050240472, %v8280_v1  ;;  %v6453_v25 = vsel %vm339_vm0, %v2095_v63, %v2096_v4  ;;  %v8327_v1 = vld [vmem:[#allocation60_spill] sm:$0xff]  ;;  %2737 = vrot.lane.b32.xlu1 %v6026_v52, %s3393_s14 }
 0x1ab   :  { %8324 = vst [vmem:[#allocation55_spill] sm:$0xff] %v6441_v5  ;;  %v2065_v15 = vmul.f32 -0.050240472, %v6169_v62  ;;  %v6446_v18 = vmul.f32 0.016746825, %v6402_v30  ;;  %8325 = vst [vmem:[#allocation84_spill] sm:$0xff] %v6453_v25  ;;  %v6464_v30 = vsel %vm339_vm0, %v2092_v27, %v2093_v12 }
 0x1ac   :  { %v2180_v23 = vrot.slane %v2146_v33, 1  ;;  %v2181_v44 = vrot.slane %v2147_v29, 1  ;;  %v8328_v5 = vrot.slane %v8327_v1, 1  ;;  %8330 = vst [vmem:[#allocation105_spill] sm:$0xff] %v6464_v30  ;;  %v3022_v3 = vrot.slane %v2985_v47, 1  ;;  %2735 = vrot.lane.b32.xlu0 %v6049_v6, %s3393_s14  ;;  %v8335_v1 = vld [vmem:[#allocation61_spill] sm:$0xff] }
 0x1ad   :  { %v3023_v8 = vrot.slane %v2986_v10, 1  ;;  %v3019_v63 = vrot.slane %v2983_v34, 1  ;;  %v3020_v4 = vrot.slane %v2984_v49, 1  ;;  %v2153_v45 = vmul.f32 0.016746825, %v6408_v24 }
 0x1ae   :  { %v6461_v62 = vsel %vm339_vm0, %v8328_v5, %v2021_v37  ;;  %v6474_v48 = vld [vmem:[%s7347_s0 + $0x48] sm:$0x1]  ;;  %v2030_v27 = vrot.slane %v6436_v38, 1  ;;  %v2101_v33 = vrot.slane %v2064_v26, 1  ;;  %v2102_v29 = vrot.slane %v2065_v15, 1  ;;  %v8333_v15 = vld [vmem:[#allocation126_spill] sm:$0xff]  ;;  %v6500_v5 = vpop.permute.xlu1 %1880  ;;  %2741 = vrot.lane.b32.xlu1 %v6071_v59, %s3393_s14 }
 0x1af   :  { %8329 = vst [vmem:[#allocation62_spill] sm:$0xff] %v6461_v62  ;;  %8331 = vst [vmem:[#allocation3_spill] sm:$0xff] %v6474_v48  ;;  %v2002_v37 = vmul.f32 -0.02900635, %v6474_v48  ;;  %v2189_v12 = vrot.slane %v6446_v18, 1  ;;  %v6484_v47 = vsel %vm339_vm0, %v2180_v23, %v2181_v44  ;;  %v6490_v26 = vsel %vm339_vm0, %v3022_v3, %v3023_v8  ;;  %v6502_v23 = vpop.permute.xlu0 %1878 }
 0x1b0   :  { %8332 = vst [vmem:[#allocation123_spill] sm:$0xff] %v6484_v47  ;;  %v2062_v10 = vmul.f32 -0.050240472, %v6175_v28  ;;  %v2063_v34 = vmul.f32 -0.050240472, %v6183_v42  ;;  %v2190_v42 = vrot.slane %v2153_v45, 1  ;;  %v6512_v24 = vsel %vm339_vm0, %v3019_v63, %v3020_v4  ;;  %2739 = vrot.lane.b32.xlu0 %v6101_v40, %s3393_s14 }
 0x1b1   :  { %v2150_v49 = vmul.f32 0.016746825, %v6421_v0  ;;  %v2151_v18 = vmul.f32 0.016746825, %v6427_v35  ;;  %v2989_v38 = vmul.f32 -0.40400636, %v8333_v15  ;;  %v6538_v40 = vsel %vm339_vm0, %v2101_v33, %v2102_v29 }
 0x1b2   :  { %v6497_v52 = vld [vmem:[%s7347_s0 + $0x178] sm:$0x1]  ;;  %v2027_v44 = vrot.slane %v2002_v37, 1  ;;  %v2987_v8 = vmul.f32 -0.40400636, %v8335_v1  ;;  %8337 = vst [vmem:[#allocation117_spill] sm:$0xff] %v6512_v24  ;;  %v6528_v62 = vpop.permute.xlu1 %1884  ;;  %2817 = vrot.lane.b32.xlu1 %v6164_v32, %s3393_s14 }
 0x1b3   :  { %8334 = vst [vmem:[#allocation14_spill] sm:$0xff] %v6497_v52  ;;  %v2990_v6 = vmul.f32 -0.40400636, %v6497_v52  ;;  %v6508_v3 = vld [vmem:[%s7347_s0 + $0x168] sm:$0x1]  ;;  %v2098_v28 = vrot.slane %v2062_v10, 1 }
 0x1b4   :  { %8336 = vst [vmem:[#allocation77_spill] sm:$0xff] %v6508_v3  ;;  %v2988_v35 = vmul.f32 -0.40400636, %v6508_v3  ;;  %v6517_v48 = vld [vmem:[%s7347_s0 + $0x78] sm:$0x1]  ;;  %v2099_v63 = vrot.slane %v2063_v34, 1  ;;  %2815 = vrot.lane.b32.xlu0 %v6195_v22, %s3393_s14 }
 0x1b5   :  { %8338 = vst [vmem:[#allocation122_spill] sm:$0xff] %v6517_v48  ;;  %v2005_v45 = vmul.f32 -0.02900635, %v6517_v48  ;;  %v2068_v37 = vmul.f32 -0.050240472, %v6200_v9  ;;  %v2186_v58 = vrot.slane %v2150_v49, 1  ;;  %v6530_v9 = vpop.permute.xlu0 %1882 }
 0x1b6   :  { %v2069_v0 = vmul.f32 -0.050240472, %v6206_v60  ;;  %v2156_v4 = vmul.f32 0.016746825, %v8333_v15  ;;  %v2157_v47 = vmul.f32 0.016746825, %v6497_v52  ;;  %v6541_v15 = vsel %vm339_vm0, %v2189_v12, %v2190_v42  ;;  %2821 = vrot.lane.b32.xlu1 %v6242_v7, %s3393_s14 }
 0x1b7   :  { %v2187_v30 = vrot.slane %v2151_v18, 1  ;;  %v3028_v25 = vrot.slane %v2989_v38, 1  ;;  %v3029_v48 = vrot.slane %v2990_v6, 1  ;;  %v8339_v60 = vld [vmem:[#allocation65_spill] sm:$0xff]  ;;  %v3025_v10 = vrot.slane %v2987_v8, 1  ;;  %v8341_v6 = vld [vmem:[#allocation66_spill] sm:$0xff] }
 0x1b8   :  { %v8340_v24 = vrot.slane %v8339_v60, 1  ;;  %v3026_v34 = vrot.slane %v2988_v35, 1  ;;  %v2036_v49 = vrot.slane %v2005_v45, 1  ;;  %v2107_v18 = vrot.slane %v2068_v37, 1  ;;  %v6555_v35 = vld [vmem:[%s7347_s0 + $0x68] sm:$0x1]  ;;  %2819 = vrot.lane.b32.xlu0 %v6264_v31, %s3393_s14 }
 0x1b9   :  { %v2108_v38 = vrot.slane %v2069_v0, 1  ;;  %v2195_v33 = vrot.slane %v2156_v4, 1  ;;  %v2196_v29 = vrot.slane %v2157_v47, 1  ;;  %8343 = vst [vmem:[#allocation136_spill] sm:$0xff] %v6555_v35  ;;  %v2004_v0 = vmul.f32 -0.02900635, %v6555_v35  ;;  %v6570_v47 = vpop.permute.xlu0 %1934 }
 0x1ba   :  { %v6535_v59 = vsel %vm339_vm0, %v8340_v24, %v2030_v27  ;;  %v8342_v24 = vrot.slane %v8341_v6, 1  ;;  %v6559_v12 = vsel %vm339_vm0, %v2098_v28, %v2099_v63  ;;  %v6562_v32 = vsel %vm339_vm0, %v2186_v58, %v2187_v30  ;;  %v8344_v30 = vld [vmem:[#allocation69_spill] sm:$0xff]  ;;  %v6589_v63 = vld [vmem:[%s7347_s0 + $0x190] sm:$0xff]  ;;  %2825 = vrot.lane.b32.xlu1 %v6281_v56, %s3393_s14 }
 0x1bb   :  { %v6565_v22 = vsel %vm339_vm0, %v3028_v25, %v3029_v48  ;;  %v2066_v42 = vmul.f32 -0.050240472, %v6212_v17  ;;  %v6573_v8 = vsel %vm339_vm0, %v3025_v10, %v3026_v34  ;;  %v2067_v45 = vmul.f32 -0.050240472, %v6228_v51  ;;  %8346 = vst [vmem:[#allocation100_spill] sm:$0xff] %v6589_v63  ;;  %v6608_v34 = vld [vmem:[%s7347_s0 + $0x180] sm:$0xff] }
 0x1bc   :  { %v6550_v27 = vsel %vm339_vm0, %v8342_v24, %v2027_v44  ;;  %v6568_v44 = vpop.permute.xlu1 %1936  ;;  %v2154_v28 = vmul.f32 0.016746825, %v8335_v1  ;;  %v2155_v37 = vmul.f32 0.016746825, %v6508_v3  ;;  %v8345_v58 = vrot.slane %v8344_v30, 1  ;;  %8348 = vst [vmem:[#allocation102_spill] sm:$0xff] %v6608_v34  ;;  %2823 = vrot.lane.b32.xlu0 %v6291_v39, %s3393_s14 }
 0x1bd   :  { %v6584_v48 = vsel %vm339_vm0, %v2107_v18, %v2108_v38  ;;  %v3065_v4 = vmul.f32 0.23325318, %v6589_v63  ;;  %v6595_v51 = vld [vmem:[%s7347_s0 + $0x198] sm:$0x1]  ;;  %v6603_v60 = vsel %vm339_vm0, %v2195_v33, %v2196_v29  ;;  %v2033_v10 = vrot.slane %v2004_v0, 1  ;;  %v8350_v38 = vld [vmem:[#allocation78_spill] sm:$0xff] }
 0x1be   :  { %v6581_v25 = vsel %vm339_vm0, %v8345_v58, %v2036_v49  ;;  %8347 = vst [vmem:[#allocation131_spill] sm:$0xff] %v6595_v51  ;;  %v3066_v1 = vmul.f32 0.23325318, %v6595_v51  ;;  %v3063_v49 = vmul.f32 0.23325318, %v6608_v34  ;;  %v1847_v31 = vadd.f32 %v6275_v57, %v8350_v38  ;;  %v8351_v6 = vld [vmem:[#allocation29_spill] sm:$0xff]  ;;  %v6635_v57 = vpop.permute.xlu0 %1938  ;;  %2829 = vrot.lane.b32.xlu1 %v6301_v54, %s3393_s14 }
 0x1bf   :  { %v6614_v18 = vld [vmem:[%s7347_s0 + $0x188] sm:$0x1]  ;;  %v1846_v24 = vadd.f32 %v6277_v55, %v8351_v6  ;;  %v6624_v33 = vld [vmem:[%s7347_s0 + $0x1b0] sm:$0xff]  ;;  %v6630_v0 = vld [vmem:[%s7347_s0 + $0x1b8] sm:$0x1]  ;;  %v2104_v38 = vrot.slane %v2066_v42, 1 }
 0x1c0   :  { %8349 = vst [vmem:[#allocation68_spill] sm:$0xff] %v6614_v18  ;;  %v3064_v7 = vmul.f32 0.23325318, %v6614_v18  ;;  %8352 = vst [vmem:[#allocation129_spill] sm:$0xff] %v6624_v33  ;;  %v3069_v29 = vmul.f32 0.23325318, %v6624_v33  ;;  %v6633_v58 = vpop.permute.xlu1 %1940  ;;  %v1895_v52 = vadd.f32 %v6411_v50, %v1847_v31  ;;  %2827 = vrot.lane.b32.xlu0 %v6318_v41, %s3393_s14 }
 0x1c1   :  { %8353 = vst [vmem:[#allocation83_spill] sm:$0xff] %v6630_v0  ;;  %v3070_v30 = vmul.f32 0.23325318, %v6630_v0  ;;  %v2105_v55 = vrot.slane %v2067_v45, 1  ;;  %v2192_v6 = vrot.slane %v2154_v28, 1  ;;  %v2193_v3 = vrot.slane %v2155_v37, 1 }
 0x1c2   :  { %v1894_v18 = vadd.f32 %v6413_v11, %v1846_v24  ;;  %v3098_v51 = vrot.slane %v3065_v4, 1  ;;  %v3099_v35 = vrot.slane %v3066_v1, 1  ;;  %v3095_v0 = vrot.slane %v3063_v49, 1  ;;  %v6646_v42 = vld [vmem:[%s7347_s0 + $0x1a0] sm:$0xff]  ;;  %v6652_v50 = vld [vmem:[%s7347_s0 + $0x1a8] sm:$0x1]  ;;  %3033 = vrot.lane.b32.xlu1 %v6321_v20, %s3393_s14 }
 0x1c3   :  { %v3096_v33 = vrot.slane %v3064_v7, 1  ;;  %8354 = vst [vmem:[#allocation140_spill] sm:$0xff] %v6646_v42  ;;  %v3067_v45 = vmul.f32 0.23325318, %v6646_v42  ;;  %8355 = vst [vmem:[#allocation141_spill] sm:$0xff] %v6652_v50  ;;  %v8356_v56 = vld [vmem:[#allocation53_spill] sm:$0xff]  ;;  %v6661_v7 = vpop.permute.xlu0 %1942  ;;  %v6669_v34 = vsel %vm339_vm0, %v2104_v38, %v2105_v55 }
 0x1c4   :  { %v3068_v11 = vmul.f32 0.23325318, %v6652_v50  ;;  %v1849_v28 = vadd.f32 %v6313_v19, %v8356_v56  ;;  %v8357_v39 = vld [vmem:[#allocation54_spill] sm:$0xff]  ;;  %v3104_v4 = vrot.slane %v3069_v29, 1  ;;  %v3105_v1 = vrot.slane %v3070_v30, 1  ;;  %v6659_v49 = vpop.permute.xlu1 %1944  ;;  %v6674_v19 = vld [vmem:[%s7347_s0 + $0x1d0] sm:$0xff] }
 0x1c5   :  { %v1848_v37 = vadd.f32 %v6315_v14, %v8357_v39  ;;  %v8358_v31 = vld [vmem:[#allocation70_spill] sm:$0xff]  ;;  %8360 = vst [vmem:[#allocation132_spill] sm:$0xff] %v6674_v19  ;;  %v3073_v14 = vmul.f32 0.23325318, %v6674_v19  ;;  %v6680_v29 = vld [vmem:[%s7347_s0 + $0x1d8] sm:$0x1]  ;;  %v6695_v50 = vsel %vm339_vm0, %v3098_v51, %v3099_v35 }
 0x1c6   :  { %v8359_v24 = vrot.slane %v8358_v31, 1  ;;  %8361 = vst [vmem:[#allocation104_spill] sm:$0xff] %v6680_v29  ;;  %v3074_v30 = vmul.f32 0.23325318, %v6680_v29  ;;  %v8362_v56 = vld [vmem:[#allocation89_spill] sm:$0xff]  ;;  %v1897_v38 = vadd.f32 %v6466_v43, %v1849_v28  ;;  %v6701_v43 = vsel %vm339_vm0, %v3104_v4, %v3105_v1  ;;  %v6706_v54 = vld [vmem:[%s7347_s0 + $0x1c0] sm:$0xff]  ;;  %3037 = vrot.lane.b32.xlu1 %v6392_v46, %s3393_s14 }
 0x1c7   :  { %v8363_v39 = vld [vmem:[#allocation9_spill] sm:$0xff]  ;;  %v1896_v55 = vadd.f32 %v6468_v21, %v1848_v37  ;;  %v3102_v21 = vrot.slane %v3068_v11, 1  ;;  %8364 = vst [vmem:[#allocation133_spill] sm:$0xff] %v6706_v54  ;;  %v3071_v41 = vmul.f32 0.23325318, %v6706_v54  ;;  %v8366_v51 = vld [vmem:[#allocation43_spill] sm:$0xff]  ;;  %v6721_v11 = vpop.permute.xlu0 %1946 }
 0x1c8   :  { %v6666_v42 = vsel %vm339_vm0, %v8359_v24, %v2033_v10  ;;  %v1903_v10 = vadd.f32 %v1895_v52, %v8362_v56  ;;  %v1902_v31 = vadd.f32 %v1894_v18, %v8363_v39  ;;  %v6692_v24 = vsel %vm339_vm0, %v2192_v6, %v2193_v3  ;;  %v6712_v3 = vld [vmem:[%s7347_s0 + $0x1c8] sm:$0x1]  ;;  %v8368_v4 = vld [vmem:[#allocation85_spill] sm:$0xff]  ;;  %v8372_v63 = vld [vmem:[#allocation40_spill] sm:$0xff] }
 0x1c9   :  { %v6698_v52 = vsel %vm339_vm0, %v3095_v0, %v3096_v33  ;;  %v3101_v18 = vrot.slane %v3067_v45, 1  ;;  %8365 = vst [vmem:[#allocation108_spill] sm:$0xff] %v6712_v3  ;;  %v3072_v35 = vmul.f32 0.23325318, %v6712_v3  ;;  %v1851_v33 = vadd.f32 %v6337_v2, %v8366_v51  ;;  %v8367_v0 = vld [vmem:[#allocation44_spill] sm:$0xff]  ;;  %v6719_v45 = vpop.permute.xlu1 %1948  ;;  %v8369_v56 = vld [vmem:[#allocation23_spill] sm:$0xff] }
 0x1ca   :  { %v1850_v6 = vadd.f32 %v6339_v61, %v8367_v0  ;;  %v3110_v28 = vrot.slane %v3073_v14, 1  ;;  %v3111_v37 = vrot.slane %v3074_v30, 1  ;;  %v1905_v1 = vadd.f32 %v1897_v38, %v8368_v4  ;;  %v8370_v29 = vld [vmem:[#allocation39_spill] sm:$0xff]  ;;  %v8371_v19 = vld [vmem:[#allocation57_spill] sm:$0xff]  ;;  %v8380_v46 = vld [vmem:[#allocation48_spill] sm:$0xff]  ;;  %3041 = vrot.lane.b32.xlu1 %v6490_v26, %s3393_s14 }
 0x1cb   :  { %v1904_v39 = vadd.f32 %v1896_v55, %v8369_v56  ;;  %v1911_v54 = vadd.f32 %v1903_v10, %v8370_v29  ;;  %v1910_v3 = vadd.f32 %v1902_v31, %v8371_v19  ;;  %v1853_v2 = vadd.f32 %v6384_v53, %v8372_v63  ;;  %v8373_v14 = vld [vmem:[#allocation99_spill] sm:$0xff]  ;;  %v8374_v10 = vld [vmem:[#allocation73_spill] sm:$0xff]  ;;  %v1967_v63 = vpop.permute.xlu0 %1966 }
 0x1cc   :  { %v1899_v51 = vadd.f32 %v6500_v5, %v1851_v33  ;;  %v1898_v61 = vadd.f32 %v6502_v23, %v1850_v6  ;;  %3031 = vrot.lane.b32.xlu0 %v8373_v14, %s3393_s14  ;;  %v6738_v29 = vsel %vm339_vm0, %v3101_v18, %v3102_v21  ;;  %v3107_v19 = vrot.slane %v3071_v41, 1  ;;  %v8375_v55 = vld [vmem:[#allocation25_spill] sm:$0xff]  ;;  %v8377_v18 = vld [vmem:[#allocation32_spill] sm:$0xff]  ;;  %v8383_v14 = vld [vmem:[#allocation107_spill] sm:$0xff] }
 0x1cd   :  { %v1959_v30 = vadd.f32 %v6568_v44, %v1911_v54  ;;  %v1958_v38 = vadd.f32 %v6570_v47, %v1910_v3  ;;  %v1852_v53 = vadd.f32 %v6386_v16, %v8374_v10  ;;  %v1901_v5 = vadd.f32 %v6528_v62, %v1853_v2  ;;  %v1969_v23 = vpop.permute.xlu1 %1968  ;;  %v8376_v44 = vld [vmem:[#allocation46_spill] sm:$0xff]  ;;  %v8378_v41 = vld [vmem:[#allocation24_spill] sm:$0xff]  ;;  %v6774_v2 = vld [vmem:[%s7347_s0 + $0x1f8] sm:$0x1] }
 0x1ce   :  { %v6744_v20 = vsel %vm339_vm0, %v3110_v28, %v3111_v37  ;;  %v3108_v31 = vrot.slane %v3072_v35, 1  ;;  %v1913_v33 = vadd.f32 %v1905_v1, %v8375_v55  ;;  %v1912_v54 = vadd.f32 %v1904_v39, %v8376_v44  ;;  %v6758_v62 = vld [vmem:[%s7347_s0 + $0x1f0] sm:$0xff]  ;;  %v8379_v37 = vld [vmem:[#allocation106_spill] sm:$0xff]  ;;  %8381 = vst [vmem:[#allocation92_spill] sm:$0xff] %v6774_v2  ;;  %v8387_v55 = vld [vmem:[#allocation117_spill] sm:$0xff]  ;;  %3045 = vrot.lane.b32.xlu1 %v6565_v22, %s3393_s14 }
 0x1cf   :  { %v1991_v47 = vadd.f32 %v1969_v23, %v1959_v30  ;;  %v1990_v3 = vadd.f32 %v1967_v63, %v1958_v38  ;;  %v1907_v21 = vadd.f32 %v1899_v51, %v8377_v18  ;;  %v1906_v0 = vadd.f32 %v1898_v61, %v8378_v41  ;;  %v8382_v51 = vld [vmem:[#allocation110_spill] sm:$0xff]  ;;  %v8384_v10 = vld [vmem:[#allocation64_spill] sm:$0xff] }
 0x1d0   :  { %v1900_v16 = vadd.f32 %v6530_v9, %v1852_v53  ;;  %3035 = vrot.lane.b32.xlu0 %v6416_v36, %s3393_s14  ;;  %v6761_v35 = vmul.f32 0.23325318, %v6758_v62  ;;  %v1961_v6 = vadd.f32 %v6633_v58, %v1913_v33  ;;  %v1960_v28 = vadd.f32 %v6635_v57, %v1912_v54  ;;  %v1971_v36 = vpop.permute.xlu0 %1970  ;;  %v8386_v63 = vld [vmem:[#allocation36_spill] sm:$0xff]  ;;  %v6799_v33 = vld [vmem:[%s7347_s0 + $0x1e8] sm:$0x1] }
 0x1d1   :  { %v2047_v9 = vadd.f32 %v6353_v13, %v1991_v47  ;;  %v2046_v4 = vadd.f32 %v8379_v37, %v1990_v3  ;;  %v1909_v1 = vadd.f32 %v1901_v5, %v8380_v46  ;;  %v1973_v56 = vpop.permute.xlu1 %1972  ;;  %v6769_v39 = vsel %vm339_vm0, %v3107_v19, %v3108_v31  ;;  %v6782_v13 = vld [vmem:[%s7347_s0 + $0x1e0] sm:$0xff]  ;;  %v8385_v5 = vld [vmem:[#allocation75_spill] sm:$0xff]  ;;  %8388 = vst [vmem:[#allocation49_spill] sm:$0xff] %v6799_v33  ;;  %v8390_v3 = vld [vmem:[#allocation128_spill] sm:$0xff] }
 0x1d2   :  { %v6777_v58 = vmul.f32 0.23325318, %v6774_v2  ;;  %v6785_v57 = vmul.f32 0.23325318, %v6782_v13  ;;  %v1993_v38 = vadd.f32 %v1973_v56, %v1961_v6  ;;  %v1992_v19 = vadd.f32 %v1971_v36, %v1960_v28  ;;  %v8389_v54 = vld [vmem:[#allocation127_spill] sm:$0xff]  ;;  %v8393_v28 = vld [vmem:[#allocation4_spill] sm:$0xff]  ;;  %3121 = vrot.lane.b32.xlu1 %v6695_v50, %s3393_s14 }
 0x1d3   :  { %v2119_v61 = vadd.f32 %v8382_v51, %v2047_v9  ;;  %v2118_v30 = vadd.f32 %v8383_v14, %v2046_v4  ;;  %v1908_v53 = vadd.f32 %v1900_v16, %v8384_v10  ;;  %v1915_v23 = vadd.f32 %v1907_v21, %v8385_v5  ;;  %v8391_v21 = vld [vmem:[#allocation55_spill] sm:$0xff]  ;;  %v8394_v56 = vld [vmem:[#allocation37_spill] sm:$0xff]  ;;  %v8396_v14 = vld [vmem:[#allocation84_spill] sm:$0xff] }
 0x1d4   :  { %v1914_v31 = vadd.f32 %v1906_v0, %v8386_v63  ;;  %3039 = vrot.lane.b32.xlu0 %v8387_v55, %s3393_s14  ;;  %v6802_v44 = vmul.f32 0.23325318, %v6799_v33  ;;  %v2049_v41 = vadd.f32 %v8391_v21, %v1993_v38  ;;  %v8392_v0 = vld [vmem:[#allocation62_spill] sm:$0xff]  ;;  %v1917_v9 = vadd.f32 %v1909_v1, %v8393_v28  ;;  %v1975_v4 = vpop.permute.xlu0 %1974  ;;  %v8395_v51 = vld [vmem:[#allocation17_spill] sm:$0xff]  ;;  %v8399_v1 = vld [vmem:[#allocation111_spill] sm:$0xff] }
 0x1d5   :  { %v2127_v47 = vadd.f32 %v2119_v61, %v8389_v54  ;;  %v2126_v18 = vadd.f32 %v2118_v30, %v8390_v3  ;;  %v2048_v16 = vadd.f32 %v8392_v0, %v1992_v19  ;;  %v1963_v26 = vadd.f32 %v6659_v49, %v1915_v23  ;;  %v1977_v37 = vpop.permute.xlu1 %1976  ;;  %v8397_v10 = vld [vmem:[#allocation105_spill] sm:$0xff]  ;;  %v8402_v3 = vld [vmem:[#allocation67_spill] sm:$0xff]  ;;  %v8468_v2 = vld [vmem:[#allocation136_spill] sm:$0xff] }
 0x1d6   :  { %v1962_v6 = vadd.f32 %v6661_v7, %v1914_v31  ;;  %v3116_v46 = vrot.slane %v6761_v35, 1  ;;  %v2121_v30 = vadd.f32 %v8396_v14, %v2049_v41  ;;  %v8398_v5 = vld [vmem:[#allocation93_spill] sm:$0xff]  ;;  %v3117_v7 = vrot.slane %v6777_v58, 1  ;;  %3125 = vrot.lane.b32.xlu1 %v6701_v43, %s3393_s14  ;;  %v8431_v58 = vld [vmem:[#allocation47_spill] sm:$0xff] }
 0x1d7   :  { %v2135_v36 = vadd.f32 %v2127_v47, %v8394_v56  ;;  %v2134_v61 = vadd.f32 %v2126_v18, %v8395_v51  ;;  %v2120_v38 = vadd.f32 %v8397_v10, %v2048_v16  ;;  %v1916_v19 = vadd.f32 %v1908_v53, %v8398_v5  ;;  %v8400_v31 = vld [vmem:[#allocation101_spill] sm:$0xff]  ;;  %v8403_v16 = vld [vmem:[#allocation91_spill] sm:$0xff]  ;;  %v8406_v56 = vld [vmem:[#allocation26_spill] sm:$0xff] }
 0x1d8   :  { %v1995_v63 = vadd.f32 %v1977_v37, %v1963_v26  ;;  %v1994_v49 = vadd.f32 %v1975_v4, %v1962_v6  ;;  %3043 = vrot.lane.b32.xlu0 %v6573_v8, %s3393_s14  ;;  %v8401_v54 = vld [vmem:[#allocation33_spill] sm:$0xff]  ;;  %v1965_v53 = vadd.f32 %v6719_v45, %v1917_v9  ;;  %v1979_v8 = vpop.permute.xlu0 %1978  ;;  %v8404_v6 = vld [vmem:[#allocation18_spill] sm:$0xff] }
 0x1d9   :  { %v2207_v23 = vadd.f32 %v8399_v1, %v2135_v36  ;;  %v2206_v55 = vadd.f32 %v8400_v31, %v2134_v61  ;;  %v2129_v47 = vadd.f32 %v2121_v30, %v8401_v54  ;;  %v2128_v18 = vadd.f32 %v2120_v38, %v8402_v3  ;;  %v1981_v0 = vpop.permute.xlu1 %1980  ;;  %v8405_v37 = vld [vmem:[#allocation82_spill] sm:$0xff]  ;;  %v8408_v61 = vld [vmem:[#allocation56_spill] sm:$0xff]  ;;  %v8409_v30 = vld [vmem:[#allocation13_spill] sm:$0xff] }
 0x1da   :  { %v1964_v21 = vadd.f32 %v6721_v11, %v1916_v19  ;;  %v2051_v41 = vadd.f32 %v6535_v59, %v1995_v63  ;;  %v2050_v22 = vadd.f32 %v6550_v27, %v1994_v49  ;;  %v1997_v9 = vadd.f32 %v1981_v0, %v1965_v53  ;;  %v8407_v59 = vld [vmem:[#allocation86_spill] sm:$0xff]  ;;  %v8410_v38 = vld [vmem:[#allocation123_spill] sm:$0xff]  ;;  %v8414_v54 = vld [vmem:[#allocation109_spill] sm:$0xff]  ;;  %3129 = vrot.lane.b32.xlu1 %v6744_v20, %s3393_s14 }
 0x1db   :  { %v2263_v26 = vadd.f32 %v8403_v16, %v2207_v23  ;;  %v2262_v28 = vadd.f32 %v8404_v6, %v2206_v55  ;;  %v2137_v4 = vadd.f32 %v2129_v47, %v8405_v37  ;;  %v2136_v36 = vadd.f32 %v2128_v18, %v8406_v56  ;;  %v8411_v19 = vld [vmem:[#allocation134_spill] sm:$0xff]  ;;  %v8412_v63 = vld [vmem:[#allocation135_spill] sm:$0xff]  ;;  %v8416_v53 = vld [vmem:[#allocation52_spill] sm:$0xff] }
 0x1dc   :  { %v2123_v51 = vadd.f32 %v6538_v40, %v2051_v41  ;;  %v2122_v45 = vadd.f32 %v6559_v12, %v2050_v22  ;;  %v1996_v11 = vadd.f32 %v1979_v8, %v1964_v21  ;;  %3119 = vrot.lane.b32.xlu0 %v6698_v52, %s3393_s14  ;;  %v2053_v49 = vadd.f32 %v6581_v25, %v1997_v9  ;;  %v6850_v23 = vpop.permute.xlu0 %2335  ;;  %v8413_v31 = vld [vmem:[#allocation31_spill] sm:$0xff]  ;;  %v8417_v21 = vld [vmem:[#allocation8_spill] sm:$0xff]  ;;  %v8419_v8 = vld [vmem:[#allocation2_spill] sm:$0xff] }
 0x1dd   :  { %v2271_v27 = vadd.f32 %v2263_v26, %v8407_v59  ;;  %v2270_v14 = vadd.f32 %v2262_v28, %v8408_v61  ;;  %v2209_v10 = vadd.f32 %v8409_v30, %v2137_v4  ;;  %v2208_v5 = vadd.f32 %v8410_v38, %v2136_v36  ;;  %v6848_v50 = vpop.permute.xlu1 %2337  ;;  %v8415_v3 = vld [vmem:[#allocation51_spill] sm:$0xff]  ;;  %v8420_v26 = vld [vmem:[#allocation12_spill] sm:$0xff]  ;;  %v8421_v37 = vld [vmem:[#allocation138_spill] sm:$0xff] }
 0x1de   :  { %v2131_v40 = vadd.f32 %v2123_v51, %v8411_v19  ;;  %v2130_v12 = vadd.f32 %v2122_v45, %v8412_v63  ;;  %v2052_v1 = vadd.f32 %v6666_v42, %v1996_v11  ;;  %v8418_v22 = vld [vmem:[#allocation11_spill] sm:$0xff]  ;;  %v2125_v25 = vadd.f32 %v6584_v48, %v2053_v49  ;;  %v8423_v9 = vld [vmem:[#allocation58_spill] sm:$0xff]  ;;  %v8424_v59 = vld [vmem:[#allocation45_spill] sm:$0xff] }
 0x1df   :  { %v2279_v55 = vadd.f32 %v2271_v27, %v8413_v31  ;;  %v2278_v47 = vadd.f32 %v2270_v14, %v8414_v54  ;;  %v2265_v18 = vadd.f32 %v8415_v3, %v2209_v10  ;;  %v2264_v52 = vadd.f32 %v8416_v53, %v2208_v5  ;;  %v8422_v56 = vld [vmem:[#allocation139_spill] sm:$0xff]  ;;  %v8425_v27 = vld [vmem:[#allocation96_spill] sm:$0xff]  ;;  %v8426_v14 = vld [vmem:[#allocation97_spill] sm:$0xff] }
 0x1e0   :  { %v2139_v41 = vadd.f32 %v2131_v40, %v8417_v21  ;;  %v2138_v0 = vadd.f32 %v2130_v12, %v8418_v22  ;;  %v2124_v42 = vadd.f32 %v6669_v34, %v2052_v1  ;;  %3123 = vrot.lane.b32.xlu0 %v6738_v29, %s3393_s14  ;;  %v3113_v48 = vrot.slane %v6785_v57, 1  ;;  %v6882_v45 = vpop.permute.xlu0 %2339  ;;  %v3358_v57 = vld [vmem:[%s7347_s0 + $0x10] sm:$0xff]  ;;  %v8427_v10 = vld [vmem:[#allocation35_spill] sm:$0xff]  ;;  %v3360_v40 = vld [vmem:[%s7347_s0] sm:$0xff] }
 0x1e1   :  { %3221 = vst.msk [vmem:[%s7348_s1 + $0x88] sm:$0xff] %vm932_vm1, %v2279_v55  ;;  %3220 = vst.msk [vmem:[%s7348_s1 + $0x80] sm:$0xff] %vm932_vm1, %v2278_v47  ;;  %v2273_v16 = vadd.f32 %v2265_v18, %v8419_v8  ;;  %v2272_v6 = vadd.f32 %v2264_v52, %v8420_v26  ;;  %v3114_v34 = vrot.slane %v6802_v44, 1  ;;  %v2133_v4 = vadd.f32 %v2125_v25, %v8421_v37  ;;  %v6880_v51 = vpop.permute.xlu1 %2341  ;;  %v8428_v5 = vld [vmem:[#allocation72_spill] sm:$0xff]  ;;  %v6915_v12 = vld [vmem:[%s7347_s0 + $0x80] sm:$0xff] }
 0x1e2   :  { %v2211_v43 = vadd.f32 %v6541_v15, %v2139_v41  ;;  %v2210_v28 = vadd.f32 %v6562_v32, %v2138_v0  ;;  %v2132_v36 = vadd.f32 %v2124_v42, %v8422_v56  ;;  %v2296_v44 = vmul.f32 0.016746825, %v3358_v57  ;;  %v6892_v15 = vld [vmem:[%s7347_s0 + $0x90] sm:$0xff]  ;;  %v8429_v31 = vld [vmem:[#allocation118_spill] sm:$0xff]  ;;  %v8430_v54 = vld [vmem:[#allocation41_spill] sm:$0xff] }
 0x1e3   :  { %v2281_v11 = vadd.f32 %v2273_v16, %v8423_v9  ;;  %v2280_v29 = vadd.f32 %v2272_v6, %v8424_v59  ;;  %v2304_v32 = vmul.f32 0.02900635, %v6892_v15  ;;  %v2141_v38 = vadd.f32 %v2133_v4, %v8427_v10  ;;  %v8433_v22 = vld [vmem:[#allocation38_spill] sm:$0xff]  ;;  %v8434_v25 = vld [vmem:[#allocation95_spill] sm:$0xff] }
 0x1e4   :  { %v2267_v61 = vadd.f32 %v8425_v27, %v2211_v43  ;;  %v2266_v30 = vadd.f32 %v8426_v14, %v2210_v28  ;;  %v2140_v19 = vadd.f32 %v2132_v36, %v8428_v5  ;;  %v2295_v63 = vmul.f32 0.016746825, %v3360_v40  ;;  %3127 = vrot.lane.b32.xlu0 %v6769_v39, %s3393_s14  ;;  %v2344_v52 = vpop.permute.xlu0 %2343  ;;  %v3362_v39 = vld [vmem:[%s7347_s0 + $0x30] sm:$0xff]  ;;  %v3364_v16 = vld [vmem:[%s7347_s0 + $0x20] sm:$0xff]  ;;  %v8439_v14 = vld [vmem:[#allocation113_spill] sm:$0xff] }
 0x1e5   :  { %3223 = vst.msk [vmem:[%s7348_s1 + $0x98] sm:$0xff] %vm932_vm1, %v2281_v11  ;;  %3222 = vst.msk [vmem:[%s7348_s1 + $0x90] sm:$0xff] %vm932_vm1, %v2280_v29  ;;  %v2303_v20 = vmul.f32 0.02900635, %v6915_v12  ;;  %v3118_v49 = vsel %vm339_vm0, %v3116_v46, %v3117_v7  ;;  %v3115_v1 = vsel %vm339_vm0, %v3113_v48, %v3114_v34  ;;  %v2213_v3 = vadd.f32 %v6603_v60, %v2141_v38  ;;  %v2346_v53 = vpop.permute.xlu1 %2345  ;;  %v8432_v7 = vld [vmem:[#allocation112_spill] sm:$0xff]  ;;  %v6950_v6 = vld [vmem:[%s7347_s0 + $0xa0] sm:$0xff] }
 0x1e6   :  { %v2275_v55 = vadd.f32 %v2267_v61, %v8429_v31  ;;  %v2274_v47 = vadd.f32 %v2266_v30, %v8430_v54  ;;  %v2212_v18 = vadd.f32 %v6692_v24, %v2140_v19  ;;  %v2312_v21 = vadd.f32 %v2304_v32, %v2296_v44  ;;  %3133 = vrot.lane.b32.xlu1 %v3118_v49, %s3393_s14  ;;  %v6941_v24 = vld [vmem:[%s7347_s0 + $0xb0] sm:$0xff]  ;;  %v8435_v34 = vld [vmem:[#allocation21_spill] sm:$0xff]  ;;  %v8436_v28 = vld [vmem:[#allocation22_spill] sm:$0xff] }
 0x1e7   :  { %v2298_v35 = vmul.f32 0.016746825, %v3362_v39  ;;  %v2269_v0 = vadd.f32 %v8433_v22, %v2213_v3  ;;  %v2311_v60 = vadd.f32 %v2303_v20, %v2295_v63  ;;  %v2306_v8 = vmul.f32 0.02900635, %v6941_v24  ;;  %v3366_v36 = vld [vmem:[%s7347_s0 + $0x50] sm:$0xff]  ;;  %v8437_v29 = vld [vmem:[#allocation30_spill] sm:$0xff] }
 0x1e8   :  { %v2283_v46 = vadd.f32 %v2275_v55, %v8431_v58  ;;  %v2282_v41 = vadd.f32 %v2274_v47, %v8432_v7  ;;  %v2268_v42 = vadd.f32 %v8434_v25, %v2212_v18  ;;  %v2297_v26 = vmul.f32 0.016746825, %v3364_v16  ;;  %3131 = vrot.lane.b32.xlu0 %v3115_v1, %s3393_s14  ;;  %v2348_v56 = vpop.permute.xlu0 %2347  ;;  %v6970_v11 = vld [vmem:[%s7347_s0 + $0xd0] sm:$0xff]  ;;  %v8438_v44 = vld [vmem:[#allocation98_spill] sm:$0xff]  ;;  %v8440_v55 = vld [vmem:[#allocation19_spill] sm:$0xff] }
 0x1e9   :  { %v2305_v48 = vmul.f32 0.02900635, %v6950_v6  ;;  %v2277_v43 = vadd.f32 %v2269_v0, %v8435_v34  ;;  %v2350_v4 = vpop.permute.xlu1 %2349  ;;  %v2300_v9 = vmul.f32 0.016746825, %v3366_v36  ;;  %v2308_v59 = vmul.f32 0.02900635, %v6970_v11 }
 0x1ea   :  { %3225 = vst.msk [vmem:[%s7348_s1 + $0xa8] sm:$0xff] %vm932_vm1, %v2283_v46  ;;  %3224 = vst.msk [vmem:[%s7348_s1 + $0xa0] sm:$0xff] %vm932_vm1, %v2282_v41  ;;  %v2276_v37 = vadd.f32 %v2268_v42, %v8436_v28  ;;  %v3368_v27 = vld [vmem:[%s7347_s0 + $0x40] sm:$0xff]  ;;  %v2307_v30 = vmul.f32 0.02900635, %v8439_v14  ;;  %v2360_v10 = vadd.f32 %v6848_v50, %v2312_v21  ;;  %v2359_v38 = vadd.f32 %v6850_v23, %v2311_v60  ;;  %v3369_v1 = vld [vmem:[%s7347_s0 + $0x70] sm:$0xff] }
 0x1eb   :  { %v2285_v57 = vadd.f32 %v2277_v43, %v8437_v29  ;;  %v2299_v61 = vmul.f32 0.016746825, %v3368_v27  ;;  %v2314_v5 = vadd.f32 %v2306_v8, %v2298_v35  ;;  %v2313_v19 = vadd.f32 %v2305_v48, %v2297_v26  ;;  %v3370_v18 = vld [vmem:[%s7347_s0 + $0x60] sm:$0xff]  ;;  %v3371_v27 = vld [vmem:[%s7347_s0 + $0x18] sm:$0x1]  ;;  %v7027_v14 = vld [vmem:[%s7347_s0 + $0x170] sm:$0xff] }
 0x1ec   :  { %v2284_v32 = vadd.f32 %v2276_v37, %v8438_v44  ;;  %v2384_v63 = vpop.permute.xlu0 %2383  ;;  %v2316_v50 = vadd.f32 %v2308_v59, %v2300_v9  ;;  %v2302_v31 = vmul.f32 0.016746825, %v3369_v1  ;;  %v2310_v54 = vmul.f32 0.02900635, %v8440_v55  ;;  %v8442_v37 = vld [vmem:[#allocation42_spill] sm:$0xff]  ;;  %v8443_v9 = vld [vmem:[#allocation76_spill] sm:$0xff] }
 0x1ed   :  { %3227 = vst.msk [vmem:[%s7348_s1 + $0xb8] sm:$0xff] %vm932_vm1, %v2285_v57  ;;  %v2386_v40 = vpop.permute.xlu1 %2385  ;;  %v6991_v49 = vadd.f32 %v2384_v63, %v2359_v38  ;;  %v2315_v23 = vadd.f32 %v2307_v30, %v2299_v61  ;;  %v2362_v47 = vadd.f32 %v6880_v51, %v2314_v5  ;;  %v2361_v3 = vadd.f32 %v6882_v45, %v2313_v19  ;;  %v8444_v29 = vld [vmem:[#allocation10_spill] sm:$0xff]  ;;  %v8445_v44 = vld [vmem:[#allocation103_spill] sm:$0xff]  ;;  %v8448_v5 = vld [vmem:[#allocation124_spill] sm:$0xff] }
 0x1ee   :  { %3226 = vst.msk [vmem:[%s7348_s1 + $0xb0] sm:$0xff] %vm932_vm1, %v2284_v32  ;;  %v6989_v20 = vadd.f32 %v2386_v40, %v2360_v10  ;;  %v2301_v21 = vmul.f32 0.016746825, %v3370_v18  ;;  %v2309_v39 = vmul.f32 0.02900635, %v6212_v17  ;;  %v2364_v41 = vadd.f32 %v2346_v53, %v2316_v50  ;;  %v8441_v53 = vld [vmem:[#allocation90_spill] sm:$0xff] }
 0x1ef   :  { %v2363_v22 = vadd.f32 %v2344_v52, %v2315_v23  ;;  %v2318_v0 = vadd.f32 %v2310_v54, %v2302_v31  ;;  %v2416_v52 = vmul.f32 0.02900635, %v8441_v53  ;;  %v2415_v36 = vmul.f32 0.02900635, %v8442_v37  ;;  %8447 = vst [vmem:[#allocation130_spill] sm:$0xff] %v7027_v14  ;;  %v8449_v40 = vld [vmem:[#allocation115_spill] sm:$0xff] }
 0x1f0   :  { %v2388_v58 = vpop.permute.xlu0 %2387  ;;  %v2317_v25 = vadd.f32 %v2309_v39, %v2301_v21  ;;  %v2418_v59 = vmul.f32 0.02900635, %v8443_v9  ;;  %v2417_v57 = vmul.f32 0.02900635, %v8444_v29  ;;  %v2420_v32 = vmul.f32 0.02900635, %v8445_v44 }
 0x1f1   :  { %v2390_v35 = vpop.permute.xlu1 %2389  ;;  %v7005_v7 = vadd.f32 %v2388_v58, %v2361_v3  ;;  %v2366_v8 = vadd.f32 %v2350_v4, %v2318_v0  ;;  %v8446_v4 = vld [vmem:[#allocation114_spill] sm:$0xff]  ;;  %v2544_v61 = vmul.f32 -0.10825317, %v3371_v27  ;;  %v7030_v30 = vmul.f32 0.02900635, %v7027_v14  ;;  %v8451_v1 = vld [vmem:[#allocation100_spill] sm:$0xff] }
 0x1f2   :  { %v7003_v46 = vadd.f32 %v2390_v35, %v2362_v47  ;;  %v2365_v16 = vadd.f32 %v2348_v56, %v2317_v25  ;;  %v2419_v56 = vmul.f32 0.02900635, %v8446_v4  ;;  %v2543_v19 = vmul.f32 -0.10825317, %v8448_v5  ;;  %v7041_v50 = vld [vmem:[%s7347_s0 + $0x160] sm:$0xff]  ;;  %v8453_v47 = vld [vmem:[#allocation129_spill] sm:$0xff] }
 0x1f3   :  { %v2546_v63 = vmul.f32 -0.10825317, %v8449_v40  ;;  %8450 = vst [vmem:[#allocation74_spill] sm:$0xff] %v7041_v50  ;;  %v7044_v23 = vmul.f32 0.02900635, %v7041_v50  ;;  %v8452_v55 = vld [vmem:[#allocation102_spill] sm:$0xff]  ;;  %v2424_v27 = vadd.f32 %v2416_v52, %v6989_v20  ;;  %v2423_v5 = vadd.f32 %v2415_v36, %v6991_v49 }
 0x1f4   :  { %v2392_v42 = vpop.permute.xlu0 %2391  ;;  %v2432_v31 = vmul.f32 0.050240472, %v8451_v1  ;;  %v2431_v54 = vmul.f32 0.050240472, %v8452_v55  ;;  %v2434_v3 = vmul.f32 0.050240472, %v8453_v47 }
 0x1f5   :  { %v2394_v51 = vpop.permute.xlu1 %2393  ;;  %v7009_v60 = vadd.f32 %v2392_v42, %v2363_v22  ;;  %v8454_v18 = vld [vmem:[#allocation140_spill] sm:$0xff]  ;;  %v8455_v39 = vld [vmem:[#allocation94_spill] sm:$0xff]  ;;  %v2563_v22 = vrot.slane %v2544_v61, 1  ;;  %v2569_v37 = vrot.slane %v2546_v63, 1  ;;  %v8460_v9 = vld [vmem:[#allocation3_spill] sm:$0xff] }
 0x1f6   :  { %v7007_v45 = vadd.f32 %v2394_v51, %v2364_v41  ;;  %v2433_v21 = vmul.f32 0.050240472, %v8454_v18  ;;  %v2545_v35 = vmul.f32 -0.10825317, %v8455_v39  ;;  %v8456_v58 = vld [vmem:[#allocation116_spill] sm:$0xff]  ;;  %v8458_v51 = vld [vmem:[#allocation121_spill] sm:$0xff] }
 0x1f7   :  { %v2562_v41 = vrot.slane %v8456_v58, 1  ;;  %v8457_v0 = vld [vmem:[#allocation88_spill] sm:$0xff]  ;;  %v2548_v42 = vmul.f32 -0.10825317, %v8458_v51  ;;  %v2547_v29 = vmul.f32 -0.10825317, %v8460_v9 }
 0x1f8   :  { %v2396_v17 = vpop.permute.xlu0 %2395  ;;  %v2559_v25 = vrot.slane %v8457_v0, 1  ;;  %v8461_v40 = vld [vmem:[#allocation132_spill] sm:$0xff]  ;;  %v8462_v1 = vld [vmem:[#allocation133_spill] sm:$0xff]  ;;  %v7065_v47 = vmul.f32 0.050240472, %v6758_v62  ;;  %v8463_v18 = vld [vmem:[#allocation119_spill] sm:$0xff] }
 0x1f9   :  { %v2398_v26 = vpop.permute.xlu1 %2397  ;;  %v7013_v34 = vadd.f32 %v2396_v17, %v2365_v16  ;;  %v8459_v17 = vld [vmem:[#allocation63_spill] sm:$0xff]  ;;  %v2436_v61 = vmul.f32 0.050240472, %v8461_v40  ;;  %v2435_v55 = vmul.f32 0.050240472, %v8462_v1  ;;  %v2565_v39 = vrot.slane %v8463_v18, 1 }
 0x1fa   :  { %v7011_v48 = vadd.f32 %v2398_v26, %v2366_v8  ;;  %v2560_v26 = vrot.slane %v2543_v19, 1  ;;  %v2568_v53 = vrot.slane %v8459_v17, 1  ;;  %v2566_v58 = vrot.slane %v2545_v35, 1  ;;  %v8464_v19 = vld [vmem:[#allocation122_spill] sm:$0xff]  ;;  %v8465_v20 = vld [vmem:[#allocation27_spill] sm:$0xff]  ;;  %v8466_v40 = vld [vmem:[#allocation125_spill] sm:$0xff] }
 0x1fb   :  { %v2550_v0 = vmul.f32 -0.10825317, %v8464_v19  ;;  %v7070_v63 = vmul.f32 0.050240472, %v6782_v13  ;;  %v2564_v51 = vsel %vm339_vm0, %v2562_v41, %v2563_v22  ;;  %v2574_v52 = vrot.slane %v8465_v20, 1 }
 0x1fc   :  { %v2464_v28 = vpop.permute.xlu0 %2463  ;;  %v2575_v49 = vrot.slane %v2548_v42, 1  ;;  %v2561_v62 = vsel %vm339_vm0, %v2559_v25, %v2560_v26  ;;  %v2570_v9 = vsel %vm339_vm0, %v2568_v53, %v2569_v37  ;;  %v2571_v35 = vrot.slane %v8466_v40, 1  ;;  %v8467_v42 = vld [vmem:[#allocation34_spill] sm:$0xff]  ;;  %v8469_v53 = vld [vmem:[#allocation81_spill] sm:$0xff] }
 0x1fd   :  { %v2466_v43 = vpop.permute.xlu1 %2465  ;;  %v2572_v1 = vrot.slane %v2547_v29, 1  ;;  %v2426_v18 = vadd.f32 %v2418_v59, %v7003_v46  ;;  %v2425_v13 = vadd.f32 %v2417_v57, %v7005_v7  ;;  %v2440_v19 = vadd.f32 %v2432_v31, %v2424_v27 }
 0x1fe   :  { %v2439_v41 = vadd.f32 %v2431_v54, %v2423_v5  ;;  %v2567_v22 = vsel %vm339_vm0, %v2565_v39, %v2566_v58  ;;  %v2580_v20 = vrot.slane %v8467_v42, 1  ;;  %v2581_v33 = vrot.slane %v2550_v0, 1 }
 0x1ff   :  { %v2549_v50 = vmul.f32 -0.10825317, %v8468_v2  ;;  %v2488_v14 = vadd.f32 %v2466_v43, %v2440_v19  ;;  %v2576_v26 = vsel %vm339_vm0, %v2574_v52, %v2575_v49  ;;  %v2577_v37 = vrot.slane %v8469_v53, 1  ;;  %v3377_v19 = vld [vmem:[%s7347_s0 + $0xa8] sm:$0x1] }
 0x200   :  { %v7034_v38 = vpop.permute.xlu0 %2467  ;;  %v2487_v25 = vadd.f32 %v2464_v28, %v2439_v41  ;;  %v2428_v29 = vadd.f32 %v2420_v32, %v7007_v45  ;;  %v2427_v46 = vadd.f32 %v2419_v56, %v7009_v60  ;;  %v2573_v57 = vsel %vm339_vm0, %v2571_v35, %v2572_v1  ;;  %v3374_v45 = vld [vmem:[%s7347_s0 + $0x98] sm:$0x1] }
 0x201   :  { %v7032_v10 = vpop.permute.xlu1 %2469  ;;  %v7092_v31 = vmul.f32 -0.1875, %v6892_v15  ;;  %v2442_v54 = vadd.f32 %v2434_v3, %v2426_v18  ;;  %v2441_v27 = vadd.f32 %v2433_v21, %v2425_v13  ;;  %v7095_v28 = vsel %vm339_vm0, %v2580_v20, %v2581_v33  ;;  %v3378_v53 = vld [vmem:[%s7347_s0 + $0xd8] sm:$0x1] }
 0x202   :  { %v2578_v5 = vrot.slane %v2549_v50, 1  ;;  %v2602_v60 = vmul.f32 -0.1875, %v3374_v45  ;;  %v2599_v32 = vmul.f32 -0.1875, %v6915_v12  ;;  %v2443_v21 = vadd.f32 %v2435_v55, %v2427_v46  ;;  %v3375_v50 = vld [vmem:[%s7347_s0 + $0x88] sm:$0x1] }
 0x203   :  { %v2490_v56 = vadd.f32 %v7032_v10, %v2442_v54  ;;  %v2489_v15 = vadd.f32 %v7034_v38, %v2441_v27  ;;  %v2600_v0 = vmul.f32 -0.1875, %v3375_v50  ;;  %v2605_v52 = vmul.f32 -0.1875, %v6941_v24  ;;  %v3380_v27 = vld [vmem:[%s7347_s0 + $0xc8] sm:$0x1] }
 0x204   :  { %v7056_v16 = vpop.permute.xlu0 %2471  ;;  %v2430_v12 = vadd.f32 %v7030_v30, %v7011_v48  ;;  %v2429_v10 = vadd.f32 %v7044_v23, %v7013_v34  ;;  %v2634_v55 = vrot.slane %v7092_v31, 1  ;;  %v2635_v49 = vrot.slane %v2602_v60, 1 }
 0x205   :  { %v7054_v8 = vpop.permute.xlu1 %2473  ;;  %v2491_v35 = vadd.f32 %v7056_v16, %v2443_v21  ;;  %v2631_v1 = vrot.slane %v2599_v32, 1  ;;  %v2632_v18 = vrot.slane %v2600_v0, 1  ;;  %v2603_v13 = vmul.f32 -0.1875, %v6950_v6  ;;  %v3383_v32 = vld [vmem:[%s7347_s0 + $0xe0] sm:$0xff] }
 0x206   :  { %v2604_v41 = vmul.f32 -0.1875, %v3377_v19  ;;  %v2446_v42 = vadd.f32 %v7065_v47, %v2430_v12  ;;  %v2640_v20 = vrot.slane %v2605_v52, 1  ;;  %v2610_v6 = vmul.f32 -0.1875, %v3378_v53 }
 0x207   :  { %v7155_v45 = vsel %vm339_vm0, %v2634_v55, %v2635_v49  ;;  %v7158_v60 = vsel %vm339_vm0, %v2631_v1, %v2632_v18  ;;  %v3388_v1 = vld [vmem:[%s7347_s0 + $0x108] sm:$0x1] }
 0x208   :  { %v7076_v17 = vpop.permute.xlu0 %2475  ;;  %v2638_v31 = vrot.slane %v2604_v41, 1  ;;  %v2848_v18 = vmul.f32 0.0625, %v3388_v1  ;;  %v3390_v41 = vld [vmem:[%s7347_s0 + $0x138] sm:$0x1] }
 0x209   :  { %v7074_v36 = vpop.permute.xlu1 %2477 }
 0x20c   :  { %v2512_v59 = vpop.permute.xlu0 %2511 }
 0x20d   :  { %v2514_v7 = vpop.permute.xlu1 %2513  ;;  %v2535_v43 = vadd.f32 %v2512_v59, %v2487_v25  ;;  %v2609_v25 = vmul.f32 -0.1875, %v6970_v11  ;;  %v2637_v59 = vrot.slane %v2603_v13, 1  ;;  %v3379_v11 = vld [vmem:[%s7347_s0 + $0xc0] sm:$0xff]  ;;  %v3389_v13 = vld [vmem:[%s7347_s0 + $0x130] sm:$0xff] }
 0x20e   :  { %v2536_v2 = vadd.f32 %v2514_v7, %v2488_v14  ;;  %v2444_v14 = vadd.f32 %v2436_v61, %v2428_v29  ;;  %v2579_v61 = vsel %vm339_vm0, %v2577_v37, %v2578_v5  ;;  %v2494_v37 = vadd.f32 %v7074_v36, %v2446_v42 }
 0x20f   :  { %v7105_v3 = vadd.f32 %v2561_v62, %v2535_v43  ;;  %v3376_v62 = vld [vmem:[%s7347_s0 + $0xb8] sm:$0x1]  ;;  %v2607_v54 = vmul.f32 -0.1875, %v3379_v11  ;;  %v2608_v36 = vmul.f32 -0.1875, %v3380_v27  ;;  %v2646_v50 = vrot.slane %v2609_v25, 1  ;;  %v8471_v11 = vld [vmem:[#allocation120_spill] sm:$0xff] }
 0x210   :  { %v7103_v39 = vadd.f32 %v2564_v51, %v2536_v2  ;;  %v2516_v58 = vpop.permute.xlu0 %2515  ;;  %v2606_v40 = vmul.f32 -0.1875, %v3376_v62  ;;  %v2492_v24 = vadd.f32 %v7054_v8, %v2444_v14  ;;  %v2445_v8 = vadd.f32 %v7070_v63, %v2429_v10  ;;  %v3382_v43 = vld [vmem:[%s7347_s0 + $0xf8] sm:$0x1] }
 0x211   :  { %v2518_v33 = vpop.permute.xlu1 %2517  ;;  %v2537_v51 = vadd.f32 %v2516_v58, %v2489_v15  ;;  %v2614_v5 = vmul.f32 -0.1875, %v3382_v43  ;;  %v3384_v15 = vld [vmem:[%s7347_s0 + $0xe8] sm:$0x1]  ;;  %v7179_v12 = vsel %vm339_vm0, %v2637_v59, %v2638_v31  ;;  %v2647_v10 = vrot.slane %v2610_v6, 1  ;;  %v3386_v62 = vld [vmem:[%s7347_s0 + $0x118] sm:$0x1] }
 0x212   :  { %v2538_v38 = vadd.f32 %v2518_v33, %v2490_v56  ;;  %v2493_v29 = vadd.f32 %v7076_v17, %v2445_v8  ;;  %v2611_v56 = vmul.f32 -0.1875, %v3383_v32  ;;  %v2612_v14 = vmul.f32 -0.1875, %v3384_v15  ;;  %v3391_v8 = vld [vmem:[%s7347_s0 + $0x120] sm:$0xff]  ;;  %v8472_v15 = vld [vmem:[#allocation131_spill] sm:$0xff] }
 0x213   :  { %v7124_v30 = vadd.f32 %v2567_v22, %v2537_v51  ;;  %v2641_v22 = vrot.slane %v2606_v40, 1  ;;  %v2644_v51 = vrot.slane %v2608_v36, 1  ;;  %v2653_v49 = vrot.slane %v2614_v5, 1 }
 0x214   :  { %v7122_v48 = vadd.f32 %v2570_v9, %v2538_v38  ;;  %v2520_v23 = vpop.permute.xlu0 %2519  ;;  %v2643_v38 = vrot.slane %v2607_v54, 1  ;;  %v2850_v40 = vmul.f32 0.0625, %v3386_v62  ;;  %v2853_v19 = vmul.f32 0.0625, %v3389_v13  ;;  %v8475_v62 = vld [vmem:[#allocation14_spill] sm:$0xff] }
 0x215   :  { %v2522_v34 = vpop.permute.xlu1 %2521  ;;  %v2539_v9 = vadd.f32 %v2520_v23, %v2491_v35  ;;  %v7172_v58 = vsel %vm339_vm0, %v2640_v20, %v2641_v22  ;;  %v2650_v35 = vrot.slane %v2612_v14, 1  ;;  %v2854_v42 = vmul.f32 0.0625, %v3390_v41  ;;  %v8478_v13 = vld [vmem:[#allocation74_spill] sm:$0xff]  ;;  %v8479_v41 = vld [vmem:[#allocation77_spill] sm:$0xff] }
 0x216   :  { %v2540_v16 = vadd.f32 %v2522_v34, %v2492_v24  ;;  %v2649_v24 = vrot.slane %v2611_v56, 1  ;;  %v3387_v34 = vld [vmem:[%s7347_s0 + $0x100] sm:$0xff]  ;;  %v7210_v53 = vsel %vm339_vm0, %v2646_v50, %v2647_v10  ;;  %v7213_v6 = vsel %vm339_vm0, %v2643_v38, %v2644_v51  ;;  %v8473_v50 = vld [vmem:[#allocation68_spill] sm:$0xff] }
 0x217   :  { %v7140_v47 = vadd.f32 %v2573_v57, %v2539_v9  ;;  %v2847_v23 = vmul.f32 0.0625, %v3387_v34  ;;  %v3392_v9 = vld [vmem:[%s7347_s0 + $0x128] sm:$0x1]  ;;  %v2883_v59 = vrot.slane %v2850_v40, 1  ;;  %v2855_v31 = vmul.f32 0.0625, %v8446_v4 }
 0x218   :  { %v7138_v46 = vadd.f32 %v2576_v26, %v2540_v16  ;;  %v2524_v7 = vpop.permute.xlu0 %2523  ;;  %v3381_v26 = vld [vmem:[%s7347_s0 + $0xf0] sm:$0xff]  ;;  %v2851_v16 = vmul.f32 0.0625, %v3391_v8  ;;  %v2852_v20 = vmul.f32 0.0625, %v3392_v9  ;;  %v2856_v54 = vmul.f32 0.0625, %v8471_v11  ;;  %v8477_v34 = vld [vmem:[#allocation83_spill] sm:$0xff] }
 0x219   :  { %v2526_v63 = vpop.permute.xlu1 %2525  ;;  %v2541_v17 = vadd.f32 %v2524_v7, %v2493_v29  ;;  %v2613_v57 = vmul.f32 -0.1875, %v3381_v26  ;;  %v8470_v29 = vld [vmem:[#allocation20_spill] sm:$0xff]  ;;  %v7223_v36 = vsel %vm339_vm0, %v2649_v24, %v2650_v35  ;;  %v2888_v26 = vrot.slane %v2853_v19, 1  ;;  %v8476_v24 = vld [vmem:[#allocation15_spill] sm:$0xff] }
 0x21a   :  { %v2542_v2 = vadd.f32 %v2526_v63, %v2494_v37  ;;  %v2857_v37 = vmul.f32 0.0625, %v8445_v44  ;;  %v2858_v63 = vmul.f32 0.0625, %v8470_v29  ;;  %v2885_v43 = vrot.slane %v2851_v16, 1 }
 0x21b   :  { %v7169_v33 = vadd.f32 %v2579_v61, %v2541_v17  ;;  %v2652_v55 = vrot.slane %v2613_v57, 1  ;;  %v2880_v17 = vrot.slane %v2848_v18, 1  ;;  %v2889_v57 = vrot.slane %v2854_v42, 1 }
 0x21c   :  { %v7167_v21 = vadd.f32 %v7095_v28, %v2542_v2  ;;  %v7176_v52 = vpop.permute.xlu0 %2727  ;;  %v3385_v28 = vld [vmem:[%s7347_s0 + $0x110] sm:$0xff]  ;;  %v2879_v2 = vrot.slane %v2847_v23, 1  ;;  %v2886_v44 = vrot.slane %v2852_v20, 1  ;;  %v2894_v56 = vrot.slane %v2857_v37, 1 }
 0x21d   :  { %v7174_v0 = vpop.permute.xlu1 %2729  ;;  %v2849_v61 = vmul.f32 0.0625, %v3385_v28  ;;  %v7220_v27 = vsel %vm339_vm0, %v2652_v55, %v2653_v49  ;;  %v2895_v4 = vrot.slane %v2858_v63, 1  ;;  %v2920_v14 = vmul.f32 0.10825317, %v8472_v15  ;;  %v8474_v49 = vld [vmem:[#allocation130_spill] sm:$0xff]  ;;  %v8480_v37 = vld [vmem:[#allocation144_spill] sm:$0xff] }
 0x21e   :  { %v2919_v10 = vmul.f32 0.10825317, %v8473_v50  ;;  %v2891_v51 = vrot.slane %v2855_v31, 1  ;;  %v2892_v55 = vrot.slane %v2856_v54, 1  ;;  %v7233_v28 = vmul.f32 0.0625, %v8474_v49 }
 0x21f   :  { %v2882_v7 = vrot.slane %v2849_v61, 1  ;;  %v2881_v61 = vsel %vm339_vm0, %v2879_v2, %v2880_v17  ;;  %v7237_v40 = vmul.f32 0.0625, %v8475_v62  ;;  %v2938_v35 = vrot.slane %v8476_v24, 1  ;;  %v8481_v2 = vld [vmem:[#allocation145_spill] sm:$0xff] }
 0x220   :  { %v7207_v25 = vpop.permute.xlu0 %2731  ;;  %v2922_v23 = vmul.f32 0.10825317, %v8477_v34  ;;  %v2890_v1 = vsel %vm339_vm0, %v2888_v26, %v2889_v57  ;;  %v2887_v18 = vsel %vm339_vm0, %v2885_v43, %v2886_v44  ;;  %v7244_v19 = vmul.f32 0.0625, %v8478_v13  ;;  %v8482_v57 = vld [vmem:[#allocation141_spill] sm:$0xff]  ;;  %v8485_v34 = vld [vmem:[#allocation147_spill] sm:$0xff] }
 0x221   :  { %v7205_v22 = vpop.permute.xlu1 %2733  ;;  %v2884_v38 = vsel %vm339_vm0, %v2882_v7, %v2883_v59  ;;  %v7247_v42 = vmul.f32 0.0625, %v8479_v41  ;;  %v7254_v9 = vsel %vm339_vm0, %v2894_v56, %v2895_v4  ;;  %v2939_v20 = vrot.slane %v2920_v14, 1  ;;  %v8483_v14 = vld [vmem:[#allocation146_spill] sm:$0xff] }
 0x222   :  { %v2935_v29 = vrot.slane %v8480_v37, 1  ;;  %v2936_v63 = vrot.slane %v2919_v10, 1  ;;  %v2664_v7 = vadd.f32 %v7155_v45, %v7103_v39  ;;  %v2663_v59 = vadd.f32 %v7158_v60, %v7105_v3  ;;  %v8484_v10 = vld [vmem:[#allocation104_spill] sm:$0xff] }
 0x223   :  { %v7262_v31 = vsel %vm339_vm0, %v2891_v51, %v2892_v55  ;;  %v2900_v11 = vrot.slane %v7233_v28, 1  ;;  %v2901_v54 = vrot.slane %v7237_v40, 1  ;;  %v2944_v17 = vrot.slane %v8481_v2, 1  ;;  %v8487_v37 = vld [vmem:[#allocation16_spill] sm:$0xff] }
 0x224   :  { %v7227_v32 = vpop.permute.xlu0 %2735  ;;  %v2945_v26 = vrot.slane %v2922_v23, 1  ;;  %v2921_v43 = vmul.f32 0.10825317, %v8482_v57  ;;  %v2752_v44 = vadd.f32 %v7174_v0, %v2664_v7  ;;  %v2751_v56 = vadd.f32 %v7176_v52, %v2663_v59 }
 0x225   :  { %v7225_v5 = vpop.permute.xlu1 %2737  ;;  %v2897_v39 = vrot.slane %v7244_v19, 1  ;;  %v2898_v3 = vrot.slane %v7247_v42, 1  ;;  %v2940_v4 = vsel %vm339_vm0, %v2938_v35, %v2939_v20  ;;  %v2937_v15 = vsel %vm339_vm0, %v2935_v29, %v2936_v63  ;;  %v8486_v35 = vld [vmem:[#allocation108_spill] sm:$0xff] }
 0x226   :  { %v2941_v50 = vrot.slane %v8483_v14, 1  ;;  %v2924_v51 = vmul.f32 0.10825317, %v8484_v10  ;;  %v2666_v55 = vadd.f32 %v7172_v58, %v7122_v48  ;;  %v2665_v0 = vadd.f32 %v7179_v12, %v7124_v30  ;;  %v8488_v63 = vld [vmem:[#allocation92_spill] sm:$0xff] }
 0x227   :  { %v2946_v62 = vsel %vm339_vm0, %v2944_v17, %v2945_v26  ;;  %v2942_v24 = vrot.slane %v2921_v43, 1  ;;  %v2950_v23 = vrot.slane %v8485_v34, 1  ;;  %v2923_v13 = vmul.f32 0.10825317, %v8486_v35  ;;  %v8489_v26 = vld [vmem:[#allocation49_spill] sm:$0xff] }
 0x228   :  { %v7251_v16 = vpop.permute.xlu0 %2739  ;;  %v2754_v19 = vadd.f32 %v7205_v22, %v2666_v55  ;;  %v2753_v41 = vadd.f32 %v7207_v25, %v2665_v0  ;;  %v2668_v48 = vadd.f32 %v7210_v53, %v7138_v46  ;;  %v2667_v30 = vadd.f32 %v7213_v6, %v7140_v47 }
 0x229   :  { %v7249_v8 = vpop.permute.xlu1 %2741  ;;  %v2947_v29 = vrot.slane %v8487_v37, 1  ;;  %v2926_v7 = vmul.f32 0.10825317, %v8488_v63  ;;  %v2943_v25 = vsel %vm339_vm0, %v2941_v50, %v2942_v24  ;;  %v2925_v57 = vmul.f32 0.10825317, %v8489_v26 }
 0x22a   :  { %v2756_v46 = vadd.f32 %v7225_v5, %v2668_v48  ;;  %v2755_v47 = vadd.f32 %v7227_v32, %v2667_v30  ;;  %v2670_v43 = vadd.f32 %v7220_v27, %v7167_v21  ;;  %v2902_v0 = vsel %vm339_vm0, %v2900_v11, %v2901_v54 }
 0x22b   :  { %v2954_v55 = vrot.slane %v2925_v57, 1 }
 0x22c   :  { %v2816_v60 = vpop.permute.xlu0 %2815  ;;  %v2758_v21 = vadd.f32 %v7249_v8, %v2670_v43 }
 0x22d   :  { %v2818_v45 = vpop.permute.xlu1 %2817  ;;  %v2839_v49 = vadd.f32 %v2816_v60, %v2751_v56  ;;  %v8490_v60 = vld [vmem:[#allocation87_spill] sm:$0xff] }
 0x22e   :  { %v2840_v52 = vadd.f32 %v2818_v45, %v2752_v44  ;;  %v2669_v44 = vadd.f32 %v7223_v36, %v7169_v33 }
 0x22f   :  { %v2911_v20 = vadd.f32 %v2881_v61, %v2839_v49  ;;  %v2948_v61 = vrot.slane %v2923_v13, 1  ;;  %v2899_v49 = vsel %vm339_vm0, %v2897_v39, %v2898_v3 }
 0x230   :  { %v2912_v42 = vadd.f32 %v2884_v38, %v2840_v52  ;;  %v2820_v12 = vpop.permute.xlu0 %2819  ;;  %v2951_v38 = vrot.slane %v2924_v51, 1  ;;  %v2757_v33 = vadd.f32 %v7251_v16, %v2669_v44 }
 0x231   :  { %v2822_v58 = vpop.permute.xlu1 %2821  ;;  %v2841_v2 = vadd.f32 %v2820_v12, %v2753_v41  ;;  %v2967_v22 = vadd.f32 %v2937_v15, %v2911_v20  ;;  %v2957_v15 = vrot.slane %v2926_v7, 1  ;;  %v2949_v32 = vsel %vm339_vm0, %v2947_v29, %v2948_v61 }
 0x232   :  { %v2842_v59 = vadd.f32 %v2822_v58, %v2754_v19  ;;  %v2968_v17 = vadd.f32 %v2940_v4, %v2912_v42  ;;  %v2956_v4 = vrot.slane %v8490_v60, 1  ;;  %v2952_v5 = vsel %vm339_vm0, %v2950_v23, %v2951_v38 }
 0x233   :  { %v2913_v6 = vadd.f32 %v2887_v18, %v2841_v2 }
 0x234   :  { %v2914_v53 = vadd.f32 %v2890_v1, %v2842_v59  ;;  %v2824_v45 = vpop.permute.xlu0 %2823  ;;  %v8491_v1 = vld [vmem:[#allocation71_spill] sm:$0xff]  ;;  %v2958_v16 = vsel %vm339_vm0, %v2956_v4, %v2957_v15 }
 0x235   :  { %v2826_v56 = vpop.permute.xlu1 %2825  ;;  %v2843_v50 = vadd.f32 %v2824_v45, %v2755_v47  ;;  %v2969_v51 = vadd.f32 %v2943_v25, %v2913_v6  ;;  %v2953_v18 = vrot.slane %v8491_v1, 1 }
 0x236   :  { %v2844_v14 = vadd.f32 %v2826_v56, %v2756_v46  ;;  %v2970_v10 = vadd.f32 %v2946_v62, %v2914_v53 }
 0x237   :  { %v2915_v36 = vadd.f32 %v7262_v31, %v2843_v50 }
 0x238   :  { %v2916_v27 = vadd.f32 %v7254_v9, %v2844_v14  ;;  %v2828_v62 = vpop.permute.xlu0 %2827  ;;  %v2955_v9 = vsel %vm339_vm0, %v2953_v18, %v2954_v55 }
 0x239   :  { %v2830_v52 = vpop.permute.xlu1 %2829  ;;  %v2845_v34 = vadd.f32 %v2828_v62, %v2757_v33  ;;  %v2971_v8 = vadd.f32 %v2949_v32, %v2915_v36 }
 0x23a   :  { %v2846_v24 = vadd.f32 %v2830_v52, %v2758_v21  ;;  %v2972_v23 = vadd.f32 %v2952_v5, %v2916_v27 }
 0x23b   :  { %v2917_v31 = vadd.f32 %v2899_v49, %v2845_v34 }
 0x23c   :  { %v2918_v35 = vadd.f32 %v2902_v0, %v2846_v24 }
 0x23d   :  { %v3034_v13 = vpop.permute.xlu1 %3033  ;;  %v2973_v28 = vadd.f32 %v2955_v9, %v2917_v31 }
 0x23e   :  { %v3032_v40 = vpop.permute.xlu0 %3031  ;;  %v2974_v19 = vadd.f32 %v2958_v16, %v2918_v35  ;;  %v3056_v20 = vadd.f32 %v3034_v13, %v2968_v17 }
 0x23f   :  { %v3055_v48 = vadd.f32 %v3032_v40, %v2967_v22 }
 0x241   :  { %v3038_v41 = vpop.permute.xlu1 %3037 }
 0x242   :  { %v3036_v11 = vpop.permute.xlu0 %3035  ;;  %v3058_v29 = vadd.f32 %v3038_v41, %v2970_v10 }
 0x243   :  { %v3057_v63 = vadd.f32 %v3036_v11, %v2969_v51 }
 0x245   :  { %v3042_v54 = vpop.permute.xlu1 %3041 }
 0x246   :  { %v3040_v42 = vpop.permute.xlu0 %3039  ;;  %v3060_v22 = vadd.f32 %v3042_v54, %v2972_v23 }
 0x247   :  { %v3059_v25 = vadd.f32 %v3040_v42, %v2971_v8 }
 0x249   :  { %v3046_v39 = vpop.permute.xlu1 %3045 }
 0x24a   :  { %v3044_v3 = vpop.permute.xlu0 %3043  ;;  %v3062_v46 = vadd.f32 %v3046_v39, %v2974_v19 }
 0x24b   :  { %v3061_v47 = vadd.f32 %v3044_v3, %v2973_v28 }
 0x24d   :  { %v3122_v30 = vpop.permute.xlu1 %3121 }
 0x24e   :  { %v3144_v58 = vadd.f32 %v3122_v30, %v3056_v20  ;;  %v3120_v12 = vpop.permute.xlu0 %3119 }
 0x24f   :  { %v3143_v37 = vadd.f32 %v3120_v12, %v3055_v48 }
 0x250   :  { %3229 = vst.msk [vmem:[%s7348_s1 + $0xc8] sm:$0xff] %vm932_vm1, %v3144_v58 }
 0x251   :  { %3228 = vst.msk [vmem:[%s7348_s1 + $0xc0] sm:$0xff] %vm932_vm1, %v3143_v37  ;;  %v3126_v7 = vpop.permute.xlu1 %3125 }
 0x252   :  { %v3146_v59 = vadd.f32 %v3126_v7, %v3058_v29  ;;  %v3124_v2 = vpop.permute.xlu0 %3123 }
 0x253   :  { %v3145_v17 = vadd.f32 %v3124_v2, %v3057_v63 }
 0x254   :  { %3231 = vst.msk [vmem:[%s7348_s1 + $0xd8] sm:$0xff] %vm932_vm1, %v3146_v59 }
 0x255   :  { %3230 = vst.msk [vmem:[%s7348_s1 + $0xd0] sm:$0xff] %vm932_vm1, %v3145_v17  ;;  %v3130_v38 = vpop.permute.xlu1 %3129 }
 0x256   :  { %v3148_v61 = vadd.f32 %v3130_v38, %v3060_v22  ;;  %v3128_v26 = vpop.permute.xlu0 %3127 }
 0x257   :  { %v3147_v57 = vadd.f32 %v3128_v26, %v3059_v25 }
 0x258   :  { %3233 = vst.msk [vmem:[%s7348_s1 + $0xe8] sm:$0xff] %vm932_vm1, %v3148_v61 }
 0x259   :  { %3232 = vst.msk [vmem:[%s7348_s1 + $0xe0] sm:$0xff] %vm932_vm1, %v3147_v57  ;;  %v3134_v53 = vpop.permute.xlu1 %3133 }
 0x25a   :  { %v3150_v6 = vadd.f32 %v3134_v53, %v3062_v46  ;;  %v3132_v43 = vpop.permute.xlu0 %3131 }
 0x25b   :  { %v3149_v44 = vadd.f32 %v3132_v43, %v3061_v47 }
 0x25c   :  { %3235 = vst.msk [vmem:[%s7348_s1 + $0xf8] sm:$0xff] %vm932_vm1, %v3150_v6 }
 0x25d   :  { %3234 = vst.msk [vmem:[%s7348_s1 + $0xf0] sm:$0xff] %vm932_vm1, %v3149_v44 }

// kernel: wtab1_forward.20
= control target key start
LH: loop header
LB: loop body
LE: loop exit
PB: predicated region body
PF: predicated region fallthrough
CT: control target
= control target key end

     0   :  { %s749_s27 = smov 0   ;;  %s840_s0 = inlined_call_operand.vmem [shape: f32[2,12,64], index: 0, kind: input, shape index: {}]   ;;  %s841_s1 = inlined_call_operand.vmem [shape: f32[4,12], index: 1, kind: input, shape index: {}]   ;;  %s842_s2 = inlined_call_operand.vmem [shape: f32[4,1], index: 2, kind: input, shape index: {}]   ;;  %s843_s3 = inlined_call_operand.vmem [shape: f32[4,1], index: 3, kind: input, shape index: {}]   ;;  %s844_s4 = inlined_call_operand.vmem [shape: f32[4,4], index: 4, kind: input, shape index: {}]   ;;  %s845_s5 = inlined_call_operand.vmem [shape: f32[4,1], index: 5, kind: input, shape index: {}]   ;;  %s846_s6 = inlined_call_operand.vmem [shape: f32[4,1], index: 6, kind: input, shape index: {}]   ;;  %s847_s7 = inlined_call_operand.vmem [shape: f32[64,256], index: 7, kind: input, shape index: {}]   ;;  %s848_s8 = inlined_call_operand.vmem [shape: f32[2,4,256], index: 8, kind: output, shape index: {}]  }
   0x1 LB: > { %s645_s28 = sadd.s32 4294967295, %s699_s27   ;;  %p649_p0 = scmp.ge.s32.totalorder %s699_s27, 1  ;;  %s699_s27 = sphi %s749_s27, %s18_s27  }
   0x2   : > { %p262_p1 = scmp.lt.s32.totalorder %s699_s27, 3 }
   0x4   : > { %p263_p2 = pnand %p649_p0, %p262_p1 }
   0x5   : > { %p296_p3 = scmp.lt.s32.totalorder (!%p263_p2), %s645_s28, 1 }
   0x6   : > { %266 = sbr.rel (%p263_p2) target bundleno = 613 (0x265), region = 52 }
   0xb   : > { %v701_v0 = vmov 0.0   ;;  %vm702_vm0 = vmmov 0   ;;  %v387_v1 = vld [vmem:[%s842_s2] sm:$0xf]  ;;  %s850_s28 = smov (!%p296_p3, %s645_s28), 1  ;;  %v703_v2 = vmov 0  }
   0xc   : > { %668 = vmatprep.subr.mxu0 %v701_v0  ;;  %672 = vmatprep.mubr.msk.f32.mxu0 %vm702_vm0, %v701_v0  ;;  %s661_s9 = sshll.u32 %s850_s28, 4  ;;  %vm313_vm1 = vcmask 1043456   ;;  %v394_v3 = vld [vmem:[%s843_s3] sm:$0xf]  ;;  %vm309_vm2 = vcmask 97280   ;;  %v509_v8 = vld [vmem:[%s847_s7 + $0x78] sm:$0xff] }
   0xd   : > { %691 = vset.pattern.permute.xlu0 %v703_v2  ;;  %692 = vset.pattern.permute.xlu1 %v703_v2  ;;  %s300_s14 = scalar_lea.vmem %s840_s0, %s661_s9  ;;  %v308_v6 = vld [vmem:[%s841_s1] sm:$0xf]  ;;  %v508_v9 = vld [vmem:[%s847_s7 + $0x70] sm:$0xff]  ;;  %v507_v10 = vld [vmem:[%s847_s7 + $0x68] sm:$0xff]  ;;  %vm403_vm3 = vcmask 31744   ;;  %vm510_vm4 = vcmask 523264  }
   0xe   : > { %390 = vperm.xlu0 %691, %v387_v1   ;;  %578 = vmatprep.mubr.f32.mxu1 %v701_v0  ;;  %v307_v4 = vld [vmem:[%s300_s14 + $0x8] sm:$0xf]  ;;  %v306_v5 = vld [vmem:[%s300_s14] sm:$0xff]  ;;  %v505_v13 = vld [vmem:[%s847_s7 + $0x58] sm:$0xff]  ;;  %s662_s15 = sshll.u32 %s850_s28, 3 }
   0xf   : > { %669 = vmatpush3.msk.msra.mxu0 %vm313_vm1, %v307_v4  ;;  %v480_v7 = vld [vmem:[%s845_s5] sm:$0xf]  ;;  %530 = vmatprep.subr.mxu1 %v509_v8  ;;  %v504_v14 = vld [vmem:[%s847_s7 + $0x50] sm:$0xff]  ;;  %v503_v15 = vld [vmem:[%s847_s7 + $0x48] sm:$0xff]  ;;  %s305_s18 = scalar_lea.vmem %s848_s8, %s662_s15 }
  0x10   : > { %670 = vmatprep.subr.mxu0 %v701_v0  ;;  %483 = vperm.xlu1 %692, %v480_v7   ;;  %v506_v11 = vld [vmem:[%s847_s7 + $0x60] sm:$0xff]  ;;  %v501_v17 = vld [vmem:[%s847_s7 + $0x38] sm:$0xff]  ;;  %v500_v18 = vld [vmem:[%s847_s7 + $0x30] sm:$0xff] }
  0x11   : > { %671 = vmatpush3.msra.mxu0 %v306_v5  ;;  %v487_v12 = vld [vmem:[%s846_s6] sm:$0xf]  ;;  %531 = vmatpush1.msra.mxu1 %v508_v9  ;;  %v499_v19 = vld [vmem:[%s847_s7 + $0x28] sm:$0xff]  ;;  %v497_v29 = vld [vmem:[%s847_s7 + $0x18] sm:$0xff] }
  0x12   : > { %397 = vperm.xlu0 %691, %v394_v3   ;;  %673 = vmatmul.mubr.msk.f32.vlgmr.msra.gmra.mxu0 %vm309_vm2, %v308_v6  ;;  %v502_v16 = vld [vmem:[%s847_s7 + $0x40] sm:$0xff]  ;;  %v496_v30 = vld [vmem:[%s847_s7 + $0x10] sm:$0xff]  ;;  %v495_v31 = vld [vmem:[%s847_s7 + $0x8] sm:$0xff] }
  0x13   : > { %675 = vmatprep.subr.mxu0 %v701_v0  ;;  %677 = vmatprep.mubr.msk.f32.mxu0 %vm702_vm0, %v701_v0  ;;  %v402_v27 = vld [vmem:[%s844_s4] sm:$0xf] }
  0x14   : > { %532 = vmatprep.subr.mxu1 %v507_v10  ;;  %490 = vperm.xlu1 %692, %v487_v12   ;;  %v498_v28 = vld [vmem:[%s847_s7 + $0x20] sm:$0xff] }
  0x15   : > { %533 = vmatpush1.msra.mxu1 %v506_v11  ;;  %v494_v32 = vld [vmem:[%s847_s7] sm:$0xff] }
  0x16   : > { %534 = vmatprep.subr.mxu1 %v505_v13 }
  0x17   : > { %535 = vmatpush1.msra.mxu1 %v504_v14 }
  0x18   : > { %536 = vmatprep.subr.mxu1 %v503_v15 }
  0x19   : > { %537 = vmatpush1.msra.mxu1 %v502_v16 }
  0x1a   : > { %538 = vmatprep.subr.mxu1 %v501_v17 }
  0x1b   : > { %539 = vmatpush1.msra.mxu1 %v500_v18 }
  0x1c   : > { %540 = vmatprep.subr.mxu1 %v499_v19 }
  0x1d   : > { %541 = vmatpush1.msra.mxu1 %v498_v28 }
  0x1e   : > { %542 = vmatprep.subr.mxu1 %v497_v29 }
  0x1f   : > { %543 = vmatpush1.msra.mxu1 %v496_v30 }
  0x20   : > { %544 = vmatprep.subr.mxu1 %v495_v31 }
  0x21   : > { %545 = vmatpush1.msra.mxu1 %v494_v32 }
  0x89   : > { %v391_v20 = vpop.permute.xlu0 %390 }
  0x8b   : > { %v484_v33 = vpop.permute.xlu1 %483 }
  0x8d   : > { %v398_v23 = vpop.permute.xlu0 %397 }
  0x8f   : > { %v491_v36 = vpop.permute.xlu1 %490 }
  0xd2   : > { %v383_v21 = vpop.f32.mrf.mxu0 }
  0xd3   : > { %v393_v22 = vmul.f32 %v391_v20, %v383_v21 }
  0xd4   : > { %v674_v24 = vpop.f32.mrf.mxu0 }
  0xd5   : > { %v400_v25 = vadd.f32 %v398_v23, %v393_v22 }
  0xd7   : > { %v401_v26 = vmax.f32 %v400_v25, 0.0 }
  0xd9   : > { %676 = vmatpush3.msk.msra.mxu0 %vm313_vm1, %v401_v26 }
  0xda   : > { %678 = vmatmul.mubr.msk.f32.vlgmr.msra.gmra.mxu0 %vm403_vm3, %v402_v27 }
 0x19a   : > { %v476_v34 = vpop.f32.mrf.mxu0 }
 0x19b   : > { %v486_v35 = vmul.f32 %v484_v33, %v476_v34 }
 0x19c   : > { %v679_v37 = vpop.f32.mrf.mxu0 }
 0x19d   : > { %v493_v38 = vadd.f32 %v491_v36, %v486_v35 }
 0x19f   : > { %658 = vmatmul.mubr.msk.f32.vlgmr.msra.gmra.mxu1 %vm510_vm4, %v493_v38 }
 0x25f   : > { %v580_v39 = vpop.f32.mrf.mxu1 }
 0x261   : > { %v582_v40 = vpop.f32.mrf.mxu1 }
 0x262   : > { %v587_v41 = vcombine.low %v580_v39, %v582_v40 }
 0x264   : > { %589 = vst [vmem:[%s305_s18] sm:$0xff] %v587_v41 }
 0x265 PF: > { %s18_s27 = sadd.s32 1, %s699_s27  }
 0x266   : > { %p15_p4 = scmp.ge.s32.totalorder %s18_s27, 4  }
 0x268   :  { %17 = sbr.rel (!%p15_p4) target bundleno = 1 (0x1), region = 82 }

// kernel: wtab1_forward.18
= control target key start
LH: loop header
LB: loop body
LE: loop exit
PB: predicated region body
PF: predicated region fallthrough
CT: control target
= control target key end

     0   :  { %vm24_vm0 = vcmask 1043456   ;;  %vm20_vm1 = vcmask 31744   ;;  %v854_v0 = vmov 0.0   ;;  %vm855_vm2 = vmmov 0   ;;  %s964_s0 = inlined_call_operand.vmem [shape: f32[9,4,128], index: 0, kind: input, shape index: {}]   ;;  %s965_s1 = inlined_call_operand.vmem [shape: f32[9,4,4], index: 1, kind: input, shape index: {}]   ;;  %s966_s2 = inlined_call_operand.vmem [shape: f32[4,1], index: 2, kind: input, shape index: {}]   ;;  %s967_s3 = inlined_call_operand.vmem [shape: f32[4,128], index: 3, kind: output, shape index: {}]  }
   0x1   :  { %805 = vmatprep.subr.mxu0 %v854_v0  ;;  %v754_v1 = vld [vmem:[%s964_s0 + $0x4] sm:$0xf]  ;;  %807 = vmatprep.mubr.msk.f32.mxu0 %vm855_vm2, %v854_v0  ;;  %v15_v3 = vld [vmem:[%s964_s0] sm:$0xf]  ;;  %v760_v5 = vld [vmem:[%s964_s0 + $0x8] sm:$0xf] }
   0x2   :  { %v753_v2 = vld [vmem:[%s965_s1 + $0x4] sm:$0xf]  ;;  %806 = vmatpush3.msk.msra.mxu0 %vm24_vm0, %v754_v1  ;;  %810 = vmatprep.subr.mxu1 %v854_v0  ;;  %v14_v4 = vld [vmem:[%s965_s1] sm:$0xf]  ;;  %v764_v6 = vld [vmem:[%s964_s0 + $0xc] sm:$0xf] }
   0x3   :  { %808 = vmatmul.mubr.msk.f32.vlgmr.msra.gmra.mxu0 %vm20_vm1, %v753_v2  ;;  %811 = vmatpush3.msk.msra.mxu1 %vm24_vm0, %v15_v3  ;;  %v759_v7 = vld [vmem:[%s965_s1 + $0x8] sm:$0xf]  ;;  %v763_v8 = vld [vmem:[%s965_s1 + $0xc] sm:$0xf]  ;;  %v768_v9 = vld [vmem:[%s964_s0 + $0x10] sm:$0xf] }
   0x4   :  { %812 = vmatprep.mubr.msk.f32.mxu1 %vm855_vm2, %v854_v0  ;;  %815 = vmatprep.subr.mxu0 %v854_v0  ;;  %v772_v10 = vld [vmem:[%s964_s0 + $0x14] sm:$0xf]  ;;  %v767_v11 = vld [vmem:[%s965_s1 + $0x10] sm:$0xf]  ;;  %v776_v13 = vld [vmem:[%s964_s0 + $0x18] sm:$0xf] }
   0x5   :  { %813 = vmatmul.mubr.msk.f32.vlgmr.msra.gmra.mxu1 %vm20_vm1, %v14_v4  ;;  %816 = vmatpush3.msk.msra.mxu0 %vm24_vm0, %v760_v5  ;;  %v771_v12 = vld [vmem:[%s965_s1 + $0x14] sm:$0xf]  ;;  %v780_v14 = vld [vmem:[%s964_s0 + $0x1c] sm:$0xf]  ;;  %v775_v15 = vld [vmem:[%s965_s1 + $0x18] sm:$0xf] }
   0x6   :  { %820 = vmatprep.subr.mxu1 %v854_v0  ;;  %817 = vmatprep.mubr.msk.f32.mxu0 %vm855_vm2, %v854_v0  ;;  %v779_v16 = vld [vmem:[%s965_s1 + $0x1c] sm:$0xf]  ;;  %v784_v17 = vld [vmem:[%s964_s0 + $0x20] sm:$0xf]  ;;  %v856_v20 = vmov 0  }
   0x7   :  { %821 = vmatpush3.msk.msra.mxu1 %vm24_vm0, %v764_v6  ;;  %818 = vmatmul.mubr.msk.f32.vlgmr.msra.gmra.mxu0 %vm20_vm1, %v759_v7  ;;  %v783_v18 = vld [vmem:[%s965_s1 + $0x20] sm:$0xf] }
   0x8   :  { %822 = vmatprep.mubr.msk.f32.mxu1 %vm855_vm2, %v854_v0  ;;  %825 = vmatprep.subr.mxu0 %v854_v0  ;;  %v741_v19 = vld [vmem:[%s966_s2] sm:$0xf] }
   0x9   :  { %823 = vmatmul.mubr.msk.f32.vlgmr.msra.gmra.mxu1 %vm20_vm1, %v763_v8  ;;  %826 = vmatpush3.msk.msra.mxu0 %vm24_vm0, %v768_v9 }
   0xa   :  { %830 = vmatprep.subr.mxu1 %v854_v0  ;;  %827 = vmatprep.mubr.msk.f32.mxu0 %vm855_vm2, %v854_v0 }
   0xb   :  { %831 = vmatpush3.msk.msra.mxu1 %vm24_vm0, %v772_v10  ;;  %828 = vmatmul.mubr.msk.f32.vlgmr.msra.gmra.mxu0 %vm20_vm1, %v767_v11 }
   0xc   :  { %832 = vmatprep.mubr.msk.f32.mxu1 %vm855_vm2, %v854_v0  ;;  %835 = vmatprep.subr.mxu0 %v854_v0 }
   0xd   :  { %833 = vmatmul.mubr.msk.f32.vlgmr.msra.gmra.mxu1 %vm20_vm1, %v771_v12  ;;  %836 = vmatpush3.msk.msra.mxu0 %vm24_vm0, %v776_v13 }
   0xe   :  { %840 = vmatprep.subr.mxu1 %v854_v0  ;;  %837 = vmatprep.mubr.msk.f32.mxu0 %vm855_vm2, %v854_v0 }
   0xf   :  { %841 = vmatpush3.msk.msra.mxu1 %vm24_vm0, %v780_v14  ;;  %838 = vmatmul.mubr.msk.f32.vlgmr.msra.gmra.mxu0 %vm20_vm1, %v775_v15 }
  0x10   :  { %842 = vmatprep.mubr.msk.f32.mxu1 %vm855_vm2, %v854_v0  ;;  %845 = vmatprep.subr.mxu0 %v854_v0 }
  0x11   :  { %843 = vmatmul.mubr.msk.f32.vlgmr.msra.gmra.mxu1 %vm20_vm1, %v779_v16  ;;  %846 = vmatpush3.msk.msra.mxu0 %vm24_vm0, %v784_v17 }
  0x12   :  { %847 = vmatprep.mubr.msk.f32.mxu0 %vm855_vm2, %v854_v0  ;;  %853 = vset.pattern.permute.xlu0 %v856_v20 }
  0x13   :  { %848 = vmatmul.mubr.msk.f32.vlgmr.msra.gmra.mxu0 %vm20_vm1, %v783_v18  ;;  %744 = vperm.xlu0 %853, %v741_v19  }
  0x8e   :  { %v745_v43 = vpop.permute.xlu0 %744 }
  0xc3   :  { %v94_v21 = vpop.f32.mrf.mxu0 }
  0xc5   :  { %v170_v22 = vpop.f32.mrf.mxu1  ;;  %v809_v23 = vpop.f32.mrf.mxu0 }
  0xc6   :  { %v171_v24 = vadd.f32 %v170_v22, %v94_v21 }
  0xc7   :  { %v814_v25 = vpop.f32.mrf.mxu1  ;;  %v250_v26 = vpop.f32.mrf.mxu0 }
  0xc8   :  { %v254_v27 = vadd.f32 %v250_v26, %v171_v24 }
  0xc9   :  { %v331_v28 = vpop.f32.mrf.mxu1  ;;  %v819_v29 = vpop.f32.mrf.mxu0 }
  0xca   :  { %v335_v30 = vadd.f32 %v331_v28, %v254_v27 }
  0xcb   :  { %v824_v31 = vpop.f32.mrf.mxu1  ;;  %v412_v32 = vpop.f32.mrf.mxu0 }
  0xcc   :  { %v416_v33 = vadd.f32 %v412_v32, %v335_v30 }
  0xcd   :  { %v493_v34 = vpop.f32.mrf.mxu1  ;;  %v829_v35 = vpop.f32.mrf.mxu0 }
  0xce   :  { %v497_v36 = vadd.f32 %v493_v34, %v416_v33 }
  0xcf   :  { %v834_v37 = vpop.f32.mrf.mxu1  ;;  %v574_v38 = vpop.f32.mrf.mxu0 }
  0xd0   :  { %v578_v39 = vadd.f32 %v574_v38, %v497_v36 }
  0xd1   :  { %v655_v40 = vpop.f32.mrf.mxu1  ;;  %v839_v41 = vpop.f32.mrf.mxu0 }
  0xd2   :  { %v659_v42 = vadd.f32 %v655_v40, %v578_v39 }
  0xd3   :  { %v844_v44 = vpop.f32.mrf.mxu1  ;;  %v736_v45 = vpop.f32.mrf.mxu0 }
  0xd4   :  { %v740_v46 = vadd.f32 %v736_v45, %v659_v42 }
  0xd5   :  { %v849_v47 = vpop.f32.mrf.mxu0 }
  0xd6   :  { %v747_v48 = vadd.f32 %v745_v43, %v740_v46 }
  0xd8   :  { %748 = vst [vmem:[%s967_s3] sm:$0xf] %v747_v48 }

// kernel: wtab1_forward.27
= control target key start
LH: loop header
LB: loop body
LE: loop exit
PB: predicated region body
PF: predicated region fallthrough
CT: control target
= control target key end

     0   :  { %v424_v3 = vmov 0.0   ;;  %vm34_vm0 = vcmask 64512   ;;  %v425_v7 = vmov 0   ;;  %vm209_vm1 = vcmask 1043456   ;;  %s513_s0 = inlined_call_operand.vmem [shape: f32[8,512], index: 0, kind: input, shape index: {}]   ;;  %s514_s1 = inlined_call_operand.vmem [shape: f32[4,8], index: 1, kind: input, shape index: {}]   ;;  %s515_s2 = inlined_call_operand.vmem [shape: f32[4,1], index: 2, kind: input, shape index: {}]   ;;  %s516_s3 = inlined_call_operand.vmem [shape: f32[4,1], index: 3, kind: input, shape index: {}]   ;;  %s517_s5 = inlined_call_operand.vmem [shape: f32[4,1], index: 5, kind: input, shape index: {}]   ;;  %s518_s6 = inlined_call_operand.vmem [shape: f32[4,1], index: 6, kind: input, shape index: {}]   ;;  %s519_s4 = inlined_call_operand.vmem [shape: f32[4,4], index: 4, kind: input, shape index: {}]   ;;  %s520_s7 = inlined_call_operand.vmem [shape: f32[4,512], index: 7, kind: input, shape index: {}]   ;;  %s521_s8 = inlined_call_operand.vmem [shape: f32[4,512], index: 8, kind: output, shape index: {}]  }
   0x1   :  { %v31_v0 = vld [vmem:[%s513_s0 + $0x8] sm:$0xff]  ;;  %v33_v1 = vld [vmem:[%s513_s0 + $0x18] sm:$0xff]  ;;  %v30_v2 = vld [vmem:[%s513_s0] sm:$0xff]  ;;  %102 = vmatprep.mubr.f32.mxu0 %v424_v3  ;;  %173 = vmatprep.mubr.f32.mxu1 %v424_v3  ;;  %vm205_vm2 = vcmask 31744  }
   0x2   :  { %68 = vmatprep.subr.mxu0 %v31_v0  ;;  %139 = vmatprep.subr.mxu1 %v33_v1  ;;  %v32_v4 = vld [vmem:[%s513_s0 + $0x10] sm:$0xff]  ;;  %v29_v5 = vld [vmem:[%s514_s1] sm:$0xf]  ;;  %v385_v32 = vld [vmem:[%s520_s7 + $0x8] sm:$0xff] }
   0x3   :  { %69 = vmatpush1.msra.mxu0 %v30_v2  ;;  %140 = vmatpush1.msra.mxu1 %v32_v4  ;;  %v180_v6 = vld [vmem:[%s515_s2] sm:$0xf]  ;;  %v389_v41 = vcombine.high %v385_v32, %v385_v32 }
   0x4   :  { %410 = vmatmul.mubr.msk.f32.vlgmr.msra.gmra.mxu0 %vm34_vm0, %v29_v5  ;;  %411 = vmatmul.mubr.msk.f32.vlgmr.msra.gmra.mxu1 %vm34_vm0, %v29_v5  ;;  %v190_v8 = vld [vmem:[%s516_s3] sm:$0xf] }
   0x5   :  { %420 = vset.pattern.permute.xlu0 %v425_v7  ;;  %286 = vmatprep.mubr.f32.mxu0 %v424_v3  ;;  %v364_v9 = vld [vmem:[%s517_s5] sm:$0xf] }
   0x6   :  { %183 = vperm.xlu0 %420, %v180_v6   ;;  %357 = vmatprep.mubr.f32.mxu1 %v424_v3  ;;  %v374_v10 = vld [vmem:[%s518_s6] sm:$0xf] }
   0x7   :  { %421 = vset.pattern.permute.xlu1 %v425_v7  ;;  %v204_v29 = vld [vmem:[%s519_s4] sm:$0xf] }
   0x8   :  { %367 = vperm.xlu1 %421, %v364_v9   ;;  %v384_v31 = vld [vmem:[%s520_s7] sm:$0xff] }
   0x9   :  { %v388_v40 = vcombine.high %v384_v31, %v384_v31 }
   0xa   :  { %193 = vperm.xlu0 %420, %v190_v8  }
   0xc   :  { %377 = vperm.xlu1 %421, %v374_v10  }
  0x81   :  { %v184_v11 = vpop.permute.xlu0 %183 }
  0x83   :  { %v368_v30 = vpop.permute.xlu1 %367 }
  0x85   :  { %v194_v18 = vpop.permute.xlu0 %193 }
  0x87   :  { %v378_v37 = vpop.permute.xlu1 %377 }
  0xc4   :  { %v104_v12 = vpop.f32.mrf.mxu0  ;;  %v175_v13 = vpop.f32.mrf.mxu1 }
  0xc5   :  { %v186_v14 = vmul.f32 %v184_v11, %v104_v12  ;;  %v188_v15 = vmul.f32 %v184_v11, %v175_v13 }
  0xc6   :  { %v106_v16 = vpop.f32.mrf.mxu0  ;;  %v177_v17 = vpop.f32.mrf.mxu1 }
  0xc7   :  { %v187_v19 = vmul.f32 %v184_v11, %v106_v16  ;;  %v189_v20 = vmul.f32 %v184_v11, %v177_v17  ;;  %v196_v21 = vadd.f32 %v194_v18, %v186_v14  ;;  %v198_v22 = vadd.f32 %v194_v18, %v188_v15 }
  0xc9   :  { %v197_v23 = vadd.f32 %v194_v18, %v187_v19  ;;  %v199_v24 = vadd.f32 %v194_v18, %v189_v20  ;;  %v200_v27 = vmax.f32 %v196_v21, 0.0  ;;  %v202_v28 = vmax.f32 %v198_v22, 0.0 }
  0xcb   :  { %v201_v25 = vmax.f32 %v197_v23, 0.0  ;;  %v203_v26 = vmax.f32 %v199_v24, 0.0 }
  0xcd   :  { %412 = vmatprep.subr.msk.mxu0 %vm209_vm1, %v201_v25  ;;  %415 = vmatprep.subr.msk.mxu1 %vm209_vm1, %v203_v26 }
  0xce   :  { %413 = vmatpush1.msk.msra.mxu0 %vm209_vm1, %v200_v27  ;;  %416 = vmatpush1.msk.msra.mxu1 %vm209_vm1, %v202_v28 }
  0xcf   :  { %414 = vmatmul.mubr.msk.f32.vlgmr.msra.gmra.mxu0 %vm205_vm2, %v204_v29  ;;  %417 = vmatmul.mubr.msk.f32.vlgmr.msra.gmra.mxu1 %vm205_vm2, %v204_v29 }
 0x18f   :  { %v288_v33 = vpop.f32.mrf.mxu0  ;;  %v359_v34 = vpop.f32.mrf.mxu1 }
 0x190   :  { %v370_v35 = vmul.f32 %v368_v30, %v288_v33  ;;  %v372_v36 = vmul.f32 %v368_v30, %v359_v34 }
 0x191   :  { %v290_v38 = vpop.f32.mrf.mxu0  ;;  %v361_v39 = vpop.f32.mrf.mxu1 }
 0x192   :  { %v371_v42 = vmul.f32 %v368_v30, %v290_v38  ;;  %v373_v43 = vmul.f32 %v368_v30, %v361_v39  ;;  %v380_v44 = vadd.f32 %v378_v37, %v370_v35  ;;  %v382_v45 = vadd.f32 %v378_v37, %v372_v36 }
 0x194   :  { %v381_v46 = vadd.f32 %v378_v37, %v371_v42  ;;  %v383_v47 = vadd.f32 %v378_v37, %v373_v43  ;;  %v392_v48 = vadd.f32 %v384_v31, %v380_v44  ;;  %v394_v50 = vadd.f32 %v385_v32, %v382_v45 }
 0x196   :  { %v393_v49 = vadd.f32 %v388_v40, %v381_v46  ;;  %v395_v51 = vadd.f32 %v389_v41, %v383_v47 }
 0x198   :  { %v400_v52 = vcombine.low %v392_v48, %v393_v49  ;;  %v401_v53 = vcombine.low %v394_v50, %v395_v51 }
 0x19a   :  { %404 = vst [vmem:[%s521_s8] sm:$0xff] %v400_v52  ;;  %405 = vst [vmem:[%s521_s8 + $0x8] sm:$0xff] %v401_v53 }

// kernel: wtab1_forward.21
= control target key start
LH: loop header
LB: loop body
LE: loop exit
PB: predicated region body
PF: predicated region fallthrough
CT: control target
= control target key end

     0   :  { %v407_v3 = vmov 0.0   ;;  %vm31_vm0 = vcmask 64512   ;;  %v408_v7 = vmov 0   ;;  %vm206_vm1 = vcmask 1043456   ;;  %s485_s0 = inlined_call_operand.vmem [shape: f32[8,512], index: 0, kind: input, shape index: {}]   ;;  %s486_s1 = inlined_call_operand.vmem [shape: f32[4,8], index: 1, kind: input, shape index: {}]   ;;  %s487_s2 = inlined_call_operand.vmem [shape: f32[4,1], index: 2, kind: input, shape index: {}]   ;;  %s488_s3 = inlined_call_operand.vmem [shape: f32[4,1], index: 3, kind: input, shape index: {}]   ;;  %s489_s5 = inlined_call_operand.vmem [shape: f32[4,1], index: 5, kind: input, shape index: {}]   ;;  %s490_s6 = inlined_call_operand.vmem [shape: f32[4,1], index: 6, kind: input, shape index: {}]   ;;  %s491_s4 = inlined_call_operand.vmem [shape: f32[4,4], index: 4, kind: input, shape index: {}]   ;;  %s492_s7 = inlined_call_operand.vmem [shape: f32[4,512], index: 7, kind: output, shape index: {}]  }
   0x1   :  { %v28_v0 = vld [vmem:[%s485_s0 + $0x8] sm:$0xff]  ;;  %v30_v1 = vld [vmem:[%s485_s0 + $0x18] sm:$0xff]  ;;  %v27_v2 = vld [vmem:[%s485_s0] sm:$0xff]  ;;  %99 = vmatprep.mubr.f32.mxu0 %v407_v3  ;;  %170 = vmatprep.mubr.f32.mxu1 %v407_v3  ;;  %vm202_vm2 = vcmask 31744  }
   0x2   :  { %65 = vmatprep.subr.mxu0 %v28_v0  ;;  %136 = vmatprep.subr.mxu1 %v30_v1  ;;  %v29_v4 = vld [vmem:[%s485_s0 + $0x10] sm:$0xff]  ;;  %v26_v5 = vld [vmem:[%s486_s1] sm:$0xf] }
   0x3   :  { %66 = vmatpush1.msra.mxu0 %v27_v2  ;;  %137 = vmatpush1.msra.mxu1 %v29_v4  ;;  %v177_v6 = vld [vmem:[%s487_s2] sm:$0xf] }
   0x4   :  { %395 = vmatmul.mubr.msk.f32.vlgmr.msra.gmra.mxu0 %vm31_vm0, %v26_v5  ;;  %396 = vmatmul.mubr.msk.f32.vlgmr.msra.gmra.mxu1 %vm31_vm0, %v26_v5  ;;  %v187_v8 = vld [vmem:[%s488_s3] sm:$0xf] }
   0x5   :  { %405 = vset.pattern.permute.xlu0 %v408_v7  ;;  %283 = vmatprep.mubr.f32.mxu0 %v407_v3  ;;  %v361_v9 = vld [vmem:[%s489_s5] sm:$0xf] }
   0x6   :  { %180 = vperm.xlu0 %405, %v177_v6   ;;  %354 = vmatprep.mubr.f32.mxu1 %v407_v3  ;;  %v371_v10 = vld [vmem:[%s490_s6] sm:$0xf] }
   0x7   :  { %406 = vset.pattern.permute.xlu1 %v408_v7  ;;  %v201_v29 = vld [vmem:[%s491_s4] sm:$0xf] }
   0x8   :  { %364 = vperm.xlu1 %406, %v361_v9  }
   0xa   :  { %190 = vperm.xlu0 %405, %v187_v8  }
   0xc   :  { %374 = vperm.xlu1 %406, %v371_v10  }
  0x81   :  { %v181_v11 = vpop.permute.xlu0 %180 }
  0x83   :  { %v365_v30 = vpop.permute.xlu1 %364 }
  0x85   :  { %v191_v18 = vpop.permute.xlu0 %190 }
  0x87   :  { %v375_v39 = vpop.permute.xlu1 %374 }
  0xc4   :  { %v101_v12 = vpop.f32.mrf.mxu0  ;;  %v172_v13 = vpop.f32.mrf.mxu1 }
  0xc5   :  { %v183_v14 = vmul.f32 %v181_v11, %v101_v12  ;;  %v185_v15 = vmul.f32 %v181_v11, %v172_v13 }
  0xc6   :  { %v103_v16 = vpop.f32.mrf.mxu0  ;;  %v174_v17 = vpop.f32.mrf.mxu1 }
  0xc7   :  { %v184_v19 = vmul.f32 %v181_v11, %v103_v16  ;;  %v186_v20 = vmul.f32 %v181_v11, %v174_v17  ;;  %v193_v21 = vadd.f32 %v191_v18, %v183_v14  ;;  %v195_v22 = vadd.f32 %v191_v18, %v185_v15 }
  0xc9   :  { %v194_v23 = vadd.f32 %v191_v18, %v184_v19  ;;  %v196_v24 = vadd.f32 %v191_v18, %v186_v20  ;;  %v197_v27 = vmax.f32 %v193_v21, 0.0  ;;  %v199_v28 = vmax.f32 %v195_v22, 0.0 }
  0xcb   :  { %v198_v25 = vmax.f32 %v194_v23, 0.0  ;;  %v200_v26 = vmax.f32 %v196_v24, 0.0 }
  0xcd   :  { %397 = vmatprep.subr.msk.mxu0 %vm206_vm1, %v198_v25  ;;  %400 = vmatprep.subr.msk.mxu1 %vm206_vm1, %v200_v26 }
  0xce   :  { %398 = vmatpush1.msk.msra.mxu0 %vm206_vm1, %v197_v27  ;;  %401 = vmatpush1.msk.msra.mxu1 %vm206_vm1, %v199_v28 }
  0xcf   :  { %399 = vmatmul.mubr.msk.f32.vlgmr.msra.gmra.mxu0 %vm202_vm2, %v201_v29  ;;  %402 = vmatmul.mubr.msk.f32.vlgmr.msra.gmra.mxu1 %vm202_vm2, %v201_v29 }
 0x18f   :  { %v285_v31 = vpop.f32.mrf.mxu0  ;;  %v356_v32 = vpop.f32.mrf.mxu1 }
 0x190   :  { %v367_v33 = vmul.f32 %v365_v30, %v285_v31  ;;  %v369_v34 = vmul.f32 %v365_v30, %v356_v32 }
 0x191   :  { %v287_v35 = vpop.f32.mrf.mxu0  ;;  %v358_v36 = vpop.f32.mrf.mxu1 }
 0x192   :  { %v368_v37 = vmul.f32 %v365_v30, %v287_v35  ;;  %v370_v38 = vmul.f32 %v365_v30, %v358_v36  ;;  %v377_v40 = vadd.f32 %v375_v39, %v367_v33  ;;  %v379_v42 = vadd.f32 %v375_v39, %v369_v34 }
 0x194   :  { %v378_v41 = vadd.f32 %v375_v39, %v368_v37  ;;  %v380_v43 = vadd.f32 %v375_v39, %v370_v38 }
 0x196   :  { %v385_v44 = vcombine.low %v377_v40, %v378_v41  ;;  %v386_v45 = vcombine.low %v379_v42, %v380_v43 }
 0x198   :  { %389 = vst [vmem:[%s492_s7] sm:$0xff] %v385_v44  ;;  %390 = vst [vmem:[%s492_s7 + $0x8] sm:$0xff] %v386_v45 }

</bundles_post_ra>
